<compile_context>
chip_gen: v6e
topology: v6e:2x2x1
jax: 0.10.0
libtpu: 0.0.40
codegen_flags: <defaults>
</compile_context>

<pallas_src>
import functools

import jax
import jax.numpy as jnp
from jax.experimental import pallas as pl
from jax.experimental.pallas import tpu as pltpu


H_LSTM = 128          # LSTM hidden size (from the PyTorch module)
CIN1_PAD = 8          # conv1 input channels padded 3 -> 8 (im2col K = 72)


# ------------------------- fused conv kernels -------------------------------

def _im2col_matmul_relu(x_ref, w_ref, b_ref, xp_scr, *, H, W, Cin):
    """Zero-pad in VMEM, in-kernel im2col, one MXU matmul, bias, ReLU.

    Returns the (H*W, Cout) f32 pre-pool activation (rows ordered h*W + w).
    """
    # pad the (H, W, Cin) frame into the (H+2, W+2, Cin) bf16 scratch
    xp_scr[...] = jnp.zeros_like(xp_scr)
    xp_scr[1:H + 1, 1:W + 1, :] = x_ref[0].astype(jnp.bfloat16)
    # 3x3 taps in (kh, kw, cin) order -> (H*W, 9*Cin) patch matrix (VMEM only)
    cols = [xp_scr[kh:kh + H, kw:kw + W, :]
            for kh in range(3) for kw in range(3)]
    patches = jnp.concatenate(cols, axis=-1).reshape(H * W, 9 * Cin)
    acc = jnp.dot(patches, w_ref[...], preferred_element_type=jnp.float32)
    return jnp.maximum(acc + b_ref[...].astype(jnp.float32), 0.0)


def _conv_relu_maxpool_kernel(x_ref, w_ref, b_ref, o_ref, xp_scr,
                              *, H, W, Cin, Cout):
    acc = _im2col_matmul_relu(x_ref, w_ref, b_ref, xp_scr, H=H, W=W, Cin=Cin)
    # 2x2 / stride-2 max pool, done with lane-preserving regroups + static slices.
    # pool along W: rows (h, 2w) and (h, 2w+1) are adjacent in the row ordering.
    t = acc.reshape(H * W // 2, 2, Cout)
    wp = jnp.maximum(t[:, 0, :], t[:, 1, :])                 # (H*(W//2), Cout)
    # pool along H: row blocks for h=2k and h=2k+1.
    t2 = wp.reshape(H // 2, 2, W // 2, Cout)
    pooled = jnp.maximum(t2[:, 0], t2[:, 1])                 # (H//2, W//2, Cout)
    o_ref[...] = pooled.reshape(1, H // 2, W // 2, Cout).astype(o_ref.dtype)


def _conv_relu_avgpool_kernel(x_ref, w_ref, b_ref, o_ref, xp_scr,
                              *, H, W, Cin, Cout):
    acc = _im2col_matmul_relu(x_ref, w_ref, b_ref, xp_scr, H=H, W=W, Cin=Cin)
    feat = jnp.mean(acc, axis=0, keepdims=True)              # AdaptiveAvgPool2d((1,1))
    o_ref[...] = feat.reshape(1, 1, Cout).astype(o_ref.dtype)


def conv3x3_relu_maxpool(x, w, b):
    """x:(BT,H,W,Cin), w:(9*Cin,Cout) bf16, b:(Cout,) -> (BT,H//2,W//2,Cout) bf16."""
    BT, H, W, Cin = x.shape
    Cout = w.shape[1]
    assert w.shape[0] == 9 * Cin
    kern = functools.partial(_conv_relu_maxpool_kernel,
                             H=H, W=W, Cin=Cin, Cout=Cout)
    return pl.pallas_call(
        kern,
        out_shape=jax.ShapeDtypeStruct((BT, H // 2, W // 2, Cout), jnp.bfloat16),
        grid=(BT,),
        in_specs=[
            pl.BlockSpec((1, H, W, Cin), lambda i: (i, 0, 0, 0)),
            pl.BlockSpec((9 * Cin, Cout), lambda i: (0, 0)),
            pl.BlockSpec((1, Cout), lambda i: (0, 0)),
        ],
        out_specs=pl.BlockSpec((1, H // 2, W // 2, Cout), lambda i: (i, 0, 0, 0)),
        scratch_shapes=[pltpu.VMEM((H + 2, W + 2, Cin), jnp.bfloat16)],
        compiler_params=pltpu.CompilerParams(
            dimension_semantics=("parallel",)),
    )(x, w, b.reshape(1, Cout))


def conv3x3_relu_avgpool(x, w, b):
    """x:(BT,H,W,Cin) -> globally average-pooled features (BT, Cout) f32."""
    BT, H, W, Cin = x.shape
    Cout = w.shape[1]
    assert w.shape[0] == 9 * Cin
    kern = functools.partial(_conv_relu_avgpool_kernel,
                             H=H, W=W, Cin=Cin, Cout=Cout)
    out = pl.pallas_call(
        kern,
        out_shape=jax.ShapeDtypeStruct((BT, 1, Cout), jnp.float32),
        grid=(BT,),
        in_specs=[
            pl.BlockSpec((1, H, W, Cin), lambda i: (i, 0, 0, 0)),
            pl.BlockSpec((9 * Cin, Cout), lambda i: (0, 0)),
            pl.BlockSpec((1, Cout), lambda i: (0, 0)),
        ],
        out_specs=pl.BlockSpec((1, 1, Cout), lambda i: (i, 0, 0)),
        scratch_shapes=[pltpu.VMEM((H + 2, W + 2, Cin), jnp.bfloat16)],
        compiler_params=pltpu.CompilerParams(
            dimension_semantics=("parallel",)),
    )(x, w, b.reshape(1, Cout))
    return out.reshape(BT, Cout)


# --------------------- small dense matmul (+bias) kernel ---------------------

def _matmul_bias_kernel(x_ref, w_ref, b_ref, o_ref):
    acc = jnp.dot(x_ref[...].astype(jnp.bfloat16),
                  w_ref[...].astype(jnp.bfloat16),
                  preferred_element_type=jnp.float32)
    o_ref[...] = (acc + b_ref[...]).astype(o_ref.dtype)


def matmul_bias(x, w, b):
    """y = x @ w + b for small M/N problems (whole problem in one VMEM block)."""
    M = x.shape[0]
    N = w.shape[1]
    return pl.pallas_call(
        _matmul_bias_kernel,
        out_shape=jax.ShapeDtypeStruct((M, N), jnp.float32),
    )(x, w, b.reshape(1, N))


# ------------------------------- LSTM kernel --------------------------------

def _lstm_kernel(xp_ref, whh_ref, o_ref, *, T, Hn):
    B = o_ref.shape[0]

    def step(t, carry):
        h, c = carry
        # x_t @ W_ih^T + b_ih + b_hh was hoisted out of the loop (xp_ref holds it);
        # only the recurrent matmul runs per step.
        gates = xp_ref[t] + jnp.dot(h.astype(jnp.bfloat16), whh_ref[...],
                                    preferred_element_type=jnp.float32)
        i_g = jax.nn.sigmoid(gates[:, 0 * Hn:1 * Hn])   # PyTorch gate order i,f,g,o
        f_g = jax.nn.sigmoid(gates[:, 1 * Hn:2 * Hn])
        g_g = jnp.tanh(gates[:, 2 * Hn:3 * Hn])
        o_g = jax.nn.sigmoid(gates[:, 3 * Hn:4 * Hn])
        c_new = f_g * c + i_g * g_g
        h_new = o_g * jnp.tanh(c_new)
        return h_new, c_new

    h0 = jnp.zeros((B, Hn), jnp.float32)
    c0 = jnp.zeros((B, Hn), jnp.float32)
    h_last, _ = jax.lax.fori_loop(0, T, step, (h0, c0), unroll=True)
    o_ref[...] = h_last


def lstm_last(x_proj_tbg, w_hh, Hn):
    """x_proj:(T,B,4H) = x @ W_ih^T + b_ih + b_hh. Returns last hidden state (B,H)."""
    T, B, _ = x_proj_tbg.shape
    return pl.pallas_call(
        functools.partial(_lstm_kernel, T=T, Hn=Hn),
        out_shape=jax.ShapeDtypeStruct((B, Hn), jnp.float32),
    )(x_proj_tbg, w_hh)


# ------------------------------ params / forward -----------------------------

def init_params(action_dim, num_classes):
    key = jax.random.PRNGKey(42)
    ks = jax.random.split(key, 12)

    def nrm(k, shape, scale):
        return (scale * jax.random.normal(k, shape)).astype(jnp.float32)

    # Conv weights in im2col layout: row (kh*3 + kw)*Cin + cin, column cout.
    # (Real PyTorch weights (Cout,Cin,3,3) would map via transpose(2,3,1,0).reshape.)
    w1 = nrm(ks[0], (9, 3, 16), 0.10)
    w1 = jnp.pad(w1, ((0, 0), (0, CIN1_PAD - 3), (0, 0)))       # zero rows for padded cin
    w1 = w1.reshape(9 * CIN1_PAD, 16).astype(jnp.bfloat16)
    return dict(
        w1=w1, b1=nrm(ks[1], (16,), 0.02),
        w2=nrm(ks[2], (9 * 16, 32), 0.05).astype(jnp.bfloat16),
        b2=nrm(ks[3], (32,), 0.02),
        w3=nrm(ks[4], (9 * 32, 64), 0.05).astype(jnp.bfloat16),
        b3=nrm(ks[5], (64,), 0.02),
        # LSTM: w_ih = weight_ih.T (64,4H), w_hh = weight_hh.T (H,4H), b = b_ih + b_hh
        w_ih=nrm(ks[6], (64, 4 * H_LSTM), 0.05).astype(jnp.bfloat16),
        w_hh=nrm(ks[7], (H_LSTM, 4 * H_LSTM), 0.05).astype(jnp.bfloat16),
        b_lstm=nrm(ks[8], (4 * H_LSTM,), 0.02),
        # FC: weight.T (128+A, num_classes)
        w_fc=nrm(ks[9], (H_LSTM + action_dim, num_classes), 0.05).astype(jnp.bfloat16),
        b_fc=nrm(ks[10], (num_classes,), 0.02),
    )


def drowsiness_cnn_lstm(params, x, action_vec):
    """x: (B, T, C, H, W) float32 (PyTorch layout); action_vec: (B, A)."""
    B, T, C, H, W = x.shape
    # NCHW frames -> NHWC, zero-pad channels 3 -> 8 (padded channels have zero
    # weights, so the math is identical to the 3-channel conv).
    xf = x.reshape(B * T, C, H, W).transpose(0, 2, 3, 1)
    xf = jnp.pad(xf, ((0, 0), (0, 0), (0, 0), (0, CIN1_PAD - C)))

    # conv1 + ReLU + MaxPool2d(2)      -> (BT, H/2, W/2, 16)
    y = conv3x3_relu_maxpool(xf, params["w1"], params["b1"])
    # conv2 + ReLU + MaxPool2d(2)      -> (BT, H/4, W/4, 32)
    y = conv3x3_relu_maxpool(y, params["w2"], params["b2"])
    # conv3 + ReLU + AdaptiveAvgPool2d -> (BT, 64)
    feats = conv3x3_relu_avgpool(y, params["w3"], params["b3"])

    # LSTM: hoisted input projection + single-kernel recurrence over T
    x_proj = matmul_bias(feats, params["w_ih"], params["b_lstm"])    # (BT, 4H)
    x_proj = x_proj.reshape(B, T, 4 * H_LSTM).transpose(1, 0, 2)     # (T, B, 4H)
    h_last = lstm_last(x_proj, params["w_hh"], H_LSTM)               # (B, H)

    # concat with action vector + final linear
    z = jnp.concatenate([h_last, action_vec], axis=1)                # (B, 128+A)
    return matmul_bias(z, params["w_fc"], params["b_fc"])


# ----------------------------------- main ------------------------------------

if __name__ == "__main__":
    B, T, C, H, W = 2, 4, 3, 16, 16
    action_dim, num_classes = 4, 3

    key = jax.random.PRNGKey(0)
    kx, ka = jax.random.split(key)
    x = jax.random.normal(kx, (B, T, C, H, W), dtype=jnp.float32)
    action_vec = jax.random.normal(ka, (B, action_dim), dtype=jnp.float32)

    params = init_params(action_dim, num_classes)

    fwd = jax.jit(drowsiness_cnn_lstm)
    logits = fwd(params, x, action_vec)
    jax.block_until_ready(logits)
    assert logits.shape == (B, num_classes), logits.shape
    print("KERNEL_OK")
</pallas_src>

<mosaic_0001>
module attributes {stable_mosaic.version = 11 : i64} {
  func.func @_conv_relu_maxpool_kernel(%arg0: i32, %arg1: memref<1x16x16x8xf32, #tpu.memory_space<vmem>>, %arg2: memref<72x16xbf16, #tpu.memory_space<vmem>>, %arg3: memref<1x16xf32, #tpu.memory_space<vmem>>, %arg4: memref<1x8x8x16xbf16, #tpu.memory_space<vmem>>, %arg5: memref<18x18x8xbf16, #tpu.memory_space<vmem>>) attributes {dimension_semantics = [#tpu.dimension_semantics<parallel>], iteration_bounds = array<i64: 8>, scalar_prefetch = 0 : i64, scratch_operands = 1 : i64, tpu.core_type = #tpu.core_type<tc>, window_params = [{transform_indices = @transform_0, window_bounds = array<i64: 1, 16, 16, 8>}, {pipeline_mode = #tpu.pipeline_mode<synchronous>, transform_indices = @transform_1, window_bounds = array<i64: 72, 16>}, {pipeline_mode = #tpu.pipeline_mode<synchronous>, transform_indices = @transform_2, window_bounds = array<i64: 1, 16>}, {transform_indices = @transform_3, window_bounds = array<i64: 1, 8, 8, 16>}]} {
    %cst = arith.constant 0.000000e+00 : bf16
    %0 = vector.broadcast %cst : bf16 to vector<18x18x8xbf16>
    %c0 = arith.constant 0 : index
    %c0_0 = arith.constant 0 : index
    %c0_1 = arith.constant 0 : index
    %1 = vector.load %arg5[%c0, %c0_0, %c0_1] : memref<18x18x8xbf16, #tpu.memory_space<vmem>>, vector<18x18x8xbf16>
    tpu.vector_store %arg5[%c0, %c0_0, %c0_1], %0 {strides = array<i32>} : memref<18x18x8xbf16, #tpu.memory_space<vmem>>, vector<18x18x8xbf16>,
    %c0_2 = arith.constant 0 : index
    %c0_3 = arith.constant 0 : index
    %c0_4 = arith.constant 0 : index
    %c0_5 = arith.constant 0 : index
    %2 = vector.load %arg1[%c0_2, %c0_3, %c0_4, %c0_5] : memref<1x16x16x8xf32, #tpu.memory_space<vmem>>, vector<1x16x16x8xf32>
    %3 = vector.shape_cast %2 : vector<1x16x16x8xf32> to vector<16x16x8xf32>
    %4 = arith.truncf %3 : vector<16x16x8xf32> to vector<16x16x8xbf16>
    %c1 = arith.constant 1 : index
    %c1_6 = arith.constant 1 : index
    %c0_7 = arith.constant 0 : index
    %5 = vector.load %arg5[%c1, %c1_6, %c0_7] : memref<18x18x8xbf16, #tpu.memory_space<vmem>>, vector<16x16x8xbf16>
    tpu.vector_store %arg5[%c1, %c1_6, %c0_7], %4 {strides = array<i32>} : memref<18x18x8xbf16, #tpu.memory_space<vmem>>, vector<16x16x8xbf16>,
    %c0_8 = arith.constant 0 : index
    %c0_9 = arith.constant 0 : index
    %c0_10 = arith.constant 0 : index
    %6 = vector.load %arg5[%c0_8, %c0_9, %c0_10] : memref<18x18x8xbf16, #tpu.memory_space<vmem>>, vector<16x16x8xbf16>
    %c0_11 = arith.constant 0 : index
    %c1_12 = arith.constant 1 : index
    %c0_13 = arith.constant 0 : index
    %7 = vector.load %arg5[%c0_11, %c1_12, %c0_13] : memref<18x18x8xbf16, #tpu.memory_space<vmem>>, vector<16x16x8xbf16>
    %c0_14 = arith.constant 0 : index
    %c2 = arith.constant 2 : index
    %c0_15 = arith.constant 0 : index
    %8 = vector.load %arg5[%c0_14, %c2, %c0_15] : memref<18x18x8xbf16, #tpu.memory_space<vmem>>, vector<16x16x8xbf16>
    %c1_16 = arith.constant 1 : index
    %c0_17 = arith.constant 0 : index
    %c0_18 = arith.constant 0 : index
    %9 = vector.load %arg5[%c1_16, %c0_17, %c0_18] : memref<18x18x8xbf16, #tpu.memory_space<vmem>>, vector<16x16x8xbf16>
    %c1_19 = arith.constant 1 : index
    %c1_20 = arith.constant 1 : index
    %c0_21 = arith.constant 0 : index
    %10 = vector.load %arg5[%c1_19, %c1_20, %c0_21] : memref<18x18x8xbf16, #tpu.memory_space<vmem>>, vector<16x16x8xbf16>
    %c1_22 = arith.constant 1 : index
    %c2_23 = arith.constant 2 : index
    %c0_24 = arith.constant 0 : index
    %11 = vector.load %arg5[%c1_22, %c2_23, %c0_24] : memref<18x18x8xbf16, #tpu.memory_space<vmem>>, vector<16x16x8xbf16>
    %c2_25 = arith.constant 2 : index
    %c0_26 = arith.constant 0 : index
    %c0_27 = arith.constant 0 : index
    %12 = vector.load %arg5[%c2_25, %c0_26, %c0_27] : memref<18x18x8xbf16, #tpu.memory_space<vmem>>, vector<16x16x8xbf16>
    %c2_28 = arith.constant 2 : index
    %c1_29 = arith.constant 1 : index
    %c0_30 = arith.constant 0 : index
    %13 = vector.load %arg5[%c2_28, %c1_29, %c0_30] : memref<18x18x8xbf16, #tpu.memory_space<vmem>>, vector<16x16x8xbf16>
    %c2_31 = arith.constant 2 : index
    %c2_32 = arith.constant 2 : index
    %c0_33 = arith.constant 0 : index
    %14 = vector.load %arg5[%c2_31, %c2_32, %c0_33] : memref<18x18x8xbf16, #tpu.memory_space<vmem>>, vector<16x16x8xbf16>
    %15 = tpu.concatenate %6, %7, %8, %9, %10, %11, %12, %13, %14 in 2 : vector<16x16x8xbf16>, vector<16x16x8xbf16>, vector<16x16x8xbf16>, vector<16x16x8xbf16>, vector<16x16x8xbf16>, vector<16x16x8xbf16>, vector<16x16x8xbf16>, vector<16x16x8xbf16>, vector<16x16x8xbf16> -> vector<16x16x72xbf16>
    %16 = vector.shape_cast %15 : vector<16x16x72xbf16> to vector<256x72xbf16>
    %c0_34 = arith.constant 0 : index
    %c0_35 = arith.constant 0 : index
    %17 = vector.load %arg2[%c0_34, %c0_35] : memref<72x16xbf16, #tpu.memory_space<vmem>>, vector<72x16xbf16>
    %cst_36 = arith.constant dense<0.000000e+00> : vector<256x16xf32>
    %18 = tpu.matmul %16, %17, %cst_36 {dimension_numbers = #tpu.dot_dimension_numbers<[1], [0], [0], [1], [0, 0, 1, 1], [], []>} : vector<256x72xbf16>, vector<72x16xbf16>, vector<256x16xf32> -> vector<256x16xf32>
    %c0_37 = arith.constant 0 : index
    %c0_38 = arith.constant 0 : index
    %19 = vector.load %arg3[%c0_37, %c0_38] : memref<1x16xf32, #tpu.memory_space<vmem>>, vector<1x16xf32>
    %20 = vector.broadcast %19 : vector<1x16xf32> to vector<256x16xf32>
    %21 = arith.addf %18, %20 : vector<256x16xf32>
    %cst_39 = arith.constant 0.000000e+00 : f32
    %22 = vector.broadcast %cst_39 : f32 to vector<256x16xf32>
    %23 = arith.maximumf %21, %22 : vector<256x16xf32>
    %24 = vector.shape_cast %23 : vector<256x16xf32> to vector<128x2x16xf32>
    %25 = vector.extract_strided_slice %24 {offsets = [0, 0, 0], sizes = [128, 1, 16], strides = [1, 1, 1]} : vector<128x2x16xf32> to vector<128x1x16xf32>
    %26 = vector.shape_cast %25 : vector<128x1x16xf32> to vector<128x16xf32>
    %27 = vector.extract_strided_slice %24 {offsets = [0, 1, 0], sizes = [128, 1, 16], strides = [1, 1, 1]} : vector<128x2x16xf32> to vector<128x1x16xf32>
    %28 = vector.shape_cast %27 : vector<128x1x16xf32> to vector<128x16xf32>
    %29 = arith.maximumf %26, %28 : vector<128x16xf32>
    %30 = vector.shape_cast %29 : vector<128x16xf32> to vector<8x2x8x16xf32>
    %31 = vector.extract_strided_slice %30 {offsets = [0, 0, 0, 0], sizes = [8, 1, 8, 16], strides = [1, 1, 1, 1]} : vector<8x2x8x16xf32> to vector<8x1x8x16xf32>
    %32 = vector.shape_cast %31 : vector<8x1x8x16xf32> to vector<8x8x16xf32>
    %33 = vector.extract_strided_slice %30 {offsets = [0, 1, 0, 0], sizes = [8, 1, 8, 16], strides = [1, 1, 1, 1]} : vector<8x2x8x16xf32> to vector<8x1x8x16xf32>
    %34 = vector.shape_cast %33 : vector<8x1x8x16xf32> to vector<8x8x16xf32>
    %35 = arith.maximumf %32, %34 : vector<8x8x16xf32>
    %36 = vector.shape_cast %35 : vector<8x8x16xf32> to vector<1x8x8x16xf32>
    %37 = arith.truncf %36 : vector<1x8x8x16xf32> to vector<1x8x8x16xbf16>
    %c0_40 = arith.constant 0 : index
    %c0_41 = arith.constant 0 : index
    %c0_42 = arith.constant 0 : index
    %c0_43 = arith.constant 0 : index
    %38 = vector.load %arg4[%c0_40, %c0_41, %c0_42, %c0_43] : memref<1x8x8x16xbf16, #tpu.memory_space<vmem>>, vector<1x8x8x16xbf16>
    tpu.vector_store %arg4[%c0_40, %c0_41, %c0_42, %c0_43], %37 {strides = array<i32>} : memref<1x8x8x16xbf16, #tpu.memory_space<vmem>>, vector<1x8x8x16xbf16>,
    return
  }
  func.func @transform_0(%arg0: i32) -> (i32, i32, i32, i32) {
    %c0_i32 = arith.constant 0 : i32
    %c0_i32_0 = arith.constant 0 : i32
    %c0_i32_1 = arith.constant 0 : i32
    %c0_i32_2 = arith.constant 0 : i32
    return %arg0, %c0_i32, %c0_i32_0, %c0_i32_1 : i32, i32, i32, i32
  }
  func.func @transform_1(%arg0: i32) -> (i32, i32) {
    %c0_i32 = arith.constant 0 : i32
    %c0_i32_0 = arith.constant 0 : i32
    %c0_i32_1 = arith.constant 0 : i32
    return %c0_i32, %c0_i32_0 : i32, i32
  }
  func.func @transform_2(%arg0: i32) -> (i32, i32) {
    %c0_i32 = arith.constant 0 : i32
    %c0_i32_0 = arith.constant 0 : i32
    %c0_i32_1 = arith.constant 0 : i32
    return %c0_i32, %c0_i32_0 : i32, i32
  }
  func.func @transform_3(%arg0: i32) -> (i32, i32, i32, i32) {
    %c0_i32 = arith.constant 0 : i32
    %c0_i32_0 = arith.constant 0 : i32
    %c0_i32_1 = arith.constant 0 : i32
    %c0_i32_2 = arith.constant 0 : i32
    return %arg0, %c0_i32, %c0_i32_0, %c0_i32_1 : i32, i32, i32, i32
  }
}

module attributes {stable_mosaic.version = 11 : i64} {
  func.func @_conv_relu_maxpool_kernel(%arg0: i32, %arg1: memref<1x8x8x16xbf16, #tpu.memory_space<vmem>>, %arg2: memref<144x32xbf16, #tpu.memory_space<vmem>>, %arg3: memref<1x32xf32, #tpu.memory_space<vmem>>, %arg4: memref<1x4x4x32xbf16, #tpu.memory_space<vmem>>, %arg5: memref<10x10x16xbf16, #tpu.memory_space<vmem>>) attributes {dimension_semantics = [#tpu.dimension_semantics<parallel>], iteration_bounds = array<i64: 8>, scalar_prefetch = 0 : i64, scratch_operands = 1 : i64, tpu.core_type = #tpu.core_type<tc>, window_params = [{transform_indices = @transform_0, window_bounds = array<i64: 1, 8, 8, 16>}, {pipeline_mode = #tpu.pipeline_mode<synchronous>, transform_indices = @transform_1, window_bounds = array<i64: 144, 32>}, {pipeline_mode = #tpu.pipeline_mode<synchronous>, transform_indices = @transform_2, window_bounds = array<i64: 1, 32>}, {transform_indices = @transform_3, window_bounds = array<i64: 1, 4, 4, 32>}]} {
    %cst = arith.constant 0.000000e+00 : bf16
    %0 = vector.broadcast %cst : bf16 to vector<10x10x16xbf16>
    %c0 = arith.constant 0 : index
    %c0_0 = arith.constant 0 : index
    %c0_1 = arith.constant 0 : index
    %1 = vector.load %arg5[%c0, %c0_0, %c0_1] : memref<10x10x16xbf16, #tpu.memory_space<vmem>>, vector<10x10x16xbf16>
    tpu.vector_store %arg5[%c0, %c0_0, %c0_1], %0 {strides = array<i32>} : memref<10x10x16xbf16, #tpu.memory_space<vmem>>, vector<10x10x16xbf16>,
    %c0_2 = arith.constant 0 : index
    %c0_3 = arith.constant 0 : index
    %c0_4 = arith.constant 0 : index
    %c0_5 = arith.constant 0 : index
    %2 = vector.load %arg1[%c0_2, %c0_3, %c0_4, %c0_5] : memref<1x8x8x16xbf16, #tpu.memory_space<vmem>>, vector<1x8x8x16xbf16>
    %3 = vector.shape_cast %2 : vector<1x8x8x16xbf16> to vector<8x8x16xbf16>
    %c1 = arith.constant 1 : index
    %c1_6 = arith.constant 1 : index
    %c0_7 = arith.constant 0 : index
    %4 = vector.load %arg5[%c1, %c1_6, %c0_7] : memref<10x10x16xbf16, #tpu.memory_space<vmem>>, vector<8x8x16xbf16>
    tpu.vector_store %arg5[%c1, %c1_6, %c0_7], %3 {strides = array<i32>} : memref<10x10x16xbf16, #tpu.memory_space<vmem>>, vector<8x8x16xbf16>,
    %c0_8 = arith.constant 0 : index
    %c0_9 = arith.constant 0 : index
    %c0_10 = arith.constant 0 : index
    %5 = vector.load %arg5[%c0_8, %c0_9, %c0_10] : memref<10x10x16xbf16, #tpu.memory_space<vmem>>, vector<8x8x16xbf16>
    %c0_11 = arith.constant 0 : index
    %c1_12 = arith.constant 1 : index
    %c0_13 = arith.constant 0 : index
    %6 = vector.load %arg5[%c0_11, %c1_12, %c0_13] : memref<10x10x16xbf16, #tpu.memory_space<vmem>>, vector<8x8x16xbf16>
    %c0_14 = arith.constant 0 : index
    %c2 = arith.constant 2 : index
    %c0_15 = arith.constant 0 : index
    %7 = vector.load %arg5[%c0_14, %c2, %c0_15] : memref<10x10x16xbf16, #tpu.memory_space<vmem>>, vector<8x8x16xbf16>
    %c1_16 = arith.constant 1 : index
    %c0_17 = arith.constant 0 : index
    %c0_18 = arith.constant 0 : index
    %8 = vector.load %arg5[%c1_16, %c0_17, %c0_18] : memref<10x10x16xbf16, #tpu.memory_space<vmem>>, vector<8x8x16xbf16>
    %c1_19 = arith.constant 1 : index
    %c1_20 = arith.constant 1 : index
    %c0_21 = arith.constant 0 : index
    %9 = vector.load %arg5[%c1_19, %c1_20, %c0_21] : memref<10x10x16xbf16, #tpu.memory_space<vmem>>, vector<8x8x16xbf16>
    %c1_22 = arith.constant 1 : index
    %c2_23 = arith.constant 2 : index
    %c0_24 = arith.constant 0 : index
    %10 = vector.load %arg5[%c1_22, %c2_23, %c0_24] : memref<10x10x16xbf16, #tpu.memory_space<vmem>>, vector<8x8x16xbf16>
    %c2_25 = arith.constant 2 : index
    %c0_26 = arith.constant 0 : index
    %c0_27 = arith.constant 0 : index
    %11 = vector.load %arg5[%c2_25, %c0_26, %c0_27] : memref<10x10x16xbf16, #tpu.memory_space<vmem>>, vector<8x8x16xbf16>
    %c2_28 = arith.constant 2 : index
    %c1_29 = arith.constant 1 : index
    %c0_30 = arith.constant 0 : index
    %12 = vector.load %arg5[%c2_28, %c1_29, %c0_30] : memref<10x10x16xbf16, #tpu.memory_space<vmem>>, vector<8x8x16xbf16>
    %c2_31 = arith.constant 2 : index
    %c2_32 = arith.constant 2 : index
    %c0_33 = arith.constant 0 : index
    %13 = vector.load %arg5[%c2_31, %c2_32, %c0_33] : memref<10x10x16xbf16, #tpu.memory_space<vmem>>, vector<8x8x16xbf16>
    %14 = tpu.concatenate %5, %6, %7, %8, %9, %10, %11, %12, %13 in 2 : vector<8x8x16xbf16>, vector<8x8x16xbf16>, vector<8x8x16xbf16>, vector<8x8x16xbf16>, vector<8x8x16xbf16>, vector<8x8x16xbf16>, vector<8x8x16xbf16>, vector<8x8x16xbf16>, vector<8x8x16xbf16> -> vector<8x8x144xbf16>
    %15 = vector.shape_cast %14 : vector<8x8x144xbf16> to vector<64x144xbf16>
    %c0_34 = arith.constant 0 : index
    %c0_35 = arith.constant 0 : index
    %16 = vector.load %arg2[%c0_34, %c0_35] : memref<144x32xbf16, #tpu.memory_space<vmem>>, vector<144x32xbf16>
    %cst_36 = arith.constant dense<0.000000e+00> : vector<64x32xf32>
    %17 = tpu.matmul %15, %16, %cst_36 {dimension_numbers = #tpu.dot_dimension_numbers<[1], [0], [0], [1], [0, 0, 1, 1], [], []>} : vector<64x144xbf16>, vector<144x32xbf16>, vector<64x32xf32> -> vector<64x32xf32>
    %c0_37 = arith.constant 0 : index
    %c0_38 = arith.constant 0 : index
    %18 = vector.load %arg3[%c0_37, %c0_38] : memref<1x32xf32, #tpu.memory_space<vmem>>, vector<1x32xf32>
    %19 = vector.broadcast %18 : vector<1x32xf32> to vector<64x32xf32>
    %20 = arith.addf %17, %19 : vector<64x32xf32>
    %cst_39 = arith.constant 0.000000e+00 : f32
    %21 = vector.broadcast %cst_39 : f32 to vector<64x32xf32>
    %22 = arith.maximumf %20, %21 : vector<64x32xf32>
    %23 = vector.shape_cast %22 : vector<64x32xf32> to vector<32x2x32xf32>
    %24 = vector.extract_strided_slice %23 {offsets = [0, 0, 0], sizes = [32, 1, 32], strides = [1, 1, 1]} : vector<32x2x32xf32> to vector<32x1x32xf32>
    %25 = vector.shape_cast %24 : vector<32x1x32xf32> to vector<32x32xf32>
    %26 = vector.extract_strided_slice %23 {offsets = [0, 1, 0], sizes = [32, 1, 32], strides = [1, 1, 1]} : vector<32x2x32xf32> to vector<32x1x32xf32>
    %27 = vector.shape_cast %26 : vector<32x1x32xf32> to vector<32x32xf32>
    %28 = arith.maximumf %25, %27 : vector<32x32xf32>
    %29 = vector.shape_cast %28 : vector<32x32xf32> to vector<4x2x4x32xf32>
    %30 = vector.extract_strided_slice %29 {offsets = [0, 0, 0, 0], sizes = [4, 1, 4, 32], strides = [1, 1, 1, 1]} : vector<4x2x4x32xf32> to vector<4x1x4x32xf32>
    %31 = vector.shape_cast %30 : vector<4x1x4x32xf32> to vector<4x4x32xf32>
    %32 = vector.extract_strided_slice %29 {offsets = [0, 1, 0, 0], sizes = [4, 1, 4, 32], strides = [1, 1, 1, 1]} : vector<4x2x4x32xf32> to vector<4x1x4x32xf32>
    %33 = vector.shape_cast %32 : vector<4x1x4x32xf32> to vector<4x4x32xf32>
    %34 = arith.maximumf %31, %33 : vector<4x4x32xf32>
    %35 = vector.shape_cast %34 : vector<4x4x32xf32> to vector<1x4x4x32xf32>
    %36 = arith.truncf %35 : vector<1x4x4x32xf32> to vector<1x4x4x32xbf16>
    %c0_40 = arith.constant 0 : index
    %c0_41 = arith.constant 0 : index
    %c0_42 = arith.constant 0 : index
    %c0_43 = arith.constant 0 : index
    %37 = vector.load %arg4[%c0_40, %c0_41, %c0_42, %c0_43] : memref<1x4x4x32xbf16, #tpu.memory_space<vmem>>, vector<1x4x4x32xbf16>
    tpu.vector_store %arg4[%c0_40, %c0_41, %c0_42, %c0_43], %36 {strides = array<i32>} : memref<1x4x4x32xbf16, #tpu.memory_space<vmem>>, vector<1x4x4x32xbf16>,
    return
  }
  func.func @transform_0(%arg0: i32) -> (i32, i32, i32, i32) {
    %c0_i32 = arith.constant 0 : i32
    %c0_i32_0 = arith.constant 0 : i32
    %c0_i32_1 = arith.constant 0 : i32
    %c0_i32_2 = arith.constant 0 : i32
    return %arg0, %c0_i32, %c0_i32_0, %c0_i32_1 : i32, i32, i32, i32
  }
  func.func @transform_1(%arg0: i32) -> (i32, i32) {
    %c0_i32 = arith.constant 0 : i32
    %c0_i32_0 = arith.constant 0 : i32
    %c0_i32_1 = arith.constant 0 : i32
    return %c0_i32, %c0_i32_0 : i32, i32
  }
  func.func @transform_2(%arg0: i32) -> (i32, i32) {
    %c0_i32 = arith.constant 0 : i32
    %c0_i32_0 = arith.constant 0 : i32
    %c0_i32_1 = arith.constant 0 : i32
    return %c0_i32, %c0_i32_0 : i32, i32
  }
  func.func @transform_3(%arg0: i32) -> (i32, i32, i32, i32) {
    %c0_i32 = arith.constant 0 : i32
    %c0_i32_0 = arith.constant 0 : i32
    %c0_i32_1 = arith.constant 0 : i32
    %c0_i32_2 = arith.constant 0 : i32
    return %arg0, %c0_i32, %c0_i32_0, %c0_i32_1 : i32, i32, i32, i32
  }
}

module attributes {stable_mosaic.version = 11 : i64} {
  func.func @_conv_relu_avgpool_kernel(%arg0: i32, %arg1: memref<1x4x4x32xbf16, #tpu.memory_space<vmem>>, %arg2: memref<288x64xbf16, #tpu.memory_space<vmem>>, %arg3: memref<1x64xf32, #tpu.memory_space<vmem>>, %arg4: memref<1x1x64xf32, #tpu.memory_space<vmem>>, %arg5: memref<6x6x32xbf16, #tpu.memory_space<vmem>>) attributes {dimension_semantics = [#tpu.dimension_semantics<parallel>], iteration_bounds = array<i64: 8>, scalar_prefetch = 0 : i64, scratch_operands = 1 : i64, tpu.core_type = #tpu.core_type<tc>, window_params = [{transform_indices = @transform_0, window_bounds = array<i64: 1, 4, 4, 32>}, {pipeline_mode = #tpu.pipeline_mode<synchronous>, transform_indices = @transform_1, window_bounds = array<i64: 288, 64>}, {pipeline_mode = #tpu.pipeline_mode<synchronous>, transform_indices = @transform_2, window_bounds = array<i64: 1, 64>}, {transform_indices = @transform_3, window_bounds = array<i64: 1, 1, 64>}]} {
    %cst = arith.constant 0.000000e+00 : bf16
    %0 = vector.broadcast %cst : bf16 to vector<6x6x32xbf16>
    %c0 = arith.constant 0 : index
    %c0_0 = arith.constant 0 : index
    %c0_1 = arith.constant 0 : index
    %1 = vector.load %arg5[%c0, %c0_0, %c0_1] : memref<6x6x32xbf16, #tpu.memory_space<vmem>>, vector<6x6x32xbf16>
    tpu.vector_store %arg5[%c0, %c0_0, %c0_1], %0 {strides = array<i32>} : memref<6x6x32xbf16, #tpu.memory_space<vmem>>, vector<6x6x32xbf16>,
    %c0_2 = arith.constant 0 : index
    %c0_3 = arith.constant 0 : index
    %c0_4 = arith.constant 0 : index
    %c0_5 = arith.constant 0 : index
    %2 = vector.load %arg1[%c0_2, %c0_3, %c0_4, %c0_5] : memref<1x4x4x32xbf16, #tpu.memory_space<vmem>>, vector<1x4x4x32xbf16>
    %3 = vector.shape_cast %2 : vector<1x4x4x32xbf16> to vector<4x4x32xbf16>
    %c1 = arith.constant 1 : index
    %c1_6 = arith.constant 1 : index
    %c0_7 = arith.constant 0 : index
    %4 = vector.load %arg5[%c1, %c1_6, %c0_7] : memref<6x6x32xbf16, #tpu.memory_space<vmem>>, vector<4x4x32xbf16>
    tpu.vector_store %arg5[%c1, %c1_6, %c0_7], %3 {strides = array<i32>} : memref<6x6x32xbf16, #tpu.memory_space<vmem>>, vector<4x4x32xbf16>,
    %c0_8 = arith.constant 0 : index
    %c0_9 = arith.constant 0 : index
    %c0_10 = arith.constant 0 : index
    %5 = vector.load %arg5[%c0_8, %c0_9, %c0_10] : memref<6x6x32xbf16, #tpu.memory_space<vmem>>, vector<4x4x32xbf16>
    %c0_11 = arith.constant 0 : index
    %c1_12 = arith.constant 1 : index
    %c0_13 = arith.constant 0 : index
    %6 = vector.load %arg5[%c0_11, %c1_12, %c0_13] : memref<6x6x32xbf16, #tpu.memory_space<vmem>>, vector<4x4x32xbf16>
    %c0_14 = arith.constant 0 : index
    %c2 = arith.constant 2 : index
    %c0_15 = arith.constant 0 : index
    %7 = vector.load %arg5[%c0_14, %c2, %c0_15] : memref<6x6x32xbf16, #tpu.memory_space<vmem>>, vector<4x4x32xbf16>
    %c1_16 = arith.constant 1 : index
    %c0_17 = arith.constant 0 : index
    %c0_18 = arith.constant 0 : index
    %8 = vector.load %arg5[%c1_16, %c0_17, %c0_18] : memref<6x6x32xbf16, #tpu.memory_space<vmem>>, vector<4x4x32xbf16>
    %c1_19 = arith.constant 1 : index
    %c1_20 = arith.constant 1 : index
    %c0_21 = arith.constant 0 : index
    %9 = vector.load %arg5[%c1_19, %c1_20, %c0_21] : memref<6x6x32xbf16, #tpu.memory_space<vmem>>, vector<4x4x32xbf16>
    %c1_22 = arith.constant 1 : index
    %c2_23 = arith.constant 2 : index
    %c0_24 = arith.constant 0 : index
    %10 = vector.load %arg5[%c1_22, %c2_23, %c0_24] : memref<6x6x32xbf16, #tpu.memory_space<vmem>>, vector<4x4x32xbf16>
    %c2_25 = arith.constant 2 : index
    %c0_26 = arith.constant 0 : index
    %c0_27 = arith.constant 0 : index
    %11 = vector.load %arg5[%c2_25, %c0_26, %c0_27] : memref<6x6x32xbf16, #tpu.memory_space<vmem>>, vector<4x4x32xbf16>
    %c2_28 = arith.constant 2 : index
    %c1_29 = arith.constant 1 : index
    %c0_30 = arith.constant 0 : index
    %12 = vector.load %arg5[%c2_28, %c1_29, %c0_30] : memref<6x6x32xbf16, #tpu.memory_space<vmem>>, vector<4x4x32xbf16>
    %c2_31 = arith.constant 2 : index
    %c2_32 = arith.constant 2 : index
    %c0_33 = arith.constant 0 : index
    %13 = vector.load %arg5[%c2_31, %c2_32, %c0_33] : memref<6x6x32xbf16, #tpu.memory_space<vmem>>, vector<4x4x32xbf16>
    %14 = tpu.concatenate %5, %6, %7, %8, %9, %10, %11, %12, %13 in 2 : vector<4x4x32xbf16>, vector<4x4x32xbf16>, vector<4x4x32xbf16>, vector<4x4x32xbf16>, vector<4x4x32xbf16>, vector<4x4x32xbf16>, vector<4x4x32xbf16>, vector<4x4x32xbf16>, vector<4x4x32xbf16> -> vector<4x4x288xbf16>
    %15 = vector.shape_cast %14 : vector<4x4x288xbf16> to vector<16x288xbf16>
    %c0_34 = arith.constant 0 : index
    %c0_35 = arith.constant 0 : index
    %16 = vector.load %arg2[%c0_34, %c0_35] : memref<288x64xbf16, #tpu.memory_space<vmem>>, vector<288x64xbf16>
    %cst_36 = arith.constant dense<0.000000e+00> : vector<16x64xf32>
    %17 = tpu.matmul %15, %16, %cst_36 {dimension_numbers = #tpu.dot_dimension_numbers<[1], [0], [0], [1], [0, 0, 1, 1], [], []>} : vector<16x288xbf16>, vector<288x64xbf16>, vector<16x64xf32> -> vector<16x64xf32>
    %c0_37 = arith.constant 0 : index
    %c0_38 = arith.constant 0 : index
    %18 = vector.load %arg3[%c0_37, %c0_38] : memref<1x64xf32, #tpu.memory_space<vmem>>, vector<1x64xf32>
    %19 = vector.broadcast %18 : vector<1x64xf32> to vector<16x64xf32>
    %20 = arith.addf %17, %19 : vector<16x64xf32>
    %cst_39 = arith.constant 0.000000e+00 : f32
    %21 = vector.broadcast %cst_39 : f32 to vector<16x64xf32>
    %22 = arith.maximumf %20, %21 : vector<16x64xf32>
    %cst_40 = arith.constant dense<0.000000e+00> : vector<64xf32>
    %23 = vector.multi_reduction <add>, %22, %cst_40 [0] : vector<16x64xf32> to vector<64xf32>
    %24 = vector.shape_cast %23 : vector<64xf32> to vector<1x64xf32>
    %cst_41 = arith.constant 1.600000e+01 : f32
    %25 = vector.broadcast %cst_41 : f32 to vector<1x64xf32>
    %26 = arith.divf %24, %25 : vector<1x64xf32>
    %27 = vector.shape_cast %26 : vector<1x64xf32> to vector<1x1x64xf32>
    %c0_42 = arith.constant 0 : index
    %c0_43 = arith.constant 0 : index
    %c0_44 = arith.constant 0 : index
    %28 = vector.load %arg4[%c0_42, %c0_43, %c0_44] : memref<1x1x64xf32, #tpu.memory_space<vmem>>, vector<1x1x64xf32>
    tpu.vector_store %arg4[%c0_42, %c0_43, %c0_44], %27 {strides = array<i32>} : memref<1x1x64xf32, #tpu.memory_space<vmem>>, vector<1x1x64xf32>,
    return
  }
  func.func @transform_0(%arg0: i32) -> (i32, i32, i32, i32) {
    %c0_i32 = arith.constant 0 : i32
    %c0_i32_0 = arith.constant 0 : i32
    %c0_i32_1 = arith.constant 0 : i32
    %c0_i32_2 = arith.constant 0 : i32
    return %arg0, %c0_i32, %c0_i32_0, %c0_i32_1 : i32, i32, i32, i32
  }
  func.func @transform_1(%arg0: i32) -> (i32, i32) {
    %c0_i32 = arith.constant 0 : i32
    %c0_i32_0 = arith.constant 0 : i32
    %c0_i32_1 = arith.constant 0 : i32
    return %c0_i32, %c0_i32_0 : i32, i32
  }
  func.func @transform_2(%arg0: i32) -> (i32, i32) {
    %c0_i32 = arith.constant 0 : i32
    %c0_i32_0 = arith.constant 0 : i32
    %c0_i32_1 = arith.constant 0 : i32
    return %c0_i32, %c0_i32_0 : i32, i32
  }
  func.func @transform_3(%arg0: i32) -> (i32, i32, i32) {
    %c0_i32 = arith.constant 0 : i32
    %c0_i32_0 = arith.constant 0 : i32
    %c0_i32_1 = arith.constant 0 : i32
    return %arg0, %c0_i32, %c0_i32_0 : i32, i32, i32
  }
}

module attributes {stable_mosaic.version = 11 : i64} {
  func.func @_matmul_bias_kernel(%arg0: memref<8x64xf32, #tpu.memory_space<vmem>>, %arg1: memref<64x512xbf16, #tpu.memory_space<vmem>>, %arg2: memref<1x512xf32, #tpu.memory_space<vmem>>, %arg3: memref<8x512xf32, #tpu.memory_space<vmem>>) attributes {dimension_semantics = [], scalar_prefetch = 0 : i64, scratch_operands = 0 : i64, tpu.core_type = #tpu.core_type<tc>} {
    %c0 = arith.constant 0 : index
    %c0_0 = arith.constant 0 : index
    %0 = vector.load %arg0[%c0, %c0_0] : memref<8x64xf32, #tpu.memory_space<vmem>>, vector<8x64xf32>
    %1 = arith.truncf %0 : vector<8x64xf32> to vector<8x64xbf16>
    %c0_1 = arith.constant 0 : index
    %c0_2 = arith.constant 0 : index
    %2 = vector.load %arg1[%c0_1, %c0_2] : memref<64x512xbf16, #tpu.memory_space<vmem>>, vector<64x512xbf16>
    %cst = arith.constant dense<0.000000e+00> : vector<8x512xf32>
    %3 = tpu.matmul %1, %2, %cst {dimension_numbers = #tpu.dot_dimension_numbers<[1], [0], [0], [1], [0, 0, 1, 1], [], []>} : vector<8x64xbf16>, vector<64x512xbf16>, vector<8x512xf32> -> vector<8x512xf32>
    %c0_3 = arith.constant 0 : index
    %c0_4 = arith.constant 0 : index
    %4 = vector.load %arg2[%c0_3, %c0_4] : memref<1x512xf32, #tpu.memory_space<vmem>>, vector<1x512xf32>
    %5 = vector.broadcast %4 : vector<1x512xf32> to vector<8x512xf32>
    %6 = arith.addf %3, %5 : vector<8x512xf32>
    %c0_5 = arith.constant 0 : index
    %c0_6 = arith.constant 0 : index
    %7 = vector.load %arg3[%c0_5, %c0_6] : memref<8x512xf32, #tpu.memory_space<vmem>>, vector<8x512xf32>
    tpu.vector_store %arg3[%c0_5, %c0_6], %6 {strides = array<i32>} : memref<8x512xf32, #tpu.memory_space<vmem>>, vector<8x512xf32>,
    return
  }
}

module attributes {stable_mosaic.version = 11 : i64} {
  func.func @_lstm_kernel(%arg0: memref<4x2x512xf32, #tpu.memory_space<vmem>>, %arg1: memref<128x512xbf16, #tpu.memory_space<vmem>>, %arg2: memref<2x128xf32, #tpu.memory_space<vmem>>) attributes {dimension_semantics = [], scalar_prefetch = 0 : i64, scratch_operands = 0 : i64, tpu.core_type = #tpu.core_type<tc>} {
    %cst = arith.constant 0.000000e+00 : f32
    %0 = vector.broadcast %cst : f32 to vector<2x128xf32>
    %cst_0 = arith.constant 0.000000e+00 : f32
    %1 = vector.broadcast %cst_0 : f32 to vector<2x128xf32>
    %c0_i32 = arith.constant 0 : i32
    %2 = arith.index_cast %c0_i32 : i32 to index
    %c0 = arith.constant 0 : index
    %c0_1 = arith.constant 0 : index
    %3 = vector.load %arg0[%2, %c0, %c0_1] : memref<4x2x512xf32, #tpu.memory_space<vmem>>, vector<1x2x512xf32>
    %4 = vector.shape_cast %3 : vector<1x2x512xf32> to vector<2x512xf32>
    %5 = arith.truncf %0 : vector<2x128xf32> to vector<2x128xbf16>
    %c0_2 = arith.constant 0 : index
    %c0_3 = arith.constant 0 : index
    %6 = vector.load %arg1[%c0_2, %c0_3] : memref<128x512xbf16, #tpu.memory_space<vmem>>, vector<128x512xbf16>
    %cst_4 = arith.constant dense<0.000000e+00> : vector<2x512xf32>
    %7 = tpu.matmul %5, %6, %cst_4 {dimension_numbers = #tpu.dot_dimension_numbers<[1], [0], [0], [1], [0, 0, 1, 1], [], []>} : vector<2x128xbf16>, vector<128x512xbf16>, vector<2x512xf32> -> vector<2x512xf32>
    %8 = arith.addf %4, %7 : vector<2x512xf32>
    %9 = vector.extract_strided_slice %8 {offsets = [0, 0], sizes = [2, 128], strides = [1, 1]} : vector<2x512xf32> to vector<2x128xf32>
    %10 = arith.negf %9 : vector<2x128xf32>
    %11 = math.exp %10 : vector<2x128xf32>
    %cst_5 = arith.constant 1.000000e+00 : f32
    %12 = vector.broadcast %cst_5 : f32 to vector<2x128xf32>
    %13 = arith.addf %12, %11 : vector<2x128xf32>
    %14 = arith.divf %12, %13 : vector<2x128xf32>
    %15 = vector.extract_strided_slice %8 {offsets = [0, 128], sizes = [2, 128], strides = [1, 1]} : vector<2x512xf32> to vector<2x128xf32>
    %16 = arith.negf %15 : vector<2x128xf32>
    %17 = math.exp %16 : vector<2x128xf32>
    %cst_6 = arith.constant 1.000000e+00 : f32
    %18 = vector.broadcast %cst_6 : f32 to vector<2x128xf32>
    %19 = arith.addf %18, %17 : vector<2x128xf32>
    %20 = arith.divf %18, %19 : vector<2x128xf32>
    %21 = vector.extract_strided_slice %8 {offsets = [0, 256], sizes = [2, 128], strides = [1, 1]} : vector<2x512xf32> to vector<2x128xf32>
    %22 = math.tanh %21 : vector<2x128xf32>
    %23 = vector.extract_strided_slice %8 {offsets = [0, 384], sizes = [2, 128], strides = [1, 1]} : vector<2x512xf32> to vector<2x128xf32>
    %24 = arith.negf %23 : vector<2x128xf32>
    %25 = math.exp %24 : vector<2x128xf32>
    %cst_7 = arith.constant 1.000000e+00 : f32
    %26 = vector.broadcast %cst_7 : f32 to vector<2x128xf32>
    %27 = arith.addf %26, %25 : vector<2x128xf32>
    %28 = arith.divf %26, %27 : vector<2x128xf32>
    %29 = arith.mulf %20, %1 : vector<2x128xf32>
    %30 = arith.mulf %14, %22 : vector<2x128xf32>
    %31 = arith.addf %29, %30 : vector<2x128xf32>
    %32 = math.tanh %31 : vector<2x128xf32>
    %33 = arith.mulf %28, %32 : vector<2x128xf32>
    %c1_i32 = arith.constant 1 : i32
    %34 = arith.index_cast %c1_i32 : i32 to index
    %c0_8 = arith.constant 0 : index
    %c0_9 = arith.constant 0 : index
    %35 = vector.load %arg0[%34, %c0_8, %c0_9] : memref<4x2x512xf32, #tpu.memory_space<vmem>>, vector<1x2x512xf32>
    %36 = vector.shape_cast %35 : vector<1x2x512xf32> to vector<2x512xf32>
    %37 = arith.truncf %33 : vector<2x128xf32> to vector<2x128xbf16>
    %c0_10 = arith.constant 0 : index
    %c0_11 = arith.constant 0 : index
    %38 = vector.load %arg1[%c0_10, %c0_11] : memref<128x512xbf16, #tpu.memory_space<vmem>>, vector<128x512xbf16>
    %cst_12 = arith.constant dense<0.000000e+00> : vector<2x512xf32>
    %39 = tpu.matmul %37, %38, %cst_12 {dimension_numbers = #tpu.dot_dimension_numbers<[1], [0], [0], [1], [0, 0, 1, 1], [], []>} : vector<2x128xbf16>, vector<128x512xbf16>, vector<2x512xf32> -> vector<2x512xf32>
    %40 = arith.addf %36, %39 : vector<2x512xf32>
    %41 = vector.extract_strided_slice %40 {offsets = [0, 0], sizes = [2, 128], strides = [1, 1]} : vector<2x512xf32> to vector<2x128xf32>
    %42 = arith.negf %41 : vector<2x128xf32>
    %43 = math.exp %42 : vector<2x128xf32>
    %cst_13 = arith.constant 1.000000e+00 : f32
    %44 = vector.broadcast %cst_13 : f32 to vector<2x128xf32>
    %45 = arith.addf %44, %43 : vector<2x128xf32>
    %46 = arith.divf %44, %45 : vector<2x128xf32>
    %47 = vector.extract_strided_slice %40 {offsets = [0, 128], sizes = [2, 128], strides = [1, 1]} : vector<2x512xf32> to vector<2x128xf32>
    %48 = arith.negf %47 : vector<2x128xf32>
    %49 = math.exp %48 : vector<2x128xf32>
    %cst_14 = arith.constant 1.000000e+00 : f32
    %50 = vector.broadcast %cst_14 : f32 to vector<2x128xf32>
    %51 = arith.addf %50, %49 : vector<2x128xf32>
    %52 = arith.divf %50, %51 : vector<2x128xf32>
    %53 = vector.extract_strided_slice %40 {offsets = [0, 256], sizes = [2, 128], strides = [1, 1]} : vector<2x512xf32> to vector<2x128xf32>
    %54 = math.tanh %53 : vector<2x128xf32>
    %55 = vector.extract_strided_slice %40 {offsets = [0, 384], sizes = [2, 128], strides = [1, 1]} : vector<2x512xf32> to vector<2x128xf32>
    %56 = arith.negf %55 : vector<2x128xf32>
    %57 = math.exp %56 : vector<2x128xf32>
    %cst_15 = arith.constant 1.000000e+00 : f32
    %58 = vector.broadcast %cst_15 : f32 to vector<2x128xf32>
    %59 = arith.addf %58, %57 : vector<2x128xf32>
    %60 = arith.divf %58, %59 : vector<2x128xf32>
    %61 = arith.mulf %52, %31 : vector<2x128xf32>
    %62 = arith.mulf %46, %54 : vector<2x128xf32>
    %63 = arith.addf %61, %62 : vector<2x128xf32>
    %64 = math.tanh %63 : vector<2x128xf32>
    %65 = arith.mulf %60, %64 : vector<2x128xf32>
    %c2_i32 = arith.constant 2 : i32
    %66 = arith.index_cast %c2_i32 : i32 to index
    %c0_16 = arith.constant 0 : index
    %c0_17 = arith.constant 0 : index
    %67 = vector.load %arg0[%66, %c0_16, %c0_17] : memref<4x2x512xf32, #tpu.memory_space<vmem>>, vector<1x2x512xf32>
    %68 = vector.shape_cast %67 : vector<1x2x512xf32> to vector<2x512xf32>
    %69 = arith.truncf %65 : vector<2x128xf32> to vector<2x128xbf16>
    %c0_18 = arith.constant 0 : index
    %c0_19 = arith.constant 0 : index
    %70 = vector.load %arg1[%c0_18, %c0_19] : memref<128x512xbf16, #tpu.memory_space<vmem>>, vector<128x512xbf16>
    %cst_20 = arith.constant dense<0.000000e+00> : vector<2x512xf32>
    %71 = tpu.matmul %69, %70, %cst_20 {dimension_numbers = #tpu.dot_dimension_numbers<[1], [0], [0], [1], [0, 0, 1, 1], [], []>} : vector<2x128xbf16>, vector<128x512xbf16>, vector<2x512xf32> -> vector<2x512xf32>
    %72 = arith.addf %68, %71 : vector<2x512xf32>
    %73 = vector.extract_strided_slice %72 {offsets = [0, 0], sizes = [2, 128], strides = [1, 1]} : vector<2x512xf32> to vector<2x128xf32>
    %74 = arith.negf %73 : vector<2x128xf32>
    %75 = math.exp %74 : vector<2x128xf32>
    %cst_21 = arith.constant 1.000000e+00 : f32
    %76 = vector.broadcast %cst_21 : f32 to vector<2x128xf32>
    %77 = arith.addf %76, %75 : vector<2x128xf32>
    %78 = arith.divf %76, %77 : vector<2x128xf32>
    %79 = vector.extract_strided_slice %72 {offsets = [0, 128], sizes = [2, 128], strides = [1, 1]} : vector<2x512xf32> to vector<2x128xf32>
    %80 = arith.negf %79 : vector<2x128xf32>
    %81 = math.exp %80 : vector<2x128xf32>
    %cst_22 = arith.constant 1.000000e+00 : f32
    %82 = vector.broadcast %cst_22 : f32 to vector<2x128xf32>
    %83 = arith.addf %82, %81 : vector<2x128xf32>
    %84 = arith.divf %82, %83 : vector<2x128xf32>
    %85 = vector.extract_strided_slice %72 {offsets = [0, 256], sizes = [2, 128], strides = [1, 1]} : vector<2x512xf32> to vector<2x128xf32>
    %86 = math.tanh %85 : vector<2x128xf32>
    %87 = vector.extract_strided_slice %72 {offsets = [0, 384], sizes = [2, 128], strides = [1, 1]} : vector<2x512xf32> to vector<2x128xf32>
    %88 = arith.negf %87 : vector<2x128xf32>
    %89 = math.exp %88 : vector<2x128xf32>
    %cst_23 = arith.constant 1.000000e+00 : f32
    %90 = vector.broadcast %cst_23 : f32 to vector<2x128xf32>
    %91 = arith.addf %90, %89 : vector<2x128xf32>
    %92 = arith.divf %90, %91 : vector<2x128xf32>
    %93 = arith.mulf %84, %63 : vector<2x128xf32>
    %94 = arith.mulf %78, %86 : vector<2x128xf32>
    %95 = arith.addf %93, %94 : vector<2x128xf32>
    %96 = math.tanh %95 : vector<2x128xf32>
    %97 = arith.mulf %92, %96 : vector<2x128xf32>
    %c3_i32 = arith.constant 3 : i32
    %98 = arith.index_cast %c3_i32 : i32 to index
    %c0_24 = arith.constant 0 : index
    %c0_25 = arith.constant 0 : index
    %99 = vector.load %arg0[%98, %c0_24, %c0_25] : memref<4x2x512xf32, #tpu.memory_space<vmem>>, vector<1x2x512xf32>
    %100 = vector.shape_cast %99 : vector<1x2x512xf32> to vector<2x512xf32>
    %101 = arith.truncf %97 : vector<2x128xf32> to vector<2x128xbf16>
    %c0_26 = arith.constant 0 : index
    %c0_27 = arith.constant 0 : index
    %102 = vector.load %arg1[%c0_26, %c0_27] : memref<128x512xbf16, #tpu.memory_space<vmem>>, vector<128x512xbf16>
    %cst_28 = arith.constant dense<0.000000e+00> : vector<2x512xf32>
    %103 = tpu.matmul %101, %102, %cst_28 {dimension_numbers = #tpu.dot_dimension_numbers<[1], [0], [0], [1], [0, 0, 1, 1], [], []>} : vector<2x128xbf16>, vector<128x512xbf16>, vector<2x512xf32> -> vector<2x512xf32>
    %104 = arith.addf %100, %103 : vector<2x512xf32>
    %105 = vector.extract_strided_slice %104 {offsets = [0, 0], sizes = [2, 128], strides = [1, 1]} : vector<2x512xf32> to vector<2x128xf32>
    %106 = arith.negf %105 : vector<2x128xf32>
    %107 = math.exp %106 : vector<2x128xf32>
    %cst_29 = arith.constant 1.000000e+00 : f32
    %108 = vector.broadcast %cst_29 : f32 to vector<2x128xf32>
    %109 = arith.addf %108, %107 : vector<2x128xf32>
    %110 = arith.divf %108, %109 : vector<2x128xf32>
    %111 = vector.extract_strided_slice %104 {offsets = [0, 128], sizes = [2, 128], strides = [1, 1]} : vector<2x512xf32> to vector<2x128xf32>
    %112 = arith.negf %111 : vector<2x128xf32>
    %113 = math.exp %112 : vector<2x128xf32>
    %cst_30 = arith.constant 1.000000e+00 : f32
    %114 = vector.broadcast %cst_30 : f32 to vector<2x128xf32>
    %115 = arith.addf %114, %113 : vector<2x128xf32>
    %116 = arith.divf %114, %115 : vector<2x128xf32>
    %117 = vector.extract_strided_slice %104 {offsets = [0, 256], sizes = [2, 128], strides = [1, 1]} : vector<2x512xf32> to vector<2x128xf32>
    %118 = math.tanh %117 : vector<2x128xf32>
    %119 = vector.extract_strided_slice %104 {offsets = [0, 384], sizes = [2, 128], strides = [1, 1]} : vector<2x512xf32> to vector<2x128xf32>
    %120 = arith.negf %119 : vector<2x128xf32>
    %121 = math.exp %120 : vector<2x128xf32>
    %cst_31 = arith.constant 1.000000e+00 : f32
    %122 = vector.broadcast %cst_31 : f32 to vector<2x128xf32>
    %123 = arith.addf %122, %121 : vector<2x128xf32>
    %124 = arith.divf %122, %123 : vector<2x128xf32>
    %125 = arith.mulf %116, %95 : vector<2x128xf32>
    %126 = arith.mulf %110, %118 : vector<2x128xf32>
    %127 = arith.addf %125, %126 : vector<2x128xf32>
    %128 = math.tanh %127 : vector<2x128xf32>
    %129 = arith.mulf %124, %128 : vector<2x128xf32>
    %c4_i32 = arith.constant 4 : i32
    %c0_32 = arith.constant 0 : index
    %c0_33 = arith.constant 0 : index
    %130 = vector.load %arg2[%c0_32, %c0_33] : memref<2x128xf32, #tpu.memory_space<vmem>>, vector<2x128xf32>
    tpu.vector_store %arg2[%c0_32, %c0_33], %129 {strides = array<i32>} : memref<2x128xf32, #tpu.memory_space<vmem>>, vector<2x128xf32>,
    return
  }
}

module attributes {stable_mosaic.version = 11 : i64} {
  func.func @_matmul_bias_kernel(%arg0: memref<2x132xf32, #tpu.memory_space<vmem>>, %arg1: memref<132x3xbf16, #tpu.memory_space<vmem>>, %arg2: memref<1x3xf32, #tpu.memory_space<vmem>>, %arg3: memref<2x3xf32, #tpu.memory_space<vmem>>) attributes {dimension_semantics = [], scalar_prefetch = 0 : i64, scratch_operands = 0 : i64, tpu.core_type = #tpu.core_type<tc>} {
    %c0 = arith.constant 0 : index
    %c0_0 = arith.constant 0 : index
    %0 = vector.load %arg0[%c0, %c0_0] : memref<2x132xf32, #tpu.memory_space<vmem>>, vector<2x132xf32>
    %1 = arith.truncf %0 : vector<2x132xf32> to vector<2x132xbf16>
    %c0_1 = arith.constant 0 : index
    %c0_2 = arith.constant 0 : index
    %2 = vector.load %arg1[%c0_1, %c0_2] : memref<132x3xbf16, #tpu.memory_space<vmem>>, vector<132x3xbf16>
    %cst = arith.constant dense<0.000000e+00> : vector<2x3xf32>
    %3 = tpu.matmul %1, %2, %cst {dimension_numbers = #tpu.dot_dimension_numbers<[1], [0], [0], [1], [0, 0, 1, 1], [], []>} : vector<2x132xbf16>, vector<132x3xbf16>, vector<2x3xf32> -> vector<2x3xf32>
    %c0_3 = arith.constant 0 : index
    %c0_4 = arith.constant 0 : index
    %4 = vector.load %arg2[%c0_3, %c0_4] : memref<1x3xf32, #tpu.memory_space<vmem>>, vector<1x3xf32>
    %5 = vector.broadcast %4 : vector<1x3xf32> to vector<2x3xf32>
    %6 = arith.addf %3, %5 : vector<2x3xf32>
    %c0_5 = arith.constant 0 : index
    %c0_6 = arith.constant 0 : index
    %7 = vector.load %arg3[%c0_5, %c0_6] : memref<2x3xf32, #tpu.memory_space<vmem>>, vector<2x3xf32>
    tpu.vector_store %arg3[%c0_5, %c0_6], %6 {strides = array<i32>} : memref<2x3xf32, #tpu.memory_space<vmem>>, vector<2x3xf32>,
    return
  }
}

</mosaic_0001>

<bundles_post_ra>
// kernel: drowsiness_cnn_lstm.9
= control target key start
LH: loop header
LB: loop body
LE: loop exit
PB: predicated region body
PF: predicated region fallthrough
CT: control target
= control target key end

     0   :  { %v272_v1 = vmov 0   ;;  %vm135_vm0 = vcmask 523264   ;;  %v35_v19 = vlaneseq  ;;  %s359_s1 = inlined_call_operand.vmem [shape: bf16[64,512], index: 1, kind: input, shape index: {}]   ;;  %s360_s0 = inlined_call_operand.vmem [shape: f32[8,64], index: 0, kind: input, shape index: {}]   ;;  %s361_s2 = inlined_call_operand.vmem [shape: f32[1,512], index: 2, kind: input, shape index: {}]   ;;  %s362_s3 = inlined_call_operand.vmem [shape: f32[8,512], index: 3, kind: output, shape index: {}]  }
   0x1   :  { %v248_v0 = vld [vmem:[%s359_s1 + $0x64] ss:$16 sps:$4 sm:$0xff]   ;;  %171 = vmatprep.mubr.bf16.mxu0 %v272_v1  ;;  %212 = vmatprep.mubr.bf16.mxu1 %v272_v1  ;;  %v250_v2 = vld [vmem:[%s359_s1 + $0x6c] ss:$16 sps:$4 sm:$0xff]   ;;  %v252_v3 = vld [vmem:[%s359_s1 + $0x60] ss:$16 sps:$4 sm:$0xff]  }
   0x2   :  { %147 = vmatprep.subr.bf16.mxu0 %v248_v0  ;;  %v253_v4 = vld [vmem:[%s359_s1 + $0x68] ss:$16 sps:$4 sm:$0xff]   ;;  %188 = vmatprep.subr.bf16.mxu1 %v250_v2  ;;  %v254_v5 = vld [vmem:[%s359_s1 + $0x44] ss:$16 sps:$4 sm:$0xff]   ;;  %v256_v6 = vld [vmem:[%s359_s1 + $0x4c] ss:$16 sps:$4 sm:$0xff]  }
   0x3   :  { %148 = vmatpush1.bf16.msra.mxu0 %v252_v3  ;;  %189 = vmatpush1.bf16.msra.mxu1 %v253_v4  ;;  %v258_v7 = vld [vmem:[%s359_s1 + $0x40] ss:$16 sps:$4 sm:$0xff]   ;;  %v259_v8 = vld [vmem:[%s359_s1 + $0x48] ss:$16 sps:$4 sm:$0xff]   ;;  %v260_v9 = vld [vmem:[%s359_s1 + $0x24] ss:$16 sps:$4 sm:$0xff]  }
   0x4   :  { %149 = vmatprep.subr.bf16.mxu0 %v254_v5  ;;  %190 = vmatprep.subr.bf16.mxu1 %v256_v6  ;;  %v262_v10 = vld [vmem:[%s359_s1 + $0x2c] ss:$16 sps:$4 sm:$0xff]   ;;  %v264_v11 = vld [vmem:[%s359_s1 + $0x20] ss:$16 sps:$4 sm:$0xff]   ;;  %v265_v12 = vld [vmem:[%s359_s1 + $0x28] ss:$16 sps:$4 sm:$0xff]  }
   0x5   :  { %v266_v13 = vld [vmem:[%s359_s1 + $0x4] ss:$16 sps:$4 sm:$0xff]   ;;  %v268_v14 = vld [vmem:[%s359_s1 + $0xc] ss:$16 sps:$4 sm:$0xff]   ;;  %v270_v15 = vld [vmem:[%s359_s1] ss:$16 sps:$4 sm:$0xff]  }
   0x6   :  { %v271_v16 = vld [vmem:[%s359_s1 + $0x8] ss:$16 sps:$4 sm:$0xff]   ;;  %v15_v17 = vld [vmem:[%s360_s0] sm:$0xff]  ;;  %v36_v20 = vshrl.u32 %v35_v19, 7 }
   0x7   :  { %150 = vmatpush1.bf16.msra.mxu0 %v258_v7  ;;  %191 = vmatpush1.bf16.msra.mxu1 %v259_v8  ;;  %v16_v18 = vpack.c.bf16 %v15_v17, %v15_v17  ;;  %v33_v23 = vld [vmem:[%s361_s2] sm:$0xf] }
   0x8   :  { %151 = vmatprep.subr.bf16.mxu0 %v260_v9  ;;  %192 = vmatprep.subr.bf16.mxu1 %v262_v10  ;;  %v37_v21 = vsub.s32 0, %v36_v20  ;;  %v45_v22 = vsub.s32 2, %v36_v20  ;;  %v41_v24 = vsub.s32 1, %v36_v20  ;;  %v49_v25 = vsub.s32 3, %v36_v20 }
   0xa   :  { %v38_v26 = vrot.slane %v33_v23, %v37_v21  ;;  %v46_v27 = vrot.slane %v33_v23, %v45_v22  ;;  %v42_v28 = vrot.slane %v33_v23, %v41_v24  ;;  %v50_v29 = vrot.slane %v33_v23, %v49_v25 }
   0xb   :  { %152 = vmatpush1.bf16.msra.mxu0 %v264_v11  ;;  %193 = vmatpush1.bf16.msra.mxu1 %v265_v12 }
   0xc   :  { %153 = vmatprep.subr.bf16.mxu0 %v266_v13  ;;  %194 = vmatprep.subr.bf16.mxu1 %v268_v14 }
   0xf   :  { %154 = vmatpush1.bf16.msra.mxu0 %v270_v15  ;;  %195 = vmatpush1.bf16.msra.mxu1 %v271_v16 }
  0x12   :  { %245 = vmatmul.mubr.msk.bf16.vlgmr.msra.gmra.mxu0 %vm135_vm0, %v16_v18  ;;  %246 = vmatmul.mubr.msk.bf16.vlgmr.msra.gmra.mxu1 %vm135_vm0, %v16_v18 }
  0xd2   :  { %v173_v30 = vpop.f32.mrf.mxu0  ;;  %v214_v31 = vpop.f32.mrf.mxu1 }
  0xd3   :  { %v174_v32 = vadd.f32 %v173_v30, %v38_v26  ;;  %v215_v33 = vadd.f32 %v214_v31, %v46_v27 }
  0xd4   :  { %v175_v34 = vpop.f32.mrf.mxu0  ;;  %v216_v35 = vpop.f32.mrf.mxu1 }
  0xd5   :  { %221 = vst [vmem:[%s362_s3] sm:$0xff] %v174_v32  ;;  %223 = vst [vmem:[%s362_s3 + $0x10] sm:$0xff] %v215_v33  ;;  %v176_v36 = vadd.f32 %v175_v34, %v42_v28  ;;  %v217_v37 = vadd.f32 %v216_v35, %v50_v29 }
  0xd6   :  { %v177_v38 = vpop.f32.mrf.mxu0  ;;  %v218_v39 = vpop.f32.mrf.mxu1 }
  0xd7   :  { %222 = vst [vmem:[%s362_s3 + $0x8] sm:$0xff] %v176_v36  ;;  %224 = vst [vmem:[%s362_s3 + $0x18] sm:$0xff] %v217_v37 }
  0xd8   :  { %v178_v40 = vpop.f32.mrf.mxu0  ;;  %v219_v41 = vpop.f32.mrf.mxu1 }

// kernel: drowsiness_cnn_lstm.8
= control target key start
LH: loop header
LB: loop body
LE: loop exit
PB: predicated region body
PF: predicated region fallthrough
CT: control target
= control target key end

     0   :  { %s1205_s12 = smov 0   ;;  %s1375_s0 = inlined_call_operand.vmem [shape: bf16[8,4,4,32], index: 0, kind: input, shape index: {}]   ;;  %s1376_s1 = inlined_call_operand.vmem [shape: bf16[288,64], index: 1, kind: input, shape index: {}]   ;;  %s1377_s2 = inlined_call_operand.vmem [shape: f32[1,64], index: 2, kind: input, shape index: {}]   ;;  %s1378_s3 = inlined_call_operand.vmem [shape: f32[8,1,64], index: 3, kind: output, shape index: {}]  }
   0x1 LB: > { %s1002_s13 = sadd.s32 4294967295, %s1176_s12   ;;  %p1006_p0 = scmp.ge.s32.totalorder %s1176_s12, 1  ;;  %s1176_s12 = sphi %s1205_s12, %s13_s12  }
   0x2   : > { %p137_p1 = scmp.lt.s32.totalorder %s1176_s12, 9 }
   0x4   : > { %p138_p2 = pnand %p1006_p0, %p137_p1 }
   0x5   : > { %p159_p3 = scmp.lt.s32.totalorder (!%p138_p2), %s1002_s13, 7  ;;  %s1179_s18 = smov (!%p138_p2), 64  }
   0x6   : > { %141 = sbr.rel (%p138_p2) target bundleno = 423 (0x1a7), region = 32  ;;  %s1180_s19 = smov (!%p138_p2), 32  }
   0x7   : > { %s1181_s7 = smov (!%p138_p2), 96  }
   0xb   : > { %vm168_vm0 = vcmask 256000   ;;  %v1178_v0 = vmov 0   ;;  %vm245_vm1 = vsmask.f32 2306  ;;  %s1382_s13 = smov (!%p159_p3, %s1002_s13), 7  ;;  %v1148_v58 = vld [vmem:[%s1376_s1 + $0x78] sm:$0xff]  }
   0xc   : > { %169 = vst.msk [vmem:[#allocation2] sm:$0x7] %vm168_vm0, %v1178_v0  ;;  %170 = vst.msk [vmem:[#allocation2 + $0x4] sm:$0x7] %vm168_vm0, %v1178_v0  ;;  %s1071_s14 = sshll.u32 %s1382_s13, 3  ;;  %1072 = vmatprep.subr.bf16.mxu0 %v1148_v58  ;;  %v1149_v63 = vld [vmem:[%s1376_s1 + $0x38] sm:$0xff]   ;;  %s166_s9 = scalar_lea.vmem %s1378_s3, %s1382_s13 }
   0xd   : > { %171 = vst.msk [vmem:[#allocation2 + $0x8] sm:$0x7] %vm168_vm0, %v1178_v0  ;;  %172 = vst.msk [vmem:[#allocation2 + $0xc] sm:$0x7] %vm168_vm0, %v1178_v0  ;;  %s163_s17 = scalar_lea.vmem %s1375_s0, %s1071_s14  ;;  %1073 = vmatpush3.bf16.msra.mxu0 %v1149_v63  ;;  %vm1184_vm3 = vmmov 0   ;;  %vm536_vm4 = vcmask 261120  }
   0xe   : > { %173 = vst.msk [vmem:[#allocation2 + $0x10] sm:$0x7] %vm168_vm0, %v1178_v0  ;;  %174 = vst.msk [vmem:[#allocation2 + $0x14] sm:$0x7] %vm168_vm0, %v1178_v0  ;;  %vm549_vm5 = vcmask 523264   ;;  %vm558_vm6 = vcmask 785408  }
   0xf   : > { %v1011_v1 = vld.sshfl [vmem:[%s163_s17 + $0x4] sm:$0x3 pattern:$0x76325410]  ;;  %vm1229_vm2 = vmand %vm168_vm0, %vm245_vm1  ;;  %vm953_vm7 = vcmask 516096  }
  0x10   : > { %v226_v3 = vshrl.u32 %v1011_v1, 16  ;;  %v229_v5 = vshll.u32 %v1011_v1, 16  ;;  %v1010_v13 = vld.sshfl [vmem:[%s163_s17 + $0x2] sm:$0x3 pattern:$0x76325410] }
  0x11   : > { %v219_v16 = vshrl.u32 %v1010_v13, 16  ;;  %v222_v17 = vshll.u32 %v1010_v13, 16  ;;  %v1012_v19 = vld.sshfl [vmem:[%s163_s17 + $0x6] sm:$0x3 pattern:$0x76325410] }
  0x12   : > { %v228_v10 = vrot.slane %v226_v3, 7  ;;  %v233_v23 = vshrl.u32 %v1012_v19, 16  ;;  %v1009_v24 = vld.sshfl [vmem:[%s163_s17] sm:$0x3 pattern:$0x76325410] }
  0x13   : > { %v1120_v2 = vld [vmem:[#allocation2] ss:$0 sps:$4 sm:$0x66]   ;;  %v221_v22 = vrot.slane %v219_v16, 7  ;;  %v236_v25 = vshll.u32 %v1012_v19, 16  ;;  %v212_v26 = vshrl.u32 %v1009_v24, 16 }
  0x14   : > { %v1121_v4 = vld [vmem:[#allocation2] ss:$0 sps:$4 sm:$0x77]   ;;  %v356_v6 = vrot.slane %v1120_v2, 1  ;;  %v253_v12 = vld [vmem:[#allocation2 + $0xc] sm:$0x7]  ;;  %v231_v15 = vor.u32 %v229_v5, %v228_v10 }
  0x15   : > { %v1122_v7 = vld [vmem:[#allocation2 + $0x14] ss:$0 sps:$4 sm:$0x33]   ;;  %v309_v8 = vshrl.u32 %v1121_v4, 16  ;;  %v311_v9 = vshll.u32 %v1121_v4, 16  ;;  %v215_v27 = vshll.u32 %v1009_v24, 16  ;;  %v224_v28 = vor.u32 %v222_v17, %v221_v22 }
  0x16   : > { %360 = vrot.lane.b32.xlu0 %v356_v6, %s1179_s18  ;;  %470 = vrot.lane.b32.xlu1 %v1122_v7, %s1179_s18  ;;  %v250_v18 = vld [vmem:[#allocation2 + $0x8] sm:$0x7]  ;;  %v254_v21 = vsel %vm1229_vm2, %v231_v15, %v253_v12  ;;  %v235_v29 = vrot.slane %v233_v23, 7  ;;  %v256_v30 = vld [vmem:[#allocation2 + $0x10] sm:$0x7]  ;;  %v214_v31 = vrot.slane %v212_v26, 7 }
  0x17   : > { %v313_v14 = vrot.slane %v311_v9, 1  ;;  %255 = vst [vmem:[#allocation2 + $0xc] sm:$0x7] %v254_v21  ;;  %v251_v32 = vsel %vm1229_vm2, %v224_v28, %v250_v18  ;;  %v247_v34 = vld [vmem:[#allocation2 + $0x4] sm:$0x7]  ;;  %v1150_v3 = vld [vmem:[%s1376_s1 + $0x70] sm:$0xff]  }
  0x18   : > { %v238_v33 = vor.u32 %v236_v25, %v235_v29  ;;  %252 = vst [vmem:[#allocation2 + $0x8] sm:$0x7] %v251_v32  ;;  %v217_v35 = vor.u32 %v215_v27, %v214_v31  ;;  %v1151_v5 = vld [vmem:[%s1376_s1 + $0x30] sm:$0xff]   ;;  %1074 = vmatprep.subr.bf16.mxu0 %v1150_v3  ;;  %v1152_v19 = vld [vmem:[%s1376_s1 + $0x68] sm:$0xff]   ;;  %v1154_v23 = vld [vmem:[%s1376_s1 + $0x60] sm:$0xff]  }
  0x19   : > { %v314_v20 = vor.u32 %v313_v14, %v309_v8  ;;  %v1264_v10 = vld [vmem:[#allocation2 + $0x14] ss:$0 sps:$4 sm:$0x77]   ;;  %1075 = vmatpush3.bf16.msra.mxu0 %v1151_v5  ;;  %v1153_v22 = vld [vmem:[%s1376_s1 + $0x28] sm:$0xff]   ;;  %v1155_v28 = vld [vmem:[%s1376_s1 + $0x20] sm:$0xff]  }
  0x1a   : > { %v257_v36 = vsel %vm1229_vm2, %v238_v33, %v256_v30  ;;  %v248_v37 = vsel %vm1229_vm2, %v217_v35, %v247_v34  ;;  %v508_v18 = vshll.u32 %v1264_v10, 16  ;;  %1076 = vmatprep.subr.bf16.mxu0 %v1152_v19  ;;  %v1182_v31 = vmov 1983009808   ;;  %v1156_v34 = vld [vmem:[%s1376_s1 + $0x58] sm:$0xff]  }
  0x1b   : > { %336 = vrot.lane.b32.xlu0 %v314_v20, %s1180_s19  ;;  %258 = vst [vmem:[#allocation2 + $0x10] sm:$0x7] %v257_v36  ;;  %249 = vst [vmem:[#allocation2 + $0x4] sm:$0x7] %v248_v37  ;;  %v605_v32 = vunpack.c.l.s4 %v1182_v31  ;;  %v607_v33 = vlaneseq  ;;  %v1157_v36 = vld [vmem:[%s1376_s1 + $0x18] sm:$0xff]  }
  0x1d   : > { %1077 = vmatpush3.bf16.msra.mxu0 %v1153_v22 }
  0x1e   : > { %v1123_v38 = vld [vmem:[#allocation2 + $0xc] ss:$0 sps:$4 sm:$0x33]   ;;  %1078 = vmatprep.subr.bf16.mxu0 %v1154_v23 }
  0x1f   : > { %466 = vrot.lane.b32.xlu1 %v1123_v38, %s1179_s18  ;;  %v1124_v39 = vld [vmem:[#allocation2 + $0x8] ss:$0 sps:$4 sm:$0x33]   ;;  %v1129_v45 = vld [vmem:[#allocation2 + $0xc] ss:$0 sps:$4 sm:$0x66]   ;;  %v606_v38 = vunpack.c.0.s8 %v605_v32 }
  0x20   : > { %v1126_v40 = vld [vmem:[#allocation2 + $0x8] ss:$0 sps:$4 sm:$0x66]   ;;  %464 = vrot.lane.b32.xlu0 %v1124_v39, %s1179_s18  ;;  %v1132_v49 = vld [vmem:[#allocation2 + $0xc] ss:$0 sps:$4 sm:$0x66]  }
  0x21   : > { %v441_v42 = vrot.slane %v1126_v40, 1  ;;  %v1133_v50 = vld [vmem:[#allocation2 + $0x8] ss:$0 sps:$4 sm:$0x77]   ;;  %v442_v55 = vrot.slane %v1129_v45, 1  ;;  %v359_v59 = vrot.slane %v1132_v49, 1  ;;  %1079 = vmatpush3.bf16.msra.mxu0 %v1155_v28 }
  0x22   : > { %v1125_v41 = vld [vmem:[#allocation2 + $0x10] ss:$0 sps:$4 sm:$0x33]   ;;  %v1128_v44 = vld [vmem:[#allocation2 + $0x4] ss:$0 sps:$4 sm:$0x66]   ;;  %1080 = vmatprep.subr.bf16.mxu0 %v1156_v34 }
  0x23   : > { %v1127_v43 = vld [vmem:[#allocation2 + $0x10] ss:$0 sps:$4 sm:$0x66]   ;;  %446 = vrot.lane.b32.xlu1 %v441_v42, %s1180_s19  ;;  %v1130_v47 = vld [vmem:[#allocation2 + $0x4] ss:$0 sps:$4 sm:$0x66]  }
  0x24   : > { %v443_v46 = vrot.slane %v1127_v43, 1  ;;  %468 = vrot.lane.b32.xlu0 %v1125_v41, %s1179_s18  ;;  %v440_v48 = vrot.slane %v1128_v44, 1  ;;  %v1135_v51 = vld [vmem:[#allocation2 + $0xc] ss:$0 sps:$4 sm:$0x77]   ;;  %v357_v53 = vrot.slane %v1130_v47, 1 }
  0x25   : > { %v1134_v52 = vld [vmem:[#allocation2 + $0x4] ss:$0 sps:$4 sm:$0x77]   ;;  %v325_v54 = vshll.u32 %v1133_v50, 16  ;;  %v323_v60 = vshrl.u32 %v1133_v50, 16  ;;  %v332_v62 = vshll.u32 %v1135_v51, 16  ;;  %1081 = vmatpush3.bf16.msra.mxu0 %v1157_v36 }
  0x26   : > { %v1131_v56 = vld [vmem:[#allocation2 + $0x8] ss:$0 sps:$4 sm:$0x66]   ;;  %v318_v57 = vshll.u32 %v1134_v52, 16  ;;  %v316_v1 = vshrl.u32 %v1134_v52, 16  ;;  %v330_v7 = vshrl.u32 %v1135_v51, 16 }
  0x27   : > { %450 = vrot.lane.b32.xlu1 %v443_v46, %s1180_s19  ;;  %v327_v61 = vrot.slane %v325_v54, 1  ;;  %v358_v0 = vrot.slane %v1131_v56, 1  ;;  %v1140_v4 = vld [vmem:[#allocation2 + $0x8] ss:$0 sps:$4 sm:$0x77]   ;;  %v334_v8 = vrot.slane %v332_v62, 1 }
  0x28   : > { %444 = vrot.lane.b32.xlu0 %v440_v48, %s1180_s19  ;;  %v320_v2 = vrot.slane %v318_v57, 1  ;;  %v1141_v11 = vld [vmem:[#allocation2 + $0xc] ss:$0 sps:$4 sm:$0x77]   ;;  %v487_v14 = vshll.u32 %v1140_v4, 16  ;;  %v485_v24 = vshrl.u32 %v1140_v4, 16 }
  0x29   : > { %v328_v6 = vor.u32 %v327_v61, %v323_v60  ;;  %v1142_v12 = vld [vmem:[#allocation2 + $0x10] ss:$0 sps:$4 sm:$0x77]   ;;  %v335_v13 = vor.u32 %v334_v8, %v330_v7  ;;  %v1136_v15 = vld [vmem:[#allocation2 + $0x4] ss:$0 sps:$4 sm:$0x33]  }
  0x2a   : > { %v321_v9 = vor.u32 %v320_v2, %v316_v1  ;;  %v1137_v16 = vld [vmem:[#allocation2 + $0x8] ss:$0 sps:$4 sm:$0x33]   ;;  %v494_v17 = vshll.u32 %v1141_v11, 16  ;;  %v501_v21 = vshll.u32 %v1142_v12, 16  ;;  %v489_v25 = vrot.slane %v487_v14, 1 }
  0x2b   : > { %362 = vrot.lane.b32.xlu1 %v357_v53, %s1179_s18  ;;  %v1138_v20 = vld [vmem:[#allocation2 + $0xc] ss:$0 sps:$4 sm:$0x33]   ;;  %v492_v26 = vshrl.u32 %v1141_v11, 16  ;;  %v499_v27 = vshrl.u32 %v1142_v12, 16  ;;  %v608_v39 = vshrl.u32 %v607_v33, 7 }
  0x2c   : > { %448 = vrot.lane.b32.xlu0 %v442_v55, %s1180_s19  ;;  %v1139_v29 = vld [vmem:[#allocation2 + $0x10] ss:$0 sps:$4 sm:$0x33]   ;;  %v496_v30 = vrot.slane %v494_v17, 1  ;;  %v503_v35 = vrot.slane %v501_v21, 1  ;;  %v490_v37 = vor.u32 %v489_v25, %v485_v24  ;;  %v1162_v41 = vld [vmem:[%s1376_s1 + $0x88] sm:$0xff]  }
  0x2d   : > { %v1158_v40 = vld [vmem:[%s1376_s1 + $0x50] sm:$0xff]   ;;  %v506_v42 = vshrl.u32 %v1264_v10, 16  ;;  %v510_v43 = vrot.slane %v508_v18, 1  ;;  %v1183_v45 = vmov 0.0   ;;  %v1165_v47 = vld [vmem:[%s1376_s1 + $0x80] sm:$0xff]   ;;  %v1306_v52 = vsub.s32 %v606_v38, %v608_v39  ;;  %v1160_v53 = vld [vmem:[%s1376_s1 + $0x48] sm:$0xff]  }
  0x2e   : > { %v1159_v44 = vld [vmem:[%s1376_s1 + $0x10] sm:$0xff]   ;;  %1097 = vmatprep.subr.bf16.mxu1 %v1183_v45  ;;  %v497_v46 = vor.u32 %v496_v30, %v492_v26  ;;  %v1166_v48 = vld [vmem:[#allocation2 + $0x8] ss:$0 sps:$4 sm:$0x66]   ;;  %v504_v49 = vor.u32 %v503_v35, %v499_v27  ;;  %1082 = vmatprep.subr.bf16.mxu0 %v1158_v40  ;;  %v1164_v4 = vld [vmem:[%s1376_s1] sm:$0xff]  }
  0x2f   : > { %366 = vrot.lane.b32.xlu1 %v359_v59, %s1179_s18  ;;  %1098 = vmatpush3.bf16.msra.mxu1 %v1162_v41  ;;  %v1167_v50 = vld [vmem:[#allocation2 + $0xc] ss:$0 sps:$4 sm:$0x66]   ;;  %v1168_v51 = vld [vmem:[#allocation2 + $0x10] ss:$0 sps:$4 sm:$0x66]   ;;  %v511_v58 = vor.u32 %v510_v43, %v506_v42 }
  0x30   : > { %364 = vrot.lane.b32.xlu0 %v358_v0, %s1179_s18  ;;  %1099 = vmatprep.subr.bf16.mxu1 %v1183_v45  ;;  %v1169_v54 = vld [vmem:[#allocation2 + $0x14] ss:$0 sps:$4 sm:$0x66]   ;;  %v532_v55 = vrot.slane %v1166_v48, 1  ;;  %v533_v56 = vrot.slane %v1167_v50, 1  ;;  %v534_v57 = vrot.slane %v1168_v51, 1 }
  0x31   : > { %v535_v59 = vrot.slane %v1169_v54, 1  ;;  %1083 = vmatpush3.bf16.msra.mxu0 %v1159_v44  ;;  %v1161_v61 = vld [vmem:[%s1376_s1 + $0x8] sm:$0xff]   ;;  %v1163_v0 = vld [vmem:[%s1376_s1 + $0x40] sm:$0xff]   ;;  %1101 = vmatprep.mubr.msk.bf16.mxu1 %vm1184_vm3, %v1183_v45  ;;  %v1145_v25 = vld [vmem:[#allocation2 + $0x10] ss:$0 sps:$4 sm:$0x77]  }
  0x32   : > { %v617_v60 = vrot.slane %v532_v55, %v1306_v52  ;;  %v633_v62 = vrot.slane %v533_v56, %v1306_v52  ;;  %v649_v63 = vrot.slane %v534_v57, %v1306_v52  ;;  %1084 = vmatprep.subr.bf16.mxu0 %v1160_v53  ;;  %v1146_v19 = vld [vmem:[#allocation2 + $0x4] ss:$0 sps:$4 sm:$0x77]   ;;  %v1144_v21 = vld [vmem:[#allocation2 + $0x8] ss:$0 sps:$4 sm:$0x77]  }
  0x33   : > { %340 = vrot.lane.b32.xlu1 %v328_v6, %s1180_s19  ;;  %1100 = vmatpush3.bf16.msra.mxu1 %v1165_v47  ;;  %v665_v1 = vrot.slane %v535_v59, %v1306_v52  ;;  %v1147_v22 = vld [vmem:[#allocation2 + $0xc] ss:$0 sps:$4 sm:$0x77]   ;;  %v403_v24 = vshll.u32 %v1146_v19, 16  ;;  %v410_v27 = vshll.u32 %v1144_v21, 16  ;;  %v401_v30 = vshrl.u32 %v1146_v19, 16 }
  0x34   : > { %338 = vrot.lane.b32.xlu0 %v321_v9, %s1180_s19  ;;  %v1047_v2 = vcombine.low %v617_v60, %v633_v62  ;;  %v417_v28 = vshll.u32 %v1147_v22, 16  ;;  %v424_v32 = vshll.u32 %v1145_v25, 16  ;;  %v408_v34 = vshrl.u32 %v1144_v21, 16  ;;  %v259_v43 = vld [vmem:[#allocation2] sm:$0x3] }
  0x35   : > { %v1049_v3 = vcombine.low %v649_v63, %v665_v1  ;;  %1085 = vmatpush3.bf16.msra.mxu0 %v1161_v61  ;;  %v405_v31 = vrot.slane %v403_v24, 1  ;;  %v412_v35 = vrot.slane %v410_v27, 1  ;;  %v415_v36 = vshrl.u32 %v1147_v22, 16  ;;  %v260_v47 = vld [vmem:[#allocation2 + $0x4] sm:$0x3] }
  0x36   : > { %v727_v5 = vrot.slane %v1047_v2, %v1306_v52  ;;  %1086 = vmatprep.subr.bf16.mxu0 %v1163_v0  ;;  %v422_v40 = vshrl.u32 %v1145_v25, 16  ;;  %v426_v41 = vrot.slane %v424_v32, 1  ;;  %v261_v51 = vld [vmem:[#allocation2 + $0x8] sm:$0x3] }
  0x37   : > { %342 = vrot.lane.b32.xlu1 %v335_v13, %s1180_s19  ;;  %v741_v6 = vrot.slane %v1049_v3, %v1306_v52  ;;  %v406_v39 = vor.u32 %v405_v31, %v401_v30  ;;  %v413_v44 = vor.u32 %v412_v35, %v408_v34 }
  0x38   : > { %380 = vrot.lane.b32.xlu0 %v1136_v15, %s1181_s7  ;;  %v427_v50 = vor.u32 %v426_v41, %v422_v40 }
  0x39   : > { %v744_v7 = vcombine.low %v727_v5, %v741_v6  ;;  %1087 = vmatpush3.bf16.msra.mxu0 %v1164_v4 }
  0x3b   : > { %382 = vrot.lane.b32.xlu1 %v1137_v16, %s1181_s7  ;;  %1102 = vmatmul.mubr.msk.bf16.vlgmr.msra.gmra.mxu1 %vm536_vm4, %v744_v7 }
  0x3c   : > { %384 = vrot.lane.b32.xlu0 %v1138_v20, %s1181_s7 }
  0x3f   : > { %386 = vrot.lane.b32.xlu1 %v1139_v29, %s1181_s7 }
  0x40   : > { %512 = vrot.lane.b32.xlu0 %v490_v37, %s1181_s7  ;;  %v419_v37 = vrot.slane %v417_v28, 1 }
  0x42   : > { %v420_v45 = vor.u32 %v419_v37, %v415_v36  ;;  %v1045_v36 = vld [vmem:[%s1377_s2] ss:$0 sm:$0xff] }
  0x43   : > { %514 = vrot.lane.b32.xlu1 %v497_v46, %s1181_s7 }
  0x44   : > { %516 = vrot.lane.b32.xlu0 %v504_v49, %s1181_s7 }
  0x47   : > { %518 = vrot.lane.b32.xlu1 %v511_v58, %s1181_s7  ;;  %v262_v58 = vld [vmem:[#allocation2 + $0xc] sm:$0x3] }
  0x88   : > { %v361_v8 = vpop.permute.xlu0 %360  ;;  %v1330_v9 = vpop.permute.xlu1 %470 }
  0x8d   : > { %v337_v10 = vpop.permute.xlu0 %336 }
  0x8e   : > { %v539_v49 = vsel %vm536_vm4, %v259_v43, %v337_v10 }
  0x8f   : > { %v551_v61 = vsel %vm549_vm5, %v539_v49, %v361_v8 }
  0x91   : > { %v467_v11 = vpop.permute.xlu1 %466 }
  0x92   : > { %v465_v12 = vpop.permute.xlu0 %464 }
  0x95   : > { %v447_v13 = vpop.permute.xlu1 %446 }
  0x96   : > { %v469_v14 = vpop.permute.xlu0 %468  ;;  %v572_v54 = vsel %vm536_vm4, %v413_v44, %v447_v13 }
  0x97   : > { %v582_v1 = vsel %vm549_vm5, %v572_v54, %v467_v11 }
  0x99   : > { %v451_v15 = vpop.permute.xlu1 %450 }
  0x9a   : > { %v445_v16 = vpop.permute.xlu0 %444  ;;  %v578_v63 = vsel %vm536_vm4, %v427_v50, %v451_v15 }
  0x9b   : > { %v569_v48 = vsel %vm536_vm4, %v406_v39, %v445_v16 }
  0x9c   : > { %v580_v59 = vsel %vm549_vm5, %v569_v48, %v465_v12 }
  0x9d   : > { %v363_v17 = vpop.permute.xlu1 %362 }
  0x9e   : > { %v449_v18 = vpop.permute.xlu0 %448 }
  0x9f   : > { %v575_v55 = vsel %vm536_vm4, %v420_v45, %v449_v18  ;;  %v586_v18 = vsel %vm549_vm5, %v578_v63, %v1330_v9 }
  0xa0   : > { %v584_v3 = vsel %vm549_vm5, %v575_v55, %v469_v14 }
  0xa1   : > { %v367_v20 = vpop.permute.xlu1 %366 }
  0xa2   : > { %v365_v23 = vpop.permute.xlu0 %364 }
  0xa5   : > { %v341_v26 = vpop.permute.xlu1 %340 }
  0xa6   : > { %v339_v29 = vpop.permute.xlu0 %338  ;;  %v545_v60 = vsel %vm536_vm4, %v261_v51, %v341_v26 }
  0xa7   : > { %v542_v56 = vsel %vm536_vm4, %v260_v47, %v339_v29  ;;  %v555_v10 = vsel %vm549_vm5, %v545_v60, %v365_v23 }
  0xa8   : > { %v553_v0 = vsel %vm549_vm5, %v542_v56, %v363_v17 }
  0xa9   : > { %v343_v33 = vpop.permute.xlu1 %342 }
  0xaa   : > { %v381_v38 = vpop.permute.xlu0 %380  ;;  %v548_v4 = vsel %vm536_vm4, %v262_v58, %v343_v33 }
  0xab   : > { %v560_v5 = vsel %vm558_vm6, %v551_v61, %v381_v38  ;;  %v557_v16 = vsel %vm549_vm5, %v548_v4, %v367_v20 }
  0xad   : > { %v383_v42 = vpop.permute.xlu1 %382 }
  0xae   : > { %v385_v46 = vpop.permute.xlu0 %384  ;;  %v562_v6 = vsel %vm558_vm6, %v553_v0, %v383_v42 }
  0xaf   : > { %v564_v11 = vsel %vm558_vm6, %v555_v10, %v385_v46 }
  0xb1   : > { %v387_v53 = vpop.permute.xlu1 %386 }
  0xb2   : > { %v513_v57 = vpop.permute.xlu0 %512  ;;  %v566_v21 = vsel %vm558_vm6, %v557_v16, %v387_v53 }
  0xb3   : > { %v588_v62 = vsel %vm558_vm6, %v580_v59, %v513_v57 }
  0xb4   : > { %v603_v12 = vcombine.low %v560_v5, %v588_v62 }
  0xb5   : > { %v515_v2 = vpop.permute.xlu1 %514 }
  0xb6   : > { %v590_v7 = vsel %vm558_vm6, %v582_v1, %v515_v2  ;;  %v517_v8 = vpop.permute.xlu0 %516  ;;  %v610_v23 = vrot.slane %v603_v12, %v1306_v52 }
  0xb7   : > { %v619_v13 = vcombine.low %v562_v6, %v590_v7  ;;  %v592_v15 = vsel %vm558_vm6, %v584_v3, %v517_v8 }
  0xb8   : > { %v635_v17 = vcombine.low %v564_v11, %v592_v15 }
  0xb9   : > { %v626_v14 = vrot.slane %v619_v13, %v1306_v52  ;;  %v519_v19 = vpop.permute.xlu1 %518 }
  0xba   : > { %v594_v22 = vsel %vm558_vm6, %v586_v18, %v519_v19  ;;  %v642_v25 = vrot.slane %v635_v17, %v1306_v52 }
  0xbb   : > { %v651_v24 = vcombine.low %v566_v21, %v594_v22  ;;  %v1046_v27 = vcombine.low %v610_v23, %v626_v14 }
  0xbd   : > { %v658_v26 = vrot.slane %v651_v24, %v1306_v52  ;;  %v720_v28 = vrot.slane %v1046_v27, %v1306_v52 }
  0xbf   : > { %v1048_v20 = vcombine.low %v642_v25, %v658_v26 }
  0xc1   : > { %v734_v29 = vrot.slane %v1048_v20, %v1306_v52 }
  0xc3   : > { %v743_v30 = vcombine.high %v720_v28, %v734_v29  ;;  %v742_v9 = vcombine.low %v720_v28, %v734_v29 }
  0xc5   : > { %890 = vmatprep.mubr.bf16.mxu0 %v743_v30 }
  0xc6   : > { %891 = vmatmul.mubr.bf16.vlgmr.msra.gmra.mxu0 %v742_v9 }
  0xfb   : > { %v933_v31 = vpop.f32.mrf.mxu1 }
  0xfd   : > { %v1103_v32 = vpop.f32.mrf.mxu1 }
  0xff   : > { %v936_v33 = vpop.f32.mrf.mxu1 }
 0x101   : > { %v1104_v34 = vpop.f32.mrf.mxu1 }
 0x186   : > { %v1088_v35 = vpop.f32.mrf.mxu0 }
 0x188   : > { %v1089_v37 = vpop.f32.mrf.mxu0 }
 0x189   : > { %v1090_v38 = vadd.f32 %v1089_v37, %v1088_v35 }
 0x18a   : > { %v1091_v39 = vpop.f32.mrf.mxu0 }
 0x18b   : > { %v893_v40 = vadd.f32 %v1090_v38, %v1045_v36 }
 0x18c   : > { %v1092_v41 = vpop.f32.mrf.mxu0 }
 0x18d   : > { %v934_v52 = vadd.f32 %v933_v31, %v893_v40  ;;  %v1093_v42 = vadd.f32 %v1092_v41, %v1091_v39 }
 0x18f   : > { %v896_v43 = vadd.f32 %v1093_v42, %v1045_v36  ;;  %v940_v44 = vmax.f32 %v934_v52, 0.0 }
 0x191   : > { %v937_v45 = vadd.f32 %v936_v33, %v896_v43  ;;  %v942_v47 = vsel %vm549_vm5, %v940_v44, 0.0 }
 0x193   : > { %v941_v46 = vmax.f32 %v937_v45, 0.0 }
 0x195   : > { %v943_v48 = vsel %vm549_vm5, %v941_v46, 0.0 }
 0x196   : > { %v944_v49 = vadd.f32 %v943_v48, %v942_v47 }
 0x198   : > { %v945_v50 = vrot.slane %v944_v49, 4 }
 0x19a   : > { %v946_v51 = vadd.f32 %v945_v50, %v944_v49 }
 0x19c   : > { %v947_v53 = vrot.slane %v946_v51, 2 }
 0x19e   : > { %v948_v54 = vadd.f32 %v947_v53, %v946_v51 }
 0x1a0   : > { %v949_v55 = vrot.slane %v948_v54, 1 }
 0x1a2   : > { %v950_v56 = vadd.f32 %v949_v55, %v948_v54 }
 0x1a4   : > { %v952_v57 = vmul.f32 0.0625, %v950_v56 }
 0x1a6   : > { %954 = vst.msk [vmem:[%s166_s9] sm:$0x1] %vm953_vm7, %v952_v57 }
 0x1a7 PF: > { %s13_s12 = sadd.s32 1, %s1176_s12  }
 0x1a8   : > { %p10_p4 = scmp.ge.s32.totalorder %s13_s12, 10  }
 0x1aa   :  { %12 = sbr.rel (!%p10_p4) target bundleno = 1 (0x1), region = 64 }

// kernel: drowsiness_cnn_lstm.7
= control target key start
LH: loop header
LB: loop body
LE: loop exit
PB: predicated region body
PF: predicated region fallthrough
CT: control target
= control target key end

     0   :  { %s2240_s12 = smov 0   ;;  %s2739_s0 = inlined_call_operand.vmem [shape: bf16[8,8,8,16], index: 0, kind: input, shape index: {}]   ;;  %s2740_s1 = inlined_call_operand.vmem [shape: bf16[144,32], index: 1, kind: input, shape index: {}]   ;;  %s2741_s2 = inlined_call_operand.vmem [shape: f32[1,32], index: 2, kind: input, shape index: {}]   ;;  %s2742_s3 = inlined_call_operand.vmem [shape: bf16[8,4,4,32], index: 3, kind: output, shape index: {}]  }
   0x1 LB: > { %s1964_s13 = sadd.s32 4294967295, %s2209_s12   ;;  %p1968_p0 = scmp.ge.s32.totalorder %s2209_s12, 1  ;;  %s2209_s12 = sphi %s2240_s12, %s13_s12  }
   0x2   : > { %p137_p1 = scmp.lt.s32.totalorder %s2209_s12, 9 }
   0x4   : > { %p138_p2 = pnand %p1968_p0, %p137_p1 }
   0x5   : > { %p161_p3 = scmp.lt.s32.totalorder (!%p138_p2), %s1964_s13, 7  ;;  %s2212_s18 = smov (!%p138_p2), 32  }
   0x6   : > { %141 = sbr.rel (%p138_p2) target bundleno = 499 (0x1f3), region = 32  ;;  %s2213_s19 = smov (!%p138_p2), 16  }
   0x7   : > { %s2214_s20 = smov (!%p138_p2), 48   ;;  %s2215_s27 = smov (!%p138_p2), 64  }
   0x8   : > { %s2216_s5 = smov (!%p138_p2), 80   ;;  %s2217_s10 = smov (!%p138_p2), 96  }
   0xb   : > { %vm172_vm0 = vcmask 125952   ;;  %vm174_vm1 = vcmask 122880   ;;  %v2211_v0 = vmov 0   ;;  %s2748_s13 = smov (!%p161_p3, %s1964_s13), 7  ;;  %vm284_vm2 = vsmask.f32 7938 }
   0xc   : > { %173 = vst.msk [vmem:[#allocation2] sm:$0xf] %vm172_vm0, %v2211_v0  ;;  %176 = vst.msk [vmem:[#allocation2 + $0x8] sm:$0xf] %vm172_vm0, %v2211_v0  ;;  %1176 = vmatprep.subr.bf16.mxu0 %v2211_v0  ;;  %2095 = vmatprep.subr.bf16.mxu1 %v2211_v0  ;;  %s2093_s14 = sshll.u32 %s2748_s13, 5  ;;  %vm922_vm6 = vcmask 130048  }
   0xd   : > { %175 = vst.msk [vmem:[#allocation2 + $0x4] sm:$0x1] %vm174_vm1, %v2211_v0  ;;  %177 = vst.msk [vmem:[#allocation2 + $0xc] sm:$0x1] %vm174_vm1, %v2211_v0  ;;  %s2300_s17 = scalar_lea.vmem %s2739_s0, %s2093_s14  ;;  %vm290_vm3 = vsmask.f32 256 }
   0xe   : > { %178 = vst.msk [vmem:[#allocation2 + $0x10] sm:$0xf] %vm172_vm0, %v2211_v0  ;;  %180 = vst.msk [vmem:[#allocation2 + $0x18] sm:$0xf] %vm172_vm0, %v2211_v0  ;;  %v195_v1 = vld [vmem:[%s2300_s17 + $0x4] sm:$0xf] }
   0xf   : > { %179 = vst.msk [vmem:[#allocation2 + $0x14] sm:$0x1] %vm174_vm1, %v2211_v0  ;;  %181 = vst.msk [vmem:[#allocation2 + $0x1c] sm:$0x1] %vm174_vm1, %v2211_v0  ;;  %v194_v2 = vld [vmem:[%s2300_s17] sm:$0xf] }
  0x10   : > { %182 = vst.msk [vmem:[#allocation2 + $0x20] sm:$0xf] %vm172_vm0, %v2211_v0  ;;  %184 = vst.msk [vmem:[#allocation2 + $0x28] sm:$0xf] %vm172_vm0, %v2211_v0  ;;  %v211_v8 = vshrl.u32 %v195_v1, 16  ;;  %v214_v9 = vshll.u32 %v195_v1, 16 }
  0x11   : > { %183 = vst.msk [vmem:[#allocation2 + $0x24] sm:$0x1] %vm174_vm1, %v2211_v0  ;;  %185 = vst.msk [vmem:[#allocation2 + $0x2c] sm:$0x1] %vm174_vm1, %v2211_v0  ;;  %v199_v10 = vld [vmem:[%s2300_s17 + $0x14] sm:$0xf] }
  0x12   : > { %186 = vst.msk [vmem:[#allocation2 + $0x30] sm:$0xf] %vm172_vm0, %v2211_v0  ;;  %188 = vst.msk [vmem:[#allocation2 + $0x38] sm:$0xf] %vm172_vm0, %v2211_v0  ;;  %v203_v12 = vshrl.u32 %v194_v2, 16  ;;  %v206_v13 = vshll.u32 %v194_v2, 16 }
  0x13   : > { %187 = vst.msk [vmem:[#allocation2 + $0x34] sm:$0x1] %vm174_vm1, %v2211_v0  ;;  %189 = vst.msk [vmem:[#allocation2 + $0x3c] sm:$0x1] %vm174_vm1, %v2211_v0  ;;  %v353_v4 = vld [vmem:[#allocation2] sm:$0xe] }
  0x14   : > { %190 = vst.msk [vmem:[#allocation2 + $0x40] sm:$0xf] %vm172_vm0, %v2211_v0  ;;  %192 = vst.msk [vmem:[#allocation2 + $0x48] sm:$0xf] %vm172_vm0, %v2211_v0  ;;  %v345_v3 = vld [vmem:[#allocation2 + $0x4] sm:$0x1] }
  0x15   : > { %191 = vst.msk [vmem:[#allocation2 + $0x44] sm:$0x1] %vm174_vm1, %v2211_v0  ;;  %193 = vst.msk [vmem:[#allocation2 + $0x4c] sm:$0x1] %vm174_vm1, %v2211_v0  ;;  %v2304_v5 = vld [vmem:[#allocation2] sm:$0xf]  ;;  %v1981_v6 = vcombine.low %v353_v4, %v345_v3 }
  0x16   : > { %v1973_v7 = vcombine.low %v2304_v5, %v345_v3  ;;  %v295_v11 = vld [vmem:[#allocation2 + $0x10] sm:$0xf]  ;;  %v213_v17 = vrot.slane %v211_v8, 7  ;;  %v298_v18 = vld [vmem:[#allocation2 + $0x14] sm:$0x1]  ;;  %vm2310_vm4 = vmand %vm172_vm0, %vm284_vm2  ;;  %v205_v20 = vrot.slane %v203_v12, 7 }
  0x17   : > { %v546_v14 = vrot.slane %v1981_v6, 1  ;;  %v286_v21 = vld [vmem:[#allocation2 + $0x8] sm:$0xf]  ;;  %v243_v22 = vshrl.u32 %v199_v10, 16  ;;  %v246_v23 = vshll.u32 %v199_v10, 16  ;;  %vm2317_vm5 = vmand %vm174_vm1, %vm290_vm3  ;;  %vm947_vm7 = vcmask 261120  }
  0x18   : > { %v453_v15 = vshll.u32 %v1973_v7, 16  ;;  %v451_v16 = vshrl.u32 %v1973_v7, 16  ;;  %v216_v25 = vor.u32 %v214_v9, %v213_v17  ;;  %v217_v26 = vrot.slane %v213_v17, 4  ;;  %v292_v28 = vld [vmem:[#allocation2 + $0xc] sm:$0x1] }
  0x19   : > { %554 = vrot.lane.b32.xlu0 %v546_v14, %s2212_s18  ;;  %v198_v29 = vld [vmem:[%s2300_s17 + $0x10] sm:$0xf]  ;;  %v208_v30 = vor.u32 %v206_v13, %v205_v20  ;;  %v209_v31 = vrot.slane %v205_v20, 4  ;;  %v245_v32 = vrot.slane %v243_v22, 7  ;;  %v197_v40 = vld [vmem:[%s2300_s17 + $0xc] sm:$0xf] }
  0x1a   : > { %v455_v24 = vrot.slane %v453_v15, 1  ;;  %v319_v33 = vld [vmem:[#allocation2 + $0x30] sm:$0xf]  ;;  %v235_v34 = vshrl.u32 %v198_v29, 16  ;;  %v296_v36 = vsel %vm2310_vm4, %v216_v25, %v295_v11  ;;  %v299_v37 = vsel %vm2317_vm5, %v217_v26, %v298_v18  ;;  %v322_v38 = vld [vmem:[#allocation2 + $0x34] sm:$0x1] }
  0x1b   : > { %v238_v39 = vshll.u32 %v198_v29, 16  ;;  %297 = vst [vmem:[#allocation2 + $0x10] sm:$0xf] %v296_v36  ;;  %300 = vst [vmem:[#allocation2 + $0x14] sm:$0x1] %v299_v37  ;;  %v287_v41 = vsel %vm2310_vm4, %v208_v30, %v286_v21  ;;  %v293_v42 = vsel %vm2317_vm5, %v209_v31, %v292_v28  ;;  %v248_v43 = vor.u32 %v246_v23, %v245_v32 }
  0x1c   : > { %v456_v35 = vor.u32 %v455_v24, %v451_v16  ;;  %v249_v44 = vrot.slane %v245_v32, 4  ;;  %v196_v45 = vld [vmem:[%s2300_s17 + $0x8] sm:$0xf]  ;;  %288 = vst [vmem:[#allocation2 + $0x8] sm:$0xf] %v287_v41  ;;  %v237_v46 = vrot.slane %v235_v34, 7 }
  0x1d   : > { %294 = vst [vmem:[#allocation2 + $0xc] sm:$0x1] %v293_v42  ;;  %v313_v47 = vld [vmem:[#allocation2 + $0x28] sm:$0xf]  ;;  %v227_v48 = vshrl.u32 %v197_v40, 16  ;;  %v230_v49 = vshll.u32 %v197_v40, 16  ;;  %v320_v51 = vsel %vm2310_vm4, %v248_v43, %v319_v33 }
  0x1e   : > { %506 = vrot.lane.b32.xlu0 %v456_v35, %s2213_s19  ;;  %v219_v50 = vshrl.u32 %v196_v45, 16  ;;  %v323_v52 = vsel %vm2317_vm5, %v249_v44, %v322_v38  ;;  %v316_v53 = vld [vmem:[#allocation2 + $0x2c] sm:$0x1]  ;;  %v222_v54 = vshll.u32 %v196_v45, 16  ;;  %v200_v55 = vld [vmem:[%s2300_s17 + $0x18] sm:$0xf]  ;;  %v240_v56 = vor.u32 %v238_v39, %v237_v46 }
  0x1f   : > { %321 = vst [vmem:[#allocation2 + $0x30] sm:$0xf] %v320_v51  ;;  %324 = vst [vmem:[#allocation2 + $0x34] sm:$0x1] %v323_v52  ;;  %v241_v57 = vrot.slane %v237_v46, 4  ;;  %v229_v58 = vrot.slane %v227_v48, 7 }
  0x20   : > { %v221_v59 = vrot.slane %v219_v50, 7  ;;  %v307_v60 = vld [vmem:[#allocation2 + $0x20] sm:$0xf]  ;;  %v310_v61 = vld [vmem:[#allocation2 + $0x24] sm:$0x1]  ;;  %v251_v62 = vshrl.u32 %v200_v55, 16  ;;  %v314_v63 = vsel %vm2310_vm4, %v240_v56, %v313_v47 }
  0x21   : > { %v317_v1 = vsel %vm2317_vm5, %v241_v57, %v316_v53  ;;  %v232_v2 = vor.u32 %v230_v49, %v229_v58  ;;  %v233_v3 = vrot.slane %v229_v58, 4  ;;  %v301_v4 = vld [vmem:[#allocation2 + $0x18] sm:$0xf]  ;;  %315 = vst [vmem:[#allocation2 + $0x28] sm:$0xf] %v314_v63  ;;  %v254_v13 = vshll.u32 %v200_v55, 16 }
  0x22   : > { %318 = vst [vmem:[#allocation2 + $0x2c] sm:$0x1] %v317_v1  ;;  %v224_v6 = vor.u32 %v222_v54, %v221_v59  ;;  %v225_v7 = vrot.slane %v221_v59, 4  ;;  %v304_v8 = vld [vmem:[#allocation2 + $0x1c] sm:$0x1]  ;;  %v2346_v12 = vrot.slane %v251_v62, 7 }
  0x23   : > { %v362_v9 = vld [vmem:[#allocation2 + $0x10] sm:$0xf]  ;;  %v308_v10 = vsel %vm2310_vm4, %v232_v2, %v307_v60  ;;  %v311_v11 = vsel %vm2317_vm5, %v233_v3, %v310_v61  ;;  %v361_v15 = vld [vmem:[#allocation2 + $0x8] sm:$0xf]  ;;  %v2363_v31 = vld [vmem:[#allocation2 + $0x14] sm:$0x1] }
  0x24   : > { %v1990_v14 = vcombine.low %v362_v9, %v362_v9  ;;  %v2348_v16 = vld [vmem:[#allocation2 + $0xc] sm:$0x1]  ;;  %309 = vst [vmem:[#allocation2 + $0x20] sm:$0xf] %v308_v10  ;;  %312 = vst [vmem:[#allocation2 + $0x24] sm:$0x1] %v311_v11  ;;  %v302_v18 = vsel %vm2310_vm4, %v224_v6, %v301_v4  ;;  %v1989_v20 = vcombine.low %v361_v15, %v361_v15 }
  0x25   : > { %v346_v17 = vld [vmem:[#allocation2 + $0xc] sm:$0x1]  ;;  %v2353_v21 = vcombine.low %v361_v15, %v2348_v16  ;;  %v354_v22 = vld [vmem:[#allocation2 + $0x8] sm:$0xe]  ;;  %303 = vst [vmem:[#allocation2 + $0x18] sm:$0xf] %v302_v18  ;;  %v305_v24 = vsel %vm2317_vm5, %v225_v7, %v304_v8  ;;  %v256_v30 = vor.u32 %v254_v13, %v2346_v12  ;;  %v1998_v53 = vcombine.low %v362_v9, %v2363_v31 }
  0x26   : > { %v2355_v23 = vld [vmem:[#allocation2 + $0x8] sm:$0xf]  ;;  %596 = vrot.lane.b32.xlu1 %v1990_v14, %s2214_s20  ;;  %v366_v25 = vld [vmem:[#allocation2 + $0x30] sm:$0xf]  ;;  %v1982_v26 = vcombine.low %v354_v22, %v346_v17  ;;  %306 = vst [vmem:[#allocation2 + $0x1c] sm:$0x1] %v305_v24  ;;  %594 = vrot.lane.b32.xlu0 %v1989_v20, %s2214_s20 }
  0x27   : > { %v1974_v28 = vcombine.low %v2355_v23, %v346_v17  ;;  %v1994_v29 = vcombine.low %v366_v25, %v366_v25  ;;  %v637_v33 = vshll.u32 %v2353_v21, 16  ;;  %v325_v34 = vld [vmem:[#allocation2 + $0x38] sm:$0xf]  ;;  %v2381_v59 = vld [vmem:[#allocation2 + $0x34] sm:$0x1]  ;;  %v635_v60 = vshrl.u32 %v2353_v21, 16 }
  0x28   : > { %v365_v35 = vld [vmem:[#allocation2 + $0x28] sm:$0xf]  ;;  %v547_v39 = vrot.slane %v1982_v26, 1  ;;  %v326_v48 = vsel %vm2310_vm4, %v256_v30, %v325_v34  ;;  %v2190_v2 = vld [vmem:[%s2740_s1 + $0x38] sm:$0xff]   ;;  %v644_v3 = vshll.u32 %v1998_v53, 16  ;;  %v2002_v4 = vcombine.low %v366_v25, %v2381_v59  ;;  %v2191_v9 = vld [vmem:[%s2740_s1 + $0x30] sm:$0xff]  }
  0x29   : > { %v460_v32 = vshll.u32 %v1974_v28, 16  ;;  %v2366_v36 = vld [vmem:[#allocation2 + $0x2c] sm:$0x1]  ;;  %v2368_v37 = vld [vmem:[#allocation2 + $0x28] sm:$0xf]  ;;  %v1993_v38 = vcombine.low %v365_v35, %v365_v35  ;;  %v458_v42 = vshrl.u32 %v1974_v28, 16  ;;  %1177 = vmatpush1.bf16.msra.mxu0 %v2190_v2  ;;  %2104 = vmatpush1.bf16.msra.mxu1 %v2190_v2 }
  0x2a   : > { %604 = vrot.lane.b32.xlu1 %v1994_v29, %s2214_s20  ;;  %v350_v40 = vld [vmem:[#allocation2 + $0x2c] sm:$0x1]  ;;  %v358_v41 = vld [vmem:[#allocation2 + $0x28] sm:$0xe]  ;;  %v2001_v49 = vcombine.low %v365_v35, %v2366_v36  ;;  %327 = vst [vmem:[#allocation2 + $0x38] sm:$0xf] %v326_v48  ;;  %1178 = vmatprep.subr.bf16.mxu0 %v2211_v0 }
  0x2b   : > { %v2371_v43 = vld [vmem:[#allocation2 + $0x20] sm:$0xf]  ;;  %v349_v44 = vld [vmem:[#allocation2 + $0x24] sm:$0x1]  ;;  %v1978_v46 = vcombine.low %v2368_v37, %v350_v40  ;;  %v1986_v47 = vcombine.low %v358_v41, %v350_v40  ;;  %602 = vrot.lane.b32.xlu0 %v1993_v38, %s2214_s20  ;;  %v462_v52 = vrot.slane %v460_v32, 1  ;;  %v639_v63 = vrot.slane %v637_v33, 1  ;;  %2096 = vmatprep.subr.bf16.mxu1 %v2211_v0 }
  0x2c   : > { %v357_v45 = vld [vmem:[#allocation2 + $0x20] sm:$0xe]  ;;  %v1977_v50 = vcombine.low %v2371_v43, %v349_v44  ;;  %v665_v1 = vshll.u32 %v2001_v49, 16  ;;  %v328_v10 = vld [vmem:[#allocation2 + $0x3c] sm:$0x1]  ;;  %v663_v13 = vshrl.u32 %v2001_v49, 16 }
  0x2d   : > { %v1985_v51 = vcombine.low %v357_v45, %v349_v44  ;;  %v551_v54 = vrot.slane %v1986_v47, 1  ;;  %v488_v58 = vshll.u32 %v1978_v46, 16  ;;  %v463_v61 = vor.u32 %v462_v52, %v458_v42  ;;  %v377_v18 = vld [vmem:[#allocation2 + $0x8] sm:$0xe]  ;;  %1179 = vmatpush1.bf16.msra.mxu0 %v2191_v9  ;;  %2105 = vmatpush1.bf16.msra.mxu1 %v2191_v9  ;;  %v201_v29 = vld [vmem:[%s2300_s17 + $0x1c] sm:$0xf] }
  0x2e   : > { %556 = vrot.lane.b32.xlu1 %v547_v39, %s2212_s18  ;;  %v479_v56 = vshrl.u32 %v1977_v50, 16  ;;  %v481_v57 = vshll.u32 %v1977_v50, 16  ;;  %v486_v7 = vshrl.u32 %v1978_v46, 16  ;;  %v640_v11 = vor.u32 %v639_v63, %v635_v60  ;;  %v2192_v25 = vld [vmem:[%s2740_s1 + $0x28] sm:$0xff]   ;;  %1180 = vmatprep.subr.bf16.mxu0 %v2211_v0  ;;  %v378_v34 = vld [vmem:[#allocation2 + $0x10] sm:$0xe] }
  0x2f   : > { %v550_v55 = vrot.slane %v1985_v51, 1  ;;  %v490_v8 = vrot.slane %v488_v58, 1  ;;  %v667_v14 = vrot.slane %v665_v1, 1  ;;  %v257_v15 = vrot.slane %v2346_v12, 4  ;;  %2097 = vmatprep.subr.bf16.mxu1 %v2211_v0  ;;  %v381_v28 = vld [vmem:[#allocation2 + $0x28] sm:$0xe] }
  0x30   : > { %v483_v62 = vrot.slane %v481_v57, 1  ;;  %v642_v17 = vshrl.u32 %v1998_v53, 16  ;;  %v646_v21 = vrot.slane %v644_v3, 1  ;;  %v672_v22 = vshll.u32 %v2002_v4, 16  ;;  %v2193_v35 = vld [vmem:[%s2740_s1 + $0x20] sm:$0xff]   ;;  %v2194_v47 = vld [vmem:[%s2740_s1 + $0x18] sm:$0xff]  }
  0x31   : > { %562 = vrot.lane.b32.xlu0 %v550_v55, %s2212_s18  ;;  %v491_v20 = vor.u32 %v490_v8, %v486_v7  ;;  %v329_v24 = vsel %vm2317_vm5, %v257_v15, %v328_v10  ;;  %v668_v12 = vor.u32 %v667_v14, %v663_v13  ;;  %v2005_v26 = vcombine.low %v377_v18, %v2348_v16  ;;  %v2416_v40 = vld [vmem:[#allocation2 + $0x14] sm:$0x1]  ;;  %v386_v44 = vld [vmem:[#allocation2 + $0x10] sm:$0xf]  ;;  %v331_v46 = vld [vmem:[#allocation2 + $0x40] sm:$0xf] }
  0x32   : > { %564 = vrot.lane.b32.xlu1 %v551_v54, %s2212_s18  ;;  %v484_v6 = vor.u32 %v483_v62, %v479_v56  ;;  %330 = vst [vmem:[#allocation2 + $0x3c] sm:$0x1] %v329_v24  ;;  %v647_v30 = vor.u32 %v646_v21, %v642_v17  ;;  %v670_v32 = vshrl.u32 %v2002_v4, 16  ;;  %v674_v33 = vrot.slane %v672_v22, 1  ;;  %1181 = vmatpush1.bf16.msra.mxu0 %v2192_v25  ;;  %v382_v45 = vld [vmem:[#allocation2 + $0x30] sm:$0xe] }
  0x33   : > { %1182 = vmatprep.subr.bf16.mxu0 %v2211_v0  ;;  %2106 = vmatpush1.bf16.msra.mxu1 %v2192_v25  ;;  %v730_v16 = vrot.slane %v2005_v26, 1  ;;  %v2009_v38 = vcombine.low %v381_v28, %v2366_v36  ;;  %v259_v39 = vshrl.u32 %v201_v29, 16  ;;  %v2006_v42 = vcombine.low %v378_v34, %v2363_v31  ;;  %v334_v51 = vld [vmem:[#allocation2 + $0x44] sm:$0x1]  ;;  %v390_v31 = vld [vmem:[#allocation2 + $0x30] sm:$0xf] }
  0x34   : > { %2098 = vmatprep.subr.bf16.mxu1 %v2211_v0  ;;  %v675_v41 = vor.u32 %v674_v33, %v670_v32  ;;  %v2425_v48 = vcombine.low %v386_v44, %v2416_v40  ;;  %v262_v50 = vshll.u32 %v201_v29, 16  ;;  %v2428_v52 = vld [vmem:[#allocation2 + $0x34] sm:$0x1]  ;;  %v2010_v54 = vcombine.low %v382_v45, %v2381_v59  ;;  %v2432_v55 = vld [vmem:[#allocation2 + $0x1c] sm:$0x1]  ;;  %v2196_v7 = vld [vmem:[%s2740_s1 + $0x8] sm:$0xff]  }
  0x35   : > { %508 = vrot.lane.b32.xlu0 %v463_v61, %s2213_s19  ;;  %v734_v36 = vrot.slane %v2009_v38, 1  ;;  %v261_v49 = vrot.slane %v259_v39, 7  ;;  %v731_v53 = vrot.slane %v2006_v42, 1  ;;  %v2013_v58 = vcombine.low %v386_v44, %v386_v44  ;;  %v387_v60 = vld [vmem:[#allocation2 + $0x18] sm:$0xf]  ;;  %v2195_v61 = vld [vmem:[%s2740_s1 + $0x10] sm:$0xff]  }
  0x36   : > { %514 = vrot.lane.b32.xlu1 %v484_v6, %s2213_s19  ;;  %1183 = vmatpush1.bf16.msra.mxu0 %v2193_v35  ;;  %v2440_v62 = vcombine.low %v390_v31, %v2428_v52  ;;  %v821_v59 = vshll.u32 %v2425_v48, 16  ;;  %v2449_v2 = vcombine.low %v387_v60, %v2432_v55  ;;  %v2451_v3 = vld [vmem:[#allocation2 + $0x10] sm:$0xf]  ;;  %v2453_v4 = vld [vmem:[#allocation2 + $0x14] sm:$0x1]  ;;  %v735_v6 = vrot.slane %v2010_v54, 1 }
  0x37   : > { %1184 = vmatprep.subr.bf16.mxu0 %v2211_v0  ;;  %2107 = vmatpush1.bf16.msra.mxu1 %v2193_v35  ;;  %v264_v56 = vor.u32 %v262_v50, %v261_v49  ;;  %v265_v57 = vrot.slane %v261_v49, 4  ;;  %v2017_v19 = vcombine.low %v390_v31, %v390_v31  ;;  %v819_v8 = vshrl.u32 %v2425_v48, 16  ;;  %v2469_v13 = vld [vmem:[#allocation2 + $0x30] sm:$0xf]  ;;  %v391_v14 = vld [vmem:[#allocation2 + $0x38] sm:$0xf] }
  0x38   : > { %2099 = vmatprep.subr.bf16.mxu1 %v2211_v0  ;;  %v823_v9 = vrot.slane %v821_v59, 1  ;;  %v849_v10 = vshll.u32 %v2440_v62, 16  ;;  %v828_v15 = vshll.u32 %v2449_v2, 16  ;;  %v2473_v17 = vld [vmem:[#allocation2 + $0x34] sm:$0x1]  ;;  %v2014_v18 = vcombine.low %v387_v60, %v387_v60  ;;  %v2197_v25 = vld [vmem:[%s2740_s1] sm:$0xff]  }
  0x39   : > { %690 = vrot.lane.b32.xlu0 %v640_v11, %s2215_s27  ;;  %v332_v63 = vsel %vm2310_vm4, %v264_v56, %v331_v46  ;;  %v335_v1 = vsel %vm2317_vm5, %v265_v57, %v334_v51  ;;  %v2457_v27 = vld [vmem:[#allocation2 + $0x3c] sm:$0x1]  ;;  %v2467_v11 = vcombine.low %v2451_v3, %v2453_v4  ;;  %v2479_v21 = vld [vmem:[#allocation2 + $0x18] sm:$0xf]  ;;  %v847_v24 = vshrl.u32 %v2440_v62, 16  ;;  %v2198_v46 = vld [vmem:[%s2740_s1 + $0x40] sm:$0xff]  }
  0x3a   : > { %516 = vrot.lane.b32.xlu1 %v491_v20, %s2213_s19  ;;  %1185 = vmatpush1.bf16.msra.mxu0 %v2194_v47  ;;  %333 = vst [vmem:[#allocation2 + $0x40] sm:$0xf] %v332_v63  ;;  %336 = vst [vmem:[#allocation2 + $0x44] sm:$0x1] %v335_v1  ;;  %v2477_v20 = vcombine.low %v391_v14, %v2457_v27  ;;  %v2481_v22 = vld [vmem:[#allocation2 + $0x1c] sm:$0x1]  ;;  %v824_v28 = vor.u32 %v823_v9, %v819_v8 }
  0x3b   : > { %1186 = vmatprep.subr.bf16.mxu0 %v2211_v0  ;;  %2108 = vmatpush1.bf16.msra.mxu1 %v2194_v47  ;;  %v403_v26 = vld [vmem:[#allocation2 + $0x18] sm:$0xe]  ;;  %v851_v29 = vrot.slane %v849_v10, 1  ;;  %v1979_v32 = vcombine.low %v2469_v13, %v2473_v17  ;;  %v406_v33 = vld [vmem:[#allocation2 + $0x30] sm:$0xe]  ;;  %v826_v34 = vshrl.u32 %v2449_v2, 16  ;;  %v2018_v38 = vcombine.low %v391_v14, %v391_v14 }
  0x3c   : > { %2100 = vmatprep.subr.bf16.mxu1 %v2211_v0  ;;  %v830_v35 = vrot.slane %v828_v15, 1  ;;  %v856_v39 = vshll.u32 %v2477_v20, 16  ;;  %v2500_v42 = vld [vmem:[#allocation2 + $0x3c] sm:$0x1]  ;;  %v2030_v45 = vcombine.low %v403_v26, %v2432_v55  ;;  %v2033_v47 = vcombine.low %v406_v33, %v2428_v52  ;;  %s2218_s17 = smov 112  }
  0x3d   : > { %698 = vrot.lane.b32.xlu0 %v668_v12, %s2215_s27  ;;  %v402_v12 = vld [vmem:[#allocation2 + $0x10] sm:$0xe]  ;;  %v465_v48 = vshrl.u32 %v2467_v11, 16  ;;  %v495_v50 = vshll.u32 %v1979_v32, 16  ;;  %v854_v52 = vshrl.u32 %v2477_v20, 16  ;;  %vm964_vm8 = vcmask 392192  }
  0x3e   : > { %692 = vrot.lane.b32.xlu1 %v647_v30, %s2215_s27  ;;  %1187 = vmatpush1.bf16.msra.mxu0 %v2195_v61  ;;  %v467_v30 = vshll.u32 %v2467_v11, 16  ;;  %v2029_v44 = vcombine.low %v402_v12, %v2416_v40  ;;  %v407_v40 = vld [vmem:[#allocation2 + $0x38] sm:$0xe]  ;;  %v831_v51 = vor.u32 %v830_v35, %v826_v34  ;;  %v858_v54 = vrot.slane %v856_v39, 1  ;;  %v355_v63 = vld [vmem:[#allocation2 + $0x10] sm:$0xe] }
  0x3f   : > { %1188 = vmatprep.subr.bf16.mxu0 %v2211_v0  ;;  %2109 = vmatpush1.bf16.msra.mxu1 %v2195_v61  ;;  %v915_v56 = vrot.slane %v2030_v45, 1  ;;  %v2034_v57 = vcombine.low %v407_v40, %v2457_v27  ;;  %v493_v61 = vshrl.u32 %v1979_v32, 16  ;;  %v497_v62 = vrot.slane %v495_v50, 1  ;;  %v359_v9 = vld [vmem:[#allocation2 + $0x30] sm:$0xe] }
  0x40   : > { %2101 = vmatprep.subr.bf16.mxu1 %v2211_v0  ;;  %v469_v49 = vrot.slane %v467_v30, 1  ;;  %v914_v55 = vrot.slane %v2029_v44, 1  ;;  %v859_v2 = vor.u32 %v858_v54, %v854_v52  ;;  %v1983_v8 = vcombine.low %v355_v63, %v2453_v4  ;;  %v356_v15 = vld [vmem:[#allocation2 + $0x18] sm:$0xe]  ;;  %v375_v30 = vld [vmem:[#allocation2 + $0x3c] sm:$0x1] }
  0x41   : > { %738 = vrot.lane.b32.xlu0 %v730_v16, %s2216_s5  ;;  %v1976_v16 = vcombine.low %v2479_v21, %v2481_v22  ;;  %v919_v1 = vrot.slane %v2034_v57, 1  ;;  %v1987_v20 = vcombine.low %v359_v9, %v2473_v17  ;;  %v1984_v4 = vcombine.low %v356_v15, %v2481_v22  ;;  %v363_v12 = vld [vmem:[#allocation2 + $0x18] sm:$0xf]  ;;  %v372_v17 = vld [vmem:[#allocation2 + $0x24] sm:$0x1] }
  0x42   : > { %700 = vrot.lane.b32.xlu1 %v675_v41, %s2215_s27  ;;  %1189 = vmatpush1.bf16.msra.mxu0 %v2196_v7  ;;  %v2498_v41 = vld [vmem:[#allocation2 + $0x38] sm:$0xf]  ;;  %v470_v60 = vor.u32 %v469_v49, %v465_v48  ;;  %v2039_v59 = vcombine.low %v914_v55, %v915_v56  ;;  %v1991_v35 = vcombine.low %v363_v12, %v363_v12  ;;  %v364_v22 = vld [vmem:[#allocation2 + $0x20] sm:$0xf]  ;;  %v2534_v45 = vld [vmem:[#allocation2 + $0x44] sm:$0x1] }
  0x43   : > { %1190 = vmatprep.subr.bf16.mxu0 %v2211_v0  ;;  %2110 = vmatpush1.bf16.msra.mxu1 %v2196_v7  ;;  %v474_v31 = vshll.u32 %v1976_v16, 16  ;;  %v498_v7 = vor.u32 %v497_v62, %v493_v61  ;;  %v360_v26 = vld [vmem:[#allocation2 + $0x38] sm:$0xe]  ;;  %v549_v32 = vrot.slane %v1984_v4, 1  ;;  %v2000_v44 = vcombine.low %v364_v22, %v372_v17  ;;  %v368_v48 = vld [vmem:[#allocation2 + $0x40] sm:$0xf] }
  0x44   : > { %2102 = vmatprep.subr.bf16.mxu1 %v2211_v0  ;;  %2055 = vmatprep.mubr.msk.bf16.mxu0 %vm922_vm6, %v2039_v59  ;;  %v1988_v33 = vcombine.low %v360_v26, %v2500_v42  ;;  %v367_v34 = vld [vmem:[#allocation2 + $0x38] sm:$0xf]  ;;  %v1992_v49 = vcombine.low %v364_v22, %v364_v22  ;;  %v2004_v50 = vcombine.low %v368_v48, %v2534_v45  ;;  %v384_v9 = vld [vmem:[#allocation2 + $0x40] sm:$0xe]  ;;  %vm981_vm9 = vcmask 523264  }
  0x45   : > { %746 = vrot.lane.b32.xlu0 %v734_v36, %s2216_s5  ;;  %v852_v36 = vor.u32 %v851_v29, %v847_v24  ;;  %v371_v24 = vld [vmem:[#allocation2 + $0x1c] sm:$0x1]  ;;  %v658_v40 = vshll.u32 %v2000_v44, 16  ;;  %v379_v52 = vld [vmem:[#allocation2 + $0x18] sm:$0xe]  ;;  %v1996_v54 = vcombine.low %v368_v48, %v368_v48  ;;  %v656_v55 = vshrl.u32 %v2000_v44, 16 }
  0x46   : > { %740 = vrot.lane.b32.xlu1 %v731_v53, %s2216_s5  ;;  %1191 = vmatpush1.bf16.msra.mxu0 %v2197_v25  ;;  %v1980_v53 = vcombine.low %v2498_v41, %v2500_v42  ;;  %v1999_v29 = vcombine.low %v363_v12, %v371_v24  ;;  %v553_v39 = vrot.slane %v1988_v33, 1  ;;  %v686_v57 = vshll.u32 %v2004_v50, 16  ;;  %v383_v61 = vld [vmem:[#allocation2 + $0x38] sm:$0xe]  ;;  %v392_v12 = vld [vmem:[#allocation2 + $0x40] sm:$0xf] }
  0x47   : > { %1206 = vmatprep.subr.bf16.mxu0 %v2211_v0  ;;  %2111 = vmatpush1.bf16.msra.mxu1 %v2197_v25  ;;  %v660_v56 = vrot.slane %v658_v40, 1  ;;  %v684_v59 = vshrl.u32 %v2004_v50, 16  ;;  %v408_v26 = vld [vmem:[#allocation2 + $0x40] sm:$0xe]  ;;  %v2019_v44 = vcombine.low %v392_v12, %v392_v12  ;;  %vm998_vm10 = vcmask 654336  }
  0x48   : > { %2103 = vmatprep.subr.bf16.mxu1 %v2211_v0  ;;  %v502_v0 = vshll.u32 %v1980_v53, 16  ;;  %v500_v11 = vshrl.u32 %v1980_v53, 16  ;;  %v688_v63 = vrot.slane %v686_v57, 1  ;;  %vm1015_vm11 = vcmask 785408  }
  0x49   : > { %778 = vrot.lane.b32.xlu0 %v2013_v58, %s2217_s10  ;;  %v918_v58 = vrot.slane %v2033_v47, 1  ;;  %v649_v47 = vshrl.u32 %v1999_v29, 16  ;;  %v661_v62 = vor.u32 %v660_v56, %v656_v55  ;;  %vm1032_vm12 = vcmask 916480  }
  0x4a   : > { %748 = vrot.lane.b32.xlu1 %v735_v6, %s2216_s5  ;;  %1207 = vmatpush2.bf16.msra.mxu0 %v2198_v46  ;;  %v472_v6 = vshrl.u32 %v1976_v16, 16  ;;  %v504_v14 = vrot.slane %v502_v0, 1  ;;  %v2003_v16 = vcombine.low %v367_v34, %v375_v30  ;;  %v689_v0 = vor.u32 %v688_v63, %v684_v59 }
  0x4b   : > { %2112 = vmatpush2.bf16.msra.mxu1 %v2198_v46  ;;  %v2043_v27 = vcombine.low %v918_v58, %v919_v1  ;;  %v1995_v46 = vcombine.low %v367_v34, %v367_v34  ;;  %v380_v1 = vld [vmem:[#allocation2 + $0x20] sm:$0xe]  ;;  %vm1842_vm13 = vcmask 1041409   ;;  %vm1845_vm14 = vcmask 1042434  }
  0x4c   : > { %v505_v25 = vor.u32 %v504_v14, %v500_v11  ;;  %v679_v42 = vshll.u32 %v2003_v16, 16  ;;  %vm1848_vm15 = vcmask 1043459   ;;  %vm1904_vm0 = vcmask 254976  }
  0x4d   : > { %786 = vrot.lane.b32.xlu0 %v2017_v19, %s2217_s10  ;;  %v476_v19 = vrot.slane %v474_v31, 1  ;;  %2057 = vmatprep.mubr.msk.bf16.mxu1 %vm922_vm6, %v2043_v27  ;;  %v677_v31 = vshrl.u32 %v2003_v16, 16  ;;  %v2008_v27 = vcombine.low %v380_v1, %v372_v17 }
  0x4e   : > { %780 = vrot.lane.b32.xlu1 %v2014_v18, %s2217_s10  ;;  %v548_v18 = vrot.slane %v1983_v8, 1  ;;  %v681_v53 = vrot.slane %v679_v42, 1  ;;  %v388_v8 = vld [vmem:[#allocation2 + $0x20] sm:$0xf] }
  0x4f   : > { %v477_v10 = vor.u32 %v476_v19, %v472_v6  ;;  %v2011_v6 = vcombine.low %v383_v61, %v375_v30  ;;  %v396_v19 = vld [vmem:[#allocation2 + $0x24] sm:$0x1] }
  0x50   : > { %v682_v58 = vor.u32 %v681_v53, %v677_v31  ;;  %v2023_v14 = vcombine.low %v388_v8, %v396_v19 }
  0x51   : > { %874 = vrot.lane.b32.xlu0 %v824_v28, %s2218_s17  ;;  %v552_v28 = vrot.slane %v1987_v20, 1  ;;  %v736_v11 = vrot.slane %v2011_v6, 1  ;;  %v397_v20 = vld [vmem:[#allocation2 + $0x2c] sm:$0x1] }
  0x52   : > { %788 = vrot.lane.b32.xlu1 %v2018_v38, %s2217_s10  ;;  %v651_v38 = vshll.u32 %v1999_v29, 16  ;;  %v2015_v29 = vcombine.low %v388_v8, %v388_v8  ;;  %v835_v33 = vshll.u32 %v2023_v14, 16 }
  0x55   : > { %882 = vrot.lane.b32.xlu0 %v852_v36, %s2218_s17  ;;  %v653_v36 = vrot.slane %v651_v38, 1 }
  0x56   : > { %876 = vrot.lane.b32.xlu1 %v831_v51, %s2218_s17 }
  0x57   : > { %v654_v51 = vor.u32 %v653_v36, %v649_v47  ;;  %v393_v47 = vld [vmem:[#allocation2 + $0x48] sm:$0xf] }
  0x59   : > { %510 = vrot.lane.b32.xlu0 %v470_v60, %s2213_s19  ;;  %v2007_v60 = vcombine.low %v379_v52, %v371_v24  ;;  %v733_v24 = vrot.slane %v2008_v27, 1 }
  0x5a   : > { %884 = vrot.lane.b32.xlu1 %v859_v2, %s2218_s17 }
  0x5b   : > { %v732_v2 = vrot.slane %v2007_v60, 1 }
  0x5d   : > { %518 = vrot.lane.b32.xlu0 %v498_v7, %s2213_s19  ;;  %v404_v7 = vld [vmem:[#allocation2 + $0x20] sm:$0xe] }
  0x5e   : > { %512 = vrot.lane.b32.xlu1 %v477_v10, %s2213_s19  ;;  %v405_v10 = vld [vmem:[#allocation2 + $0x28] sm:$0xe]  ;;  %v2031_v15 = vcombine.low %v404_v7, %v396_v19 }
  0x5f   : > { %v2032_v4 = vcombine.low %v405_v10, %v397_v20 }
  0x60   : > { %v2549_v34 = vrot.slane %v2031_v15, 1 }
  0x61   : > { %558 = vrot.lane.b32.xlu0 %v548_v18, %s2212_s18  ;;  %v400_v18 = vld [vmem:[#allocation2 + $0x44] sm:$0x1]  ;;  %v2552_v22 = vrot.slane %v2032_v4, 1 }
  0x62   : > { %520 = vrot.lane.b32.xlu1 %v505_v25, %s2213_s19  ;;  %v2012_v25 = vcombine.low %v384_v9, %v2534_v45  ;;  %v2027_v30 = vcombine.low %v392_v12, %v400_v18  ;;  %v2035_v38 = vcombine.low %v408_v26, %v400_v18  ;;  %v833_v45 = vshrl.u32 %v2023_v14, 16 }
  0x64   : > { %v737_v16 = vrot.slane %v2012_v25, 1  ;;  %v863_v36 = vshll.u32 %v2027_v30, 16  ;;  %v861_v53 = vshrl.u32 %v2027_v30, 16 }
  0x65   : > { %566 = vrot.lane.b32.xlu0 %v552_v28, %s2212_s18  ;;  %v409_v28 = vld [vmem:[#allocation2 + $0x48] sm:$0xe] }
  0x66   : > { %560 = vrot.lane.b32.xlu1 %v549_v32, %s2212_s18  ;;  %v389_v32 = vld [vmem:[#allocation2 + $0x28] sm:$0xf]  ;;  %v865_v52 = vrot.slane %v863_v36, 1 }
  0x67   : > { %v2024_v17 = vcombine.low %v389_v32, %v397_v20  ;;  %v2016_v42 = vcombine.low %v389_v32, %v389_v32 }
  0x68   : > { %v866_v60 = vor.u32 %v865_v52, %v861_v53 }
  0x69   : > { %598 = vrot.lane.b32.xlu0 %v1991_v35, %s2214_s20  ;;  %v401_v35 = vld [vmem:[#allocation2 + $0x4c] sm:$0x1]  ;;  %v842_v40 = vshll.u32 %v2024_v17, 16  ;;  %v840_v55 = vshrl.u32 %v2024_v17, 16 }
  0x6a   : > { %568 = vrot.lane.b32.xlu1 %v553_v39, %s2212_s18  ;;  %v2036_v39 = vcombine.low %v409_v28, %v401_v35  ;;  %v2028_v48 = vcombine.low %v393_v47, %v401_v35 }
  0x6b   : > { %v844_v56 = vrot.slane %v842_v40, 1 }
  0x6c   : > { %v2558_v50 = vrot.slane %v2036_v39, 1  ;;  %v870_v57 = vshll.u32 %v2028_v48, 16 }
  0x6d   : > { %606 = vrot.lane.b32.xlu0 %v1995_v46, %s2214_s20  ;;  %v837_v46 = vrot.slane %v835_v33, 1  ;;  %v845_v61 = vor.u32 %v844_v56, %v840_v55 }
  0x6e   : > { %600 = vrot.lane.b32.xlu1 %v1992_v49, %s2214_s20  ;;  %v2556_v49 = vrot.slane %v2035_v38, 1  ;;  %v872_v59 = vrot.slane %v870_v57, 1 }
  0x6f   : > { %v838_v31 = vor.u32 %v837_v46, %v833_v45 }
  0x71   : > { %694 = vrot.lane.b32.xlu0 %v654_v51, %s2215_s27  ;;  %v2041_v51 = vcombine.low %v2549_v34, %v2552_v22 }
  0x72   : > { %608 = vrot.lane.b32.xlu1 %v1996_v54, %s2214_s20  ;;  %v2020_v54 = vcombine.low %v393_v47, %v393_v47  ;;  %s2094_s20 = sshll.u32 %s2748_s13, 3 }
  0x73   : > { %s2685_s13 = scalar_lea.vmem %s2742_s3, %s2094_s20 }
  0x75   : > { %702 = vrot.lane.b32.xlu0 %v682_v58, %s2215_s27  ;;  %v2045_v58 = vcombine.low %v2556_v49, %v2558_v50 }
  0x76   : > { %696 = vrot.lane.b32.xlu1 %v661_v62, %s2215_s27  ;;  %v868_v62 = vshrl.u32 %v2028_v48, 16 }
  0x78   : > { %v873_v1 = vor.u32 %v872_v59, %v868_v62 }
  0x79   : > { %742 = vrot.lane.b32.xlu0 %v732_v2, %s2216_s5 }
  0x7a   : > { %704 = vrot.lane.b32.xlu1 %v689_v0, %s2215_s27 }
  0x7d   : > { %750 = vrot.lane.b32.xlu0 %v736_v11, %s2216_s5 }
  0x7e   : > { %744 = vrot.lane.b32.xlu1 %v733_v24, %s2216_s5 }
  0x81   : > { %782 = vrot.lane.b32.xlu0 %v2015_v29, %s2217_s10 }
  0x82   : > { %752 = vrot.lane.b32.xlu1 %v737_v16, %s2216_s5 }
  0x85   : > { %790 = vrot.lane.b32.xlu0 %v2019_v44, %s2217_s10 }
  0x86   : > { %784 = vrot.lane.b32.xlu1 %v2016_v42, %s2217_s10 }
  0x89   : > { %878 = vrot.lane.b32.xlu0 %v838_v31, %s2218_s17 }
  0x8a   : > { %792 = vrot.lane.b32.xlu1 %v2020_v54, %s2217_s10 }
  0x8b   : > { %v555_v63 = vpop.permute.xlu0 %554 }
  0x8d   : > { %886 = vrot.lane.b32.xlu0 %v866_v60, %s2218_s17 }
  0x8e   : > { %880 = vrot.lane.b32.xlu1 %v845_v61, %s2218_s17 }
  0x90   : > { %v507_v2 = vpop.permute.xlu0 %506 }
  0x91   : > { %v925_v30 = vsel %vm922_vm6, %v2304_v5, %v507_v2 }
  0x92   : > { %888 = vrot.lane.b32.xlu1 %v873_v1, %s2218_s17  ;;  %v949_v35 = vsel %vm947_vm7, %v925_v30, %v555_v63 }
  0x98   : > { %v597_v6 = vpop.permute.xlu1 %596  ;;  %v595_v19 = vpop.permute.xlu0 %594 }
  0x9c   : > { %v605_v0 = vpop.permute.xlu1 %604 }
  0x9d   : > { %v603_v27 = vpop.permute.xlu0 %602 }
  0xa0   : > { %v557_v7 = vpop.permute.xlu1 %556 }
  0xa3   : > { %v563_v8 = vpop.permute.xlu0 %562 }
  0xa4   : > { %v565_v9 = vpop.permute.xlu1 %564 }
  0xa7   : > { %v509_v10 = vpop.permute.xlu0 %508 }
  0xa8   : > { %v515_v11 = vpop.permute.xlu1 %514  ;;  %v928_v32 = vsel %vm922_vm6, %v2355_v23, %v509_v10  ;;  %v966_v23 = vsel %vm964_vm8, %v949_v35, %v595_v19 }
  0xa9   : > { %v937_v17 = vsel %vm922_vm6, %v2371_v43, %v515_v11  ;;  %v951_v16 = vsel %vm947_vm7, %v928_v32, %v557_v7 }
  0xaa   : > { %v957_v5 = vsel %vm947_vm7, %v937_v17, %v563_v8  ;;  %v968_v45 = vsel %vm964_vm8, %v951_v16, %v597_v6 }
  0xab   : > { %v691_v14 = vpop.permute.xlu0 %690  ;;  %v974_v42 = vsel %vm964_vm8, %v957_v5, %v603_v27 }
  0xac   : > { %v517_v15 = vpop.permute.xlu1 %516  ;;  %v983_v43 = vsel %vm981_vm9, %v966_v23, %v691_v14 }
  0xad   : > { %v940_v39 = vsel %vm922_vm6, %v2368_v37, %v517_v15 }
  0xae   : > { %v959_v46 = vsel %vm947_vm7, %v940_v39, %v565_v9 }
  0xaf   : > { %v699_v18 = vpop.permute.xlu0 %698  ;;  %v976_v52 = vsel %vm964_vm8, %v959_v46, %v605_v0 }
  0xb0   : > { %v693_v20 = vpop.permute.xlu1 %692  ;;  %v991_v56 = vsel %vm981_vm9, %v974_v42, %v699_v18 }
  0xb1   : > { %v985_v47 = vsel %vm981_vm9, %v968_v45, %v693_v20 }
  0xb3   : > { %v739_v24 = vpop.permute.xlu0 %738 }
  0xb4   : > { %v701_v25 = vpop.permute.xlu1 %700  ;;  %v1000_v37 = vsel %vm998_vm10, %v983_v43, %v739_v24 }
  0xb5   : > { %v993_v57 = vsel %vm981_vm9, %v976_v52, %v701_v25 }
  0xb7   : > { %v747_v4 = vpop.permute.xlu0 %746 }
  0xb8   : > { %v741_v12 = vpop.permute.xlu1 %740  ;;  %v1008_v62 = vsel %vm998_vm10, %v991_v56, %v747_v4 }
  0xb9   : > { %v1002_v48 = vsel %vm998_vm10, %v985_v47, %v741_v12 }
  0xbb   : > { %v779_v26 = vpop.permute.xlu0 %778 }
  0xbc   : > { %v749_v28 = vpop.permute.xlu1 %748  ;;  %v1017_v40 = vsel %vm1015_vm11, %v1000_v37, %v779_v26 }
  0xbd   : > { %v1010_v59 = vsel %vm998_vm10, %v993_v57, %v749_v28 }
  0xbf   : > { %v787_v29 = vpop.permute.xlu0 %786 }
  0xc0   : > { %v781_v33 = vpop.permute.xlu1 %780  ;;  %v1025_v63 = vsel %vm1015_vm11, %v1008_v62, %v787_v29 }
  0xc1   : > { %v1019_v31 = vsel %vm1015_vm11, %v1002_v48, %v781_v33 }
  0xc3   : > { %v875_v38 = vpop.permute.xlu0 %874 }
  0xc4   : > { %v789_v44 = vpop.permute.xlu1 %788  ;;  %v1034_v54 = vsel %vm1032_vm12, %v1017_v40, %v875_v38 }
  0xc5   : > { %v1027_v1 = vsel %vm1015_vm11, %v1010_v59, %v789_v44  ;;  %v2219_v59 = vmov 1983009808  }
  0xc7   : > { %v883_v36 = vpop.permute.xlu0 %882 }
  0xc8   : > { %v877_v53 = vpop.permute.xlu1 %876  ;;  %v1042_v6 = vsel %vm1032_vm12, %v1025_v63, %v883_v36  ;;  %v1259_v63 = vunpack.c.l.s4 %v2219_v59 }
  0xc9   : > { %v1036_v55 = vsel %vm1032_vm12, %v1019_v31, %v877_v53 }
  0xca   : > { %v2038_v60 = vcombine.low %v1034_v54, %v1036_v55 }
  0xcb   : > { %v511_v61 = vpop.permute.xlu0 %510 }
  0xcc   : > { %v885_v2 = vpop.permute.xlu1 %884  ;;  %1209 = vmatmul.mubr.bf16.vlgmr.msra.gmra.mxu0 %v2038_v60  ;;  %v931_v29 = vsel %vm922_vm6, %v2451_v3, %v511_v61 }
  0xcd   : > { %v1044_v19 = vsel %vm1032_vm12, %v1027_v1, %v885_v2  ;;  %2056 = vmatprep.mubr.msk.bf16.mxu0 %vm922_vm6, %v2041_v51  ;;  %v1261_v1 = vlaneseq  ;;  %v1260_v2 = vunpack.c.0.s8 %v1259_v63 }
  0xce   : > { %v2042_v0 = vcombine.low %v1042_v6, %v1044_v19  ;;  %v2646_v19 = vld [vmem:[%s2741_s2] ss:$0 sm:$0xff] }
  0xcf   : > { %v519_v27 = vpop.permute.xlu0 %518  ;;  %v1262_v6 = vshrl.u32 %v1261_v1, 7 }
  0xd0   : > { %v513_v7 = vpop.permute.xlu1 %512  ;;  %1225 = vmatmul.mubr.bf16.vlgmr.msra.gmra.mxu1 %v2042_v0  ;;  %v943_v16 = vsel %vm922_vm6, %v2469_v13, %v519_v27 }
  0xd1   : > { %2058 = vmatprep.mubr.msk.bf16.mxu1 %vm922_vm6, %v2045_v58  ;;  %v934_v30 = vsel %vm922_vm6, %v2479_v21, %v513_v7  ;;  %v2649_v7 = vsub.s32 %v1260_v2, %v1262_v6 }
  0xd3   : > { %v559_v8 = vpop.permute.xlu0 %558 }
  0xd4   : > { %v521_v9 = vpop.permute.xlu1 %520  ;;  %v953_v32 = vsel %vm947_vm7, %v931_v29, %v559_v8 }
  0xd5   : > { %v946_v21 = vsel %vm922_vm6, %v2498_v41, %v521_v9 }
  0xd7   : > { %v567_v10 = vpop.permute.xlu0 %566 }
  0xd8   : > { %v561_v11 = vpop.permute.xlu1 %560  ;;  %v961_v45 = vsel %vm947_vm7, %v943_v16, %v567_v10 }
  0xd9   : > { %v955_v33 = vsel %vm947_vm7, %v934_v30, %v561_v11 }
  0xdb   : > { %v599_v14 = vpop.permute.xlu0 %598 }
  0xdc   : > { %v569_v15 = vpop.permute.xlu1 %568  ;;  %v970_v38 = vsel %vm964_vm8, %v953_v32, %v599_v14 }
  0xdd   : > { %v963_v43 = vsel %vm947_vm7, %v946_v21, %v569_v15 }
  0xdf   : > { %v607_v18 = vpop.permute.xlu0 %606 }
  0xe0   : > { %v601_v20 = vpop.permute.xlu1 %600  ;;  %v978_v36 = vsel %vm964_vm8, %v961_v45, %v607_v18 }
  0xe1   : > { %v972_v39 = vsel %vm964_vm8, %v955_v33, %v601_v20 }
  0xe3   : > { %v695_v34 = vpop.permute.xlu0 %694 }
  0xe4   : > { %v609_v22 = vpop.permute.xlu1 %608  ;;  %v987_v5 = vsel %vm981_vm9, %v970_v38, %v695_v34 }
  0xe5   : > { %v980_v42 = vsel %vm964_vm8, %v963_v43, %v609_v22 }
  0xe7   : > { %v703_v51 = vpop.permute.xlu0 %702 }
  0xe8   : > { %v697_v24 = vpop.permute.xlu1 %696  ;;  %v995_v48 = vsel %vm981_vm9, %v978_v36, %v703_v51 }
  0xe9   : > { %v989_v3 = vsel %vm981_vm9, %v972_v39, %v697_v24 }
  0xeb   : > { %v743_v25 = vpop.permute.xlu0 %742 }
  0xec   : > { %v705_v4 = vpop.permute.xlu1 %704  ;;  %v1004_v44 = vsel %vm998_vm10, %v987_v5, %v743_v25 }
  0xed   : > { %v997_v40 = vsel %vm981_vm9, %v980_v42, %v705_v4 }
  0xef   : > { %v751_v12 = vpop.permute.xlu0 %750 }
  0xf0   : > { %v745_v26 = vpop.permute.xlu1 %744  ;;  %v1012_v52 = vsel %vm998_vm10, %v995_v48, %v751_v12 }
  0xf1   : > { %v1006_v23 = vsel %vm998_vm10, %v989_v3, %v745_v26 }
  0xf3   : > { %v783_v28 = vpop.permute.xlu0 %782 }
  0xf4   : > { %v753_v49 = vpop.permute.xlu1 %752  ;;  %v1021_v13 = vsel %vm1015_vm11, %v1004_v44, %v783_v28 }
  0xf5   : > { %v1014_v54 = vsel %vm998_vm10, %v997_v40, %v753_v49 }
  0xf7   : > { %v791_v50 = vpop.permute.xlu0 %790 }
  0xf8   : > { %v785_v58 = vpop.permute.xlu1 %784  ;;  %v1029_v55 = vsel %vm1015_vm11, %v1012_v52, %v791_v50 }
  0xf9   : > { %v1023_v46 = vsel %vm1015_vm11, %v1006_v23, %v785_v58 }
  0xfb   : > { %v879_v17 = vpop.permute.xlu0 %878 }
  0xfc   : > { %v793_v35 = vpop.permute.xlu1 %792  ;;  %v1038_v37 = vsel %vm1032_vm12, %v1021_v13, %v879_v17 }
  0xfd   : > { %v1031_v56 = vsel %vm1015_vm11, %v1014_v54, %v793_v35 }
  0xff   : > { %v887_v31 = vpop.permute.xlu0 %886 }
 0x100   : > { %v881_v47 = vpop.permute.xlu1 %880  ;;  %v1046_v60 = vsel %vm1032_vm12, %v1029_v55, %v887_v31 }
 0x101   : > { %v1040_v41 = vsel %vm1032_vm12, %v1023_v46, %v881_v47 }
 0x102   : > { %v2040_v53 = vcombine.low %v1038_v37, %v1040_v41 }
 0x104   : > { %v889_v57 = vpop.permute.xlu1 %888  ;;  %1217 = vmatmul.mubr.bf16.gmra.mxu0 %v2040_v53 }
 0x105   : > { %v1048_v61 = vsel %vm1032_vm12, %v1031_v56, %v889_v57 }
 0x106   : > { %v2044_v62 = vcombine.low %v1046_v60, %v1048_v61 }
 0x108   : > { %1233 = vmatmul.mubr.bf16.gmra.mxu1 %v2044_v62 }
 0x18c   : > { %v1210_v0 = vpop.f32.mrf.mxu0 }
 0x18d   : > { %v1211_v27 = vadd.f32 %v2646_v19, %v1210_v0 }
 0x18e   : > { %v1212_v8 = vpop.f32.mrf.mxu0 }
 0x18f   : > { %v1241_v9 = vmax.f32 %v1211_v27, 0.0 }
 0x190   : > { %v1213_v10 = vpop.f32.mrf.mxu0  ;;  %v1226_v11 = vpop.f32.mrf.mxu1 }
 0x191   : > { %v1257_v14 = vcombine.high %v1241_v9, %v1241_v9  ;;  %v1264_v15 = vrot.slane %v1241_v9, %v2649_v7  ;;  %v1214_v18 = vadd.f32 %v2646_v19, %v1213_v10  ;;  %v1227_v20 = vadd.f32 %v2646_v19, %v1226_v11 }
 0x192   : > { %v1215_v34 = vpop.f32.mrf.mxu0  ;;  %v1228_v22 = vpop.f32.mrf.mxu1 }
 0x193   : > { %v1271_v51 = vrot.slane %v1257_v14, %v2649_v7  ;;  %v1272_v24 = vcombine.high %v1264_v15, %v1264_v15  ;;  %v2059_v25 = vrot.slane %v1264_v15, 9  ;;  %v1242_v4 = vmax.f32 %v1214_v18, 0.0 }
 0x194   : > { %v1245_v12 = vmax.f32 %v1227_v20, 0.0  ;;  %v1229_v26 = vpop.f32.mrf.mxu1 }
 0x195   : > { %v1273_v28 = vcombine.high %v1271_v51, %v1271_v51  ;;  %v2060_v49 = vrot.slane %v1272_v24, 9  ;;  %v1274_v50 = vcombine.high %v1242_v4, %v1242_v4  ;;  %v1281_v58 = vrot.slane %v1242_v4, %v2649_v7 }
 0x196   : > { %v1325_v29 = vcombine.high %v1245_v12, %v1245_v12  ;;  %v1332_v30 = vrot.slane %v1245_v12, %v2649_v7  ;;  %v1231_v32 = vpop.f32.mrf.mxu1  ;;  %v2061_v33 = vrot.slane %v1271_v51, 9  ;;  %v1521_v35 = vmax.f32 %v1264_v15, %v2059_v25 }
 0x197   : > { %v2062_v17 = vrot.slane %v1273_v28, 9  ;;  %v1230_v16 = vadd.f32 %v2646_v19, %v1229_v26  ;;  %v1288_v38 = vrot.slane %v1274_v50, %v2649_v7  ;;  %v1289_v39 = vcombine.high %v1281_v58, %v1281_v58 }
 0x198   : > { %v2063_v5 = vrot.slane %v1281_v58, 9  ;;  %v1339_v3 = vrot.slane %v1325_v29, %v2649_v7  ;;  %v1522_v21 = vmax.f32 %v1272_v24, %v2060_v49  ;;  %v1340_v44 = vcombine.high %v1332_v30, %v1332_v30 }
 0x199   : > { %v2075_v23 = vrot.slane %v1332_v30, 9  ;;  %v1246_v45 = vmax.f32 %v1230_v16, 0.0  ;;  %v1290_v43 = vcombine.high %v1288_v38, %v1288_v38  ;;  %v2064_v13 = vrot.slane %v1289_v39, 9 }
 0x19a   : > { %v2065_v46 = vrot.slane %v1288_v38, 9  ;;  %v1525_v47 = vmax.f32 %v1281_v58, %v2063_v5  ;;  %v1523_v36 = vmax.f32 %v1271_v51, %v2061_v33  ;;  %v1341_v42 = vcombine.high %v1339_v3, %v1339_v3 }
 0x19b   : > { %v2076_v37 = vrot.slane %v1340_v44, 9  ;;  %v2077_v41 = vrot.slane %v1339_v3, 9  ;;  %v2066_v48 = vrot.slane %v1290_v43, 9  ;;  %v1526_v40 = vmax.f32 %v1289_v39, %v2064_v13 }
 0x19c   : > { %v1527_v31 = vmax.f32 %v1288_v38, %v2065_v46  ;;  %v1553_v53 = vmax.f32 %v1521_v35, %v1525_v47  ;;  %v1524_v52 = vmax.f32 %v1273_v28, %v2062_v17  ;;  %v2078_v54 = vrot.slane %v1341_v42, 9 }
 0x19d   : > { %v1537_v55 = vmax.f32 %v1332_v30, %v2075_v23  ;;  %v1342_v56 = vcombine.high %v1246_v45, %v1246_v45  ;;  %v1528_v57 = vmax.f32 %v1290_v43, %v2066_v48  ;;  %v1554_v60 = vmax.f32 %v1522_v21, %v1526_v40 }
 0x19e   : > { %v1555_v61 = vmax.f32 %v1523_v36, %v1527_v31  ;;  %v1569_v62 = vpack.c.bf16 %v1553_v53, %v1553_v53  ;;  %v1538_v59 = vmax.f32 %v1340_v44, %v2076_v37  ;;  %v1539_v63 = vmax.f32 %v1339_v3, %v2077_v41 }
 0x19f   : > { %v1349_v1 = vrot.slane %v1246_v45, %v2649_v7  ;;  %v1356_v2 = vrot.slane %v1342_v56, %v2649_v7  ;;  %v1556_v6 = vmax.f32 %v1524_v52, %v1528_v57  ;;  %v1570_v0 = vpack.c.bf16 %v1554_v60, %v1554_v60 }
 0x1a0   : > { %v1571_v27 = vpack.c.bf16 %v1555_v61, %v1555_v61  ;;  %v1607_v8 = vrot.slane %v1569_v62, %v2649_v7  ;;  %v1540_v34 = vmax.f32 %v1341_v42, %v2078_v54 }
 0x1a1   : > { %v1357_v9 = vcombine.high %v1349_v1, %v1349_v1  ;;  %v1358_v10 = vcombine.high %v1356_v2, %v1356_v2  ;;  %v2079_v11 = vrot.slane %v1349_v1, 9  ;;  %v2081_v14 = vrot.slane %v1356_v2, 9 }
 0x1a2   : > { %v1572_v15 = vpack.c.bf16 %v1556_v6, %v1556_v6  ;;  %v1614_v18 = vrot.slane %v1570_v0, %v2649_v7  ;;  %v1621_v20 = vrot.slane %v1571_v27, %v2649_v7  ;;  %v1719_v12 = vrot.slane %v1607_v8, %v2649_v7 }
 0x1a3   : > { %v2080_v22 = vrot.slane %v1357_v9, 9  ;;  %v2082_v51 = vrot.slane %v1358_v10, 9  ;;  %v1541_v24 = vmax.f32 %v1349_v1, %v2079_v11  ;;  %v1543_v25 = vmax.f32 %v1356_v2, %v2081_v14 }
 0x1a4   : > { %v1628_v4 = vrot.slane %v1572_v15, %v2649_v7  ;;  %v1726_v26 = vrot.slane %v1614_v18, %v2649_v7  ;;  %v1733_v28 = vrot.slane %v1621_v20, %v2649_v7  ;;  %v1825_v39 = vunpack.c.l.b16 %v1719_v12 }
 0x1a5   : > { %v1542_v49 = vmax.f32 %v1357_v9, %v2080_v22  ;;  %v1544_v50 = vmax.f32 %v1358_v10, %v2082_v51  ;;  %v1561_v58 = vmax.f32 %v1537_v55, %v1541_v24  ;;  %v1563_v29 = vmax.f32 %v1539_v63, %v1543_v25 }
 0x1a6   : > { %v1740_v30 = vrot.slane %v1628_v4, %v2649_v7  ;;  %v1826_v32 = vunpack.c.l.b16 %v1726_v26  ;;  %v1827_v33 = vunpack.c.l.b16 %v1733_v28 }
 0x1a7   : > { %v1562_v17 = vmax.f32 %v1538_v59, %v1542_v49  ;;  %v1564_v35 = vmax.f32 %v1540_v34, %v1544_v50  ;;  %v1577_v16 = vpack.c.bf16 %v1561_v58, %v1561_v58  ;;  %v1579_v38 = vpack.c.bf16 %v1563_v29, %v1563_v29 }
 0x1a8   : > { %v1828_v5 = vunpack.c.l.b16 %v1740_v30  ;;  %v1841_v3 = vrot.slane %v1826_v32, 7  ;;  %v1844_v21 = vrot.slane %v1827_v33, 6 }
 0x1a9   : > { %v1578_v44 = vpack.c.bf16 %v1562_v17, %v1562_v17  ;;  %v1580_v23 = vpack.c.bf16 %v1564_v35, %v1564_v35  ;;  %v1663_v45 = vrot.slane %v1577_v16, %v2649_v7  ;;  %v1677_v43 = vrot.slane %v1579_v38, %v2649_v7 }
 0x1aa   : > { %v1843_v13 = vsel %vm1842_vm13, %v1841_v3, %v1825_v39  ;;  %v1847_v46 = vrot.slane %v1828_v5, 5 }
 0x1ab   : > { %v1846_v47 = vsel %vm1845_vm14, %v1844_v21, %v1843_v13  ;;  %v1670_v36 = vrot.slane %v1578_v44, %v2649_v7  ;;  %v1684_v42 = vrot.slane %v1580_v23, %v2649_v7  ;;  %v1789_v41 = vrot.slane %v1677_v43, %v2649_v7 }
 0x1ac   : > { %v1849_v37 = vsel %vm1848_vm15, %v1847_v46, %v1846_v47  ;;  %v1775_v40 = vrot.slane %v1663_v45, %v2649_v7 }
 0x1ad   : > { %v1868_v48 = vpack.c.b16 %v1849_v37, %v1849_v37  ;;  %v1782_v31 = vrot.slane %v1670_v36, %v2649_v7  ;;  %v1796_v53 = vrot.slane %v1684_v42, %v2649_v7  ;;  %v1835_v52 = vunpack.c.l.b16 %v1789_v41 }
 0x1ae   : > { %v1833_v60 = vunpack.c.l.b16 %v1775_v40 }
 0x1af   : > { %v1878_v54 = vrot.slane %v1868_v48, %v2649_v7  ;;  %v1834_v55 = vunpack.c.l.b16 %v1782_v31  ;;  %v1836_v56 = vunpack.c.l.b16 %v1796_v53  ;;  %v1858_v57 = vrot.slane %v1835_v52, 6 }
 0x1b1   : > { %1905 = vst.msk [vmem:[%s2685_s13] sm:$0x3] %vm1904_vm0, %v1878_v54  ;;  %v1856_v61 = vrot.slane %v1834_v55, 7  ;;  %v1860_v62 = vrot.slane %v1836_v56, 5 }
 0x1b3   : > { %v1857_v59 = vsel %vm1842_vm13, %v1856_v61, %v1833_v60 }
 0x1b4   : > { %v1859_v63 = vsel %vm1845_vm14, %v1858_v57, %v1857_v59 }
 0x1b5   : > { %v1861_v1 = vsel %vm1848_vm15, %v1860_v62, %v1859_v63 }
 0x1b6   : > { %v1870_v2 = vpack.c.b16 %v1861_v1, %v1861_v1 }
 0x1b8   : > { %v1892_v6 = vrot.slane %v1870_v2, %v2649_v7 }
 0x1ba   : > { %1907 = vst.msk [vmem:[%s2685_s13 + $0x4] sm:$0x3] %vm1904_vm0, %v1892_v6 }
 0x1c4   : > { %v1218_v0 = vpop.f32.mrf.mxu0 }
 0x1c5   : > { %v1219_v27 = vadd.f32 %v2646_v19, %v1218_v0 }
 0x1c6   : > { %v1220_v8 = vpop.f32.mrf.mxu0 }
 0x1c7   : > { %v1243_v9 = vmax.f32 %v1219_v27, 0.0 }
 0x1c8   : > { %v1221_v10 = vpop.f32.mrf.mxu0  ;;  %v1234_v11 = vpop.f32.mrf.mxu1 }
 0x1c9   : > { %v1291_v14 = vcombine.high %v1243_v9, %v1243_v9  ;;  %v1298_v15 = vrot.slane %v1243_v9, %v2649_v7  ;;  %v1222_v18 = vadd.f32 %v2646_v19, %v1221_v10  ;;  %v1235_v20 = vadd.f32 %v2646_v19, %v1234_v11 }
 0x1ca   : > { %v1223_v34 = vpop.f32.mrf.mxu0  ;;  %v1236_v22 = vpop.f32.mrf.mxu1 }
 0x1cb   : > { %v1305_v51 = vrot.slane %v1291_v14, %v2649_v7  ;;  %v1306_v24 = vcombine.high %v1298_v15, %v1298_v15  ;;  %v2067_v25 = vrot.slane %v1298_v15, 9  ;;  %v1244_v4 = vmax.f32 %v1222_v18, 0.0 }
 0x1cc   : > { %v1247_v12 = vmax.f32 %v1235_v20, 0.0  ;;  %v1237_v26 = vpop.f32.mrf.mxu1 }
 0x1cd   : > { %v1307_v28 = vcombine.high %v1305_v51, %v1305_v51  ;;  %v2068_v49 = vrot.slane %v1306_v24, 9  ;;  %v1308_v50 = vcombine.high %v1244_v4, %v1244_v4  ;;  %v1315_v58 = vrot.slane %v1244_v4, %v2649_v7 }
 0x1ce   : > { %v1359_v29 = vcombine.high %v1247_v12, %v1247_v12  ;;  %v1366_v30 = vrot.slane %v1247_v12, %v2649_v7  ;;  %v1239_v32 = vpop.f32.mrf.mxu1  ;;  %v2069_v33 = vrot.slane %v1305_v51, 9  ;;  %v1529_v35 = vmax.f32 %v1298_v15, %v2067_v25 }
 0x1cf   : > { %v2070_v17 = vrot.slane %v1307_v28, 9  ;;  %v1238_v16 = vadd.f32 %v2646_v19, %v1237_v26  ;;  %v1322_v38 = vrot.slane %v1308_v50, %v2649_v7  ;;  %v1323_v39 = vcombine.high %v1315_v58, %v1315_v58 }
 0x1d0   : > { %v2071_v5 = vrot.slane %v1315_v58, 9  ;;  %v1373_v3 = vrot.slane %v1359_v29, %v2649_v7  ;;  %v1530_v21 = vmax.f32 %v1306_v24, %v2068_v49  ;;  %v1374_v44 = vcombine.high %v1366_v30, %v1366_v30 }
 0x1d1   : > { %v2083_v23 = vrot.slane %v1366_v30, 9  ;;  %v1248_v45 = vmax.f32 %v1238_v16, 0.0  ;;  %v1324_v43 = vcombine.high %v1322_v38, %v1322_v38  ;;  %v2072_v13 = vrot.slane %v1323_v39, 9 }
 0x1d2   : > { %v2073_v46 = vrot.slane %v1322_v38, 9  ;;  %v1533_v47 = vmax.f32 %v1315_v58, %v2071_v5  ;;  %v1531_v36 = vmax.f32 %v1305_v51, %v2069_v33  ;;  %v1375_v42 = vcombine.high %v1373_v3, %v1373_v3 }
 0x1d3   : > { %v2084_v37 = vrot.slane %v1374_v44, 9  ;;  %v2085_v41 = vrot.slane %v1373_v3, 9  ;;  %v2074_v48 = vrot.slane %v1324_v43, 9  ;;  %v1534_v19 = vmax.f32 %v1323_v39, %v2072_v13 }
 0x1d4   : > { %v1535_v40 = vmax.f32 %v1322_v38, %v2073_v46  ;;  %v1557_v31 = vmax.f32 %v1529_v35, %v1533_v47  ;;  %v1532_v53 = vmax.f32 %v1307_v28, %v2070_v17  ;;  %v2086_v52 = vrot.slane %v1375_v42, 9 }
 0x1d5   : > { %v1545_v54 = vmax.f32 %v1366_v30, %v2083_v23  ;;  %v1376_v55 = vcombine.high %v1248_v45, %v1248_v45  ;;  %v1536_v56 = vmax.f32 %v1324_v43, %v2074_v48  ;;  %v1558_v57 = vmax.f32 %v1530_v21, %v1534_v19 }
 0x1d6   : > { %v1559_v60 = vmax.f32 %v1531_v36, %v1535_v40  ;;  %v1573_v61 = vpack.c.bf16 %v1557_v31, %v1557_v31  ;;  %v1546_v62 = vmax.f32 %v1374_v44, %v2084_v37  ;;  %v1547_v59 = vmax.f32 %v1373_v3, %v2085_v41 }
 0x1d7   : > { %v1383_v63 = vrot.slane %v1248_v45, %v2649_v7  ;;  %v1390_v1 = vrot.slane %v1376_v55, %v2649_v7  ;;  %v1560_v2 = vmax.f32 %v1532_v53, %v1536_v56  ;;  %v1574_v6 = vpack.c.bf16 %v1558_v57, %v1558_v57 }
 0x1d8   : > { %v1575_v0 = vpack.c.bf16 %v1559_v60, %v1559_v60  ;;  %v1635_v27 = vrot.slane %v1573_v61, %v2649_v7  ;;  %v1548_v20 = vmax.f32 %v1375_v42, %v2086_v52 }
 0x1d9   : > { %v1391_v8 = vcombine.high %v1383_v63, %v1383_v63  ;;  %v1392_v9 = vcombine.high %v1390_v1, %v1390_v1  ;;  %v2087_v10 = vrot.slane %v1383_v63, 9  ;;  %v2089_v11 = vrot.slane %v1390_v1, 9 }
 0x1da   : > { %v1576_v14 = vpack.c.bf16 %v1560_v2, %v1560_v2  ;;  %v1642_v15 = vrot.slane %v1574_v6, %v2649_v7  ;;  %v1649_v18 = vrot.slane %v1575_v0, %v2649_v7  ;;  %v1747_v4 = vrot.slane %v1635_v27, %v2649_v7 }
 0x1db   : > { %v2088_v34 = vrot.slane %v1391_v8, 9  ;;  %v2090_v22 = vrot.slane %v1392_v9, 9  ;;  %v1549_v51 = vmax.f32 %v1383_v63, %v2087_v10  ;;  %v1551_v24 = vmax.f32 %v1390_v1, %v2089_v11 }
 0x1dc   : > { %v1656_v25 = vrot.slane %v1576_v14, %v2649_v7  ;;  %v1754_v12 = vrot.slane %v1642_v15, %v2649_v7  ;;  %v1761_v26 = vrot.slane %v1649_v18, %v2649_v7  ;;  %v1829_v38 = vunpack.c.l.b16 %v1747_v4 }
 0x1dd   : > { %v1550_v28 = vmax.f32 %v1391_v8, %v2088_v34  ;;  %v1552_v49 = vmax.f32 %v1392_v9, %v2090_v22  ;;  %v1565_v50 = vmax.f32 %v1545_v54, %v1549_v51  ;;  %v1567_v58 = vmax.f32 %v1547_v59, %v1551_v24 }
 0x1de   : > { %v1768_v29 = vrot.slane %v1656_v25, %v2649_v7  ;;  %v1830_v30 = vunpack.c.l.b16 %v1754_v12  ;;  %v1831_v32 = vunpack.c.l.b16 %v1761_v26 }
 0x1df   : > { %v1566_v33 = vmax.f32 %v1546_v62, %v1550_v28  ;;  %v1568_v17 = vmax.f32 %v1548_v20, %v1552_v49  ;;  %v1581_v35 = vpack.c.bf16 %v1565_v50, %v1565_v50  ;;  %v1583_v16 = vpack.c.bf16 %v1567_v58, %v1567_v58 }
 0x1e0   : > { %v1832_v39 = vunpack.c.l.b16 %v1768_v29  ;;  %v1850_v5 = vrot.slane %v1830_v30, 7  ;;  %v1852_v3 = vrot.slane %v1831_v32, 6 }
 0x1e1   : > { %v1582_v21 = vpack.c.bf16 %v1566_v33, %v1566_v33  ;;  %v1584_v44 = vpack.c.bf16 %v1568_v17, %v1568_v17  ;;  %v1691_v23 = vrot.slane %v1581_v35, %v2649_v7  ;;  %v1705_v45 = vrot.slane %v1583_v16, %v2649_v7 }
 0x1e2   : > { %v1851_v43 = vsel %vm1842_vm13, %v1850_v5, %v1829_v38  ;;  %v1854_v13 = vrot.slane %v1832_v39, 5 }
 0x1e3   : > { %v1853_v46 = vsel %vm1845_vm14, %v1852_v3, %v1851_v43  ;;  %v1698_v47 = vrot.slane %v1582_v21, %v2649_v7  ;;  %v1712_v36 = vrot.slane %v1584_v44, %v2649_v7  ;;  %v1817_v37 = vrot.slane %v1705_v45, %v2649_v7 }
 0x1e4   : > { %v1855_v42 = vsel %vm1848_vm15, %v1854_v13, %v1853_v46  ;;  %v1803_v48 = vrot.slane %v1691_v23, %v2649_v7 }
 0x1e5   : > { %v1869_v41 = vpack.c.b16 %v1855_v42, %v1855_v42  ;;  %v1810_v19 = vrot.slane %v1698_v47, %v2649_v7  ;;  %v1824_v40 = vrot.slane %v1712_v36, %v2649_v7  ;;  %v1839_v31 = vunpack.c.l.b16 %v1817_v37 }
 0x1e6   : > { %v1837_v56 = vunpack.c.l.b16 %v1803_v48 }
 0x1e7   : > { %v1885_v53 = vrot.slane %v1869_v41, %v2649_v7  ;;  %v1838_v52 = vunpack.c.l.b16 %v1810_v19  ;;  %v1840_v54 = vunpack.c.l.b16 %v1824_v40  ;;  %v1864_v55 = vrot.slane %v1839_v31, 6 }
 0x1e9   : > { %1906 = vst.msk [vmem:[%s2685_s13 + $0x2] sm:$0x3] %vm1904_vm0, %v1885_v53  ;;  %v1862_v57 = vrot.slane %v1838_v52, 7  ;;  %v1866_v60 = vrot.slane %v1840_v54, 5 }
 0x1eb   : > { %v1863_v61 = vsel %vm1842_vm13, %v1862_v57, %v1837_v56 }
 0x1ec   : > { %v1865_v62 = vsel %vm1845_vm14, %v1864_v55, %v1863_v61 }
 0x1ed   : > { %v1867_v59 = vsel %vm1848_vm15, %v1866_v60, %v1865_v62 }
 0x1ee   : > { %v1871_v63 = vpack.c.b16 %v1867_v59, %v1867_v59 }
 0x1f0   : > { %v1899_v1 = vrot.slane %v1871_v63, %v2649_v7 }
 0x1f2   : > { %1908 = vst.msk [vmem:[%s2685_s13 + $0x6] sm:$0x3] %vm1904_vm0, %v1899_v1 }
 0x1f3 PF: > { %s13_s12 = sadd.s32 1, %s2209_s12  }
 0x1f4   : > { %p10_p4 = scmp.ge.s32.totalorder %s13_s12, 10  }
 0x1f6   :  { %12 = sbr.rel (!%p10_p4) target bundleno = 1 (0x1), region = 64 }

// kernel: drowsiness_cnn_lstm.11
= control target key start
LH: loop header
LB: loop body
LE: loop exit
PB: predicated region body
PF: predicated region fallthrough
CT: control target
= control target key end

     0   :  { %v214_v1 = vmov 0   ;;  %s272_s0 = inlined_call_operand.vmem [shape: f32[2,132], index: 0, kind: input, shape index: {}]   ;;  %s273_s1 = inlined_call_operand.vmem [shape: bf16[132,3], index: 1, kind: input, shape index: {}]   ;;  %s274_s2 = inlined_call_operand.vmem [shape: f32[1,3], index: 2, kind: input, shape index: {}]   ;;  %s275_s3 = inlined_call_operand.hbm [shape: f32[2,3], index: 3, kind: output, shape index: {}]  }
   0x1   :  { %v183_v0 = vld [vmem:[%s273_s1 + $0x38] sm:$0xff]   ;;  %113 = vmatprep.subr.bf16.mxu0 %v214_v1  ;;  %v184_v2 = vld [vmem:[%s273_s1 + $0x30] sm:$0xff]   ;;  %v185_v3 = vld [vmem:[%s273_s1 + $0x28] sm:$0xff]  }
   0x2   :  { %114 = vmatpush1.bf16.msra.mxu0 %v183_v0  ;;  %v169_v4 = vld.sshfl [vmem:[%s272_s0] sm:$0x33 pattern:$0x76325410] }
   0x3   :  { %115 = vmatprep.subr.bf16.mxu0 %v214_v1  ;;  %v186_v5 = vld [vmem:[%s273_s1 + $0x20] sm:$0xff]   ;;  %v25_v6 = vcombine.high %v169_v4, %v169_v4 }
   0x6   :  { %116 = vmatpush1.bf16.msra.mxu0 %v184_v2 }
   0x7   :  { %117 = vmatprep.subr.bf16.mxu0 %v214_v1 }
   0xa   :  { %118 = vmatpush1.bf16.msra.mxu0 %v185_v3 }
   0xb   :  { %8 = vsyncpa [#allocation3], 0  ;;  %119 = vmatprep.subr.bf16.mxu0 %v214_v1  ;;  %vm105_vm0 = vcmask 31744   ;;  %v29_v7 = vpack.c.bf16 %v25_v6, %v25_v6  ;;  %v187_v8 = vld [vmem:[%s273_s1 + $0x18] sm:$0xff]   ;;  %v188_v9 = vld [vmem:[%s273_s1 + $0x10] sm:$0xff]   ;;  %vm109_vm1 = vcmask 1041408   ;;  %v28_v14 = vpack.c.bf16 %v169_v4, %v169_v4 }
   0xc   :  { %v189_v10 = vld [vmem:[%s273_s1 + $0x8] sm:$0xff]   ;;  %v190_v11 = vld [vmem:[%s273_s1] sm:$0xff]   ;;  %s215_s6 = smov [#allocation2]   ;;  %vm153_vm2 = vcmask 17408  }
   0xd   :  { %180 = vmatprep.mubr.msk.bf16.mxu0 %vm105_vm0, %v29_v7  ;;  %v191_v12 = vld [vmem:[%s273_s1 + $0x40] ss:$0 sps:$4 sm:$0x33]   ;;  %s161_s7 = sshll.u32 %s215_s6, 4  ;;  %s162_s7 = int_to_ptr.vmem [resolvable:$true] %s161_s7 }
   0xe   :  { %120 = vmatpush1.bf16.msra.mxu0 %v186_v5  ;;  %v111_v13 = vsel %vm109_vm1, %v191_v12, 0  ;;  %v170_v15 = vld [vmem:[%s274_s2] ss:$0 sm:$0xff]  ;;  %s192_s1 = scalar_lea.vmem %s162_s7, 32  ;;  %p197_p1 = scmp.lt.s32.totalorder %s162_s7, %s162_s7 }
   0xf   :  { %121 = vmatprep.subr.bf16.mxu0 %v214_v1  ;;  %p193_p0 = scmp.ne.s32.totalorder %s162_s7, %s192_s1  ;;  %p198_p2 = scmp.lt.s32.totalorder %s192_s1, %s192_s1 }
  0x11   :  { %p199_p3 = por %p198_p2, %p197_p1 }
  0x12   :  { %122 = vmatpush1.bf16.msra.mxu0 %v187_v8 }
  0x13   :  { %123 = vmatprep.subr.bf16.mxu0 %v214_v1  ;;  %p200_p4 = pnand %p199_p3, %p193_p0 }
  0x16   :  { %124 = vmatpush1.bf16.msra.mxu0 %v188_v9 }
  0x17   :  { %125 = vmatprep.subr.bf16.mxu0 %v214_v1 }
  0x1a   :  { %126 = vmatpush1.bf16.msra.mxu0 %v189_v10 }
  0x1b   :  { %127 = vmatprep.subr.bf16.mxu0 %v214_v1 }
  0x1e   :  { %128 = vmatpush1.bf16.msra.mxu0 %v190_v11 }
  0x1f   :  { %143 = vmatprep.subr.bf16.mxu0 %v214_v1 }
  0x22   :  { %144 = vmatpush2.bf16.msra.mxu0 %v111_v13 }
  0x25   :  { %146 = vmatmul.mubr.bf16.vlgmr.msra.gmra.mxu0 %v28_v14 }
  0xe5   :  { %v147_v16 = vpop.f32.mrf.mxu0 }
  0xe6   :  { %v148_v17 = vadd.f32 %v170_v15, %v147_v16 }
  0xe7   :  { %v149_v18 = vpop.f32.mrf.mxu0 }
  0xe8   :  { %154 = vst.msk [vmem:[#allocation2] sm:$0x3] %vm153_vm2, %v148_v17 }
  0xe9   :  { %v150_v19 = vpop.f32.mrf.mxu0 }
  0xea   :  { %203 = shalt.err (!%p200_p4)
}
  0xeb   :  { %164 = dma.vmem_to_hbm [thread:$0]  %s162_s7, 32, %s275_s3, [#allocation3]   ;;  %v151_v20 = vpop.f32.mrf.mxu0 }
  0xec   :  { %212 = dma.done.wait [#allocation3], 32  }
  0xed   :  { %213 = vsyncadd [#allocation3], 4294967264 }
  0xee   :  { %168 = vsyncpa [#allocation3], 1 }

// kernel: drowsiness_cnn_lstm.10
= control target key start
LH: loop header
LB: loop body
LE: loop exit
PB: predicated region body
PF: predicated region fallthrough
CT: control target
= control target key end

     0   :  { %v924_v1 = vmov 0   ;;  %v925_v33 = vmov 1983009808   ;;  %v296_v35 = vlaneseq  ;;  %s1272_s1 = inlined_call_operand.vmem [shape: bf16[128,512], index: 1, kind: input, shape index: {}]   ;;  %s1273_s0 = inlined_call_operand.vmem [shape: f32[4,2,512], index: 0, kind: input, shape index: {}]   ;;  %s1274_s2 = inlined_call_operand.vmem [shape: f32[2,128], index: 2, kind: output, shape index: {}]  }
   0x1   :  { %v944_v0 = vld [vmem:[%s1272_s1 + $0xe4] ss:$16 sps:$4 sm:$0xff]   ;;  %237 = vmatprep.mubr.bf16.mxu0 %v924_v1  ;;  %278 = vmatprep.mubr.bf16.mxu1 %v924_v1  ;;  %v951_v2 = vld [vmem:[%s1272_s1 + $0xec] ss:$16 sps:$4 sm:$0xff]   ;;  %v957_v3 = vld [vmem:[%s1272_s1 + $0xe0] ss:$16 sps:$4 sm:$0xff]   ;;  %v294_v34 = vunpack.c.l.s4 %v925_v33 }
   0x2   :  { %205 = vmatprep.subr.bf16.mxu0 %v944_v0  ;;  %v962_v4 = vld [vmem:[%s1272_s1 + $0xe8] ss:$16 sps:$4 sm:$0xff]   ;;  %246 = vmatprep.subr.bf16.mxu1 %v951_v2  ;;  %v968_v5 = vld [vmem:[%s1272_s1 + $0xc4] ss:$16 sps:$4 sm:$0xff]   ;;  %v975_v6 = vld [vmem:[%s1272_s1 + $0xcc] ss:$16 sps:$4 sm:$0xff]  }
   0x3   :  { %206 = vmatpush1.bf16.msra.mxu0 %v957_v3  ;;  %247 = vmatpush1.bf16.msra.mxu1 %v962_v4  ;;  %v980_v7 = vld [vmem:[%s1272_s1 + $0xc0] ss:$16 sps:$4 sm:$0xff]   ;;  %v986_v8 = vld [vmem:[%s1272_s1 + $0xc8] ss:$16 sps:$4 sm:$0xff]   ;;  %v992_v9 = vld [vmem:[%s1272_s1 + $0xa4] ss:$16 sps:$4 sm:$0xff]   ;;  %v295_v36 = vunpack.c.0.s8 %v294_v34 }
   0x4   :  { %207 = vmatprep.subr.bf16.mxu0 %v968_v5  ;;  %248 = vmatprep.subr.bf16.mxu1 %v975_v6  ;;  %v997_v10 = vld [vmem:[%s1272_s1 + $0xac] ss:$16 sps:$4 sm:$0xff]   ;;  %v1002_v11 = vld [vmem:[%s1272_s1 + $0xa0] ss:$16 sps:$4 sm:$0xff]   ;;  %v1007_v12 = vld [vmem:[%s1272_s1 + $0xa8] ss:$16 sps:$4 sm:$0xff]  }
   0x5   :  { %v1014_v13 = vld [vmem:[%s1272_s1 + $0x84] ss:$16 sps:$4 sm:$0xff]   ;;  %v1021_v14 = vld [vmem:[%s1272_s1 + $0x8c] ss:$16 sps:$4 sm:$0xff]   ;;  %v1026_v15 = vld [vmem:[%s1272_s1 + $0x80] ss:$16 sps:$4 sm:$0xff]  }
   0x6   :  { %v1033_v16 = vld [vmem:[%s1272_s1 + $0x88] ss:$16 sps:$4 sm:$0xff]   ;;  %v1038_v17 = vld [vmem:[%s1272_s1 + $0x64] ss:$16 sps:$4 sm:$0xff]   ;;  %v1045_v18 = vld [vmem:[%s1272_s1 + $0x6c] ss:$16 sps:$4 sm:$0xff]  }
   0x7   :  { %208 = vmatpush1.bf16.msra.mxu0 %v980_v7  ;;  %249 = vmatpush1.bf16.msra.mxu1 %v986_v8  ;;  %v1050_v19 = vld [vmem:[%s1272_s1 + $0x60] ss:$16 sps:$4 sm:$0xff]   ;;  %v1055_v20 = vld [vmem:[%s1272_s1 + $0x68] ss:$16 sps:$4 sm:$0xff]   ;;  %v1062_v21 = vld [vmem:[%s1272_s1 + $0x44] ss:$16 sps:$4 sm:$0xff]  }
   0x8   :  { %209 = vmatprep.subr.bf16.mxu0 %v992_v9  ;;  %250 = vmatprep.subr.bf16.mxu1 %v997_v10  ;;  %v1069_v22 = vld [vmem:[%s1272_s1 + $0x4c] ss:$16 sps:$4 sm:$0xff]   ;;  %v1076_v23 = vld [vmem:[%s1272_s1 + $0x40] ss:$16 sps:$4 sm:$0xff]   ;;  %v1081_v24 = vld [vmem:[%s1272_s1 + $0x48] ss:$16 sps:$4 sm:$0xff]  }
   0x9   :  { %v1088_v25 = vld [vmem:[%s1272_s1 + $0x24] ss:$16 sps:$4 sm:$0xff]   ;;  %v1093_v26 = vld [vmem:[%s1272_s1 + $0x2c] ss:$16 sps:$4 sm:$0xff]   ;;  %v1100_v27 = vld [vmem:[%s1272_s1 + $0x20] ss:$16 sps:$4 sm:$0xff]  }
   0xa   :  { %v1105_v28 = vld [vmem:[%s1272_s1 + $0x28] ss:$16 sps:$4 sm:$0xff]   ;;  %v1112_v29 = vld [vmem:[%s1272_s1 + $0x4] ss:$16 sps:$4 sm:$0xff]   ;;  %v1117_v30 = vld [vmem:[%s1272_s1 + $0xc] ss:$16 sps:$4 sm:$0xff]  }
   0xb   :  { %210 = vmatpush1.bf16.msra.mxu0 %v1002_v11  ;;  %251 = vmatpush1.bf16.msra.mxu1 %v1007_v12  ;;  %v1124_v31 = vld [vmem:[%s1272_s1] ss:$16 sps:$4 sm:$0xff]   ;;  %v1129_v32 = vld [vmem:[%s1272_s1 + $0x8] ss:$16 sps:$4 sm:$0xff]   ;;  %v297_v37 = vshrl.u32 %v296_v35, 7 }
   0xc   :  { %211 = vmatprep.subr.bf16.mxu0 %v1014_v13  ;;  %252 = vmatprep.subr.bf16.mxu1 %v1021_v14  ;;  %v12_v49 = vld [vmem:[%s1273_s0] sm:$0xff] }
   0xd   :  { %v1173_v40 = vsub.s32 %v295_v36, %v297_v37 }
   0xf   :  { %212 = vmatpush1.bf16.msra.mxu0 %v1026_v15  ;;  %253 = vmatpush1.bf16.msra.mxu1 %v1033_v16 }
  0x10   :  { %213 = vmatprep.subr.bf16.mxu0 %v1038_v17  ;;  %254 = vmatprep.subr.bf16.mxu1 %v1045_v18 }
  0x13   :  { %214 = vmatpush1.bf16.msra.mxu0 %v1050_v19  ;;  %255 = vmatpush1.bf16.msra.mxu1 %v1055_v20 }
  0x14   :  { %215 = vmatprep.subr.bf16.mxu0 %v1062_v21  ;;  %256 = vmatprep.subr.bf16.mxu1 %v1069_v22 }
  0x17   :  { %216 = vmatpush1.bf16.msra.mxu0 %v1076_v23  ;;  %257 = vmatpush1.bf16.msra.mxu1 %v1081_v24 }
  0x18   :  { %217 = vmatprep.subr.bf16.mxu0 %v1088_v25  ;;  %258 = vmatprep.subr.bf16.mxu1 %v1093_v26 }
  0x1b   :  { %218 = vmatpush1.bf16.msra.mxu0 %v1100_v27  ;;  %259 = vmatpush1.bf16.msra.mxu1 %v1105_v28 }
  0x1c   :  { %219 = vmatprep.subr.bf16.mxu0 %v1112_v29  ;;  %260 = vmatprep.subr.bf16.mxu1 %v1117_v30 }
  0x1f   :  { %220 = vmatpush1.bf16.msra.mxu0 %v1124_v31  ;;  %261 = vmatpush1.bf16.msra.mxu1 %v1129_v32 }
  0x20   :  { %344 = vmatprep.subr.bf16.mxu0 %v944_v0  ;;  %385 = vmatprep.subr.bf16.mxu1 %v951_v2 }
  0x22   :  { %238 = vmatmul.mubr.bf16.vlgmr.msra.gmra.mxu0 %v924_v1  ;;  %279 = vmatmul.mubr.bf16.vlgmr.msra.gmra.mxu1 %v924_v1 }
  0x23   :  { %345 = vmatpush1.bf16.msra.mxu0 %v957_v3  ;;  %386 = vmatpush1.bf16.msra.mxu1 %v962_v4 }
  0x24   :  { %346 = vmatprep.subr.bf16.mxu0 %v968_v5  ;;  %387 = vmatprep.subr.bf16.mxu1 %v975_v6 }
  0x25   :  { %376 = vmatprep.mubr.bf16.mxu0 %v924_v1  ;;  %417 = vmatprep.mubr.bf16.mxu1 %v924_v1 }
  0x27   :  { %347 = vmatpush1.bf16.msra.mxu0 %v980_v7  ;;  %388 = vmatpush1.bf16.msra.mxu1 %v986_v8 }
  0x28   :  { %348 = vmatprep.subr.bf16.mxu0 %v992_v9  ;;  %389 = vmatprep.subr.bf16.mxu1 %v997_v10 }
  0x2b   :  { %349 = vmatpush1.bf16.msra.mxu0 %v1002_v11  ;;  %390 = vmatpush1.bf16.msra.mxu1 %v1007_v12 }
  0x2c   :  { %350 = vmatprep.subr.bf16.mxu0 %v1014_v13  ;;  %391 = vmatprep.subr.bf16.mxu1 %v1021_v14 }
  0x2f   :  { %351 = vmatpush1.bf16.msra.mxu0 %v1026_v15  ;;  %392 = vmatpush1.bf16.msra.mxu1 %v1033_v16 }
  0x30   :  { %352 = vmatprep.subr.bf16.mxu0 %v1038_v17  ;;  %393 = vmatprep.subr.bf16.mxu1 %v1045_v18 }
  0x33   :  { %353 = vmatpush1.bf16.msra.mxu0 %v1050_v19  ;;  %394 = vmatpush1.bf16.msra.mxu1 %v1055_v20 }
  0x34   :  { %354 = vmatprep.subr.bf16.mxu0 %v1062_v21  ;;  %395 = vmatprep.subr.bf16.mxu1 %v1069_v22 }
  0x37   :  { %355 = vmatpush1.bf16.msra.mxu0 %v1076_v23  ;;  %396 = vmatpush1.bf16.msra.mxu1 %v1081_v24 }
  0x38   :  { %356 = vmatprep.subr.bf16.mxu0 %v1088_v25  ;;  %397 = vmatprep.subr.bf16.mxu1 %v1093_v26 }
  0x3b   :  { %357 = vmatpush1.bf16.msra.mxu0 %v1100_v27  ;;  %398 = vmatpush1.bf16.msra.mxu1 %v1105_v28 }
  0x3c   :  { %358 = vmatprep.subr.bf16.mxu0 %v1112_v29  ;;  %399 = vmatprep.subr.bf16.mxu1 %v1117_v30 }
  0x3f   :  { %359 = vmatpush1.bf16.msra.mxu0 %v1124_v31  ;;  %400 = vmatpush1.bf16.msra.mxu1 %v1129_v32 }
  0x40   :  { %483 = vmatprep.subr.bf16.mxu0 %v944_v0  ;;  %524 = vmatprep.subr.bf16.mxu1 %v951_v2 }
  0xe2   :  { %v239_v38 = vpop.f32.mrf.mxu0  ;;  %v280_v39 = vpop.f32.mrf.mxu1 }
  0xe4   :  { %v241_v41 = vpop.f32.mrf.mxu0  ;;  %v282_v42 = vpop.f32.mrf.mxu1 }
  0xe5   :  { %v291_v43 = vcombine.low %v239_v38, %v241_v41  ;;  %v292_v44 = vcombine.low %v280_v39, %v282_v42 }
  0xe6   :  { %v243_v45 = vpop.f32.mrf.mxu0  ;;  %v284_v46 = vpop.f32.mrf.mxu1 }
  0xe7   :  { %v299_v47 = vrot.slane %v291_v43, %v1173_v40  ;;  %v306_v48 = vrot.slane %v292_v44, %v1173_v40 }
  0xe8   :  { %v244_v50 = vpop.f32.mrf.mxu0  ;;  %v285_v51 = vpop.f32.mrf.mxu1 }
  0xe9   :  { %v307_v52 = vcombine.low %v299_v47, %v306_v48 }
  0xeb   :  { %v309_v53 = vadd.f32 %v307_v52, %v12_v49 }
  0xed   :  { %v795_v54 = vmul.f32 -1.442695, %v309_v53  ;;  %v317_v55 = vrot.slane %v309_v53, 2  ;;  %v328_v57 = vrot.slane %v309_v53, 6  ;;  %v325_v60 = vrot.slane %v309_v53, 4 }
  0xef   :  { %860 = vpow2.f32 %v795_v54  ;;  %v796_v56 = vmul.f32 -1.442695, %v317_v55  ;;  %v797_v58 = vmul.f32 -1.442695, %v328_v57 }
  0xf1   :  { %862 = vpow2.f32 %v796_v56  ;;  %v798_v56 = vld [vmem:[%s1273_s0 + $0x8] sm:$0xff] }
  0xf2   :  { %864 = vpow2.f32 %v797_v58 }
  0xfc   :  { %v861_v59 = vpop.eup %860 }
  0xfd   :  { %v313_v61 = vadd.f32 1.0, %v861_v59 }
  0xfe   :  { %v863_v62 = vpop.eup %862 }
  0xff   :  { %866 = vrcp.f32 %v313_v61  ;;  %v322_v63 = vadd.f32 1.0, %v863_v62  ;;  %v865_v33 = vpop.eup %864 }
 0x100   :  { %868 = vtanh.f32 %v325_v60  ;;  %v333_v37 = vadd.f32 1.0, %v865_v33 }
 0x101   :  { %870 = vrcp.f32 %v322_v63 }
 0x102   :  { %872 = vrcp.f32 %v333_v37 }
 0x10c   :  { %v867_v34 = vpop.eup %866 }
 0x10d   :  { %v869_v35 = vpop.eup %868 }
 0x10e   :  { %v871_v36 = vpop.eup %870  ;;  %v337_v39 = vmul.f32 %v869_v35, %v867_v34 }
 0x10f   :  { %v336_v38 = vmul.f32 0.0, %v871_v36  ;;  %v873_v42 = vpop.eup %872 }
 0x111   :  { %v1180_v41 = vadd.f32 %v337_v39, %v336_v38 }
 0x113   :  { %874 = vtanh.f32 %v1180_v41 }
 0x120   :  { %v875_v43 = vpop.eup %874 }
 0x121   :  { %v340_v44 = vmul.f32 %v875_v43, %v873_v42 }
 0x123   :  { %v343_v45 = vpack.c.bf16 %v340_v44, %v340_v44 }
 0x125   :  { %377 = vmatmul.mubr.bf16.vlgmr.msra.gmra.mxu0 %v343_v45  ;;  %418 = vmatmul.mubr.bf16.vlgmr.msra.gmra.mxu1 %v343_v45 }
 0x126   :  { %484 = vmatpush1.bf16.msra.mxu0 %v957_v3  ;;  %525 = vmatpush1.bf16.msra.mxu1 %v962_v4 }
 0x127   :  { %485 = vmatprep.subr.bf16.mxu0 %v968_v5  ;;  %526 = vmatprep.subr.bf16.mxu1 %v975_v6 }
 0x128   :  { %515 = vmatprep.mubr.bf16.mxu0 %v924_v1  ;;  %556 = vmatprep.mubr.bf16.mxu1 %v924_v1 }
 0x12a   :  { %486 = vmatpush1.bf16.msra.mxu0 %v980_v7  ;;  %527 = vmatpush1.bf16.msra.mxu1 %v986_v8 }
 0x12b   :  { %487 = vmatprep.subr.bf16.mxu0 %v992_v9  ;;  %528 = vmatprep.subr.bf16.mxu1 %v997_v10 }
 0x12e   :  { %488 = vmatpush1.bf16.msra.mxu0 %v1002_v11  ;;  %529 = vmatpush1.bf16.msra.mxu1 %v1007_v12 }
 0x12f   :  { %489 = vmatprep.subr.bf16.mxu0 %v1014_v13  ;;  %530 = vmatprep.subr.bf16.mxu1 %v1021_v14 }
 0x132   :  { %490 = vmatpush1.bf16.msra.mxu0 %v1026_v15  ;;  %531 = vmatpush1.bf16.msra.mxu1 %v1033_v16 }
 0x133   :  { %491 = vmatprep.subr.bf16.mxu0 %v1038_v17  ;;  %532 = vmatprep.subr.bf16.mxu1 %v1045_v18 }
 0x136   :  { %492 = vmatpush1.bf16.msra.mxu0 %v1050_v19  ;;  %533 = vmatpush1.bf16.msra.mxu1 %v1055_v20 }
 0x137   :  { %493 = vmatprep.subr.bf16.mxu0 %v1062_v21  ;;  %534 = vmatprep.subr.bf16.mxu1 %v1069_v22 }
 0x13a   :  { %494 = vmatpush1.bf16.msra.mxu0 %v1076_v23  ;;  %535 = vmatpush1.bf16.msra.mxu1 %v1081_v24 }
 0x13b   :  { %495 = vmatprep.subr.bf16.mxu0 %v1088_v25  ;;  %536 = vmatprep.subr.bf16.mxu1 %v1093_v26 }
 0x13e   :  { %496 = vmatpush1.bf16.msra.mxu0 %v1100_v27  ;;  %537 = vmatpush1.bf16.msra.mxu1 %v1105_v28 }
 0x13f   :  { %497 = vmatprep.subr.bf16.mxu0 %v1112_v29  ;;  %538 = vmatprep.subr.bf16.mxu1 %v1117_v30 }
 0x142   :  { %498 = vmatpush1.bf16.msra.mxu0 %v1124_v31  ;;  %539 = vmatpush1.bf16.msra.mxu1 %v1129_v32 }
 0x143   :  { %622 = vmatprep.subr.bf16.mxu0 %v944_v0  ;;  %663 = vmatprep.subr.bf16.mxu1 %v951_v2 }
 0x1e5   :  { %v378_v46 = vpop.f32.mrf.mxu0  ;;  %v419_v47 = vpop.f32.mrf.mxu1 }
 0x1e7   :  { %v380_v48 = vpop.f32.mrf.mxu0  ;;  %v421_v49 = vpop.f32.mrf.mxu1 }
 0x1e8   :  { %v430_v50 = vcombine.low %v378_v46, %v380_v48  ;;  %v431_v51 = vcombine.low %v419_v47, %v421_v49 }
 0x1e9   :  { %v382_v52 = vpop.f32.mrf.mxu0  ;;  %v423_v53 = vpop.f32.mrf.mxu1 }
 0x1ea   :  { %v438_v54 = vrot.slane %v430_v50, %v1173_v40  ;;  %v445_v55 = vrot.slane %v431_v51, %v1173_v40 }
 0x1eb   :  { %v383_v57 = vpop.f32.mrf.mxu0  ;;  %v424_v0 = vpop.f32.mrf.mxu1 }
 0x1ec   :  { %v446_v58 = vcombine.low %v438_v54, %v445_v55 }
 0x1ee   :  { %v448_v2 = vadd.f32 %v798_v56, %v446_v58 }
 0x1f0   :  { %v799_v59 = vmul.f32 -1.442695, %v448_v2  ;;  %v456_v60 = vrot.slane %v448_v2, 2  ;;  %v467_v62 = vrot.slane %v448_v2, 6  ;;  %v464_v34 = vrot.slane %v448_v2, 4 }
 0x1f2   :  { %876 = vpow2.f32 %v799_v59  ;;  %v800_v61 = vmul.f32 -1.442695, %v456_v60  ;;  %v801_v63 = vmul.f32 -1.442695, %v467_v62 }
 0x1f4   :  { %878 = vpow2.f32 %v800_v61 }
 0x1f5   :  { %880 = vpow2.f32 %v801_v63 }
 0x1ff   :  { %v877_v33 = vpop.eup %876 }
 0x200   :  { %v452_v35 = vadd.f32 1.0, %v877_v33 }
 0x201   :  { %v879_v36 = vpop.eup %878 }
 0x202   :  { %882 = vrcp.f32 %v452_v35  ;;  %v461_v37 = vadd.f32 1.0, %v879_v36  ;;  %v881_v38 = vpop.eup %880 }
 0x203   :  { %884 = vtanh.f32 %v464_v34  ;;  %v472_v44 = vadd.f32 1.0, %v881_v38  ;;  %v806_v34 = vld [vmem:[%s1273_s0 + $0x18] sm:$0xff] }
 0x204   :  { %886 = vrcp.f32 %v461_v37 }
 0x205   :  { %888 = vrcp.f32 %v472_v44 }
 0x20f   :  { %v883_v39 = vpop.eup %882 }
 0x210   :  { %v885_v42 = vpop.eup %884 }
 0x211   :  { %v887_v43 = vpop.eup %886  ;;  %v476_v46 = vmul.f32 %v885_v42, %v883_v39 }
 0x212   :  { %v475_v45 = vmul.f32 %v887_v43, %v1180_v41  ;;  %v889_v48 = vpop.eup %888 }
 0x214   :  { %v1223_v47 = vadd.f32 %v476_v46, %v475_v45 }
 0x216   :  { %890 = vtanh.f32 %v1223_v47 }
 0x223   :  { %v891_v49 = vpop.eup %890 }
 0x224   :  { %v479_v50 = vmul.f32 %v891_v49, %v889_v48 }
 0x226   :  { %v482_v51 = vpack.c.bf16 %v479_v50, %v479_v50 }
 0x228   :  { %516 = vmatmul.mubr.bf16.vlgmr.msra.gmra.mxu0 %v482_v51  ;;  %557 = vmatmul.mubr.bf16.vlgmr.msra.gmra.mxu1 %v482_v51 }
 0x229   :  { %623 = vmatpush1.bf16.msra.mxu0 %v957_v3  ;;  %664 = vmatpush1.bf16.msra.mxu1 %v962_v4 }
 0x22a   :  { %624 = vmatprep.subr.bf16.mxu0 %v968_v5  ;;  %665 = vmatprep.subr.bf16.mxu1 %v975_v6 }
 0x22b   :  { %654 = vmatprep.mubr.bf16.mxu0 %v924_v1  ;;  %695 = vmatprep.mubr.bf16.mxu1 %v924_v1 }
 0x22d   :  { %625 = vmatpush1.bf16.msra.mxu0 %v980_v7  ;;  %666 = vmatpush1.bf16.msra.mxu1 %v986_v8 }
 0x22e   :  { %626 = vmatprep.subr.bf16.mxu0 %v992_v9  ;;  %667 = vmatprep.subr.bf16.mxu1 %v997_v10 }
 0x231   :  { %627 = vmatpush1.bf16.msra.mxu0 %v1002_v11  ;;  %668 = vmatpush1.bf16.msra.mxu1 %v1007_v12  ;;  %v802_v12 = vld [vmem:[%s1273_s0 + $0x10] sm:$0xff] }
 0x232   :  { %628 = vmatprep.subr.bf16.mxu0 %v1014_v13  ;;  %669 = vmatprep.subr.bf16.mxu1 %v1021_v14 }
 0x235   :  { %629 = vmatpush1.bf16.msra.mxu0 %v1026_v15  ;;  %670 = vmatpush1.bf16.msra.mxu1 %v1033_v16 }
 0x236   :  { %630 = vmatprep.subr.bf16.mxu0 %v1038_v17  ;;  %671 = vmatprep.subr.bf16.mxu1 %v1045_v18 }
 0x239   :  { %631 = vmatpush1.bf16.msra.mxu0 %v1050_v19  ;;  %672 = vmatpush1.bf16.msra.mxu1 %v1055_v20 }
 0x23a   :  { %632 = vmatprep.subr.bf16.mxu0 %v1062_v21  ;;  %673 = vmatprep.subr.bf16.mxu1 %v1069_v22 }
 0x23d   :  { %633 = vmatpush1.bf16.msra.mxu0 %v1076_v23  ;;  %674 = vmatpush1.bf16.msra.mxu1 %v1081_v24 }
 0x23e   :  { %634 = vmatprep.subr.bf16.mxu0 %v1088_v25  ;;  %675 = vmatprep.subr.bf16.mxu1 %v1093_v26 }
 0x241   :  { %635 = vmatpush1.bf16.msra.mxu0 %v1100_v27  ;;  %676 = vmatpush1.bf16.msra.mxu1 %v1105_v28 }
 0x242   :  { %636 = vmatprep.subr.bf16.mxu0 %v1112_v29  ;;  %677 = vmatprep.subr.bf16.mxu1 %v1117_v30 }
 0x245   :  { %637 = vmatpush1.bf16.msra.mxu0 %v1124_v31  ;;  %678 = vmatpush1.bf16.msra.mxu1 %v1129_v32 }
 0x2e8   :  { %v517_v1 = vpop.f32.mrf.mxu0  ;;  %v558_v3 = vpop.f32.mrf.mxu1 }
 0x2ea   :  { %v519_v4 = vpop.f32.mrf.mxu0  ;;  %v560_v5 = vpop.f32.mrf.mxu1 }
 0x2eb   :  { %v569_v6 = vcombine.low %v517_v1, %v519_v4  ;;  %v570_v7 = vcombine.low %v558_v3, %v560_v5 }
 0x2ec   :  { %v521_v8 = vpop.f32.mrf.mxu0  ;;  %v562_v9 = vpop.f32.mrf.mxu1 }
 0x2ed   :  { %v577_v10 = vrot.slane %v569_v6, %v1173_v40  ;;  %v584_v11 = vrot.slane %v570_v7, %v1173_v40 }
 0x2ee   :  { %v522_v13 = vpop.f32.mrf.mxu0  ;;  %v563_v14 = vpop.f32.mrf.mxu1 }
 0x2ef   :  { %v585_v15 = vcombine.low %v577_v10, %v584_v11 }
 0x2f1   :  { %v587_v16 = vadd.f32 %v802_v12, %v585_v15 }
 0x2f3   :  { %v803_v17 = vmul.f32 -1.442695, %v587_v16  ;;  %v595_v18 = vrot.slane %v587_v16, 2  ;;  %v606_v20 = vrot.slane %v587_v16, 6  ;;  %v603_v23 = vrot.slane %v587_v16, 4 }
 0x2f5   :  { %892 = vpow2.f32 %v803_v17  ;;  %v804_v19 = vmul.f32 -1.442695, %v595_v18  ;;  %v805_v21 = vmul.f32 -1.442695, %v606_v20 }
 0x2f7   :  { %894 = vpow2.f32 %v804_v19 }
 0x2f8   :  { %896 = vpow2.f32 %v805_v21 }
 0x302   :  { %v893_v22 = vpop.eup %892 }
 0x303   :  { %v591_v24 = vadd.f32 1.0, %v893_v22 }
 0x304   :  { %v895_v25 = vpop.eup %894 }
 0x305   :  { %898 = vrcp.f32 %v591_v24  ;;  %v600_v26 = vadd.f32 1.0, %v895_v25  ;;  %v897_v27 = vpop.eup %896 }
 0x306   :  { %900 = vtanh.f32 %v603_v23  ;;  %v611_v31 = vadd.f32 1.0, %v897_v27 }
 0x307   :  { %902 = vrcp.f32 %v600_v26 }
 0x308   :  { %904 = vrcp.f32 %v611_v31 }
 0x312   :  { %v899_v28 = vpop.eup %898 }
 0x313   :  { %v901_v29 = vpop.eup %900 }
 0x314   :  { %v903_v30 = vpop.eup %902  ;;  %v615_v41 = vmul.f32 %v901_v29, %v899_v28 }
 0x315   :  { %v614_v32 = vmul.f32 %v903_v30, %v1223_v47  ;;  %v905_v53 = vpop.eup %904 }
 0x317   :  { %v616_v52 = vadd.f32 %v615_v41, %v614_v32 }
 0x319   :  { %906 = vtanh.f32 %v616_v52 }
 0x326   :  { %v907_v54 = vpop.eup %906 }
 0x327   :  { %v618_v55 = vmul.f32 %v907_v54, %v905_v53 }
 0x329   :  { %v621_v56 = vpack.c.bf16 %v618_v55, %v618_v55 }
 0x32b   :  { %655 = vmatmul.mubr.bf16.vlgmr.msra.gmra.mxu0 %v621_v56  ;;  %696 = vmatmul.mubr.bf16.vlgmr.msra.gmra.mxu1 %v621_v56 }
 0x3eb   :  { %v656_v57 = vpop.f32.mrf.mxu0  ;;  %v697_v0 = vpop.f32.mrf.mxu1 }
 0x3ed   :  { %v658_v58 = vpop.f32.mrf.mxu0  ;;  %v699_v2 = vpop.f32.mrf.mxu1 }
 0x3ee   :  { %v708_v59 = vcombine.low %v656_v57, %v658_v58  ;;  %v709_v60 = vcombine.low %v697_v0, %v699_v2 }
 0x3ef   :  { %v660_v61 = vpop.f32.mrf.mxu0  ;;  %v701_v62 = vpop.f32.mrf.mxu1 }
 0x3f0   :  { %v716_v63 = vrot.slane %v708_v59, %v1173_v40  ;;  %v723_v33 = vrot.slane %v709_v60, %v1173_v40 }
 0x3f1   :  { %v661_v35 = vpop.f32.mrf.mxu0  ;;  %v702_v36 = vpop.f32.mrf.mxu1 }
 0x3f2   :  { %v724_v37 = vcombine.low %v716_v63, %v723_v33 }
 0x3f4   :  { %v726_v38 = vadd.f32 %v806_v34, %v724_v37 }
 0x3f6   :  { %v807_v39 = vmul.f32 -1.442695, %v726_v38  ;;  %v734_v42 = vrot.slane %v726_v38, 2  ;;  %v745_v44 = vrot.slane %v726_v38, 6  ;;  %v742_v47 = vrot.slane %v726_v38, 4 }
 0x3f8   :  { %908 = vpow2.f32 %v807_v39  ;;  %v808_v43 = vmul.f32 -1.442695, %v734_v42  ;;  %v809_v45 = vmul.f32 -1.442695, %v745_v44 }
 0x3fa   :  { %910 = vpow2.f32 %v808_v43 }
 0x3fb   :  { %912 = vpow2.f32 %v809_v45 }
 0x405   :  { %v909_v46 = vpop.eup %908 }
 0x406   :  { %v730_v48 = vadd.f32 1.0, %v909_v46 }
 0x407   :  { %v911_v49 = vpop.eup %910 }
 0x408   :  { %914 = vrcp.f32 %v730_v48  ;;  %v739_v40 = vadd.f32 1.0, %v911_v49  ;;  %v913_v50 = vpop.eup %912 }
 0x409   :  { %916 = vtanh.f32 %v742_v47  ;;  %v750_v4 = vadd.f32 1.0, %v913_v50 }
 0x40a   :  { %918 = vrcp.f32 %v739_v40 }
 0x40b   :  { %920 = vrcp.f32 %v750_v4 }
 0x415   :  { %v915_v51 = vpop.eup %914 }
 0x416   :  { %v917_v1 = vpop.eup %916 }
 0x417   :  { %v919_v3 = vpop.eup %918  ;;  %v754_v6 = vmul.f32 %v917_v1, %v915_v51 }
 0x418   :  { %v753_v5 = vmul.f32 %v919_v3, %v616_v52  ;;  %v921_v8 = vpop.eup %920 }
 0x41a   :  { %v755_v7 = vadd.f32 %v754_v6, %v753_v5 }
 0x41c   :  { %922 = vtanh.f32 %v755_v7 }
 0x429   :  { %v923_v9 = vpop.eup %922 }
 0x42a   :  { %v757_v10 = vmul.f32 %v923_v9, %v921_v8 }
 0x42c   :  { %758 = vst [vmem:[%s1274_s2] sm:$0x3] %v757_v10 }

// kernel: drowsiness_cnn_lstm.6
= control target key start
LH: loop header
LB: loop body
LE: loop exit
PB: predicated region body
PF: predicated region fallthrough
CT: control target
= control target key end

     0   :  { %s5607_s12 = smov 0   ;;  %s7221_s0 = inlined_call_operand.vmem [shape: f32[8,16,16,8], index: 0, kind: input, shape index: {}]   ;;  %s7222_s1 = inlined_call_operand.vmem [shape: bf16[72,16], index: 1, kind: input, shape index: {}]   ;;  %s7223_s2 = inlined_call_operand.vmem [shape: f32[1,16], index: 2, kind: input, shape index: {}]   ;;  %s7224_s3 = inlined_call_operand.vmem [shape: bf16[8,8,8,16], index: 3, kind: output, shape index: {}]  }
   0x1 LB: > { %s4832_s13 = sadd.s32 4294967295, %s5575_s12   ;;  %p4836_p0 = scmp.ge.s32.totalorder %s5575_s12, 1  ;;  %s5575_s12 = sphi %s5607_s12, %s13_s12  }
   0x2   : > { %p137_p1 = scmp.lt.s32.totalorder %s5575_s12, 9 }
   0x4   : > { %p138_p2 = pnand %p4836_p0, %p137_p1 }
   0x6   : > { %141 = sbr.rel (%p138_p2) target bundleno = 674 (0x2a2), region = 32 }
   0xb   : > { %vm172_vm0 = vcmask 60416   ;;  %vm175_vm1 = vcmask 57344   ;;  %v5577_v0 = vmov 0   ;;  %p161_p3 = scmp.lt.s32.totalorder %s4832_s13, 7  ;;  %vm356_vm2 = vsmask.f32 256 }
   0xc   : > { %173 = vst.msk [vmem:[#allocation2] sm:$0xf] %vm172_vm0, %v5577_v0  ;;  %174 = vst.msk [vmem:[#allocation2 + $0x4] sm:$0xf] %vm172_vm0, %v5577_v0  ;;  %vm357_vm3 = vsmask.f32 4368 }
   0xd   : > { %176 = vst.msk [vmem:[#allocation2 + $0x8] sm:$0x1] %vm175_vm1, %v5577_v0  ;;  %179 = vst.msk [vmem:[#allocation2 + $0x14] sm:$0x1] %vm175_vm1, %v5577_v0  ;;  %s7253_s13 = smov (!%p161_p3, %s4832_s13), 7  ;;  %vm1391_vm6 = vcmask 1046528  }
   0xe   : > { %177 = vst.msk [vmem:[#allocation2 + $0xc] sm:$0xf] %vm172_vm0, %v5577_v0  ;;  %178 = vst.msk [vmem:[#allocation2 + $0x10] sm:$0xf] %vm172_vm0, %v5577_v0  ;;  %s5233_s14 = sshll.u32 %s7253_s13, 8  ;;  %s5578_s18 = smov 16  }
   0xf   : > { %180 = vst.msk [vmem:[#allocation2 + $0x18] sm:$0xf] %vm172_vm0, %v5577_v0  ;;  %181 = vst.msk [vmem:[#allocation2 + $0x1c] sm:$0xf] %vm172_vm0, %v5577_v0  ;;  %s5679_s17 = scalar_lea.vmem %s7221_s0, %s5233_s14  ;;  %vm1118_vm4 = vsmask.f32 7424 }
  0x10   : > { %182 = vst.msk [vmem:[#allocation2 + $0x20] sm:$0x1] %vm175_vm1, %v5577_v0  ;;  %185 = vst.msk [vmem:[#allocation2 + $0x2c] sm:$0x1] %vm175_vm1, %v5577_v0  ;;  %v244_v1 = vld [vmem:[%s5679_s17 + $0x80] sm:$0xff]  ;;  %v245_v2 = vld [vmem:[%s5679_s17 + $0x88] sm:$0xff] }
  0x11   : > { %183 = vst.msk [vmem:[#allocation2 + $0x24] sm:$0xf] %vm172_vm0, %v5577_v0  ;;  %184 = vst.msk [vmem:[#allocation2 + $0x28] sm:$0xf] %vm172_vm0, %v5577_v0  ;;  %vm681_vm5 = vsmask.f32 7938  ;;  %v5251_v6 = vpack.c.bf16 %v244_v1, %v244_v1  ;;  %v5252_v7 = vpack.c.bf16 %v245_v2, %v245_v2 }
  0x12   : > { %186 = vst.msk [vmem:[#allocation2 + $0x30] sm:$0xf] %vm172_vm0, %v5577_v0  ;;  %187 = vst.msk [vmem:[#allocation2 + $0x34] sm:$0xf] %vm172_vm0, %v5577_v0  ;;  %v228_v3 = vld [vmem:[%s5679_s17] sm:$0xff]  ;;  %v229_v16 = vld [vmem:[%s5679_s17 + $0x8] sm:$0xff] }
  0x13   : > { %188 = vst.msk [vmem:[#allocation2 + $0x38] sm:$0x1] %vm175_vm1, %v5577_v0  ;;  %191 = vst.msk [vmem:[#allocation2 + $0x44] sm:$0x1] %vm175_vm1, %v5577_v0  ;;  %v798_v4 = vld [vmem:[#allocation2 + $0x4] sm:$0xf]  ;;  %v5235_v11 = vpack.c.bf16 %v228_v3, %v228_v3  ;;  %v5236_v30 = vpack.c.bf16 %v229_v16, %v229_v16 }
  0x14   : > { %189 = vst.msk [vmem:[#allocation2 + $0x3c] sm:$0xf] %vm172_vm0, %v5577_v0  ;;  %190 = vst.msk [vmem:[#allocation2 + $0x40] sm:$0xf] %vm172_vm0, %v5577_v0  ;;  %v845_v5 = vld [vmem:[#allocation2] sm:$0xe] }
  0x15   : > { %192 = vst.msk [vmem:[#allocation2 + $0x48] sm:$0xf] %vm172_vm0, %v5577_v0  ;;  %193 = vst.msk [vmem:[#allocation2 + $0x4c] sm:$0xf] %vm172_vm0, %v5577_v0  ;;  %v4905_v9 = vcombine.low %v845_v5, %v798_v4  ;;  %v797_v10 = vld [vmem:[#allocation2] sm:$0xf] }
  0x16   : > { %194 = vst.msk [vmem:[#allocation2 + $0x50] sm:$0x1] %vm175_vm1, %v5577_v0  ;;  %197 = vst.msk [vmem:[#allocation2 + $0x5c] sm:$0x1] %vm175_vm1, %v5577_v0  ;;  %v5684_v12 = vcombine.low %v797_v10, %v798_v4  ;;  %v496_v13 = vshrl.u32 %v5251_v6, 16  ;;  %v499_v14 = vshll.u32 %v5251_v6, 16 }
  0x17   : > { %195 = vst.msk [vmem:[#allocation2 + $0x54] sm:$0xf] %vm172_vm0, %v5577_v0  ;;  %196 = vst.msk [vmem:[#allocation2 + $0x58] sm:$0xf] %vm172_vm0, %v5577_v0  ;;  %v504_v15 = vshrl.u32 %v5252_v7, 16  ;;  %v1392_v17 = vrot.slane %v4905_v9, 1 }
  0x18   : > { %198 = vst.msk [vmem:[#allocation2 + $0x60] sm:$0xf] %vm172_vm0, %v5577_v0  ;;  %199 = vst.msk [vmem:[#allocation2 + $0x64] sm:$0xf] %vm172_vm0, %v5577_v0  ;;  %v507_v20 = vshll.u32 %v5252_v7, 16  ;;  %v1120_v21 = vshrl.u32 %v5684_v12, 16 }
  0x19   : > { %200 = vst.msk [vmem:[#allocation2 + $0x68] sm:$0x1] %vm175_vm1, %v5577_v0  ;;  %203 = vst.msk [vmem:[#allocation2 + $0x74] sm:$0x1] %vm175_vm1, %v5577_v0  ;;  %v1122_v22 = vshll.u32 %v5684_v12, 16  ;;  %v498_v24 = vrot.slane %v496_v13, 7 }
  0x1a   : > { %201 = vst.msk [vmem:[#allocation2 + $0x6c] sm:$0xf] %vm172_vm0, %v5577_v0  ;;  %202 = vst.msk [vmem:[#allocation2 + $0x70] sm:$0xf] %vm172_vm0, %v5577_v0  ;;  %v5695_v25 = vrot.slane %v504_v15, 7  ;;  %v360_v31 = vshrl.u32 %v5235_v11, 16 }
  0x1b   : > { %204 = vst.msk [vmem:[#allocation2 + $0x78] sm:$0xf] %vm172_vm0, %v5577_v0  ;;  %205 = vst.msk [vmem:[#allocation2 + $0x7c] sm:$0xf] %vm172_vm0, %v5577_v0  ;;  %v246_v32 = vld [vmem:[%s5679_s17 + $0x90] sm:$0xff]  ;;  %v1124_v33 = vrot.slane %v1122_v22, 1  ;;  %v501_v34 = vor.u32 %v499_v14, %v498_v24 }
  0x1c   : > { %206 = vst.msk [vmem:[#allocation2 + $0x80] sm:$0x1] %vm175_vm1, %v5577_v0  ;;  %209 = vst.msk [vmem:[#allocation2 + $0x8c] sm:$0x1] %vm175_vm1, %v5577_v0  ;;  %v502_v35 = vrot.slane %v498_v24, 4  ;;  %v509_v36 = vor.u32 %v507_v20, %v5695_v25  ;;  %v247_v37 = vld [vmem:[%s5679_s17 + $0x98] sm:$0xff]  ;;  %v5253_v47 = vpack.c.bf16 %v246_v32, %v246_v32 }
  0x1d   : > { %207 = vst.msk [vmem:[#allocation2 + $0x84] sm:$0xf] %vm172_vm0, %v5577_v0  ;;  %208 = vst.msk [vmem:[#allocation2 + $0x88] sm:$0xf] %vm172_vm0, %v5577_v0  ;;  %v362_v38 = vrot.slane %v360_v31, 7  ;;  %v363_v39 = vshll.u32 %v5235_v11, 16  ;;  %v1125_v43 = vor.u32 %v1124_v33, %v1120_v21  ;;  %v5254_v51 = vpack.c.bf16 %v247_v37, %v247_v37 }
  0x1e   : > { %210 = vst.msk [vmem:[#allocation2 + $0x90] sm:$0xf] %vm172_vm0, %v5577_v0  ;;  %211 = vst.msk [vmem:[#allocation2 + $0x94] sm:$0xf] %vm172_vm0, %v5577_v0  ;;  %v368_v40 = vshrl.u32 %v5236_v30, 16  ;;  %v371_v41 = vshll.u32 %v5236_v30, 16 }
  0x1f   : > { %212 = vst.msk [vmem:[#allocation2 + $0x98] sm:$0x1] %vm175_vm1, %v5577_v0  ;;  %215 = vst.msk [vmem:[#allocation2 + $0xa4] sm:$0x1] %vm175_vm1, %v5577_v0  ;;  %v230_v42 = vld [vmem:[%s5679_s17 + $0x10] sm:$0xff]  ;;  %v365_v48 = vor.u32 %v363_v39, %v362_v38  ;;  %v366_v49 = vrot.slane %v362_v38, 4 }
  0x20   : > { %213 = vst.msk [vmem:[#allocation2 + $0x9c] sm:$0xf] %vm172_vm0, %v5577_v0  ;;  %214 = vst.msk [vmem:[#allocation2 + $0xa0] sm:$0xf] %vm172_vm0, %v5577_v0  ;;  %v683_v46 = vld [vmem:[#allocation2 + $0xc] sm:$0xf]  ;;  %v5237_v56 = vpack.c.bf16 %v230_v42, %v230_v42 }
  0x21   : > { %216 = vst.msk [vmem:[#allocation2 + $0xa8] sm:$0xf] %vm172_vm0, %v5577_v0  ;;  %217 = vst.msk [vmem:[#allocation2 + $0xac] sm:$0xf] %vm172_vm0, %v5577_v0  ;;  %v741_v29 = vld [vmem:[#allocation2 + $0x6c] sm:$0xf] }
  0x22   : > { %218 = vst.msk [vmem:[#allocation2 + $0xb0] sm:$0x1] %vm175_vm1, %v5577_v0  ;;  %221 = vst.msk [vmem:[#allocation2 + $0xbc] sm:$0x1] %vm175_vm1, %v5577_v0  ;;  %v5714_v50 = vrot.slane %v368_v40, 7  ;;  %v231_v52 = vld [vmem:[%s5679_s17 + $0x18] sm:$0xff] }
  0x23   : > { %219 = vst.msk [vmem:[#allocation2 + $0xb4] sm:$0xf] %vm172_vm0, %v5577_v0  ;;  %220 = vst.msk [vmem:[#allocation2 + $0xb8] sm:$0xf] %vm172_vm0, %v5577_v0  ;;  %v513_v54 = vshrl.u32 %v5253_v47, 16  ;;  %v516_v55 = vshll.u32 %v5253_v47, 16 }
  0x24   : > { %222 = vst.msk [vmem:[#allocation2 + $0xc0] sm:$0xf] %vm172_vm0, %v5577_v0  ;;  %223 = vst.msk [vmem:[#allocation2 + $0xc4] sm:$0xf] %vm172_vm0, %v5577_v0  ;;  %v242_v57 = vld [vmem:[%s5679_s17 + $0x70] sm:$0xff]  ;;  %v243_v58 = vld [vmem:[%s5679_s17 + $0x78] sm:$0xff]  ;;  %v373_v59 = vor.u32 %v371_v41, %v5714_v50 }
  0x25   : > { %224 = vst.msk [vmem:[#allocation2 + $0xc8] sm:$0x1] %vm175_vm1, %v5577_v0  ;;  %227 = vst.msk [vmem:[#allocation2 + $0xd4] sm:$0x1] %vm175_vm1, %v5577_v0  ;;  %s5579_s19 = smov 8   ;;  %v521_v61 = vshrl.u32 %v5254_v51, 16  ;;  %v5249_v6 = vpack.c.bf16 %v242_v57, %v242_v57  ;;  %v5250_v7 = vpack.c.bf16 %v243_v58, %v243_v58 }
  0x26   : > { %225 = vst.msk [vmem:[#allocation2 + $0xcc] sm:$0xf] %vm172_vm0, %v5577_v0  ;;  %226 = vst.msk [vmem:[#allocation2 + $0xd0] sm:$0xf] %vm172_vm0, %v5577_v0  ;;  %v524_v62 = vshll.u32 %v5254_v51, 16  ;;  %v515_v63 = vrot.slane %v513_v54, 7  ;;  %v5238_v0 = vpack.c.bf16 %v231_v52, %v231_v52 }
  0x27   : > { %v5424_v8 = vld [vmem:[#allocation2 + $0x8] ss:$0 sps:$4 sm:$0x11]   ;;  %vm5691_vm7 = vmor %vm356_vm2, %vm357_vm3  ;;  %v377_v1 = vshrl.u32 %v5237_v56, 16  ;;  %v380_v2 = vshll.u32 %v5237_v56, 16  ;;  %v5726_v4 = vrot.slane %v521_v61, 7 }
  0x28   : > { %v1393_v18 = vrot.slane %v5424_v8, 1  ;;  %v1127_v19 = vshll.u32 %v5424_v8, 16  ;;  %vm5700_vm8 = vmand %vm172_vm0, %vm681_vm5  ;;  %v510_v44 = vsel %vm5691_vm7, %v502_v35, %v509_v36  ;;  %v374_v3 = vsel %vm5691_vm7, %v366_v49, %v373_v59  ;;  %v748_v5 = vld [vmem:[#allocation2 + $0x78] sm:$0xf]  ;;  %v734_v32 = vld [vmem:[#allocation2 + $0x60] sm:$0xf] }
  0x29   : > { %v742_v45 = vsel %vm5700_vm8, %v501_v34, %v741_v29  ;;  %744 = vst.msk [vmem:[#allocation2 + $0x70] sm:$0xf] %vm172_vm0, %v510_v44  ;;  %v684_v60 = vsel %vm5700_vm8, %v365_v48, %v683_v46  ;;  %686 = vst.msk [vmem:[#allocation2 + $0x10] sm:$0xf] %vm172_vm0, %v374_v3  ;;  %v518_v8 = vor.u32 %v516_v55, %v515_v63  ;;  %v519_v9 = vrot.slane %v515_v63, 4  ;;  %s5580_s20 = smov 24  }
  0x2a   : > { %v1394_v26 = vsel %vm1391_vm6, %v1392_v17, %v1393_v18  ;;  %v1129_v27 = vrot.slane %v1127_v19, 1  ;;  %743 = vst [vmem:[#allocation2 + $0x6c] sm:$0xf] %v742_v45  ;;  %685 = vst [vmem:[#allocation2 + $0xc] sm:$0xf] %v684_v60  ;;  %v379_v10 = vrot.slane %v377_v1, 7  ;;  %v526_v13 = vor.u32 %v524_v62, %v5726_v4 }
  0x2b   : > { %1440 = vrot.lane.b32.xlu0 %v1394_v26, %s5578_s18  ;;  %v385_v11 = vshrl.u32 %v5238_v0, 16  ;;  %v692_v14 = vld [vmem:[#allocation2 + $0x18] sm:$0xf]  ;;  %v479_v15 = vshrl.u32 %v5249_v6, 16  ;;  %v749_v18 = vsel %vm5700_vm8, %v518_v8, %v748_v5  ;;  %v388_v20 = vshll.u32 %v5238_v0, 16  ;;  %vm5748_vm9 = vmand %vm175_vm1, %vm356_vm2  ;;  %s5581_s21 = smov 40  }
  0x2c   : > { %v1130_v53 = vsel %vm1118_vm4, %v1125_v43, %v1129_v27  ;;  %v382_v19 = vor.u32 %v380_v2, %v379_v10  ;;  %v482_v21 = vshll.u32 %v5249_v6, 16  ;;  %v527_v24 = vsel %vm5691_vm7, %v519_v9, %v526_v13  ;;  %750 = vst [vmem:[#allocation2 + $0x78] sm:$0xf] %v749_v18  ;;  %v689_v35 = vld [vmem:[#allocation2 + $0x14] sm:$0x1]  ;;  %s5582_s22 = smov 32  }
  0x2d   : > { %v383_v26 = vrot.slane %v379_v10, 4  ;;  %751 = vst.msk [vmem:[#allocation2 + $0x7c] sm:$0xf] %vm172_vm0, %v527_v24  ;;  %v5740_v27 = vrot.slane %v385_v11, 7  ;;  %v481_v30 = vrot.slane %v479_v15, 7  ;;  %v487_v31 = vshrl.u32 %v5250_v7, 16 }
  0x2e   : > { %v693_v29 = vsel %vm5700_vm8, %v382_v19, %v692_v14  ;;  %v490_v34 = vshll.u32 %v5250_v7, 16  ;;  %v738_v41 = vld [vmem:[#allocation2 + $0x68] sm:$0x1]  ;;  %v745_v42 = vld [vmem:[#allocation2 + $0x74] sm:$0x1]  ;;  %v375_v45 = vrot.slane %v5714_v50, 4 }
  0x2f   : > { %1311 = vrot.lane.b32.xlu0 %v1130_v53, %s5579_s19  ;;  %694 = vst [vmem:[#allocation2 + $0x18] sm:$0xf] %v693_v29  ;;  %v390_v37 = vor.u32 %v388_v20, %v5740_v27  ;;  %v484_v38 = vor.u32 %v482_v21, %v481_v30  ;;  %v485_v39 = vrot.slane %v481_v30, 4  ;;  %v489_v40 = vrot.slane %v487_v31, 7  ;;  %v696_v5 = vld [vmem:[#allocation2 + $0x20] sm:$0x1] }
  0x30   : > { %v5730_v17 = vld [vmem:[#allocation2 + $0x70] sm:$0xf]  ;;  %v511_v46 = vrot.slane %v5695_v25, 4  ;;  %v690_v50 = vsel %vm5748_vm9, %v375_v45, %v689_v35  ;;  %v392_v6 = vrot.slane %v5740_v27, 4  ;;  %v232_v27 = vld [vmem:[%s5679_s17 + $0x20] sm:$0xff]  ;;  %s5583_s23 = smov 48  }
  0x31   : > { %v877_v16 = vld [vmem:[#allocation2 + $0x6c] sm:$0xf]  ;;  %v816_v43 = vld [vmem:[#allocation2 + $0x70] sm:$0xf]  ;;  %v391_v51 = vsel %vm5691_vm7, %v383_v26, %v390_v37  ;;  %v492_v52 = vor.u32 %v490_v34, %v489_v40  ;;  %v494_v55 = vrot.slane %v489_v40, 4  ;;  %v735_v56 = vsel %vm5700_vm8, %v484_v38, %v734_v32  ;;  %s5584_s24 = smov 56  }
  0x32   : > { %v5735_v22 = vcombine.low %v877_v16, %v5730_v17  ;;  %v861_v33 = vld [vmem:[#allocation2 + $0xc] sm:$0xf]  ;;  %v862_v44 = vld [vmem:[#allocation2 + $0x10] sm:$0xf]  ;;  %695 = vst.msk [vmem:[#allocation2 + $0x1c] sm:$0xf] %vm172_vm0, %v391_v51  ;;  %v746_v58 = vsel %vm5748_vm9, %v511_v46, %v745_v42  ;;  %v697_v15 = vsel %vm5748_vm9, %v392_v6, %v696_v5  ;;  %v5809_v45 = vpack.c.bf16 %v232_v27, %v232_v27 }
  0x33   : > { %v854_v47 = vld [vmem:[#allocation2 + $0x6c] sm:$0xe]  ;;  %v5755_v49 = vcombine.low %v861_v33, %v862_v44  ;;  %v800_v53 = vld [vmem:[#allocation2 + $0x10] sm:$0xf]  ;;  %v879_v25 = vld [vmem:[#allocation2 + $0x78] sm:$0xf]  ;;  %v493_v57 = vsel %vm5691_vm7, %v485_v39, %v492_v52  ;;  %v739_v61 = vsel %vm5748_vm9, %v494_v55, %v738_v41 }
  0x34   : > { %1568 = vrot.lane.b32.xlu1 %v5735_v22, %s5580_s20  ;;  %v909_v48 = vld [vmem:[#allocation2 + $0xc] sm:$0xe]  ;;  %736 = vst [vmem:[#allocation2 + $0x60] sm:$0xf] %v735_v56  ;;  %691 = vst [vmem:[#allocation2 + $0x14] sm:$0x1] %v690_v50  ;;  %v4914_v1 = vcombine.low %v854_v47, %v816_v43 }
  0x35   : > { %v846_v54 = vld [vmem:[#allocation2 + $0xc] sm:$0xe]  ;;  %1552 = vrot.lane.b32.xlu0 %v5755_v49, %s5580_s20  ;;  %v4953_v59 = vcombine.low %v909_v48, %v862_v44  ;;  %v5770_v60 = vld [vmem:[#allocation2 + $0x7c] sm:$0xf]  ;;  %737 = vst.msk [vmem:[#allocation2 + $0x64] sm:$0xf] %vm172_vm0, %v493_v57 }
  0x36   : > { %v4906_v62 = vcombine.low %v846_v54, %v800_v53  ;;  %v799_v63 = vld [vmem:[#allocation2 + $0xc] sm:$0xf]  ;;  %747 = vst [vmem:[#allocation2 + $0x74] sm:$0x1] %v746_v58  ;;  %v1635_v2 = vshll.u32 %v5755_v49, 16  ;;  %v5777_v3 = vcombine.low %v879_v25, %v5770_v60  ;;  %v1731_v7 = vshll.u32 %v5735_v22, 16 }
  0x37   : > { %v815_v0 = vld [vmem:[#allocation2 + $0x6c] sm:$0xf]  ;;  %740 = vst [vmem:[#allocation2 + $0x68] sm:$0x1] %v739_v61  ;;  %v863_v8 = vld [vmem:[#allocation2 + $0x18] sm:$0xf]  ;;  %v5783_v9 = vcombine.low %v799_v63, %v800_v53 }
  0x38   : > { %1570 = vrot.lane.b32.xlu1 %v5777_v3, %s5580_s20  ;;  %v5785_v10 = vcombine.low %v815_v0, %v816_v43  ;;  %v1395_v11 = vrot.slane %v4906_v62, 1  ;;  %v1419_v13 = vrot.slane %v4914_v1, 1  ;;  %v1904_v14 = vrot.slane %v4953_v59, 1  ;;  %v752_v16 = vld [vmem:[#allocation2 + $0x80] sm:$0x1]  ;;  %v233_v58 = vld [vmem:[%s5679_s17 + $0x28] sm:$0xff] }
  0x39   : > { %v917_v18 = vld [vmem:[#allocation2 + $0x6c] sm:$0xe]  ;;  %v5789_v19 = vld [vmem:[#allocation2 + $0x1c] sm:$0xf]  ;;  %v1633_v20 = vshrl.u32 %v5755_v49, 16  ;;  %v1637_v21 = vrot.slane %v1635_v2, 1 }
  0x3a   : > { %v1132_v24 = vshrl.u32 %v5783_v9, 16  ;;  %698 = vst [vmem:[#allocation2 + $0x20] sm:$0x1] %v697_v15  ;;  %v528_v26 = vrot.slane %v5726_v4, 4  ;;  %v5796_v29 = vcombine.low %v863_v8, %v5789_v19  ;;  %v1134_v34 = vshll.u32 %v5783_v9, 16  ;;  %v248_v8 = vld [vmem:[%s5679_s17 + $0xa0] sm:$0xff] }
  0x3b   : > { %v853_v30 = vld [vmem:[#allocation2 + $0x60] sm:$0xe]  ;;  %v5438_v33 = vld [vmem:[#allocation2 + $0x14] ss:$0 sps:$4 sm:$0x11]   ;;  %v1230_v4 = vshll.u32 %v5785_v10, 16  ;;  %v4961_v42 = vcombine.low %v917_v18, %v5730_v17  ;;  %v1638_v5 = vor.u32 %v1637_v21, %v1633_v20 }
  0x3c   : > { %v813_v31 = vld [vmem:[#allocation2 + $0x60] sm:$0xf]  ;;  %v814_v32 = vld [vmem:[#allocation2 + $0x64] sm:$0xf]  ;;  %v753_v35 = vsel %vm5748_vm9, %v528_v26, %v752_v16  ;;  %1554 = vrot.lane.b32.xlu0 %v5796_v29, %s5580_s20  ;;  %v1396_v40 = vrot.slane %v5438_v33, 1  ;;  %v1136_v54 = vrot.slane %v1134_v34, 1 }
  0x3d   : > { %v4913_v38 = vcombine.low %v853_v30, %v814_v32  ;;  %v5803_v39 = vcombine.low %v813_v31, %v814_v32  ;;  %754 = vst [vmem:[#allocation2 + $0x80] sm:$0x1] %v753_v35  ;;  %v5806_v41 = vld [vmem:[#allocation2 + $0x74] ss:$0 sps:$4 sm:$0x11]   ;;  %v1139_v55 = vshll.u32 %v5438_v33, 16  ;;  %v5240_v32 = vpack.c.bf16 %v233_v58, %v233_v58 }
  0x3e   : > { %v5435_v37 = vld [vmem:[#allocation2 + $0x68] ss:$0 sps:$4 sm:$0x11]   ;;  %v1397_v46 = vsel %vm1391_vm6, %v1395_v11, %v1396_v40  ;;  %v1420_v47 = vrot.slane %v5806_v41, 1  ;;  %v1647_v56 = vshll.u32 %v5796_v29, 16  ;;  %v1928_v61 = vrot.slane %v4961_v42, 1 }
  0x3f   : > { %v1416_v43 = vrot.slane %v4913_v38, 1  ;;  %v1417_v44 = vrot.slane %v5435_v37, 1  ;;  %v5444_v48 = vld [vmem:[#allocation2 + $0x14] ss:$0 sps:$4 sm:$0x11]   ;;  %v1216_v49 = vshrl.u32 %v5803_v39, 16  ;;  %v5837_v33 = vpack.c.bf16 %v248_v8, %v248_v8 }
  0x40   : > { %v1218_v51 = vshll.u32 %v5803_v39, 16  ;;  %1442 = vrot.lane.b32.xlu0 %v1397_v46, %s5578_s18  ;;  %v5817_v53 = vld [vmem:[#allocation2 + $0x74] ss:$0 sps:$4 sm:$0x11]   ;;  %v1223_v17 = vshll.u32 %v5435_v37, 16  ;;  %v1905_v50 = vrot.slane %v5444_v48, 1  ;;  %v1421_v59 = vsel %vm1391_vm6, %v1419_v13, %v1420_v47 }
  0x41   : > { %v1418_v52 = vsel %vm1391_vm6, %v1416_v43, %v1417_v44  ;;  %v1640_v57 = vshll.u32 %v5444_v48, 16  ;;  %v1929_v62 = vrot.slane %v5817_v53, 1  ;;  %v5824_v0 = vld [vmem:[#allocation2 + $0x20] ss:$0 sps:$4 sm:$0x11]   ;;  %v1228_v6 = vshrl.u32 %v5785_v10, 16 }
  0x42   : > { %1456 = vrot.lane.b32.xlu1 %v1418_v52, %s5578_s18  ;;  %v1220_v25 = vrot.slane %v1218_v51, 1  ;;  %v1225_v63 = vrot.slane %v1223_v17, 1  ;;  %v1906_v1 = vsel %vm1391_vm6, %v1904_v14, %v1905_v50  ;;  %v910_v11 = vld [vmem:[#allocation2 + $0x18] sm:$0xe]  ;;  %v1137_v13 = vor.u32 %v1136_v54, %v1132_v24  ;;  %v249_v26 = vld [vmem:[%s5679_s17 + $0xa8] sm:$0xff]  ;;  %s5585_s25 = smov 64  }
  0x43   : > { %v1642_v15 = vrot.slane %v1640_v57, 1  ;;  %v1141_v16 = vrot.slane %v1139_v55, 1  ;;  %v1232_v18 = vrot.slane %v1230_v4, 1  ;;  %v1645_v14 = vshrl.u32 %v5796_v29, 16  ;;  %v926_v37 = vld [vmem:[#allocation2 + $0x18] sm:$0xf] }
  0x44   : > { %v1221_v2 = vor.u32 %v1220_v25, %v1216_v49  ;;  %1952 = vrot.lane.b32.xlu0 %v1906_v1, %s5581_s21  ;;  %v1649_v30 = vrot.slane %v1647_v56, 1  ;;  %v1652_v20 = vshll.u32 %v5824_v0, 16  ;;  %v1930_v21 = vsel %vm1391_vm6, %v1928_v61, %v1929_v62  ;;  %v5849_v42 = vld [vmem:[#allocation2 + $0x1c] sm:$0xf]  ;;  %v699_v25 = vld [vmem:[#allocation2 + $0x24] sm:$0xf] }
  0x45   : > { %v1235_v31 = vshll.u32 %v5806_v41, 16  ;;  %v4954_v24 = vcombine.low %v910_v11, %v5789_v19  ;;  %v1729_v34 = vshrl.u32 %v5735_v22, 16  ;;  %v1733_v35 = vrot.slane %v1731_v7, 1  ;;  %v5851_v19 = vld [vmem:[#allocation2 + $0x80] ss:$0 sps:$4 sm:$0x11]  }
  0x46   : > { %1458 = vrot.lane.b32.xlu1 %v1421_v59, %s5578_s18  ;;  %v1226_v27 = vsel %vm1118_vm4, %v1221_v2, %v1225_v63  ;;  %v5843_v38 = vpack.c.bf16 %v249_v26, %v249_v26  ;;  %v1743_v29 = vshll.u32 %v5777_v3, 16  ;;  %v1643_v4 = vsel %vm1118_vm4, %v1638_v5, %v1642_v15  ;;  %v703_v61 = vld [vmem:[#allocation2 + $0x2c] sm:$0x1]  ;;  %v918_v62 = vld [vmem:[#allocation2 + $0x78] sm:$0xe]  ;;  %s5234_s11 = sshll.u32 %s7253_s13, 5 }
  0x47   : > { %v1142_v40 = vsel %vm1118_vm4, %v1137_v13, %v1141_v16  ;;  %v1233_v41 = vor.u32 %v1232_v18, %v1228_v6  ;;  %v1650_v22 = vor.u32 %v1649_v30, %v1645_v14  ;;  %v1654_v7 = vrot.slane %v1652_v20, 1  ;;  %v5869_v6 = vld [vmem:[#allocation2 + $0x7c] sm:$0xf]  ;;  %v5885_v30 = vld [vmem:[#allocation2 + $0x20] ss:$0 sps:$4 sm:$0x11]   ;;  %s7068_s16 = scalar_lea.vmem %s7224_s3, %s5234_s11 }
  0x48   : > { %1327 = vrot.lane.b32.xlu0 %v1226_v27, %s5579_s19  ;;  %v394_v43 = vshrl.u32 %v5809_v45, 16  ;;  %v397_v44 = vshll.u32 %v5809_v45, 16  ;;  %v1237_v46 = vrot.slane %v1235_v31, 1  ;;  %v1736_v47 = vshll.u32 %v5817_v53, 16 }
  0x49   : > { %v402_v48 = vshrl.u32 %v5240_v32, 16  ;;  %v405_v49 = vshll.u32 %v5240_v32, 16  ;;  %v1907_v51 = vrot.slane %v4954_v24, 1  ;;  %v1734_v52 = vor.u32 %v1733_v35, %v1729_v34  ;;  %v755_v34 = vld [vmem:[#allocation2 + $0x84] sm:$0xf] }
  0x4a   : > { %1968 = vrot.lane.b32.xlu1 %v1930_v21, %s5581_s21  ;;  %v5858_v17 = vcombine.low %v926_v37, %v5849_v42  ;;  %v396_v54 = vrot.slane %v394_v43, 7  ;;  %v1908_v55 = vrot.slane %v5824_v0, 1  ;;  %v1741_v56 = vshrl.u32 %v5777_v3, 16  ;;  %v942_v0 = vld [vmem:[#allocation2 + $0x78] sm:$0xf] }
  0x4b   : > { %v1745_v50 = vrot.slane %v1743_v29, 1  ;;  %v404_v45 = vrot.slane %v402_v48, 7  ;;  %v1655_v53 = vsel %vm1118_vm4, %v1650_v22, %v1654_v7  ;;  %v1748_v57 = vshll.u32 %v5851_v19, 16 }
  0x4c   : > { %1824 = vrot.lane.b32.xlu0 %v1643_v4, %s5582_s22  ;;  %v399_v58 = vor.u32 %v397_v44, %v396_v54  ;;  %v400_v59 = vrot.slane %v396_v54, 4  ;;  %v1238_v63 = vsel %vm1118_vm4, %v1233_v41, %v1237_v46  ;;  %v1738_v1 = vrot.slane %v1736_v47, 1  ;;  %v974_v41 = vld [vmem:[#allocation2 + $0x18] sm:$0xe]  ;;  %v5899_v44 = vld [vmem:[#allocation2 + $0x1c] sm:$0xf] }
  0x4d   : > { %v407_v2 = vor.u32 %v405_v49, %v404_v45  ;;  %v409_v5 = vrot.slane %v404_v45, 4  ;;  %v530_v8 = vshrl.u32 %v5837_v33, 16  ;;  %v533_v11 = vshll.u32 %v5837_v33, 16  ;;  %v5905_v54 = vld [vmem:[#allocation2 + $0x80] ss:$0 sps:$4 sm:$0x11]  }
  0x4e   : > { %1313 = vrot.lane.b32.xlu1 %v1142_v40, %s5579_s19  ;;  %v700_v3 = vsel %vm5700_vm8, %v399_v58, %v699_v25  ;;  %v538_v15 = vshrl.u32 %v5843_v38, 16  ;;  %v2147_v13 = vshll.u32 %v5858_v17, 16  ;;  %v541_v26 = vshll.u32 %v5843_v38, 16  ;;  %v759_v38 = vld [vmem:[#allocation2 + $0x8c] sm:$0x1] }
  0x4f   : > { %v408_v16 = vsel %vm5691_vm7, %v400_v59, %v407_v2  ;;  %701 = vst [vmem:[#allocation2 + $0x24] sm:$0xf] %v700_v3  ;;  %v704_v18 = vsel %vm5748_vm9, %v409_v5, %v703_v61  ;;  %v4962_v27 = vcombine.low %v918_v62, %v5770_v60  ;;  %v1909_v14 = vsel %vm1391_vm6, %v1907_v51, %v1908_v55  ;;  %v801_v40 = vld [vmem:[#allocation2 + $0x18] sm:$0xf] }
  0x50   : > { %1826 = vrot.lane.b32.xlu0 %v1655_v53, %s5582_s22  ;;  %702 = vst.msk [vmem:[#allocation2 + $0x28] sm:$0xf] %vm172_vm0, %v408_v16  ;;  %705 = vst [vmem:[#allocation2 + $0x2c] sm:$0x1] %v704_v18  ;;  %v532_v20 = vrot.slane %v530_v8, 7  ;;  %v540_v21 = vrot.slane %v538_v15, 7  ;;  %v1739_v31 = vsel %vm1118_vm4, %v1734_v52, %v1738_v1  ;;  %v1746_v32 = vor.u32 %v1745_v50, %v1741_v56 }
  0x51   : > { %v1750_v33 = vrot.slane %v1748_v57, 1  ;;  %v5889_v24 = vcombine.low %v942_v0, %v5869_v6  ;;  %v2145_v29 = vshrl.u32 %v5858_v17, 16  ;;  %v2149_v4 = vrot.slane %v2147_v13, 1  ;;  %v234_v57 = vld [vmem:[%s5679_s17 + $0x30] sm:$0xff]  ;;  %v982_v59 = vld [vmem:[#allocation2 + $0x78] sm:$0xe] }
  0x52   : > { %1329 = vrot.lane.b32.xlu1 %v1238_v63, %s5579_s19  ;;  %v535_v60 = vor.u32 %v533_v11, %v532_v20  ;;  %v536_v35 = vrot.slane %v532_v20, 4  ;;  %v543_v37 = vor.u32 %v541_v26, %v540_v21  ;;  %v2152_v22 = vshll.u32 %v5885_v30, 16  ;;  %v5924_v63 = vld [vmem:[#allocation2 + $0x20] ss:$0 sps:$4 sm:$0x11]   ;;  %v235_v13 = vld [vmem:[%s5679_s17 + $0x38] sm:$0xff] }
  0x53   : > { %v545_v46 = vrot.slane %v540_v21, 4  ;;  %v1751_v47 = vsel %vm1118_vm4, %v1746_v32, %v1750_v33  ;;  %v1931_v48 = vrot.slane %v4962_v27, 1  ;;  %v1932_v49 = vrot.slane %v5851_v19, 1  ;;  %v817_v11 = vld [vmem:[#allocation2 + $0x78] sm:$0xf] }
  0x54   : > { %1954 = vrot.lane.b32.xlu0 %v1909_v14, %s5581_s21  ;;  %v544_v7 = vsel %vm5691_vm7, %v536_v35, %v543_v37  ;;  %v756_v43 = vsel %vm5700_vm8, %v535_v60, %v755_v34  ;;  %v2243_v51 = vshll.u32 %v5889_v24, 16  ;;  %v5914_v19 = vcombine.low %v801_v40, %v5899_v44  ;;  %v5932_v15 = vld [vmem:[#allocation2 + $0x7c] sm:$0xf]  ;;  %v5946_v34 = vld [vmem:[#allocation2 + $0x80] ss:$0 sps:$4 sm:$0x11]  }
  0x55   : > { %757 = vst [vmem:[#allocation2 + $0x84] sm:$0xf] %v756_v43  ;;  %758 = vst.msk [vmem:[#allocation2 + $0x88] sm:$0xf] %vm172_vm0, %v544_v7  ;;  %v760_v55 = vsel %vm5748_vm9, %v545_v46, %v759_v38  ;;  %v2150_v45 = vor.u32 %v2149_v4, %v2145_v29  ;;  %v2154_v25 = vrot.slane %v2152_v22, 1  ;;  %v5001_v58 = vcombine.low %v974_v41, %v5849_v42  ;;  %v250_v60 = vld [vmem:[%s5679_s17 + $0xb0] sm:$0xff] }
  0x56   : > { %1840 = vrot.lane.b32.xlu1 %v1739_v31, %s5582_s22  ;;  %v928_v52 = vld [vmem:[#allocation2 + $0x24] sm:$0xf]  ;;  %761 = vst [vmem:[#allocation2 + $0x8c] sm:$0x1] %v760_v55  ;;  %v2241_v61 = vshrl.u32 %v5889_v24, 16  ;;  %v2245_v62 = vrot.slane %v2243_v51, 1  ;;  %v5939_v20 = vpack.c.bf16 %v234_v57, %v234_v57  ;;  %v5009_v35 = vcombine.low %v982_v59, %v5869_v6 }
  0x57   : > { %v5911_v56 = vld [vmem:[#allocation2 + $0x28] sm:$0xf]  ;;  %v5918_v53 = vld [vmem:[#allocation2 + $0x2c] ss:$0 sps:$4 sm:$0x11]   ;;  %v2248_v3 = vshll.u32 %v5905_v54, 16  ;;  %v2155_v16 = vsel %vm1118_vm4, %v2150_v45, %v2154_v25  ;;  %v5962_v46 = vcombine.low %v817_v11, %v5932_v15 }
  0x58   : > { %2064 = vrot.lane.b32.xlu0 %v5858_v17, %s5583_s23  ;;  %v4970_v50 = vcombine.low %v928_v52, %v5911_v56  ;;  %v1933_v17 = vsel %vm1391_vm6, %v1931_v48, %v1932_v49  ;;  %v803_v1 = vld [vmem:[#allocation2 + $0x24] sm:$0xf]  ;;  %v2164_v5 = vshll.u32 %v5918_v53, 16  ;;  %v5928_v8 = vld [vmem:[#allocation2 + $0x28] sm:$0xf]  ;;  %v1146_v42 = vshll.u32 %v5914_v19, 16 }
  0x59   : > { %v2416_v31 = vrot.slane %v5001_v58, 1  ;;  %v2417_v32 = vrot.slane %v5885_v30, 1  ;;  %v5944_v33 = vcombine.low %v803_v1, %v5928_v8  ;;  %v2246_v38 = vor.u32 %v2245_v62, %v2241_v61  ;;  %v251_v7 = vld [vmem:[%s5679_s17 + $0xb8] sm:$0xff]  ;;  %v5959_v43 = vld [vmem:[#allocation2 + $0x2c] ss:$0 sps:$4 sm:$0x11]  }
  0x5a   : > { %1842 = vrot.lane.b32.xlu1 %v1751_v47, %s5582_s22  ;;  %v2159_v2 = vshll.u32 %v4970_v50, 16  ;;  %v2157_v0 = vshrl.u32 %v4970_v50, 16  ;;  %v2166_v26 = vrot.slane %v2164_v5, 1  ;;  %v2250_v29 = vrot.slane %v2248_v3, 1  ;;  %v975_v49 = vld [vmem:[#allocation2 + $0x24] sm:$0xe] }
  0x5b   : > { %v1144_v41 = vshrl.u32 %v5914_v19, 16  ;;  %v1148_v30 = vrot.slane %v1146_v42, 1  ;;  %v1151_v22 = vshll.u32 %v5924_v63, 16  ;;  %v5242_v47 = vpack.c.bf16 %v235_v13, %v235_v13  ;;  %v236_v58 = vld [vmem:[%s5679_s17 + $0x40] sm:$0xff] }
  0x5c   : > { %2066 = vrot.lane.b32.xlu0 %v4970_v50, %s5583_s23  ;;  %v2161_v18 = vrot.slane %v2159_v2, 1  ;;  %v944_v27 = vld [vmem:[#allocation2 + $0x84] sm:$0xf]  ;;  %v5937_v14 = vld [vmem:[#allocation2 + $0x88] sm:$0xf]  ;;  %v5964_v48 = vpack.c.bf16 %v250_v60, %v250_v60  ;;  %v1158_v50 = vshll.u32 %v5944_v33, 16  ;;  %v5970_v57 = vpack.c.bf16 %v251_v7, %v251_v7 }
  0x5d   : > { %v4978_v21 = vcombine.low %v944_v27, %v5937_v14  ;;  %v5950_v4 = vld [vmem:[#allocation2 + $0x8c] ss:$0 sps:$4 sm:$0x11]   ;;  %v2440_v45 = vrot.slane %v5009_v35, 1  ;;  %v2441_v25 = vrot.slane %v5905_v54, 1  ;;  %v2251_v59 = vsel %vm1118_vm4, %v2246_v38, %v2250_v29 }
  0x5e   : > { %1970 = vrot.lane.b32.xlu1 %v1933_v17, %s5581_s21  ;;  %v2162_v37 = vor.u32 %v2161_v18, %v2157_v0  ;;  %v2260_v55 = vshll.u32 %v5950_v4, 16  ;;  %v237_v17 = vld [vmem:[%s5679_s17 + $0x48] sm:$0xff]  ;;  %v1149_v61 = vor.u32 %v1148_v30, %v1144_v41  ;;  %v1153_v62 = vrot.slane %v1151_v22, 1  ;;  %v847_v2 = vld [vmem:[#allocation2 + $0x18] sm:$0xe] }
  0x5f   : > { %v2255_v40 = vshll.u32 %v4978_v21, 16  ;;  %v2253_v51 = vshrl.u32 %v4978_v21, 16  ;;  %v1247_v1 = vshll.u32 %v5946_v34, 16  ;;  %v5002_v0 = vcombine.low %v975_v49, %v5911_v56  ;;  %v5983_v18 = vld [vmem:[#allocation2 + $0x78] sm:$0xe] }
  0x60   : > { %2336 = vrot.lane.b32.xlu0 %v2155_v16, %s5584_s24  ;;  %v2167_v6 = vsel %vm1118_vm4, %v2162_v37, %v2166_v26  ;;  %v1156_v5 = vshrl.u32 %v5944_v33, 16  ;;  %v1240_v54 = vshrl.u32 %v5962_v46, 16  ;;  %v1242_v3 = vshll.u32 %v5962_v46, 16  ;;  %v819_v56 = vld [vmem:[#allocation2 + $0x84] sm:$0xf] }
  0x61   : > { %v2257_v52 = vrot.slane %v2255_v40, 1  ;;  %v2262_v11 = vrot.slane %v2260_v55, 1  ;;  %v1160_v13 = vrot.slane %v1158_v50, 1  ;;  %v1163_v16 = vshll.u32 %v5959_v43, 16  ;;  %v848_v35 = vld [vmem:[#allocation2 + $0x24] sm:$0xe] }
  0x62   : > { %2080 = vrot.lane.b32.xlu1 %v5889_v24, %s5583_s23  ;;  %v2418_v24 = vsel %vm1391_vm6, %v2416_v31, %v2417_v32  ;;  %v2442_v26 = vsel %vm1391_vm6, %v2440_v45, %v2441_v25  ;;  %v4907_v27 = vcombine.low %v847_v2, %v5899_v44  ;;  %v5987_v31 = vld [vmem:[#allocation2 + $0x88] sm:$0xf]  ;;  %v5991_v32 = vpack.c.bf16 %v237_v17, %v237_v17  ;;  %v983_v40 = vld [vmem:[#allocation2 + $0x84] sm:$0xe] }
  0x63   : > { %v2258_v42 = vor.u32 %v2257_v52, %v2253_v51  ;;  %v1154_v60 = vsel %vm1118_vm4, %v1149_v61, %v1153_v62  ;;  %v411_v37 = vshrl.u32 %v5939_v20, 16  ;;  %v414_v38 = vshll.u32 %v5939_v20, 16  ;;  %v710_v62 = vld [vmem:[#allocation2 + $0x38] sm:$0x1] }
  0x64   : > { %2338 = vrot.lane.b32.xlu0 %v2167_v6, %s5584_s24  ;;  %v419_v29 = vshrl.u32 %v5242_v47, 16  ;;  %v2419_v44 = vrot.slane %v5002_v0, 1  ;;  %v2420_v41 = vrot.slane %v5918_v53, 1  ;;  %v1244_v30 = vrot.slane %v1242_v3, 1 }
  0x65   : > { %v422_v22 = vshll.u32 %v5242_v47, 16  ;;  %v2263_v7 = vsel %vm1118_vm4, %v2258_v42, %v2262_v11  ;;  %v6001_v6 = vcombine.low %v819_v56, %v5987_v31  ;;  %v413_v49 = vrot.slane %v411_v37, 7  ;;  %v865_v42 = vld [vmem:[#allocation2 + $0x24] sm:$0xf] }
  0x66   : > { %2082 = vrot.lane.b32.xlu1 %v4978_v21, %s5583_s23  ;;  %v5989_v21 = vpack.c.bf16 %v236_v58, %v236_v58  ;;  %v421_v51 = vrot.slane %v419_v29, 7  ;;  %v1161_v52 = vor.u32 %v1160_v13, %v1156_v5  ;;  %v1165_v55 = vrot.slane %v1163_v16, 1 }
  0x67   : > { %7237 = vst [vmem:[#allocation3_spill] sm:$0xff] %v6001_v6  ;;  %v4908_v20 = vcombine.low %v848_v35, %v5928_v8  ;;  %v4915_v50 = vcombine.low %v5983_v18, %v5932_v15  ;;  %v5010_v45 = vcombine.low %v983_v40, %v5937_v14  ;;  %v416_v53 = vor.u32 %v414_v38, %v413_v49  ;;  %v6010_v8 = vld [vmem:[#allocation2 + $0x8c] ss:$0 sps:$4 sm:$0x11]   ;;  %v252_v18 = vld [vmem:[%s5679_s17 + $0xc0] sm:$0xff] }
  0x68   : > { %2464 = vrot.lane.b32.xlu0 %v2418_v24, %s5585_s25  ;;  %v706_v24 = vld [vmem:[#allocation2 + $0x30] sm:$0xf]  ;;  %v417_v47 = vrot.slane %v413_v49, 4  ;;  %v424_v25 = vor.u32 %v422_v22, %v421_v51  ;;  %v2421_v58 = vsel %vm1391_vm6, %v2419_v44, %v2420_v41  ;;  %v1245_v17 = vor.u32 %v1244_v30, %v1240_v54 }
  0x69   : > { %v1398_v61 = vrot.slane %v4907_v27, 1  ;;  %v1254_v2 = vshll.u32 %v6001_v6, 16  ;;  %v707_v0 = vsel %vm5700_vm8, %v416_v53, %v706_v24  ;;  %v426_v5 = vrot.slane %v421_v51, 4  ;;  %v6024_v27 = vld [vmem:[#allocation2 + $0x28] sm:$0xf] }
  0x6a   : > { %2352 = vrot.lane.b32.xlu1 %v2251_v59, %s5584_s24  ;;  %v1249_v59 = vrot.slane %v1247_v1, 1  ;;  %v425_v14 = vsel %vm5691_vm7, %v417_v47, %v424_v25  ;;  %v1166_v3 = vsel %vm1118_vm4, %v1161_v52, %v1165_v55  ;;  %708 = vst [vmem:[#allocation2 + $0x30] sm:$0xf] %v707_v0  ;;  %v547_v1 = vshrl.u32 %v5964_v48, 16  ;;  %v762_v41 = vld [vmem:[#allocation2 + $0x90] sm:$0xf] }
  0x6b   : > { %709 = vst.msk [vmem:[#allocation2 + $0x34] sm:$0xf] %vm172_vm0, %v425_v14  ;;  %v550_v54 = vshll.u32 %v5964_v48, 16  ;;  %v555_v11 = vshrl.u32 %v5970_v57, 16  ;;  %v1399_v13 = vrot.slane %v5924_v63, 1  ;;  %v2443_v16 = vrot.slane %v5010_v45, 1 }
  0x6c   : > { %1315 = vrot.lane.b32.xlu0 %v1154_v60, %s5579_s19  ;;  %v711_v56 = vsel %vm5748_vm9, %v426_v5, %v710_v62  ;;  %v558_v60 = vshll.u32 %v5970_v57, 16  ;;  %v1250_v35 = vsel %vm1118_vm4, %v1245_v17, %v1249_v59  ;;  %v2444_v48 = vrot.slane %v5950_v4, 1  ;;  %v6055_v62 = vld [vmem:[#allocation2 + $0x2c] ss:$0 sps:$4 sm:$0x11]  }
  0x6d   : > { %712 = vst [vmem:[#allocation2 + $0x38] sm:$0x1] %v711_v56  ;;  %v549_v37 = vrot.slane %v547_v1, 7  ;;  %v557_v38 = vrot.slane %v555_v11, 7  ;;  %v1401_v29 = vrot.slane %v4908_v20, 1  ;;  %v1252_v63 = vshrl.u32 %v6001_v6, 16 }
  0x6e   : > { %2354 = vrot.lane.b32.xlu1 %v2263_v7, %s5584_s24  ;;  %v1256_v40 = vrot.slane %v1254_v2, 1  ;;  %v1259_v44 = vshll.u32 %v6010_v8, 16  ;;  %v6035_v30 = vcombine.low %v865_v42, %v6024_v27  ;;  %v766_v7 = vld [vmem:[#allocation2 + $0x98] sm:$0x1]  ;;  %v1400_v4 = vsel %vm1391_vm6, %v1398_v61, %v1399_v13  ;;  %v856_v20 = vld [vmem:[#allocation2 + $0x84] sm:$0xe] }
  0x6f   : > { %v552_v57 = vor.u32 %v550_v54, %v549_v37  ;;  %v553_v22 = vrot.slane %v549_v37, 4  ;;  %v1402_v49 = vrot.slane %v5959_v43, 1  ;;  %v562_v51 = vrot.slane %v557_v38, 4  ;;  %v881_v2 = vld [vmem:[#allocation2 + $0x84] sm:$0xf] }
  0x70   : > { %2466 = vrot.lane.b32.xlu0 %v2421_v58, %s5585_s25  ;;  %v428_v52 = vshrl.u32 %v5989_v21, 16  ;;  %v2445_v55 = vsel %vm1391_vm6, %v2443_v16, %v2444_v48  ;;  %v436_v53 = vshrl.u32 %v5991_v32, 16  ;;  %v1257_v47 = vor.u32 %v1256_v40, %v1252_v63  ;;  %v713_v14 = vld [vmem:[#allocation2 + $0x3c] sm:$0xf]  ;;  %v6059_v5 = vld [vmem:[#allocation2 + $0x88] sm:$0xf] }
  0x71   : > { %v763_v45 = vsel %vm5700_vm8, %v552_v57, %v762_v41  ;;  %v1261_v25 = vrot.slane %v1259_v44, 1  ;;  %v867_v58 = vld [vmem:[#allocation2 + $0x30] sm:$0xf]  ;;  %v767_v17 = vsel %vm5748_vm9, %v562_v51, %v766_v7  ;;  %v431_v59 = vshll.u32 %v5989_v21, 16 }
  0x72   : > { %2480 = vrot.lane.b32.xlu1 %v2442_v26, %s5585_s25  ;;  %v560_v26 = vor.u32 %v558_v60, %v557_v38  ;;  %v6048_v43 = vld [vmem:[#allocation2 + $0x34] sm:$0xf]  ;;  %764 = vst [vmem:[#allocation2 + $0x90] sm:$0xf] %v763_v45  ;;  %v1659_v61 = vshll.u32 %v6035_v30, 16  ;;  %v1403_v0 = vsel %vm1391_vm6, %v1401_v29, %v1402_v49  ;;  %v1422_v21 = vrot.slane %v4915_v50, 1 }
  0x73   : > { %768 = vst [vmem:[#allocation2 + $0x98] sm:$0x1] %v767_v17  ;;  %v1423_v42 = vrot.slane %v5946_v34, 1  ;;  %v4924_v1 = vcombine.low %v867_v58, %v6048_v43  ;;  %v438_v54 = vrot.slane %v436_v53, 7  ;;  %v1262_v11 = vsel %vm1118_vm4, %v1257_v47, %v1261_v25  ;;  %v253_v29 = vld [vmem:[%s5679_s17 + $0xc8] sm:$0xff] }
  0x74   : > { %1317 = vrot.lane.b32.xlu0 %v1166_v3, %s5579_s19  ;;  %v561_v24 = vsel %vm5691_vm7, %v553_v22, %v560_v26  ;;  %v430_v3 = vrot.slane %v428_v52, 7  ;;  %v4916_v13 = vcombine.low %v856_v20, %v5987_v31  ;;  %v1657_v16 = vshrl.u32 %v6035_v30, 16  ;;  %v6080_v37 = vld [vmem:[#allocation2 + $0x38] ss:$0 sps:$4 sm:$0x11]  }
  0x75   : > { %765 = vst.msk [vmem:[#allocation2 + $0x94] sm:$0xf] %vm172_vm0, %v561_v24  ;;  %v1661_v60 = vrot.slane %v1659_v61, 1  ;;  %v439_v15 = vshll.u32 %v5991_v32, 16  ;;  %v6075_v34 = vcombine.low %v881_v2, %v6059_v5  ;;  %v1671_v31 = vshll.u32 %v4924_v1, 16 }
  0x76   : > { %1331 = vrot.lane.b32.xlu1 %v1250_v35, %s5579_s19  ;;  %v433_v56 = vor.u32 %v431_v59, %v430_v3  ;;  %v1664_v35 = vshll.u32 %v6055_v62, 16  ;;  %v434_v48 = vrot.slane %v430_v3, 4  ;;  %v1424_v63 = vsel %vm1391_vm6, %v1422_v21, %v1423_v42  ;;  %v911_v49 = vld [vmem:[#allocation2 + $0x24] sm:$0xe]  ;;  %v769_v61 = vld [vmem:[#allocation2 + $0x9c] sm:$0xf] }
  0x77   : > { %v441_v38 = vor.u32 %v439_v15, %v438_v54  ;;  %v1425_v32 = vrot.slane %v4916_v13, 1  ;;  %v1426_v40 = vrot.slane %v6010_v8, 1  ;;  %v5259_v44 = vpack.c.bf16 %v252_v18, %v252_v18  ;;  %v6095_v24 = vld [vmem:[#allocation2 + $0x8c] ss:$0 sps:$4 sm:$0x11]  }
  0x78   : > { %1444 = vrot.lane.b32.xlu0 %v1400_v4, %s5578_s18  ;;  %v714_v50 = vsel %vm5700_vm8, %v433_v56, %v713_v14  ;;  %v1662_v41 = vor.u32 %v1661_v60, %v1657_v16  ;;  %v1666_v57 = vrot.slane %v1664_v35, 1  ;;  %v717_v4 = vld [vmem:[#allocation2 + $0x44] sm:$0x1]  ;;  %v1755_v51 = vshll.u32 %v6075_v34, 16  ;;  %v912_v2 = vld [vmem:[#allocation2 + $0x30] sm:$0xe] }
  0x79   : > { %715 = vst [vmem:[#allocation2 + $0x3c] sm:$0xf] %v714_v50  ;;  %v883_v22 = vld [vmem:[#allocation2 + $0x90] sm:$0xf]  ;;  %v442_v7 = vsel %vm5691_vm7, %v434_v48, %v441_v38  ;;  %v5260_v52 = vpack.c.bf16 %v253_v29, %v253_v29  ;;  %v1669_v8 = vshrl.u32 %v4924_v1, 16  ;;  %v1676_v20 = vshll.u32 %v6080_v37, 16 }
  0x7a   : > { %2482 = vrot.lane.b32.xlu1 %v2445_v55, %s5585_s25  ;;  %716 = vst.msk [vmem:[#allocation2 + $0x40] sm:$0xf] %vm172_vm0, %v442_v7  ;;  %v1673_v55 = vrot.slane %v1671_v31, 1  ;;  %v1427_v45 = vsel %vm1391_vm6, %v1425_v32, %v1426_v40  ;;  %v443_v47 = vrot.slane %v438_v54, 4  ;;  %v564_v25 = vshrl.u32 %v5259_v44, 16 }
  0x7b   : > { %v1667_v58 = vsel %vm1118_vm4, %v1662_v41, %v1666_v57  ;;  %v1753_v17 = vshrl.u32 %v6075_v34, 16  ;;  %v567_v59 = vshll.u32 %v5259_v44, 16  ;;  %v1757_v14 = vrot.slane %v1755_v51, 1  ;;  %v930_v15 = vld [vmem:[#allocation2 + $0x30] sm:$0xf] }
  0x7c   : > { %1446 = vrot.lane.b32.xlu0 %v1403_v0, %s5578_s18  ;;  %v6085_v26 = vld [vmem:[#allocation2 + $0x94] sm:$0xf]  ;;  %v718_v0 = vsel %vm5748_vm9, %v443_v47, %v717_v4  ;;  %v566_v3 = vrot.slane %v564_v25, 7  ;;  %v572_v21 = vshrl.u32 %v5260_v52, 16  ;;  %v1674_v42 = vor.u32 %v1673_v55, %v1669_v8  ;;  %v919_v38 = vld [vmem:[#allocation2 + $0x84] sm:$0xe] }
  0x7d   : > { %v4932_v53 = vcombine.low %v883_v22, %v6085_v26  ;;  %v1678_v54 = vrot.slane %v1676_v20, 1  ;;  %719 = vst [vmem:[#allocation2 + $0x44] sm:$0x1] %v718_v0  ;;  %v575_v13 = vshll.u32 %v5260_v52, 16  ;;  %v4956_v35 = vcombine.low %v912_v2, %v6048_v43  ;;  %v6111_v18 = vld [vmem:[#allocation2 + $0x34] sm:$0xf] }
  0x7e   : > { %1333 = vrot.lane.b32.xlu1 %v1262_v11, %s5579_s19  ;;  %v6107_v11 = vld [vmem:[#allocation2 + $0x98] ss:$0 sps:$4 sm:$0x11]   ;;  %v569_v56 = vor.u32 %v567_v59, %v566_v3  ;;  %v570_v60 = vrot.slane %v566_v3, 4  ;;  %v1758_v32 = vor.u32 %v1757_v14, %v1753_v17  ;;  %v773_v40 = vld [vmem:[#allocation2 + $0xa4] sm:$0x1]  ;;  %v4971_v4 = vcombine.low %v930_v15, %v6111_v18 }
  0x7f   : > { %v1767_v16 = vshll.u32 %v4932_v53, 16  ;;  %v1679_v29 = vsel %vm1118_vm4, %v1674_v42, %v1678_v54  ;;  %v1765_v44 = vshrl.u32 %v4932_v53, 16  ;;  %v1772_v57 = vshll.u32 %v6107_v11, 16  ;;  %v6120_v22 = vld [vmem:[#allocation2 + $0x38] ss:$0 sps:$4 sm:$0x11]  }
  0x80   : > { %1556 = vrot.lane.b32.xlu0 %v6035_v30, %s5580_s20  ;;  %v4955_v30 = vcombine.low %v911_v49, %v6024_v27  ;;  %v1760_v27 = vshll.u32 %v6095_v24, 16  ;;  %v770_v31 = vsel %vm5700_vm8, %v569_v56, %v769_v61  ;;  %v6125_v49 = vld [vmem:[#allocation2 + $0x94] sm:$0xf]  ;;  %v920_v51 = vld [vmem:[#allocation2 + $0x90] sm:$0xe]  ;;  %v1913_v52 = vrot.slane %v4956_v35, 1 }
  0x81   : > { %771 = vst [vmem:[#allocation2 + $0x9c] sm:$0xf] %v770_v31  ;;  %v1769_v41 = vrot.slane %v1767_v16, 1  ;;  %v1914_v8 = vrot.slane %v6080_v37, 1  ;;  %v4963_v55 = vcombine.low %v919_v38, %v6059_v5  ;;  %v6133_v47 = vld [vmem:[#allocation2 + $0x40] sm:$0xf]  ;;  %v4964_v5 = vcombine.low %v920_v51, %v6085_v26 }
  0x82   : > { %1460 = vrot.lane.b32.xlu1 %v1424_v63, %s5578_s18  ;;  %v1910_v48 = vrot.slane %v4955_v30, 1  ;;  %v1911_v63 = vrot.slane %v6055_v62, 1  ;;  %v1762_v43 = vrot.slane %v1760_v27, 1  ;;  %v1774_v17 = vrot.slane %v1772_v57, 1  ;;  %v805_v16 = vld [vmem:[#allocation2 + $0x30] sm:$0xf] }
  0x83   : > { %v2171_v37 = vshll.u32 %v4971_v4, 16  ;;  %v2176_v2 = vshll.u32 %v6120_v22, 16  ;;  %v1915_v14 = vsel %vm1391_vm6, %v1913_v52, %v1914_v8  ;;  %v1934_v3 = vrot.slane %v4963_v55, 1  ;;  %v6150_v42 = vld [vmem:[#allocation2 + $0x98] ss:$0 sps:$4 sm:$0x11]  }
  0x84   : > { %1558 = vrot.lane.b32.xlu0 %v4924_v1, %s5580_s20  ;;  %v574_v1 = vrot.slane %v572_v21, 7  ;;  %v1912_v20 = vsel %vm1391_vm6, %v1910_v48, %v1911_v63  ;;  %v1763_v30 = vsel %vm1118_vm4, %v1758_v32, %v1762_v43  ;;  %v1935_v21 = vrot.slane %v6095_v24, 1  ;;  %v238_v56 = vld [vmem:[%s5679_s17 + $0x50] sm:$0xff]  ;;  %v239_v24 = vld [vmem:[%s5679_s17 + $0x58] sm:$0xff] }
  0x85   : > { %v2169_v27 = vshrl.u32 %v4971_v4, 16  ;;  %v1938_v35 = vrot.slane %v6107_v11, 1  ;;  %v2178_v48 = vrot.slane %v2176_v2, 1  ;;  %v6156_v15 = vld [vmem:[#allocation2 + $0x34] sm:$0xf]  ;;  %v255_v31 = vld [vmem:[%s5679_s17 + $0xd8] sm:$0xff]  ;;  %v5245_v52 = vpack.c.bf16 %v238_v56, %v238_v56 }
  0x86   : > { %1462 = vrot.lane.b32.xlu1 %v1427_v45, %s5578_s18  ;;  %v577_v50 = vor.u32 %v575_v13, %v574_v1  ;;  %v579_v62 = vrot.slane %v574_v1, 4  ;;  %v932_v45 = vld [vmem:[#allocation2 + $0x3c] sm:$0xf]  ;;  %v2173_v13 = vrot.slane %v2171_v37, 1  ;;  %v1937_v1 = vrot.slane %v4964_v5, 1 }
  0x87   : > { %v4972_v61 = vcombine.low %v932_v45, %v6133_v47  ;;  %v6162_v38 = vld [vmem:[#allocation2 + $0x44] ss:$0 sps:$4 sm:$0x11]   ;;  %v984_v63 = vld [vmem:[#allocation2 + $0x90] sm:$0xe]  ;;  %v2272_v43 = vshll.u32 %v6150_v42, 16 }
  0x88   : > { %1828 = vrot.lane.b32.xlu0 %v1667_v58, %s5582_s22  ;;  %v578_v7 = vsel %vm5691_vm7, %v570_v60, %v577_v50  ;;  %v774_v25 = vsel %vm5748_vm9, %v579_v62, %v773_v40  ;;  %v1770_v58 = vor.u32 %v1769_v41, %v1765_v44  ;;  %v254_v50 = vld [vmem:[%s5679_s17 + $0xd0] sm:$0xff]  ;;  %v2174_v40 = vor.u32 %v2173_v13, %v2169_v27  ;;  %v948_v11 = vld [vmem:[#allocation2 + $0x9c] sm:$0xf]  ;;  %v6174_v51 = vld [vmem:[#allocation2 + $0x38] ss:$0 sps:$4 sm:$0x11]  }
  0x89   : > { %772 = vst.msk [vmem:[#allocation2 + $0xa0] sm:$0xf] %vm172_vm0, %v578_v7  ;;  %775 = vst [vmem:[#allocation2 + $0xa4] sm:$0x1] %v774_v25  ;;  %v2183_v60 = vshll.u32 %v4972_v61, 16  ;;  %v2423_v57 = vrot.slane %v6120_v22, 1  ;;  %v6171_v7 = vcombine.low %v805_v16, %v6156_v15  ;;  %v6178_v45 = vpack.c.bf16 %v254_v50, %v254_v50 }
  0x8a   : > { %1572 = vrot.lane.b32.xlu1 %v6075_v34, %s5580_s20  ;;  %v946_v34 = vld [vmem:[#allocation2 + $0x90] sm:$0xf]  ;;  %v1775_v0 = vsel %vm1118_vm4, %v1770_v58, %v1774_v17  ;;  %v977_v8 = vld [vmem:[#allocation2 + $0x3c] sm:$0xe]  ;;  %v2188_v55 = vshll.u32 %v6162_v38, 16  ;;  %v6180_v25 = vpack.c.bf16 %v255_v31, %v255_v31  ;;  %v1939_v22 = vsel %vm1391_vm6, %v1937_v1, %v1938_v35 }
  0x8b   : > { %v6139_v59 = vcombine.low %v946_v34, %v6125_v49  ;;  %7238 = vst [vmem:[#allocation4_spill] sm:$0xff] %v6171_v7  ;;  %v2181_v34 = vshrl.u32 %v4972_v61, 16  ;;  %v2185_v62 = vrot.slane %v2183_v60, 1  ;;  %v2274_v58 = vrot.slane %v2272_v43, 1  ;;  %v807_v2 = vld [vmem:[#allocation2 + $0x3c] sm:$0xf] }
  0x8c   : > { %1830 = vrot.lane.b32.xlu0 %v1679_v29, %s5582_s22  ;;  %v1936_v29 = vsel %vm1391_vm6, %v1934_v3, %v1935_v21  ;;  %v2179_v17 = vsel %vm1118_vm4, %v2174_v40, %v2178_v48  ;;  %v5011_v37 = vcombine.low %v984_v63, %v6125_v49  ;;  %v6199_v27 = vld [vmem:[#allocation2 + $0x94] sm:$0xf]  ;;  %v445_v49 = vshrl.u32 %v5245_v52, 16 }
  0x8d   : > { %v2267_v26 = vshll.u32 %v6139_v59, 16  ;;  %v2186_v21 = vor.u32 %v2185_v62, %v2181_v34  ;;  %v2190_v13 = vrot.slane %v2188_v55, 1  ;;  %v448_v16 = vshll.u32 %v5245_v52, 16  ;;  %v724_v62 = vld [vmem:[#allocation2 + $0x50] sm:$0x1] }
  0x8e   : > { %1574 = vrot.lane.b32.xlu1 %v4932_v53, %s5580_s20  ;;  %v976_v53 = vld [vmem:[#allocation2 + $0x30] sm:$0xe]  ;;  %v1168_v1 = vshrl.u32 %v6171_v7, 16  ;;  %v447_v48 = vrot.slane %v445_v49, 7  ;;  %v2447_v49 = vrot.slane %v6150_v42, 1  ;;  %vm2836_vm10 = vcmask 1043456  }
  0x8f   : > { %v5003_v54 = vcombine.low %v976_v53, %v6111_v18  ;;  %v2265_v18 = vshrl.u32 %v6139_v59, 16  ;;  %v2269_v32 = vrot.slane %v2267_v26, 1  ;;  %v1170_v53 = vshll.u32 %v6171_v7, 16 }
  0x90   : > { %1956 = vrot.lane.b32.xlu0 %v1912_v20, %s5581_s21  ;;  %v6167_v44 = vld [vmem:[#allocation2 + $0xa0] sm:$0xf]  ;;  %v5246_v20 = vpack.c.bf16 %v239_v24, %v239_v24  ;;  %v1175_v26 = vshll.u32 %v6174_v51, 16  ;;  %v6207_v35 = vld [vmem:[#allocation2 + $0xa4] ss:$0 sps:$4 sm:$0x11]   ;;  %v450_v43 = vor.u32 %v448_v16, %v447_v48 }
  0x91   : > { %v2422_v41 = vrot.slane %v5003_v54, 1  ;;  %v6197_v54 = vld [vmem:[#allocation2 + $0x40] sm:$0xf]  ;;  %v1172_v24 = vrot.slane %v1170_v53, 1  ;;  %v451_v40 = vrot.slane %v447_v48, 4  ;;  %v1405_v42 = vrot.slane %v6174_v51, 1 }
  0x92   : > { %1844 = vrot.lane.b32.xlu1 %v1763_v30, %s5582_s22  ;;  %v6184_v30 = vcombine.low %v948_v11, %v6167_v44  ;;  %v453_v56 = vshrl.u32 %v5246_v20, 16  ;;  %v456_v60 = vshll.u32 %v5246_v20, 16  ;;  %v6210_v50 = vcombine.low %v807_v2, %v6197_v54  ;;  %v823_v16 = vld [vmem:[#allocation2 + $0x9c] sm:$0xf] }
  0x93   : > { %v6189_v5 = vsel %vm1391_vm6, %v2422_v41, %v2423_v57  ;;  %v1177_v63 = vrot.slane %v1175_v26, 1  ;;  %v2191_v11 = vsel %vm1118_vm4, %v2186_v21, %v2190_v13  ;;  %v2426_v41 = vrot.slane %v6162_v38, 1 }
  0x94   : > { %1958 = vrot.lane.b32.xlu0 %v1915_v14, %s5581_s21  ;;  %v821_v14 = vld [vmem:[#allocation2 + $0x90] sm:$0xf]  ;;  %7239 = vst [vmem:[#allocation5_spill] sm:$0xff] %v6210_v50  ;;  %v6222_v57 = vrot.slane %v5011_v37, 1  ;;  %v2284_v20 = vshll.u32 %v6207_v35, 16  ;;  %v589_v21 = vshrl.u32 %v6180_v25, 16 }
  0x95   : > { %v6213_v31 = vcombine.low %v821_v14, %v6199_v27  ;;  %v6236_v37 = vld [vmem:[#allocation2 + $0x98] ss:$0 sps:$4 sm:$0x11]   ;;  %v581_v14 = vshrl.u32 %v6178_v45, 16  ;;  %v592_v26 = vshll.u32 %v6180_v25, 16  ;;  %vm2496_vm11 = vcmask 64512  }
  0x96   : > { %1846 = vrot.lane.b32.xlu1 %v1775_v0, %s5582_s22  ;;  %v5004_v0 = vcombine.low %v977_v8, %v6133_v47  ;;  %v2279_v47 = vshll.u32 %v6184_v30, 16  ;;  %v2277_v8 = vshrl.u32 %v6184_v30, 16  ;;  %v2286_v25 = vrot.slane %v2284_v20, 1 }
  0x97   : > { %7240 = vst [vmem:[#allocation6_spill] sm:$0xff] %v6213_v31  ;;  %v1266_v13 = vshll.u32 %v6213_v31, 16  ;;  %vm2529_vm12 = vcmask 130048   ;;  %vm2562_vm13 = vcmask 195584   ;;  %vm2595_vm14 = vcmask 261120  }
  0x98   : > { %2068 = vrot.lane.b32.xlu0 %v4971_v4, %s5583_s23  ;;  %v2270_v4 = vor.u32 %v2269_v32, %v2265_v18  ;;  %v455_v18 = vrot.slane %v453_v56, 7  ;;  %v6216_v32 = vrot.slane %v5004_v0, 1  ;;  %v2281_v55 = vrot.slane %v2279_v47, 1  ;;  %v6257_v47 = vld [vmem:[#allocation2 + $0xa0] sm:$0xf] }
  0x99   : > { %v584_v0 = vshll.u32 %v6178_v45, 16  ;;  %v6255_v45 = vld [vmem:[%s7222_s1 + $0x18] sm:$0xff]   ;;  %vm2628_vm15 = vcmask 326656   ;;  %vm2661_vm1 = vcmask 392192   ;;  %vm2694_vm2 = vcmask 457728  }
  0x9a   : > { %1972 = vrot.lane.b32.xlu1 %v1936_v29, %s5581_s21  ;;  %v720_v29 = vld [vmem:[#allocation2 + $0x48] sm:$0xf]  ;;  %v458_v34 = vor.u32 %v456_v60, %v455_v18  ;;  %v460_v2 = vrot.slane %v455_v18, 4  ;;  %v2282_v60 = vor.u32 %v2281_v55, %v2277_v8  ;;  %v1180_v18 = vshrl.u32 %v6210_v50, 16  ;;  %v849_v8 = vld [vmem:[#allocation2 + $0x30] sm:$0xe] }
  0x9b   : > { %vm2727_vm3 = vcmask 523264   ;;  %vm2803_vm5 = vcmask 588800  }
  0x9c   : > { %2070 = vrot.lane.b32.xlu0 %v4972_v61, %s5583_s23  ;;  %v6204_v61 = vsel %vm1118_vm4, %v2270_v4, %v2274_v58  ;;  %v1173_v4 = vor.u32 %v1172_v24, %v1168_v1  ;;  %v6233_v58 = vld [vmem:[#allocation2 + $0x44] ss:$0 sps:$4 sm:$0x11]   ;;  %v459_v53 = vsel %vm5691_vm7, %v451_v40, %v458_v34  ;;  %v725_v56 = vsel %vm5748_vm9, %v460_v2, %v724_v62  ;;  %v241_v2 = vld [vmem:[%s5679_s17 + $0x68] sm:$0xff] }
  0x9d   : > { %v6194_v3 = vpop.permute.xlu0 %1440  ;;  %723 = vst.msk [vmem:[#allocation2 + $0x4c] sm:$0xf] %vm172_vm0, %v459_v53  ;;  %726 = vst [vmem:[#allocation2 + $0x50] sm:$0x1] %v725_v56  ;;  %v591_v1 = vrot.slane %v589_v21, 7  ;;  %v6274_v53 = vcombine.low %v823_v16, %v6257_v47  ;;  %v4909_v16 = vcombine.low %v849_v8, %v6156_v15  ;;  %v6296_v15 = vld [vmem:[%s7222_s1 + $0x8] sm:$0xff]  }
  0x9e   : > { %1974 = vrot.lane.b32.xlu1 %v1939_v22, %s5581_s21  ;;  %v721_v22 = vsel %vm5700_vm8, %v450_v43, %v720_v29  ;;  %v1178_v24 = vsel %vm1118_vm4, %v1173_v4, %v1177_v63  ;;  %v1187_v29 = vshll.u32 %v6233_v58, 16  ;;  %v776_v43 = vld [vmem:[#allocation2 + $0xa8] sm:$0xf]  ;;  %v780_v63 = vld [vmem:[#allocation2 + $0xb0] sm:$0x1]  ;;  %v1264_v4 = vshrl.u32 %v6213_v31, 16 }
  0x9f   : > { %722 = vst [vmem:[#allocation2 + $0x48] sm:$0xf] %v721_v22  ;;  %v594_v22 = vor.u32 %v592_v26, %v591_v1  ;;  %7241 = vst [vmem:[#allocation7_spill] sm:$0xff] %v6274_v53  ;;  %v985_v26 = vld [vmem:[#allocation2 + $0x9c] sm:$0xe]  ;;  %v1404_v38 = vrot.slane %v4909_v16, 1 }
  0xa0   : > { %2340 = vrot.lane.b32.xlu0 %v2179_v17, %s5584_s24  ;;  %v1182_v17 = vshll.u32 %v6210_v50, 16 }
  0xa1   : > { %v6224_v52 = vpop.permute.xlu0 %1311 }
  0xa2   : > { %2084 = vrot.lane.b32.xlu1 %v6139_v59, %s5583_s23  ;;  %v5516_v59 = vld [vmem:[%s7222_s1 + $0x20] ss:$0 sps:$4 sm:$0xff]   ;;  %v1184_v62 = vrot.slane %v1182_v17, 1  ;;  %v5520_v17 = vld [vmem:[%s7222_s1 + $0x10] sm:$0xff]  }
  0xa3   : > { %5404 = vmatprep.subr.msk.bf16.mxu0 %vm2836_vm10, %v5516_v59  ;;  %5405 = vmatprep.subr.msk.bf16.mxu1 %vm2836_vm10, %v5516_v59  ;;  %v2838_v40 = vsel %vm2836_vm10, %v5516_v59, 0  ;;  %v1271_v59 = vshll.u32 %v6236_v37, 16  ;;  %vm4652_vm10 = vcmask 1047559  }
  0xa4   : > { %2342 = vrot.lane.b32.xlu0 %v2191_v11, %s5584_s24  ;;  %v240_v11 = vld [vmem:[%s5679_s17 + $0x60] sm:$0xff]  ;;  %5353 = vmatpush3.bf16.msra.mxu0 %v2838_v40 }
  0xa5   : > { %5354 = vmatprep.subr.bf16.mxu0 %v6255_v45  ;;  %5399 = vmatpush3.bf16.msra.mxu1 %v2838_v40  ;;  %v5012_v40 = vcombine.low %v985_v26, %v6167_v44 }
  0xa6   : > { %2086 = vrot.lane.b32.xlu1 %v6184_v30, %s5583_s23  ;;  %v583_v30 = vrot.slane %v581_v14, 7  ;;  %v6259_v48 = vpop.permute.xlu1 %1568  ;;  %v2287_v14 = vsel %vm1118_vm4, %v2282_v60, %v2286_v25  ;;  %5395 = vmatprep.subr.bf16.mxu1 %v6255_v45  ;;  %v5247_v60 = vpack.c.bf16 %v240_v11, %v240_v11  ;;  %v1189_v25 = vrot.slane %v1187_v29, 1 }
  0xa7   : > { %v6267_v34 = vpop.permute.xlu0 %1552  ;;  %v1278_v29 = vshll.u32 %v6274_v53, 16 }
  0xa8   : > { %2468 = vrot.lane.b32.xlu0 %v6189_v5, %s5585_s25  ;;  %v586_v55 = vor.u32 %v584_v0, %v583_v30  ;;  %v587_v20 = vrot.slane %v583_v30, 4  ;;  %v596_v5 = vrot.slane %v591_v1, 4  ;;  %v1268_v0 = vrot.slane %v1266_v13, 1  ;;  %v850_v30 = vld [vmem:[#allocation2 + $0x3c] sm:$0xe]  ;;  %5355 = vmatpush3.bf16.msra.mxu0 %v6255_v45 }
  0xa9   : > { %v1185_v13 = vor.u32 %v1184_v62, %v1180_v18  ;;  %v6298_v1 = vpack.c.bf16 %v241_v2, %v241_v2  ;;  %v6307_v18 = vld [vmem:[#allocation2 + $0xa4] ss:$0 sps:$4 sm:$0x11]   ;;  %5356 = vmatprep.subr.bf16.mxu0 %v5520_v17  ;;  %v2448_v62 = vsel %vm1391_vm6, %v6222_v57, %v2447_v49  ;;  %5400 = vmatpush3.bf16.msra.mxu1 %v6255_v45  ;;  %v465_v57 = vshll.u32 %v5247_v60, 16 }
  0xaa   : > { %2356 = vrot.lane.b32.xlu1 %v6204_v61, %s5584_s24  ;;  %v595_v61 = vsel %vm5691_vm7, %v587_v20, %v594_v22  ;;  %v777_v21 = vsel %vm5700_vm8, %v586_v55, %v776_v43  ;;  %v781_v56 = vsel %vm5748_vm9, %v596_v5, %v780_v63  ;;  %v6301_v43 = vpop.permute.xlu1 %1570  ;;  %v1269_v8 = vor.u32 %v1268_v0, %v1264_v4  ;;  %v6319_v20 = vld [vmem:[#allocation2 + $0x40] sm:$0xf] }
  0xab   : > { %778 = vst [vmem:[#allocation2 + $0xa8] sm:$0xf] %v777_v21  ;;  %779 = vst.msk [vmem:[#allocation2 + $0xac] sm:$0xf] %vm172_vm0, %v595_v61  ;;  %v1273_v55 = vrot.slane %v1271_v59, 1  ;;  %v462_v22 = vshrl.u32 %v5247_v60, 16  ;;  %5396 = vmatprep.subr.bf16.mxu1 %v5520_v17  ;;  %v1190_v44 = vsel %vm1118_vm4, %v1185_v13, %v1189_v25 }
  0xac   : > { %1319 = vrot.lane.b32.xlu0 %v1178_v24, %s5579_s19  ;;  %782 = vst [vmem:[#allocation2 + $0xb0] sm:$0x1] %v781_v56  ;;  %v2427_v24 = vsel %vm1391_vm6, %v6216_v32, %v2426_v41  ;;  %v4910_v32 = vcombine.low %v850_v30, %v6197_v54  ;;  %v869_v41 = vld [vmem:[#allocation2 + $0x3c] sm:$0xf]  ;;  %5357 = vmatpush3.bf16.msra.mxu0 %v5520_v17  ;;  %v470_v49 = vshrl.u32 %v6298_v1, 16  ;;  %v6328_v45 = vld [vmem:[%s7222_s1] sm:$0xff]  }
  0xad   : > { %v1276_v54 = vshrl.u32 %v6274_v53, 16  ;;  %v1280_v63 = vrot.slane %v1278_v29, 1  ;;  %v1283_v4 = vshll.u32 %v6307_v18, 16  ;;  %v857_v59 = vld [vmem:[#allocation2 + $0x90] sm:$0xe]  ;;  %5358 = vmatprep.subr.bf16.mxu0 %v6296_v15  ;;  %v464_v51 = vrot.slane %v462_v22, 7  ;;  %5401 = vmatpush3.bf16.msra.mxu1 %v5520_v17 }
  0xae   : > { %2358 = vrot.lane.b32.xlu1 %v2287_v14, %s5584_s24  ;;  %v6311_v11 = vpop.permute.xlu0 %1554  ;;  %v1274_v2 = vsel %vm1118_vm4, %v1269_v8, %v1273_v55  ;;  %v2449_v14 = vrot.slane %v5012_v40, 1  ;;  %v2450_v0 = vrot.slane %v6207_v35, 1  ;;  %v473_v61 = vshll.u32 %v6298_v1, 16  ;;  %v727_v21 = vld [vmem:[#allocation2 + $0x54] sm:$0xf]  ;;  %5397 = vmatprep.subr.bf16.mxu1 %v6296_v15  ;;  %v256_v13 = vld [vmem:[%s5679_s17 + $0xe0] sm:$0xff] }
  0xaf   : > { %v1407_v16 = vrot.slane %v4910_v32, 1  ;;  %v6342_v56 = vcombine.low %v869_v41, %v6319_v20  ;;  %v467_v60 = vor.u32 %v465_v57, %v464_v51  ;;  %v257_v25 = vld [vmem:[%s5679_s17 + $0xe8] sm:$0xff]  ;;  %v1408_v30 = vrot.slane %v6233_v58, 1  ;;  %v858_v32 = vld [vmem:[#allocation2 + $0x9c] sm:$0xe] }
  0xb0   : > { %2470 = vrot.lane.b32.xlu0 %v2427_v24, %s5585_s25  ;;  %v4917_v35 = vcombine.low %v857_v59, %v6199_v27  ;;  %v468_v1 = vrot.slane %v464_v51, 4  ;;  %v472_v24 = vrot.slane %v470_v49, 7  ;;  %5359 = vmatpush3.bf16.msra.mxu0 %v6296_v15  ;;  %v1406_v17 = vsel %vm1391_vm6, %v1404_v38, %v1405_v42  ;;  %v871_v27 = vld [vmem:[#allocation2 + $0x48] sm:$0xf]  ;;  %v6359_v55 = vld [vmem:[#allocation2 + $0x4c] sm:$0xf] }
  0xb1   : > { %v1281_v29 = vor.u32 %v1280_v63, %v1276_v54  ;;  %v1285_v40 = vrot.slane %v1283_v4, 1  ;;  %5360 = vmatprep.subr.bf16.mxu0 %v6328_v45  ;;  %v2451_v58 = vsel %vm1391_vm6, %v2449_v14, %v2450_v0  ;;  %v5263_v22 = vpack.c.bf16 %v256_v13, %v256_v13  ;;  %5402 = vmatpush3.bf16.msra.mxu1 %v6296_v15  ;;  %v731_v57 = vld [vmem:[#allocation2 + $0x5c] sm:$0x1]  ;;  %v6369_v4 = vld [vmem:[#allocation2 + $0x44] ss:$0 sps:$4 sm:$0x11]  }
  0xb2   : > { %2484 = vrot.lane.b32.xlu1 %v2448_v62, %s5585_s25  ;;  %v6334_v5 = vpop.permute.xlu0 %1442  ;;  %v728_v62 = vsel %vm5700_vm8, %v467_v60, %v727_v21  ;;  %v475_v41 = vor.u32 %v473_v61, %v472_v24  ;;  %v1683_v42 = vshll.u32 %v6342_v56, 16  ;;  %5398 = vmatprep.subr.bf16.mxu1 %v6328_v45  ;;  %v1409_v49 = vsel %vm1391_vm6, %v1407_v16, %v1408_v30  ;;  %v885_v14 = vld [vmem:[#allocation2 + $0x9c] sm:$0xf]  ;;  %v6379_v0 = vld [vmem:[#allocation2 + $0xa0] sm:$0xf] }
  0xb3   : > { %729 = vst [vmem:[#allocation2 + $0x54] sm:$0xf] %v728_v62  ;;  %v1428_v54 = vrot.slane %v4917_v35, 1  ;;  %v1429_v63 = vrot.slane %v6236_v37, 1  ;;  %v1286_v15 = vsel %vm1118_vm4, %v1281_v29, %v1285_v40  ;;  %v6376_v51 = vcombine.low %v871_v27, %v6359_v55  ;;  %v783_v40 = vld [vmem:[#allocation2 + $0xb4] sm:$0xf] }
  0xb4   : > { %v6339_v26 = vpop.permute.xlu1 %1456  ;;  %1321 = vrot.lane.b32.xlu0 %v1190_v44, %s5579_s19  ;;  %v5264_v44 = vpack.c.bf16 %v257_v25, %v257_v25  ;;  %v476_v59 = vsel %vm5691_vm7, %v468_v1, %v475_v41  ;;  %5361 = vmatpush3.bf16.msra.mxu0 %v6328_v45  ;;  %v477_v37 = vrot.slane %v472_v24, 4  ;;  %v598_v21 = vshrl.u32 %v5263_v22, 16  ;;  %v6400_v27 = vld [vmem:[#allocation2 + $0x50] ss:$0 sps:$4 sm:$0x11]   ;;  %v259_v53 = vld [vmem:[%s5679_s17 + $0xf8] sm:$0xff] }
  0xb5   : > { %730 = vst.msk [vmem:[#allocation2 + $0x58] sm:$0xf] %vm172_vm0, %v476_v59  ;;  %v601_v16 = vshll.u32 %v5263_v22, 16  ;;  %5403 = vmatpush3.bf16.msra.mxu1 %v6328_v45  ;;  %v1685_v30 = vrot.slane %v1683_v42, 1  ;;  %v1688_v1 = vshll.u32 %v6369_v4, 16  ;;  %v6394_v24 = vcombine.low %v885_v14, %v6379_v0 }
  0xb6   : > { %1335 = vrot.lane.b32.xlu1 %v1274_v2, %s5579_s19  ;;  %v6356_v8 = vpop.permute.xlu0 %1952  ;;  %v4918_v2 = vcombine.low %v858_v32, %v6257_v47  ;;  %v606_v60 = vshrl.u32 %v5264_v44, 16  ;;  %v609_v13 = vshll.u32 %v5264_v44, 16  ;;  %v1681_v47 = vshrl.u32 %v6342_v56, 16  ;;  %v887_v59 = vld [vmem:[#allocation2 + $0xa8] sm:$0xf] }
  0xb7   : > { %v732_v35 = vsel %vm5748_vm9, %v477_v37, %v731_v57  ;;  %v1430_v45 = vsel %vm1391_vm6, %v1428_v54, %v1429_v63  ;;  %v1695_v62 = vshll.u32 %v6376_v51, 16  ;;  %v6406_v14 = vld [vmem:[#allocation2 + $0xac] sm:$0xf]  ;;  %v1690_v54 = vrot.slane %v1688_v1, 1  ;;  %v6510_v50 = vld [vmem:[#allocation2 + $0xa8] sm:$0xe] }
  0xb8   : > { %v6362_v38 = vpop.permute.xlu1 %1458  ;;  %1448 = vrot.lane.b32.xlu0 %v1406_v17, %s5578_s18  ;;  %733 = vst [vmem:[#allocation2 + $0x5c] sm:$0x1] %v732_v35  ;;  %v600_v17 = vrot.slane %v598_v21, 7  ;;  %v608_v29 = vrot.slane %v606_v60, 7  ;;  %v1431_v41 = vrot.slane %v4918_v2, 1  ;;  %v1693_v37 = vshrl.u32 %v6376_v51, 16 }
  0xb9   : > { %v1697_v21 = vrot.slane %v1695_v62, 1  ;;  %v6418_v60 = vld [vmem:[#allocation2 + $0xa4] ss:$0 sps:$4 sm:$0x11]   ;;  %v6427_v35 = vld [vmem:[#allocation2 + $0x4c] sm:$0xf] }
  0xba   : > { %2486 = vrot.lane.b32.xlu1 %v2451_v58, %s5585_s25  ;;  %v6383_v61 = vpop.permute.xlu0 %1327  ;;  %v1432_v58 = vrot.slane %v6307_v18, 1  ;;  %v603_v22 = vor.u32 %v601_v16, %v600_v17  ;;  %v604_v44 = vrot.slane %v600_v17, 4  ;;  %v611_v42 = vor.u32 %v609_v13, %v608_v29 }
  0xbb   : > { %v1779_v18 = vshll.u32 %v6394_v24, 16  ;;  %v1700_v16 = vshll.u32 %v6400_v27, 16 }
  0xbc   : > { %v6386_v25 = vpop.permute.xlu1 %1968  ;;  %1450 = vrot.lane.b32.xlu0 %v1409_v49, %s5578_s18  ;;  %v1686_v49 = vor.u32 %v1685_v30, %v1681_v47  ;;  %v612_v63 = vsel %vm5691_vm7, %v604_v44, %v611_v42  ;;  %v784_v2 = vsel %vm5700_vm8, %v603_v22, %v783_v40  ;;  %v1433_v13 = vsel %vm1391_vm6, %v1431_v41, %v1432_v58  ;;  %v934_v30 = vld [vmem:[#allocation2 + $0x48] sm:$0xf] }
  0xbd   : > { %785 = vst [vmem:[#allocation2 + $0xb4] sm:$0xf] %v784_v2  ;;  %786 = vst.msk [vmem:[#allocation2 + $0xb8] sm:$0xf] %vm172_vm0, %v612_v63  ;;  %v6425_v47 = vcombine.low %v887_v59, %v6406_v14  ;;  %v1781_v62 = vrot.slane %v1779_v18, 1  ;;  %v1698_v41 = vor.u32 %v1697_v21, %v1693_v37  ;;  %v1702_v22 = vrot.slane %v1700_v16, 1 }
  0xbe   : > { %1337 = vrot.lane.b32.xlu1 %v1286_v15, %s5579_s19  ;;  %v6402_v32 = vpop.permute.xlu0 %1824  ;;  %v913_v15 = vld [vmem:[#allocation2 + $0x3c] sm:$0xe]  ;;  %v1691_v40 = vsel %vm1118_vm4, %v1686_v49, %v1690_v54  ;;  %v914_v58 = vld [vmem:[#allocation2 + $0x48] sm:$0xe]  ;;  %v1784_v44 = vshll.u32 %v6418_v60, 16  ;;  %v6439_v42 = vcombine.low %v934_v30, %v6427_v35  ;;  %v613_v49 = vrot.slane %v608_v29, 4 }
  0xbf   : > { %v4957_v17 = vcombine.low %v913_v15, %v6319_v20  ;;  %v787_v59 = vld [vmem:[#allocation2 + $0xbc] sm:$0x1]  ;;  %v6444_v15 = vld [vmem:[#allocation2 + $0xb0] ss:$0 sps:$4 sm:$0x11]   ;;  %v2498_v54 = vsel %vm2496_vm11, %v5684_v12, %v6224_v52  ;;  %v4958_v63 = vcombine.low %v914_v58, %v6359_v55  ;;  %v1917_v21 = vrot.slane %v6369_v4, 1 }
  0xc0   : > { %v6404_v57 = vpop.permute.xlu1 %1313  ;;  %1560 = vrot.lane.b32.xlu0 %v6342_v56, %s5580_s20  ;;  %v921_v2 = vld [vmem:[#allocation2 + $0x9c] sm:$0xe]  ;;  %v788_v16 = vsel %vm5748_vm9, %v613_v49, %v787_v59  ;;  %v1703_v29 = vsel %vm1118_vm4, %v1698_v41, %v1702_v22  ;;  %v1786_v52 = vrot.slane %v1784_v44, 1  ;;  %v6460_v30 = vld [vmem:[#allocation2 + $0x50] ss:$0 sps:$4 sm:$0x11]   ;;  %v2531_v22 = vsel %vm2529_vm12, %v2498_v54, %v6194_v3 }
  0xc1   : > { %v1916_v37 = vrot.slane %v4957_v17, 1  ;;  %789 = vst [vmem:[#allocation2 + $0xbc] sm:$0x1] %v788_v16  ;;  %v922_v17 = vld [vmem:[#allocation2 + $0xa8] sm:$0xe]  ;;  %v1789_v4 = vshrl.u32 %v6425_v47, 16 }
  0xc2   : > { %1464 = vrot.lane.b32.xlu1 %v1430_v45, %s5578_s18  ;;  %v6421_v56 = vpop.permute.xlu0 %1826  ;;  %v1777_v45 = vshrl.u32 %v6394_v24, 16  ;;  %v1796_v58 = vshll.u32 %v6444_v15, 16  ;;  %v1919_v59 = vrot.slane %v4958_v63, 1  ;;  %v4966_v49 = vcombine.low %v922_v17, %v6406_v14  ;;  %v6480_v16 = vld [vmem:[#allocation2 + $0x58] sm:$0xf] }
  0xc3   : > { %v1918_v44 = vsel %vm1391_vm6, %v1916_v37, %v1917_v21  ;;  %v2193_v3 = vshrl.u32 %v6439_v42, 16  ;;  %v1944_v31 = vrot.slane %v6444_v15, 1  ;;  %v6521_v15 = vpack.c.bf16 %v259_v53, %v259_v53 }
  0xc4   : > { %v6429_v1 = vpop.permute.xlu1 %1329  ;;  %1562 = vrot.lane.b32.xlu0 %v6376_v51, %s5580_s20  ;;  %v1791_v51 = vshll.u32 %v6425_v47, 16  ;;  %v1782_v12 = vor.u32 %v1781_v62, %v1777_v45  ;;  %v950_v45 = vld [vmem:[#allocation2 + $0xa8] sm:$0xf]  ;;  %v6469_v62 = vld [vmem:[#allocation2 + $0xac] sm:$0xf]  ;;  %v1798_v21 = vrot.slane %v1796_v58, 1 }
  0xc5   : > { %v6487_v14 = vcombine.low %v950_v45, %v6469_v62 }
  0xc6   : > { %1466 = vrot.lane.b32.xlu1 %v1433_v13, %s5578_s18  ;;  %v6441_v20 = vpop.permute.xlu0 %1954  ;;  %v2195_v13 = vshll.u32 %v6439_v42, 16 }
  0xc8   : > { %v6449_v18 = vpop.permute.xlu1 %1840  ;;  %1832 = vrot.lane.b32.xlu0 %v1691_v40, %s5582_s22  ;;  %v1793_v40 = vrot.slane %v1791_v51, 1  ;;  %v1920_v51 = vrot.slane %v6400_v27, 1  ;;  %v2197_v54 = vrot.slane %v2195_v13, 1  ;;  %v978_v27 = vld [vmem:[#allocation2 + $0x48] sm:$0xe] }
  0xc9   : > { %v809_v13 = vld [vmem:[#allocation2 + $0x48] sm:$0xf]  ;;  %v5005_v45 = vcombine.low %v978_v27, %v6427_v35  ;;  %v6539_v27 = vld [vmem:[#allocation2 + $0x54] sm:$0xe] }
  0xca   : > { %1576 = vrot.lane.b32.xlu1 %v6394_v24, %s5580_s20  ;;  %v6462_v55 = vpop.permute.xlu0 %2064  ;;  %v4965_v24 = vcombine.low %v921_v2, %v6379_v0  ;;  %v1787_v0 = vsel %vm1118_vm4, %v1782_v12, %v1786_v52  ;;  %v936_v2 = vld [vmem:[#allocation2 + $0x54] sm:$0xf]  ;;  %v1794_v63 = vor.u32 %v1793_v40, %v1789_v4  ;;  %v2564_v12 = vsel %vm2562_vm13, %v2531_v22, %v6267_v34  ;;  %v6503_v34 = vld [vmem:[#allocation2 + $0x4c] sm:$0xf]  ;;  %v825_v35 = vld [vmem:[#allocation2 + $0xa8] sm:$0xf] }
  0xcb   : > { %v2514_v4 = vsel %vm2496_vm11, %v5803_v39, %v6383_v61  ;;  %v1941_v40 = vrot.slane %v6418_v60, 1  ;;  %v6501_v58 = vcombine.low %v936_v2, %v6480_v16  ;;  %v1943_v22 = vrot.slane %v4966_v49, 1 }
  0xcc   : > { %v6467_v41 = vpop.permute.xlu1 %1842  ;;  %1834 = vrot.lane.b32.xlu0 %v1703_v29, %s5582_s22  ;;  %v2200_v29 = vshll.u32 %v6460_v30, 16  ;;  %v1940_v17 = vrot.slane %v4965_v24, 1  ;;  %v1921_v24 = vsel %vm1391_vm6, %v1919_v59, %v1920_v51  ;;  %v1799_v61 = vsel %vm1118_vm4, %v1794_v63, %v1798_v21  ;;  %v6517_v59 = vld [vmem:[#allocation2 + $0xb0] ss:$0 sps:$4 sm:$0x11]  }
  0xcd   : > { %v2291_v2 = vshll.u32 %v6487_v14, 16  ;;  %v2547_v7 = vsel %vm2529_vm12, %v2514_v4, %v6339_v26  ;;  %v2500_v49 = vsel %vm2496_vm11, %v5783_v9, %v6404_v57  ;;  %v2207_v26 = vshll.u32 %v6501_v58, 16  ;;  %v6534_v21 = vld [vmem:[#allocation2 + $0xac] sm:$0xf]  ;;  %v952_v4 = vld [vmem:[#allocation2 + $0xb4] sm:$0xf] }
  0xce   : > { %1578 = vrot.lane.b32.xlu1 %v6425_v47, %s5580_s20  ;;  %v6483_v37 = vpop.permute.xlu0 %2066  ;;  %v258_v47 = vld [vmem:[%s5679_s17 + $0xf0] sm:$0xff]  ;;  %v2202_v60 = vrot.slane %v2200_v29, 1  ;;  %v6532_v63 = vcombine.low %v809_v13, %v6503_v34  ;;  %v2597_v53 = vsel %vm2595_vm14, %v2564_v12, %v6402_v32  ;;  %v1945_v9 = vsel %vm1391_vm6, %v1943_v22, %v1944_v31  ;;  %v6551_v32 = vld [vmem:[#allocation2 + $0xb8] sm:$0xf] }
  0xcf   : > { %v6519_v51 = vpack.c.bf16 %v258_v47, %v258_v47  ;;  %v6544_v29 = vrot.slane %v5005_v45, 1  ;;  %v2580_v47 = vsel %vm2562_vm13, %v2547_v7, %v6259_v48  ;;  %v2289_v12 = vshrl.u32 %v6487_v14, 16  ;;  %v6583_v57 = vld [vmem:[#allocation2 + $0x50] ss:$0 sps:$4 sm:$0x11]  }
  0xd0   : > { %v6492_v52 = vpop.permute.xlu1 %1970  ;;  %1960 = vrot.lane.b32.xlu0 %v1918_v44, %s5581_s21  ;;  %v2198_v44 = vor.u32 %v2197_v54, %v2193_v3  ;;  %v1942_v3 = vsel %vm1391_vm6, %v1940_v17, %v1941_v40  ;;  %v6529_v54 = vld [vmem:[#allocation2 + $0x5c] ss:$0 sps:$4 sm:$0x11]   ;;  %7242 = vst [vmem:[#allocation8_spill] sm:$0xff] %v6532_v63  ;;  %v2293_v40 = vrot.slane %v2291_v2, 1  ;;  %v2533_v31 = vsel %vm2529_vm12, %v2500_v49, %v6334_v5 }
  0xd1   : > { %v2296_v22 = vshll.u32 %v6517_v59, 16  ;;  %v6561_v7 = vcombine.low %v825_v35, %v6534_v21  ;;  %v2630_v48 = vsel %vm2628_vm15, %v2597_v53, %v6356_v8  ;;  %v2212_v5 = vshll.u32 %v6529_v54, 16 }
  0xd2   : > { %1848 = vrot.lane.b32.xlu1 %v1787_v0, %s5582_s22  ;;  %v2337_v39 = vpop.permute.xlu0 %2336  ;;  %v2203_v13 = vsel %vm1118_vm4, %v2198_v44, %v2202_v60  ;;  %v2209_v44 = vrot.slane %v2207_v26, 1  ;;  %v2663_v60 = vsel %vm2661_vm1, %v2630_v48, %v6462_v55  ;;  %v6575_v35 = vcombine.low %v952_v4, %v6551_v32  ;;  %v6587_v4 = vld [vmem:[#allocation2 + $0x58] sm:$0xf] }
  0xd3   : > { %v1192_v8 = vshrl.u32 %v6532_v63, 16  ;;  %v2696_v49 = vsel %vm2694_vm2, %v2663_v60, %v2337_v39  ;;  %v6581_v53 = vor.u32 %v2293_v40, %v2289_v12  ;;  %v1194_v55 = vshll.u32 %v6532_v63, 16 }
  0xd4   : > { %v6515_v0 = vpop.permute.xlu1 %2080  ;;  %1962 = vrot.lane.b32.xlu0 %v1921_v24, %s5581_s21  ;;  %v615_v45 = vshrl.u32 %v6519_v51, 16  ;;  %v618_v6 = vshll.u32 %v6519_v51, 16  ;;  %v2613_v39 = vsel %vm2595_vm14, %v2580_v47, %v6449_v18  ;;  %v2214_v40 = vrot.slane %v2212_v5, 1 }
  0xd5   : > { %v2303_v60 = vshll.u32 %v6575_v35, 16  ;;  %v626_v51 = vshll.u32 %v6521_v15, 16  ;;  %v2516_v18 = vsel %vm2496_vm11, %v5785_v10, %v6429_v1  ;;  %v1199_v47 = vshll.u32 %v6583_v57, 16 }
  0xd6   : > { %1850 = vrot.lane.b32.xlu1 %v1799_v61, %s5582_s22  ;;  %v6548_v17 = vpop.permute.xlu0 %2338  ;;  %v2205_v61 = vshrl.u32 %v6501_v58, 16  ;;  %v2646_v10 = vsel %vm2628_vm15, %v2613_v39, %v6386_v25  ;;  %v2432_v36 = vrot.slane %v6529_v54, 1 }
  0xd7   : > { %v2679_v25 = vsel %vm2661_vm1, %v2646_v10, %v6515_v0  ;;  %v2549_v0 = vsel %vm2529_vm12, %v2516_v18, %v6362_v38 }
  0xd8   : > { %v6556_v24 = vpop.permute.xlu1 %2082  ;;  %2072 = vrot.lane.b32.xlu0 %v6439_v42, %s5583_s23  ;;  %v2566_v42 = vsel %vm2562_vm13, %v2533_v31, %v6311_v11  ;;  %v623_v11 = vshrl.u32 %v6521_v15, 16  ;;  %v2210_v12 = vor.u32 %v2209_v44, %v2205_v61  ;;  %v2298_v31 = vrot.slane %v2296_v22, 1  ;;  %v6608_v22 = vld [vmem:[#allocation2 + $0xbc] ss:$0 sps:$4 sm:$0x11]  }
  0xd9   : > { %v2599_v63 = vsel %vm2595_vm14, %v2566_v42, %v6421_v56  ;;  %v1196_v15 = vrot.slane %v1194_v55, 1  ;;  %v2301_v42 = vshrl.u32 %v6575_v35, 16 }
  0xda   : > { %1976 = vrot.lane.b32.xlu1 %v1942_v3, %s5581_s21  ;;  %v2465_v26 = vpop.permute.xlu0 %2464  ;;  %v811_v3 = vld [vmem:[#allocation2 + $0x54] sm:$0xf]  ;;  %v2215_v1 = vsel %vm1118_vm4, %v2210_v12, %v2214_v40  ;;  %v1201_v40 = vrot.slane %v1199_v47, 1  ;;  %v2299_v38 = vsel %vm1118_vm4, %v6581_v53, %v2298_v31  ;;  %v2582_v53 = vsel %vm2562_vm13, %v2549_v0, %v6301_v43 }
  0xdb   : > { %v2729_v2 = vsel %vm2727_vm3, %v2696_v49, %v2465_v26  ;;  %v617_v49 = vrot.slane %v615_v45, 7  ;;  %v625_v26 = vrot.slane %v623_v11, 7  ;;  %v790_v45 = vld [vmem:[#allocation2 + $0xc0] sm:$0xf]  ;;  %v2308_v11 = vshll.u32 %v6608_v22, 16 }
  0xdc   : > { %v2353_v48 = vpop.permute.xlu1 %2352  ;;  %2074 = vrot.lane.b32.xlu0 %v6501_v58, %s5583_s23  ;;  %5362 = vmatprep.mubr.msk.bf16.mxu0 %vm2803_vm5, %v2729_v2  ;;  %v2632_v2 = vsel %vm2628_vm15, %v2599_v63, %v6441_v20  ;;  %v1197_v12 = vor.u32 %v1196_v15, %v1192_v8  ;;  %v2453_v43 = vrot.slane %v6517_v59, 1 }
  0xdd   : > { %v620_v44 = vor.u32 %v618_v6, %v617_v49  ;;  %v621_v5 = vrot.slane %v617_v49, 4  ;;  %v628_v56 = vor.u32 %v626_v51, %v625_v26  ;;  %v2305_v6 = vrot.slane %v2303_v60, 1  ;;  %v6643_v60 = vld [vmem:[#allocation2 + $0x5c] ss:$0 sps:$4 sm:$0x11]  }
  0xde   : > { %1978 = vrot.lane.b32.xlu1 %v1945_v9, %s5581_s21  ;;  %v6605_v58 = vpop.permute.xlu0 %1315  ;;  %v6611_v9 = vcombine.low %v811_v3, %v6587_v4  ;;  %v2665_v3 = vsel %vm2661_vm1, %v2632_v2, %v6483_v37  ;;  %v630_v37 = vrot.slane %v625_v26, 4  ;;  %v2712_v23 = vsel %vm2694_vm2, %v2679_v25, %v2353_v48  ;;  %v6655_v26 = vld [vmem:[#allocation2 + $0xb0] ss:$0 sps:$4 sm:$0x11]   ;;  %v6674_v2 = vld [vmem:[#allocation2 + $0xb8] sm:$0xf] }
  0xdf   : > { %v629_v55 = vsel %vm5691_vm7, %v621_v5, %v628_v56  ;;  %v791_v20 = vsel %vm5700_vm8, %v620_v44, %v790_v45  ;;  %v2698_v63 = vsel %vm2694_vm2, %v2665_v3, %v6548_v17  ;;  %v7243_v48 = vrot.slane %v6460_v30, 1  ;;  %v827_v56 = vld [vmem:[#allocation2 + $0xb4] sm:$0xf] }
  0xe0   : > { %v6613_v61 = vpop.permute.xlu1 %2354  ;;  %2344 = vrot.lane.b32.xlu0 %v2203_v13, %s5584_s24  ;;  %792 = vst [vmem:[#allocation2 + $0xc0] sm:$0xf] %v791_v20  ;;  %793 = vst.msk [vmem:[#allocation2 + $0xc4] sm:$0xf] %vm172_vm0, %v629_v55  ;;  %v1206_v49 = vshll.u32 %v6611_v9, 16  ;;  %v2310_v47 = vrot.slane %v2308_v11, 1  ;;  %v7244_v30 = vcombine.low %v6539_v27, %v6480_v16  ;;  %v1202_v15 = vsel %vm1118_vm4, %v1197_v12, %v1201_v40 }
  0xe1   : > { %v2430_v8 = vsel %vm1391_vm6, %v6544_v29, %v7243_v48  ;;  %v1290_v29 = vshll.u32 %v6561_v7, 16  ;;  %v7245_v44 = vcombine.low %v6510_v50, %v6469_v62  ;;  %v2615_v16 = vsel %vm2595_vm14, %v2582_v53, %v6467_v41  ;;  %v987_v50 = vld [vmem:[#allocation2 + $0xb4] sm:$0xe]  ;;  %v6707_v12 = vld [vmem:[#allocation2 + $0xbc] ss:$0 sps:$4 sm:$0x11]  }
  0xe2   : > { %2088 = vrot.lane.b32.xlu1 %v6487_v14, %s5583_s23  ;;  %v2467_v13 = vpop.permute.xlu0 %2466  ;;  %v794_v14 = vld [vmem:[#allocation2 + $0xc8] sm:$0x1]  ;;  %v2431_v45 = vrot.slane %v7244_v30, 1  ;;  %v1204_v27 = vshrl.u32 %v6611_v9, 16  ;;  %v1211_v10 = vshll.u32 %v6643_v60, 16  ;;  %v2648_v54 = vsel %vm2628_vm15, %v2615_v16, %v6492_v52 }
  0xe3   : > { %v2731_v39 = vsel %vm2727_vm3, %v2698_v63, %v2467_v13  ;;  %v795_v51 = vsel %vm5748_vm9, %v630_v37, %v794_v14  ;;  %v2452_v5 = vrot.slane %v7245_v44, 1  ;;  %v1208_v62 = vrot.slane %v1206_v49, 1 }
  0xe4   : > { %v2481_v28 = vpop.permute.xlu1 %2480  ;;  %2346 = vrot.lane.b32.xlu0 %v2215_v1, %s5584_s24  ;;  %5363 = vmatmul.mubr.msk.bf16.vlgmr.msra.gmra.mxu0 %vm2803_vm5, %v2731_v39  ;;  %796 = vst [vmem:[#allocation2 + $0xc8] sm:$0x1] %v795_v51  ;;  %v851_v1 = vld [vmem:[#allocation2 + $0x48] sm:$0xe]  ;;  %v1295_v41 = vshll.u32 %v6655_v26, 16  ;;  %v2681_v3 = vsel %vm2661_vm1, %v2648_v54, %v6556_v24  ;;  %v1292_v55 = vrot.slane %v1290_v29, 1  ;;  %v6693_v20 = vcombine.low %v827_v56, %v6674_v2 }
  0xe5   : > { %v2745_v17 = vsel %vm2727_vm3, %v2712_v23, %v2481_v28  ;;  %v2714_v52 = vsel %vm2694_vm2, %v2681_v3, %v6613_v61  ;;  %v5014_v63 = vcombine.low %v987_v50, %v6551_v32  ;;  %v4911_v24 = vcombine.low %v851_v1, %v6503_v34  ;;  %v852_v39 = vld [vmem:[#allocation2 + $0x54] sm:$0xe]  ;;  %v6736_v1 = vld [vmem:[#allocation2 + $0x64] sm:$0xf] }
  0xe6   : > { %2090 = vrot.lane.b32.xlu1 %v6575_v35, %s5583_s23  ;;  %5378 = vmatprep.mubr.msk.bf16.mxu1 %vm2803_vm5, %v2745_v17  ;;  %v6659_v18 = vpop.permute.xlu0 %1317  ;;  %v2306_v35 = vor.u32 %v2305_v6, %v2301_v42  ;;  %v1288_v42 = vshrl.u32 %v6561_v7, 16  ;;  %v2433_v11 = vsel %vm1391_vm6, %v2431_v45, %v2432_v36  ;;  %v1209_v37 = vor.u32 %v1208_v62, %v1204_v27  ;;  %v873_v51 = vld [vmem:[#allocation2 + $0x54] sm:$0xf] }
  0xe7   : > { %v1213_v14 = vrot.slane %v1211_v10, 1  ;;  %v1297_v23 = vrot.slane %v1295_v41, 1  ;;  %v2454_v32 = vsel %vm1391_vm6, %v2452_v5, %v2453_v43  ;;  %v1302_v40 = vshll.u32 %v6693_v20, 16  ;;  %v875_v10 = vld [vmem:[#allocation2 + $0x60] sm:$0xf] }
  0xe8   : > { %v6667_v31 = vpop.permute.xlu1 %1331  ;;  %2472 = vrot.lane.b32.xlu0 %v2430_v8, %s5585_s25  ;;  %v2311_v6 = vsel %vm1118_vm4, %v2306_v35, %v2310_v47  ;;  %v1293_v28 = vor.u32 %v1292_v55, %v1288_v42  ;;  %v1410_v0 = vrot.slane %v4911_v24, 1  ;;  %v4912_v17 = vcombine.low %v852_v39, %v6587_v4  ;;  %v6723_v4 = vld [vmem:[#allocation2 + $0x58] sm:$0xf]  ;;  %v860_v50 = vld [vmem:[#allocation2 + $0xb4] sm:$0xe] }
  0xe9   : > { %v1214_v48 = vsel %vm1118_vm4, %v1209_v37, %v1213_v14  ;;  %v1411_v8 = vrot.slane %v6583_v57, 1  ;;  %v2456_v49 = vrot.slane %v6608_v22, 1  ;;  %v1300_v30 = vshrl.u32 %v6693_v20, 16  ;;  %v6744_v42 = vld [vmem:[#allocation2 + $0x5c] ss:$0 sps:$4 sm:$0x11]  }
  0xea   : > { %2360 = vrot.lane.b32.xlu1 %v2299_v38, %s5584_s24  ;;  %v6689_v59 = vpop.permute.xlu0 %1444  ;;  %v2455_v38 = vrot.slane %v5014_v63, 1  ;;  %v1298_v47 = vsel %vm1118_vm4, %v1293_v28, %v1297_v23  ;;  %v1304_v45 = vrot.slane %v1302_v40, 1  ;;  %v1307_v29 = vshll.u32 %v6707_v12, 16  ;;  %v889_v63 = vld [vmem:[#allocation2 + $0xb4] sm:$0xf] }
  0xeb   : > { %v1412_v57 = vsel %vm1391_vm6, %v1410_v0, %v1411_v8  ;;  %v1413_v22 = vrot.slane %v4912_v17, 1  ;;  %v1414_v36 = vrot.slane %v6643_v60, 1  ;;  %v4927_v44 = vcombine.low %v873_v51, %v6723_v4  ;;  %v6756_v24 = vld [vmem:[#allocation2 + $0x68] ss:$0 sps:$4 sm:$0x11]  }
  0xec   : > { %v2483_v25 = vpop.permute.xlu1 %2482  ;;  %1323 = vrot.lane.b32.xlu0 %v1202_v15, %s5579_s19  ;;  %v859_v15 = vld [vmem:[#allocation2 + $0xa8] sm:$0xe]  ;;  %v2457_v56 = vsel %vm1391_vm6, %v2455_v38, %v2456_v49  ;;  %v1305_v16 = vor.u32 %v1304_v45, %v1300_v30  ;;  %v1309_v43 = vrot.slane %v1307_v29, 1  ;;  %v4928_v62 = vcombine.low %v875_v10, %v6736_v1  ;;  %v891_v0 = vld [vmem:[#allocation2 + $0xc0] sm:$0xf] }
  0xed   : > { %v2747_v13 = vsel %vm2727_vm3, %v2714_v52, %v2483_v25  ;;  %v4919_v27 = vcombine.low %v859_v15, %v6534_v21  ;;  %v1415_v60 = vsel %vm1391_vm6, %v1413_v22, %v1414_v36  ;;  %v1707_v41 = vshll.u32 %v4927_v44, 16  ;;  %v6767_v17 = vld [vmem:[#allocation2 + $0xc4] sm:$0xf]  ;;  %v915_v29 = vld [vmem:[#allocation2 + $0x54] sm:$0xe] }
  0xee   : > { %2362 = vrot.lane.b32.xlu1 %v2311_v6, %s5584_s24  ;;  %5379 = vmatmul.mubr.msk.bf16.vlgmr.msra.gmra.mxu1 %vm2803_vm5, %v2747_v13  ;;  %v6704_v61 = vpop.permute.xlu0 %1446  ;;  %v1310_v21 = vsel %vm1118_vm4, %v1305_v16, %v1309_v43  ;;  %v1435_v55 = vrot.slane %v6655_v26, 1  ;;  %v4920_v52 = vcombine.low %v860_v50, %v6674_v2  ;;  %v6753_v13 = vld [vmem:[#allocation2 + $0xb8] sm:$0xf]  ;;  %v1712_v14 = vshll.u32 %v6744_v42, 16  ;;  %v916_v43 = vld [vmem:[#allocation2 + $0x60] sm:$0xe] }
  0xef   : > { %v1434_v6 = vrot.slane %v4919_v27, 1  ;;  %v1709_v37 = vrot.slane %v1707_v41, 1  ;;  %v1719_v23 = vshll.u32 %v4928_v62, 16  ;;  %v4935_v28 = vcombine.low %v889_v63, %v6753_v13 }
  0xf0   : > { %v6710_v34 = vpop.permute.xlu1 %1333  ;;  %2474 = vrot.lane.b32.xlu0 %v2433_v11, %s5585_s25  ;;  %v1705_v11 = vshrl.u32 %v4927_v44, 16  ;;  %v1437_v2 = vrot.slane %v4920_v52, 1  ;;  %v1714_v38 = vrot.slane %v1712_v14, 1  ;;  %v1717_v49 = vshrl.u32 %v4928_v62, 16 }
  0xf1   : > { %v1436_v26 = vsel %vm1391_vm6, %v1434_v6, %v1435_v55  ;;  %v1721_v51 = vrot.slane %v1719_v23, 1  ;;  %v4936_v45 = vcombine.low %v891_v0, %v6767_v17  ;;  %v1803_v15 = vshll.u32 %v4935_v28, 16  ;;  %v938_v6 = vld [vmem:[#allocation2 + $0x60] sm:$0xf] }
  0xf2   : > { %2488 = vrot.lane.b32.xlu1 %v2454_v32, %s5585_s25  ;;  %v6718_v35 = vpop.permute.xlu0 %1556  ;;  %v1438_v32 = vrot.slane %v6707_v12, 1  ;;  %v1710_v8 = vor.u32 %v1709_v37, %v1705_v11  ;;  %v1801_v10 = vshrl.u32 %v4935_v28, 16  ;;  %v1923_v52 = vrot.slane %v6744_v42, 1  ;;  %v6796_v11 = vld [vmem:[#allocation2 + $0x64] sm:$0xf] }
  0xf3   : > { %v1805_v50 = vrot.slane %v1803_v15, 1  ;;  %v1815_v41 = vshll.u32 %v4936_v45, 16  ;;  %v1813_v23 = vshrl.u32 %v4936_v45, 16  ;;  %vm4634_vm0 = vcmask 1041409  }
  0xf4   : > { %v6725_v53 = vpop.permute.xlu1 %1460  ;;  %1325 = vrot.lane.b32.xlu0 %v1214_v48, %s5579_s19  ;;  %v1724_v48 = vshll.u32 %v6756_v24, 16  ;;  %v1439_v30 = vsel %vm1391_vm6, %v1437_v2, %v1438_v32  ;;  %v1715_v36 = vsel %vm1118_vm4, %v1710_v8, %v1714_v38  ;;  %v923_v32 = vld [vmem:[#allocation2 + $0xb4] sm:$0xe]  ;;  %v940_v38 = vld [vmem:[#allocation2 + $0x6c] sm:$0xf]  ;;  %vm4643_vm7 = vcmask 1044484  }
  0xf5   : > { %v1806_v14 = vor.u32 %v1805_v50, %v1801_v10  ;;  %v4967_v8 = vcombine.low %v923_v32, %v6753_v13  ;;  %vm4646_vm8 = vcmask 1045509   ;;  %vm4649_vm9 = vcmask 1046534  }
  0xf6   : > { %1339 = vrot.lane.b32.xlu1 %v1298_v47, %s5579_s19  ;;  %v6732_v5 = vpop.permute.xlu0 %1558  ;;  %v6772_v47 = vld [vmem:[#allocation2 + $0xbc] ss:$0 sps:$4 sm:$0x11]   ;;  %v1726_v22 = vrot.slane %v1724_v48, 1  ;;  %v1926_v48 = vrot.slane %v6756_v24, 1 }
  0xf7   : > { %v1808_v16 = vshll.u32 %v6772_v47, 16  ;;  %v1946_v24 = vrot.slane %v4967_v8, 1 }
  0xf8   : > { %v6738_v54 = vpop.permute.xlu1 %1462  ;;  %1452 = vrot.lane.b32.xlu0 %v1412_v57, %s5578_s18 }
  0xf9   : > { %v1810_v63 = vrot.slane %v1808_v16, 1 }
  0xfa   : > { %2490 = vrot.lane.b32.xlu1 %v2457_v56, %s5585_s25  ;;  %v6746_v3 = vpop.permute.xlu0 %1828  ;;  %v4959_v56 = vcombine.low %v915_v29, %v6723_v4 }
  0xfc   : > { %v6751_v25 = vpop.permute.xlu1 %1572  ;;  %1454 = vrot.lane.b32.xlu0 %v1415_v60, %s5578_s18  ;;  %v6787_v60 = vld [vmem:[#allocation2 + $0xc8] ss:$0 sps:$4 sm:$0x11]   ;;  %v1922_v55 = vrot.slane %v4959_v56, 1 }
  0xfd   : > { %v1820_v2 = vshll.u32 %v6787_v60, 16  ;;  %v6821_v56 = vld [vmem:[#allocation2 + $0x68] ss:$0 sps:$4 sm:$0x11]  }
  0xfe   : > { %1341 = vrot.lane.b32.xlu1 %v1310_v21, %s5579_s19  ;;  %v6760_v39 = vpop.permute.xlu0 %1830  ;;  %v1924_v42 = vsel %vm1391_vm6, %v1922_v55, %v1923_v52  ;;  %v2502_v55 = vsel %vm2496_vm11, %v5914_v19, %v6605_v58  ;;  %v1950_v58 = vrot.slane %v6787_v60, 1 }
  0xff   : > { %v1822_v15 = vrot.slane %v1820_v2, 1 }
 0x100   : > { %v6765_v40 = vpop.permute.xlu1 %1574  ;;  %1564 = vrot.lane.b32.xlu0 %v4927_v44, %s5580_s20  ;;  %v1722_v44 = vor.u32 %v1721_v51, %v1717_v49  ;;  %v6809_v49 = vld [vmem:[#allocation2 + $0x70] sm:$0xf] }
 0x102   : > { %1468 = vrot.lane.b32.xlu1 %v1436_v26, %s5578_s18  ;;  %v6774_v12 = vpop.permute.xlu0 %1956  ;;  %v1727_v4 = vsel %vm1118_vm4, %v1722_v44, %v1726_v22  ;;  %v1817_v26 = vrot.slane %v1815_v41, 1  ;;  %v1947_v44 = vrot.slane %v6772_v47, 1  ;;  %v6825_v41 = vld [vmem:[#allocation2 + $0x74] ss:$0 sps:$4 sm:$0x11]  }
 0x103   : > { %v2236_v60 = vshll.u32 %v6825_v41, 16 }
 0x104   : > { %v6778_v57 = vpop.permute.xlu1 %1844  ;;  %1566 = vrot.lane.b32.xlu0 %v4928_v62, %s5580_s20  ;;  %v4960_v62 = vcombine.low %v916_v43, %v6736_v1  ;;  %v1818_v29 = vor.u32 %v1817_v26, %v1813_v23  ;;  %v2224_v26 = vshll.u32 %v6821_v56, 16 }
 0x106   : > { %1470 = vrot.lane.b32.xlu1 %v1439_v30, %s5578_s18  ;;  %v6785_v27 = vpop.permute.xlu0 %1958  ;;  %v1925_v0 = vrot.slane %v4960_v62, 1  ;;  %v1811_v30 = vsel %vm1118_vm4, %v1806_v14, %v1810_v63  ;;  %v1823_v10 = vsel %vm1118_vm4, %v1818_v29, %v1822_v15  ;;  %v980_v63 = vld [vmem:[#allocation2 + $0x60] sm:$0xe]  ;;  %v2535_v14 = vsel %vm2529_vm12, %v2502_v55, %v6689_v59 }
 0x107   : > { %v2568_v2 = vsel %vm2562_vm13, %v2535_v14, %v6718_v35  ;;  %v2238_v55 = vrot.slane %v2236_v60, 1  ;;  %v6879_v14 = vld [vmem:[#allocation2 + $0xd4] ss:$0 sps:$4 sm:$0x11]  }
 0x108   : > { %v6789_v21 = vpop.permute.xlu1 %1846  ;;  %1836 = vrot.lane.b32.xlu0 %v1715_v36, %s5582_s22  ;;  %v924_v36 = vld [vmem:[#allocation2 + $0xc0] sm:$0xe]  ;;  %v1927_v13 = vsel %vm1391_vm6, %v1925_v0, %v1926_v48  ;;  %v956_v0 = vld [vmem:[#allocation2 + $0xcc] sm:$0xf]  ;;  %v6844_v48 = vld [vmem:[#allocation2 + $0xd0] sm:$0xf]  ;;  %v2601_v59 = vsel %vm2595_vm14, %v2568_v2, %v6746_v3 }
 0x109   : > { %v4968_v50 = vcombine.low %v924_v36, %v6767_v17  ;;  %v1948_v17 = vsel %vm1391_vm6, %v1946_v24, %v1947_v44  ;;  %v2226_v3 = vrot.slane %v2224_v26, 1 }
 0x10a   : > { %1580 = vrot.lane.b32.xlu1 %v4935_v28, %s5580_s20  ;;  %v6798_v37 = vpop.permute.xlu0 %2068  ;;  %v4975_v28 = vcombine.low %v938_v6, %v6796_v11  ;;  %v954_v6 = vld [vmem:[#allocation2 + $0xc0] sm:$0xf] }
 0x10b   : > { %v1949_v19 = vrot.slane %v4968_v50, 1  ;;  %v2518_v50 = vsel %vm2496_vm11, %v5962_v46, %v6667_v31 }
 0x10c   : > { %v6801_v1 = vpop.permute.xlu1 %1972  ;;  %1838 = vrot.lane.b32.xlu0 %v1727_v4, %s5582_s22  ;;  %v2219_v16 = vshll.u32 %v4975_v28, 16  ;;  %v6829_v4 = vld [vmem:[#allocation2 + $0xc4] sm:$0xf]  ;;  %v2217_v47 = vshrl.u32 %v4975_v28, 16  ;;  %v2551_v46 = vsel %vm2529_vm12, %v2518_v50, %v6725_v53 }
 0x10d   : > { %v1951_v44 = vsel %vm1391_vm6, %v1949_v19, %v1950_v58  ;;  %v2435_v19 = vrot.slane %v6821_v56, 1 }
 0x10e   : > { %1582 = vrot.lane.b32.xlu1 %v4936_v45, %s5580_s20  ;;  %v6811_v51 = vpop.permute.xlu0 %2070  ;;  %v4976_v45 = vcombine.low %v940_v38, %v6809_v49  ;;  %v2221_v23 = vrot.slane %v2219_v16, 1  ;;  %v5007_v38 = vcombine.low %v980_v63, %v6796_v11  ;;  %v6861_v11 = vld [vmem:[#allocation2 + $0xc8] ss:$0 sps:$4 sm:$0x11]  }
 0x10f   : > { %v2320_v63 = vshll.u32 %v6861_v11, 16 }
 0x110   : > { %v6814_v22 = vpop.permute.xlu1 %1974  ;;  %1964 = vrot.lane.b32.xlu0 %v1924_v42, %s5581_s21  ;;  %v2231_v52 = vshll.u32 %v4976_v45, 16  ;;  %v4983_v42 = vcombine.low %v954_v6, %v6829_v4  ;;  %v2229_v35 = vshrl.u32 %v4976_v45, 16  ;;  %v2222_v36 = vor.u32 %v2221_v23, %v2217_v47 }
 0x111   : > { %v2584_v23 = vsel %vm2562_vm13, %v2551_v46, %v6751_v25 }
 0x112   : > { %1852 = vrot.lane.b32.xlu1 %v1811_v30, %s5582_s22  ;;  %v2341_v43 = vpop.permute.xlu0 %2340  ;;  %v2634_v30 = vsel %vm2628_vm15, %v2601_v59, %v6774_v12  ;;  %v2233_v29 = vrot.slane %v2231_v52, 1  ;;  %v2504_v12 = vsel %vm2496_vm11, %v5944_v33, %v6659_v18  ;;  %v2315_v16 = vshll.u32 %v4983_v42, 16  ;;  %v981_v18 = vld [vmem:[#allocation2 + $0x6c] sm:$0xe] }
 0x113   : > { %v2667_v15 = vsel %vm2661_vm1, %v2634_v30, %v6798_v37  ;;  %v2434_v33 = vrot.slane %v5007_v38, 1  ;;  %v2227_v47 = vsel %vm1118_vm4, %v2222_v36, %v2226_v3  ;;  %v2313_v52 = vshrl.u32 %v4983_v42, 16 }
 0x114   : > { %v6827_v62 = vpop.permute.xlu1 %2084  ;;  %1966 = vrot.lane.b32.xlu0 %v1927_v13, %s5581_s21  ;;  %v6859_v13 = vcombine.low %v956_v0, %v6844_v48  ;;  %v2234_v6 = vor.u32 %v2233_v29, %v2229_v35  ;;  %v5008_v58 = vcombine.low %v981_v18, %v6809_v49  ;;  %v2617_v53 = vsel %vm2595_vm14, %v2584_v23, %v6778_v57  ;;  %v988_v29 = vld [vmem:[#allocation2 + $0xc0] sm:$0xe] }
 0x115   : > { %v2322_v49 = vrot.slane %v2320_v63, 1  ;;  %v2332_v57 = vshll.u32 %v6879_v14, 16  ;;  %v2436_v36 = vsel %vm1391_vm6, %v2434_v33, %v2435_v19  ;;  %v2438_v3 = vrot.slane %v6825_v41, 1 }
 0x116   : > { %1854 = vrot.lane.b32.xlu1 %v1823_v10, %s5582_s22  ;;  %v2343_v32 = vpop.permute.xlu0 %2342  ;;  %v2239_v0 = vsel %vm1118_vm4, %v2234_v6, %v2238_v55  ;;  %v2325_v25 = vshrl.u32 %v6859_v13, 16 }
 0x118   : > { %v6848_v8 = vpop.permute.xlu1 %2086  ;;  %2076 = vrot.lane.b32.xlu0 %v4975_v28, %s5583_s23  ;;  %v2700_v28 = vsel %vm2694_vm2, %v2667_v15, %v2341_v43  ;;  %v2537_v43 = vsel %vm2529_vm12, %v2504_v12, %v6704_v61  ;;  %v2327_v61 = vshll.u32 %v6859_v13, 16  ;;  %v5015_v12 = vcombine.low %v988_v29, %v6829_v4 }
 0x119   : > { %v2570_v31 = vsel %vm2562_vm13, %v2537_v43, %v6732_v5 }
 0x11a   : > { %1980 = vrot.lane.b32.xlu1 %v1948_v17, %s5581_s21  ;;  %v2469_v24 = vpop.permute.xlu0 %2468  ;;  %v2317_v17 = vrot.slane %v2315_v16, 1  ;;  %v2603_v26 = vsel %vm2595_vm14, %v2570_v31, %v6760_v39  ;;  %v2650_v39 = vsel %vm2628_vm15, %v2617_v53, %v6801_v1  ;;  %v2329_v35 = vrot.slane %v2327_v61, 1 }
 0x11b   : > { %v2733_v37 = vsel %vm2727_vm3, %v2700_v28, %v2469_v24  ;;  %v2636_v5 = vsel %vm2628_vm15, %v2603_v26, %v6785_v27  ;;  %v2683_v27 = vsel %vm2661_vm1, %v2650_v39, %v6827_v62  ;;  %v7246_v62 = vld [vmem:[#allocation3_spill] sm:$0xff]  ;;  %v2458_v33 = vrot.slane %v5015_v12, 1 }
 0x11c   : > { %v2357_v10 = vpop.permute.xlu1 %2356  ;;  %2078 = vrot.lane.b32.xlu0 %v4976_v45, %s5583_s23  ;;  %5366 = vmatprep.mubr.msk.bf16.mxu0 %vm2803_vm5, %v2733_v37  ;;  %v2669_v56 = vsel %vm2661_vm1, %v2636_v5, %v6811_v51  ;;  %v2318_v30 = vor.u32 %v2317_v17, %v2313_v52  ;;  %v2330_v16 = vor.u32 %v2329_v35, %v2325_v25  ;;  %v2334_v37 = vrot.slane %v2332_v57, 1 }
 0x11d   : > { %v2702_v59 = vsel %vm2694_vm2, %v2669_v56, %v2343_v32  ;;  %v2716_v60 = vsel %vm2694_vm2, %v2683_v27, %v2357_v10  ;;  %v2520_v32 = vsel %vm2496_vm11, %v7246_v62, %v6710_v34  ;;  %v989_v34 = vld [vmem:[#allocation2 + $0xcc] sm:$0xe]  ;;  %v2462_v52 = vrot.slane %v6879_v14, 1  ;;  %v7247_v27 = vld [vmem:[#allocation4_spill] sm:$0xff] }
 0x11e   : > { %1982 = vrot.lane.b32.xlu1 %v1951_v44, %s5581_s21  ;;  %v6885_v45 = vpop.permute.xlu0 %1319  ;;  %v2553_v28 = vsel %vm2529_vm12, %v2520_v32, %v6738_v54  ;;  %v2323_v44 = vsel %vm1118_vm4, %v2318_v30, %v2322_v49  ;;  %v5016_v4 = vcombine.low %v989_v34, %v6844_v48 }
 0x120   : > { %v2359_v2 = vpop.permute.xlu1 %2358  ;;  %2348 = vrot.lane.b32.xlu0 %v2227_v47, %s5584_s24  ;;  %v2461_v47 = vrot.slane %v5016_v4, 1 }
 0x122   : > { %2092 = vrot.lane.b32.xlu1 %v4983_v42, %s5583_s23  ;;  %v2471_v38 = vpop.permute.xlu0 %2470  ;;  %v2437_v42 = vrot.slane %v5008_v58, 1  ;;  %v2463_v46 = vsel %vm1391_vm6, %v2461_v47, %v2462_v52 }
 0x123   : > { %v2735_v1 = vsel %vm2727_vm3, %v2702_v59, %v2471_v38  ;;  %v2506_v59 = vsel %vm2496_vm11, %v7247_v27, %v6885_v45 }
 0x124   : > { %v2485_v15 = vpop.permute.xlu1 %2484  ;;  %2350 = vrot.lane.b32.xlu0 %v2239_v0, %s5584_s24  ;;  %5367 = vmatmul.mubr.msk.bf16.gmra.mxu0 %vm2803_vm5, %v2735_v1  ;;  %v2439_v54 = vsel %vm1391_vm6, %v2437_v42, %v2438_v3  ;;  %v7249_v3 = vld [vmem:[#allocation6_spill] sm:$0xff] }
 0x125   : > { %v2749_v51 = vsel %vm2727_vm3, %v2716_v60, %v2485_v15 }
 0x126   : > { %2094 = vrot.lane.b32.xlu1 %v6859_v13, %s5583_s23  ;;  %5382 = vmatprep.mubr.msk.bf16.mxu1 %vm2803_vm5, %v2749_v51  ;;  %v1322_v24 = vpop.permute.xlu0 %1321  ;;  %v2586_v13 = vsel %vm2562_vm13, %v2553_v28, %v6765_v40  ;;  %v2335_v40 = vsel %vm1118_vm4, %v2330_v16, %v2334_v37  ;;  %v7248_v51 = vld [vmem:[#allocation5_spill] sm:$0xff]  ;;  %vm4637_vm4 = vcmask 1042434  }
 0x127   : > { %v2619_v50 = vsel %vm2595_vm14, %v2586_v13, %v6789_v21  ;;  %v2459_v21 = vrot.slane %v6861_v11, 1  ;;  %v2508_v42 = vsel %vm2496_vm11, %v7248_v51, %v1322_v24 }
 0x128   : > { %v1336_v10 = vpop.permute.xlu1 %1335  ;;  %2476 = vrot.lane.b32.xlu0 %v2436_v36, %s5585_s25  ;;  %v2652_v41 = vsel %vm2628_vm15, %v2619_v50, %v6814_v22 }
 0x129   : > { %v2685_v6 = vsel %vm2661_vm1, %v2652_v41, %v6848_v8  ;;  %v2460_v8 = vsel %vm1391_vm6, %v2458_v33, %v2459_v21  ;;  %v2522_v12 = vsel %vm2496_vm11, %v7249_v3, %v1336_v10  ;;  %vm4640_vm6 = vcmask 1043459  }
 0x12a   : > { %2364 = vrot.lane.b32.xlu1 %v2323_v44, %s5584_s24  ;;  %v1449_v55 = vpop.permute.xlu0 %1448  ;;  %v2718_v18 = vsel %vm2694_vm2, %v2685_v6, %v2359_v2 }
 0x12b   : > { %v2539_v38 = vsel %vm2529_vm12, %v2506_v59, %v1449_v55 }
 0x12c   : > { %v2487_v43 = vpop.permute.xlu1 %2486  ;;  %2478 = vrot.lane.b32.xlu0 %v2439_v54, %s5585_s25 }
 0x12d   : > { %v2751_v22 = vsel %vm2727_vm3, %v2718_v18, %v2487_v43  ;;  %v7250_v43 = vld [vmem:[#allocation7_spill] sm:$0xff] }
 0x12e   : > { %2366 = vrot.lane.b32.xlu1 %v2335_v40, %s5584_s24  ;;  %5383 = vmatmul.mubr.msk.bf16.gmra.mxu1 %vm2803_vm5, %v2751_v22  ;;  %v1451_v48 = vpop.permute.xlu0 %1450 }
 0x12f   : > { %v2541_v28 = vsel %vm2529_vm12, %v2508_v42, %v1451_v48 }
 0x130   : > { %v1338_v63 = vpop.permute.xlu1 %1337 }
 0x131   : > { %v2524_v22 = vsel %vm2496_vm11, %v7250_v43, %v1338_v63 }
 0x132   : > { %2492 = vrot.lane.b32.xlu1 %v2460_v8, %s5585_s25  ;;  %v1561_v11 = vpop.permute.xlu0 %1560 }
 0x133   : > { %v2572_v30 = vsel %vm2562_vm13, %v2539_v38, %v1561_v11 }
 0x134   : > { %v1465_v31 = vpop.permute.xlu1 %1464 }
 0x135   : > { %v2555_v44 = vsel %vm2529_vm12, %v2522_v12, %v1465_v31 }
 0x136   : > { %2494 = vrot.lane.b32.xlu1 %v2463_v46, %s5585_s25  ;;  %v1563_v17 = vpop.permute.xlu0 %1562 }
 0x137   : > { %v2574_v16 = vsel %vm2562_vm13, %v2541_v28, %v1563_v17 }
 0x138   : > { %v1467_v61 = vpop.permute.xlu1 %1466 }
 0x139   : > { %v2557_v48 = vsel %vm2529_vm12, %v2524_v22, %v1467_v61 }
 0x13a   : > { %v1833_v23 = vpop.permute.xlu0 %1832 }
 0x13b   : > { %v2605_v29 = vsel %vm2595_vm14, %v2572_v30, %v1833_v23 }
 0x13c   : > { %v1577_v26 = vpop.permute.xlu1 %1576 }
 0x13d   : > { %v2588_v24 = vsel %vm2562_vm13, %v2555_v44, %v1577_v26 }
 0x13e   : > { %v1835_v2 = vpop.permute.xlu0 %1834 }
 0x13f   : > { %v2607_v34 = vsel %vm2595_vm14, %v2574_v16, %v1835_v2 }
 0x140   : > { %v1579_v19 = vpop.permute.xlu1 %1578 }
 0x141   : > { %v2590_v47 = vsel %vm2562_vm13, %v2557_v48, %v1579_v19 }
 0x142   : > { %v1961_v58 = vpop.permute.xlu0 %1960 }
 0x143   : > { %v2638_v1 = vsel %vm2628_vm15, %v2605_v29, %v1961_v58 }
 0x144   : > { %v1849_v53 = vpop.permute.xlu1 %1848 }
 0x145   : > { %v2621_v50 = vsel %vm2595_vm14, %v2588_v24, %v1849_v53 }
 0x146   : > { %v1963_v5 = vpop.permute.xlu0 %1962 }
 0x147   : > { %v2640_v41 = vsel %vm2628_vm15, %v2607_v34, %v1963_v5 }
 0x148   : > { %v1851_v0 = vpop.permute.xlu1 %1850 }
 0x149   : > { %v2623_v11 = vsel %vm2595_vm14, %v2590_v47, %v1851_v0 }
 0x14a   : > { %v2073_v14 = vpop.permute.xlu0 %2072 }
 0x14b   : > { %v2671_v15 = vsel %vm2661_vm1, %v2638_v1, %v2073_v14  ;;  %v7251_v1 = vld [vmem:[#allocation8_spill] sm:$0xff] }
 0x14c   : > { %v1977_v25 = vpop.permute.xlu1 %1976 }
 0x14d   : > { %v2654_v54 = vsel %vm2628_vm15, %v2621_v50, %v1977_v25 }
 0x14e   : > { %v2075_v39 = vpop.permute.xlu0 %2074 }
 0x14f   : > { %v2673_v10 = vsel %vm2661_vm1, %v2640_v41, %v2075_v39 }
 0x150   : > { %v1979_v56 = vpop.permute.xlu1 %1978 }
 0x151   : > { %v2656_v46 = vsel %vm2628_vm15, %v2623_v11, %v1979_v56  ;;  %v7025_v11 = vld [vmem:[%s7223_s2] ss:$0 sm:$0xff] }
 0x152   : > { %v2345_v49 = vpop.permute.xlu0 %2344 }
 0x153   : > { %v2704_v62 = vsel %vm2694_vm2, %v2671_v15, %v2345_v49 }
 0x154   : > { %v2089_v57 = vpop.permute.xlu1 %2088 }
 0x155   : > { %v2687_v4 = vsel %vm2661_vm1, %v2654_v54, %v2089_v57  ;;  %v5586_v54 = vmov 1983009808  }
 0x156   : > { %v2347_v35 = vpop.permute.xlu0 %2346 }
 0x157   : > { %v2706_v6 = vsel %vm2694_vm2, %v2673_v10, %v2347_v35  ;;  %v3067_v10 = vunpack.c.l.s4 %v5586_v54 }
 0x158   : > { %v2091_v60 = vpop.permute.xlu1 %2090 }
 0x159   : > { %v2689_v31 = vsel %vm2661_vm1, %v2656_v46, %v2091_v60  ;;  %v3068_v48 = vunpack.c.0.s8 %v3067_v10 }
 0x15a   : > { %v2473_v32 = vpop.permute.xlu0 %2472 }
 0x15b   : > { %v2737_v45 = vsel %vm2727_vm3, %v2704_v62, %v2473_v32 }
 0x15c   : > { %v2361_v36 = vpop.permute.xlu1 %2360  ;;  %5370 = vmatprep.mubr.msk.bf16.mxu0 %vm2803_vm5, %v2737_v45 }
 0x15d   : > { %v2720_v40 = vsel %vm2694_vm2, %v2687_v4, %v2361_v36  ;;  %v3069_v4 = vlaneseq }
 0x15e   : > { %v1324_v37 = vpop.permute.xlu0 %1323 }
 0x15f   : > { %v2510_v15 = vsel %vm2496_vm11, %v7251_v1, %v1324_v37 }
 0x160   : > { %v2363_v13 = vpop.permute.xlu1 %2362 }
 0x161   : > { %v2722_v23 = vsel %vm2694_vm2, %v2689_v31, %v2363_v13 }
 0x162   : > { %v2475_v55 = vpop.permute.xlu0 %2474 }
 0x163   : > { %v2739_v33 = vsel %vm2727_vm3, %v2706_v6, %v2475_v55 }
 0x164   : > { %v2489_v21 = vpop.permute.xlu1 %2488  ;;  %5371 = vmatmul.mubr.msk.bf16.gmra.mxu0 %vm2803_vm5, %v2739_v33 }
 0x165   : > { %v2753_v18 = vsel %vm2727_vm3, %v2720_v40, %v2489_v21 }
 0x166   : > { %5386 = vmatprep.mubr.msk.bf16.mxu1 %vm2803_vm5, %v2753_v18  ;;  %v1326_v8 = vpop.permute.xlu0 %1325 }
 0x167   : > { %v2512_v42 = vsel %vm2496_vm11, %v6611_v9, %v1326_v8  ;;  %v3070_v8 = vshrl.u32 %v3069_v4, 7 }
 0x168   : > { %v1340_v52 = vpop.permute.xlu1 %1339 }
 0x169   : > { %v2526_v50 = vsel %vm2496_vm11, %v6561_v7, %v1340_v52 }
 0x16a   : > { %v1453_v17 = vpop.permute.xlu0 %1452 }
 0x16b   : > { %v2543_v51 = vsel %vm2529_vm12, %v2510_v15, %v1453_v17 }
 0x16c   : > { %v2491_v26 = vpop.permute.xlu1 %2490 }
 0x16d   : > { %v2755_v63 = vsel %vm2727_vm3, %v2722_v23, %v2491_v26 }
 0x16e   : > { %5387 = vmatmul.mubr.msk.bf16.gmra.mxu1 %vm2803_vm5, %v2755_v63  ;;  %v1455_v2 = vpop.permute.xlu0 %1454 }
 0x16f   : > { %v2545_v12 = vsel %vm2529_vm12, %v2512_v42, %v1455_v2 }
 0x170   : > { %v1342_v61 = vpop.permute.xlu1 %1341 }
 0x171   : > { %v2528_v7 = vsel %vm2496_vm11, %v6693_v20, %v1342_v61  ;;  %v7033_v61 = vsub.s32 %v3068_v48, %v3070_v8  ;;  %vm4768_vm11 = vcmask 125952  }
 0x172   : > { %v1565_v58 = vpop.permute.xlu0 %1564 }
 0x173   : > { %v2576_v62 = vsel %vm2562_vm13, %v2543_v51, %v1565_v58 }
 0x174   : > { %v1469_v53 = vpop.permute.xlu1 %1468 }
 0x175   : > { %v2559_v6 = vsel %vm2529_vm12, %v2526_v50, %v1469_v53 }
 0x176   : > { %v1567_v19 = vpop.permute.xlu0 %1566 }
 0x177   : > { %v2578_v44 = vsel %vm2562_vm13, %v2545_v12, %v1567_v19 }
 0x178   : > { %v1471_v5 = vpop.permute.xlu1 %1470 }
 0x179   : > { %v2561_v47 = vsel %vm2529_vm12, %v2528_v7, %v1471_v5 }
 0x17a   : > { %v1837_v14 = vpop.permute.xlu0 %1836 }
 0x17b   : > { %v2609_v45 = vsel %vm2595_vm14, %v2576_v62, %v1837_v14 }
 0x17c   : > { %v1581_v0 = vpop.permute.xlu1 %1580 }
 0x17d   : > { %v2592_v33 = vsel %vm2562_vm13, %v2559_v6, %v1581_v0 }
 0x17e   : > { %v1839_v25 = vpop.permute.xlu0 %1838 }
 0x17f   : > { %v2611_v24 = vsel %vm2595_vm14, %v2578_v44, %v1839_v25 }
 0x180   : > { %v1583_v39 = vpop.permute.xlu1 %1582 }
 0x181   : > { %v2594_v46 = vsel %vm2562_vm13, %v2561_v47, %v1583_v39 }
 0x182   : > { %v1965_v56 = vpop.permute.xlu0 %1964 }
 0x183   : > { %v2642_v3 = vsel %vm2628_vm15, %v2609_v45, %v1965_v56 }
 0x184   : > { %v1853_v49 = vpop.permute.xlu1 %1852 }
 0x185   : > { %v2625_v43 = vsel %vm2595_vm14, %v2592_v33, %v1853_v49 }
 0x186   : > { %v1967_v57 = vpop.permute.xlu0 %1966 }
 0x187   : > { %v2644_v13 = vsel %vm2628_vm15, %v2611_v24, %v1967_v57 }
 0x188   : > { %v1855_v27 = vpop.permute.xlu1 %1854 }
 0x189   : > { %v2627_v20 = vsel %vm2595_vm14, %v2594_v46, %v1855_v27 }
 0x18a   : > { %v2077_v59 = vpop.permute.xlu0 %2076 }
 0x18b   : > { %v2675_v28 = vsel %vm2661_vm1, %v2642_v3, %v2077_v59 }
 0x18c   : > { %v1981_v38 = vpop.permute.xlu1 %1980 }
 0x18d   : > { %v2658_v22 = vsel %vm2628_vm15, %v2625_v43, %v1981_v38 }
 0x18e   : > { %v2079_v30 = vpop.permute.xlu0 %2078 }
 0x18f   : > { %v2677_v41 = vsel %vm2661_vm1, %v2644_v13, %v2079_v30 }
 0x190   : > { %v1983_v35 = vpop.permute.xlu1 %1982 }
 0x191   : > { %v2660_v63 = vsel %vm2628_vm15, %v2627_v20, %v1983_v35 }
 0x192   : > { %v2349_v29 = vpop.permute.xlu0 %2348 }
 0x193   : > { %v2708_v16 = vsel %vm2694_vm2, %v2675_v28, %v2349_v29 }
 0x194   : > { %v2093_v60 = vpop.permute.xlu1 %2092 }
 0x195   : > { %v2691_v52 = vsel %vm2661_vm1, %v2658_v22, %v2093_v60 }
 0x196   : > { %v2351_v32 = vpop.permute.xlu0 %2350 }
 0x197   : > { %v2710_v55 = vsel %vm2694_vm2, %v2677_v41, %v2351_v32 }
 0x198   : > { %v2095_v36 = vpop.permute.xlu1 %2094 }
 0x199   : > { %v2693_v58 = vsel %vm2661_vm1, %v2660_v63, %v2095_v36 }
 0x19a   : > { %v2477_v37 = vpop.permute.xlu0 %2476 }
 0x19b   : > { %v2741_v9 = vsel %vm2727_vm3, %v2708_v16, %v2477_v37 }
 0x19c   : > { %v2365_v34 = vpop.permute.xlu1 %2364  ;;  %5374 = vmatprep.mubr.msk.bf16.mxu0 %vm2803_vm5, %v2741_v9 }
 0x19d   : > { %v2724_v31 = vsel %vm2694_vm2, %v2691_v52, %v2365_v34 }
 0x19e   : > { %v2479_v40 = vpop.permute.xlu0 %2478 }
 0x19f   : > { %v2743_v21 = vsel %vm2727_vm3, %v2710_v55, %v2479_v40 }
 0x1a0   : > { %v2367_v18 = vpop.permute.xlu1 %2366  ;;  %5375 = vmatmul.mubr.msk.bf16.gmra.mxu0 %vm2803_vm5, %v2743_v21 }
 0x1a1   : > { %v2726_v19 = vsel %vm2694_vm2, %v2693_v58, %v2367_v18 }
 0x1a4   : > { %v2493_v17 = vpop.permute.xlu1 %2492  ;;  %v5364_v26 = vpop.f32.mrf.mxu0 }
 0x1a5   : > { %v2757_v23 = vsel %vm2727_vm3, %v2724_v31, %v2493_v17  ;;  %v2883_v2 = vadd.f32 %v5364_v26, %v7025_v11 }
 0x1a6   : > { %5390 = vmatprep.mubr.msk.bf16.mxu1 %vm2803_vm5, %v2757_v23  ;;  %v2874_v53 = vpop.f32.mrf.mxu0 }
 0x1a7   : > { %v3003_v5 = vmax.f32 %v2883_v2, 0.0  ;;  %v2875_v14 = vadd.f32 %v7025_v11, %v2874_v53 }
 0x1a8   : > { %v2495_v0 = vpop.permute.xlu1 %2494  ;;  %v5365_v39 = vpop.f32.mrf.mxu0 }
 0x1a9   : > { %v2759_v25 = vsel %vm2727_vm3, %v2726_v19, %v2495_v0  ;;  %v3099_v56 = vcombine.high %v3003_v5, %v3003_v5  ;;  %v3106_v49 = vrot.slane %v3003_v5, %v7033_v61  ;;  %v3001_v57 = vmax.f32 %v2875_v14, 0.0 }
 0x1aa   : > { %v2886_v27 = vadd.f32 %v5365_v39, %v7025_v11  ;;  %5391 = vmatmul.mubr.msk.bf16.gmra.mxu1 %vm2803_vm5, %v2759_v25  ;;  %v2877_v59 = vpop.f32.mrf.mxu0 }
 0x1ab   : > { %v3113_v38 = vrot.slane %v3099_v56, %v7033_v61  ;;  %v3114_v30 = vcombine.high %v3106_v49, %v3106_v49  ;;  %v5047_v35 = vrot.slane %v3106_v49, 9  ;;  %v3065_v29 = vcombine.high %v3001_v57, %v3001_v57 }
 0x1ac   : > { %v3072_v60 = vrot.slane %v3001_v57, %v7033_v61  ;;  %v3004_v1 = vmax.f32 %v2886_v27, 0.0  ;;  %v2878_v62 = vadd.f32 %v7025_v11, %v2877_v59 }
 0x1ad   : > { %v3115_v15 = vcombine.high %v3113_v38, %v3113_v38  ;;  %v5048_v51 = vrot.slane %v3114_v30, 9  ;;  %v5049_v42 = vrot.slane %v3113_v38, 9  ;;  %v3079_v32 = vrot.slane %v3065_v29, %v7033_v61 }
 0x1ae   : > { %v3080_v45 = vcombine.high %v3072_v60, %v3072_v60  ;;  %v5039_v36 = vrot.slane %v3072_v60, 9  ;;  %v3116_v3 = vcombine.high %v3004_v1, %v3004_v1  ;;  %v4129_v28 = vmax.f32 %v3106_v49, %v5047_v35  ;;  %v5380_v43 = vpop.f32.mrf.mxu1 }
 0x1af   : > { %v5050_v12 = vrot.slane %v3115_v15, 9  ;;  %v4130_v44 = vmax.f32 %v3114_v30, %v5048_v51  ;;  %v3123_v16 = vrot.slane %v3004_v1, %v7033_v61  ;;  %v3081_v37 = vcombine.high %v3079_v32, %v3079_v32 }
 0x1b0   : > { %v5040_v24 = vrot.slane %v3080_v45, 9  ;;  %v5041_v9 = vrot.slane %v3079_v32, 9  ;;  %v4121_v34 = vmax.f32 %v3072_v60, %v5039_v36  ;;  %v4131_v13 = vmax.f32 %v3113_v38, %v5049_v42  ;;  %v2938_v53 = vpop.f32.mrf.mxu1 }
 0x1b1   : > { %v3130_v50 = vrot.slane %v3116_v3, %v7033_v61  ;;  %v3131_v41 = vcombine.high %v3123_v16, %v3123_v16  ;;  %v5051_v54 = vrot.slane %v3123_v16, 9  ;;  %v5042_v10 = vrot.slane %v3081_v37, 9 }
 0x1b2   : > { %v4122_v4 = vmax.f32 %v3080_v45, %v5040_v24  ;;  %v4123_v6 = vmax.f32 %v3079_v32, %v5041_v9  ;;  %v4249_v55 = vmax.f32 %v4121_v34, %v4129_v28  ;;  %v4132_v40 = vmax.f32 %v3115_v15, %v5050_v12 }
 0x1b3   : > { %v3132_v33 = vcombine.high %v3130_v50, %v3130_v50  ;;  %v5052_v21 = vrot.slane %v3131_v41, 9  ;;  %v5053_v18 = vrot.slane %v3130_v50, 9  ;;  %v4124_v7 = vmax.f32 %v3081_v37, %v5042_v10 }
 0x1b4   : > { %v4250_v22 = vmax.f32 %v4122_v4, %v4130_v44  ;;  %v4251_v48 = vmax.f32 %v4123_v6, %v4131_v13  ;;  %v5267_v8 = vpack.c.bf16 %v4249_v55, %v4249_v55  ;;  %v4133_v52 = vmax.f32 %v3123_v16, %v5051_v54  ;;  %v5381_v4 = vpop.f32.mrf.mxu1 }
 0x1b5   : > { %v5054_v47 = vrot.slane %v3132_v33, 9  ;;  %v3002_v46 = vmax.f32 %v2878_v62, 0.0  ;;  %v4252_v31 = vmax.f32 %v4124_v7, %v4132_v40  ;;  %v4134_v23 = vmax.f32 %v3131_v41, %v5052_v21 }
 0x1b6   : > { %v5268_v17 = vpack.c.bf16 %v4250_v22, %v4250_v22  ;;  %v5269_v20 = vpack.c.bf16 %v4251_v48, %v4251_v48  ;;  %v4135_v26 = vmax.f32 %v3130_v50, %v5053_v18  ;;  %v2947_v58 = vadd.f32 %v5380_v43, %v7025_v11 }
 0x1b7   : > { %v3082_v63 = vcombine.high %v3002_v46, %v3002_v46  ;;  %v3089_v2 = vrot.slane %v3002_v46, %v7033_v61  ;;  %v5270_v19 = vpack.c.bf16 %v4252_v31, %v4252_v31  ;;  %v4569_v5 = vunpack.c.l.b16 %v5267_v8 }
 0x1b8   : > { %v4570_v14 = vunpack.c.l.b16 %v5268_v17  ;;  %v4571_v0 = vunpack.c.l.b16 %v5269_v20  ;;  %v3019_v49 = vmax.f32 %v2947_v58, 0.0  ;;  %v2939_v38 = vadd.f32 %v7025_v11, %v2938_v53 }
 0x1b9   : > { %v3096_v25 = vrot.slane %v3082_v63, %v7033_v61  ;;  %v3097_v39 = vcombine.high %v3089_v2, %v3089_v2  ;;  %v5043_v56 = vrot.slane %v3089_v2, 9  ;;  %v4572_v57 = vunpack.c.l.b16 %v5270_v19 }
 0x1ba   : > { %v4633_v27 = vrot.slane %v4570_v14, 7  ;;  %v4636_v59 = vrot.slane %v4571_v0, 6  ;;  %v4136_v15 = vmax.f32 %v3132_v33, %v5054_v47  ;;  %v3371_v51 = vcombine.high %v3019_v49, %v3019_v49 }
 0x1bb   : > { %v3098_v30 = vcombine.high %v3096_v25, %v3096_v25  ;;  %v5044_v35 = vrot.slane %v3097_v39, 9  ;;  %v5045_v29 = vrot.slane %v3096_v25, 9  ;;  %v4125_v60 = vmax.f32 %v3089_v2, %v5043_v56 }
 0x1bc   : > { %v4635_v1 = vsel %vm4634_vm0, %v4633_v27, %v4569_v5  ;;  %v3378_v42 = vrot.slane %v3019_v49, %v7033_v61  ;;  %v4639_v62 = vrot.slane %v4572_v57, 5  ;;  %v3385_v28 = vrot.slane %v3371_v51, %v7033_v61 }
 0x1bd   : > { %v5046_v32 = vrot.slane %v3098_v30, 9  ;;  %v4126_v45 = vmax.f32 %v3097_v39, %v5044_v35  ;;  %v4127_v36 = vmax.f32 %v3096_v25, %v5045_v29  ;;  %v4638_v3 = vsel %vm4637_vm4, %v4636_v59, %v4635_v1 }
 0x1be   : > { %v4253_v12 = vmax.f32 %v4125_v60, %v4133_v52  ;;  %v3386_v44 = vcombine.high %v3378_v42, %v3378_v42  ;;  %v3017_v9 = vmax.f32 %v2939_v38, 0.0  ;;  %v5111_v13 = vrot.slane %v3378_v42, 9 }
 0x1bf   : > { %v4128_v16 = vmax.f32 %v3098_v30, %v5046_v32  ;;  %v4254_v37 = vmax.f32 %v4126_v45, %v4134_v23  ;;  %v4255_v24 = vmax.f32 %v4127_v36, %v4135_v26  ;;  %v4641_v10 = vsel %vm4640_vm6, %v4639_v62, %v4638_v3 }
 0x1c0   : > { %v5271_v34 = vpack.c.bf16 %v4253_v12, %v4253_v12  ;;  %v3387_v55 = vcombine.high %v3385_v28, %v3385_v28  ;;  %v5112_v40 = vrot.slane %v3386_v44, 9  ;;  %v5113_v33 = vrot.slane %v3385_v28, 9 }
 0x1c1   : > { %v4256_v50 = vmax.f32 %v4128_v16, %v4136_v15  ;;  %v5272_v41 = vpack.c.bf16 %v4254_v37, %v4254_v37  ;;  %v5273_v54 = vpack.c.bf16 %v4255_v24, %v4255_v24  ;;  %v3337_v7 = vcombine.high %v3017_v9, %v3017_v9 }
 0x1c2   : > { %v4573_v6 = vunpack.c.l.b16 %v5271_v34  ;;  %v4193_v48 = vmax.f32 %v3378_v42, %v5111_v13  ;;  %v3344_v8 = vrot.slane %v3017_v9, %v7033_v61  ;;  %v2950_v47 = vadd.f32 %v5381_v4, %v7025_v11  ;;  %v2941_v42 = vpop.f32.mrf.mxu1 }
 0x1c3   : > { %v5274_v21 = vpack.c.bf16 %v4256_v50, %v4256_v50  ;;  %v4574_v18 = vunpack.c.l.b16 %v5272_v41  ;;  %v4575_v43 = vunpack.c.l.b16 %v5273_v54  ;;  %v3351_v17 = vrot.slane %v3337_v7, %v7033_v61 }
 0x1c4   : > { %v4642_v22 = vrot.slane %v4573_v6, 4  ;;  %v3352_v23 = vcombine.high %v3344_v8, %v3344_v8  ;;  %v5103_v26 = vrot.slane %v3344_v8, 9  ;;  %v3020_v63 = vmax.f32 %v2950_v47, 0.0 }
 0x1c5   : > { %v4576_v52 = vunpack.c.l.b16 %v5274_v21  ;;  %v4645_v46 = vrot.slane %v4574_v18, 3  ;;  %v4648_v31 = vrot.slane %v4575_v43, 2  ;;  %v3353_v53 = vcombine.high %v3351_v17, %v3351_v17 }
 0x1c6   : > { %v4644_v20 = vsel %vm4643_vm7, %v4642_v22, %v4641_v10  ;;  %v5105_v19 = vrot.slane %v3351_v17, 9  ;;  %v5114_v14 = vrot.slane %v3387_v55, 9  ;;  %v5104_v0 = vrot.slane %v3352_v23, 9 }
 0x1c7   : > { %v4647_v2 = vsel %vm4646_vm8, %v4645_v46, %v4644_v20  ;;  %v4651_v58 = vrot.slane %v4576_v52, 1  ;;  %v4185_v25 = vmax.f32 %v3344_v8, %v5103_v26  ;;  %v4195_v56 = vmax.f32 %v3385_v28, %v5113_v33 }
 0x1c8   : > { %v4650_v5 = vsel %vm4649_vm9, %v4648_v31, %v4647_v2  ;;  %v5106_v49 = vrot.slane %v3353_v53, 9  ;;  %v4187_v57 = vmax.f32 %v3351_v17, %v5105_v19  ;;  %v4194_v59 = vmax.f32 %v3386_v44, %v5112_v40 }
 0x1c9   : > { %v4653_v39 = vsel %vm4652_vm10, %v4651_v58, %v4650_v5  ;;  %v4186_v38 = vmax.f32 %v3352_v23, %v5104_v0  ;;  %v3388_v30 = vcombine.high %v3020_v63, %v3020_v63  ;;  %v4196_v60 = vmax.f32 %v3387_v55, %v5114_v14 }
 0x1ca   : > { %v4752_v27 = vpack.c.b16 %v4653_v39, %v4653_v39  ;;  %v4188_v35 = vmax.f32 %v3353_v53, %v5106_v49  ;;  %v4283_v29 = vmax.f32 %v4187_v57, %v4195_v56  ;;  %v4281_v1 = vmax.f32 %v4185_v25, %v4193_v48 }
 0x1cb   : > { %v4282_v15 = vmax.f32 %v4186_v38, %v4194_v59  ;;  %v3395_v51 = vrot.slane %v3020_v63, %v7033_v61  ;;  %v3402_v36 = vrot.slane %v3388_v30, %v7033_v61  ;;  %v2942_v3 = vadd.f32 %v7025_v11, %v2941_v42 }
 0x1cc   : > { %4769 = vst.msk [vmem:[%s7068_s16] sm:$0xf] %vm4768_vm11, %v4752_v27  ;;  %v4284_v62 = vmax.f32 %v4188_v35, %v4196_v60  ;;  %v5301_v45 = vpack.c.bf16 %v4283_v29, %v4283_v29  ;;  %v5299_v12 = vpack.c.bf16 %v4281_v1, %v4281_v1 }
 0x1cd   : > { %v5300_v32 = vpack.c.bf16 %v4282_v15, %v4282_v15  ;;  %v3403_v44 = vcombine.high %v3395_v51, %v3395_v51  ;;  %v5115_v16 = vrot.slane %v3395_v51, 9  ;;  %v3018_v37 = vmax.f32 %v2942_v3, 0.0 }
 0x1ce   : > { %v5302_v24 = vpack.c.bf16 %v4284_v62, %v4284_v62  ;;  %v4603_v9 = vunpack.c.l.b16 %v5301_v45  ;;  %v3404_v13 = vcombine.high %v3402_v36, %v3402_v36  ;;  %v4601_v54 = vunpack.c.l.b16 %v5299_v12 }
 0x1cf   : > { %v4602_v28 = vunpack.c.l.b16 %v5300_v32  ;;  %v3354_v50 = vcombine.high %v3018_v37, %v3018_v37  ;;  %v3361_v41 = vrot.slane %v3018_v37, %v7033_v61  ;;  %v5116_v10 = vrot.slane %v3403_v44, 9 }
 0x1d0   : > { %v5117_v4 = vrot.slane %v3402_v36, 9  ;;  %v4197_v6 = vmax.f32 %v3395_v51, %v5115_v16  ;;  %v4604_v21 = vunpack.c.l.b16 %v5302_v24  ;;  %v4698_v43 = vrot.slane %v4603_v9, 6 }
 0x1d1   : > { %v4696_v34 = vrot.slane %v4602_v28, 7  ;;  %v3368_v55 = vrot.slane %v3354_v50, %v7033_v61  ;;  %v3369_v40 = vcombine.high %v3361_v41, %v3361_v41  ;;  %v5107_v33 = vrot.slane %v3361_v41, 9 }
 0x1d2   : > { %v5118_v7 = vrot.slane %v3404_v13, 9  ;;  %v4198_v52 = vmax.f32 %v3403_v44, %v5116_v10  ;;  %v4199_v46 = vmax.f32 %v3402_v36, %v5117_v4  ;;  %v4700_v63 = vrot.slane %v4604_v21, 5 }
 0x1d3   : > { %v4697_v18 = vsel %vm4634_vm0, %v4696_v34, %v4601_v54  ;;  %v3370_v22 = vcombine.high %v3368_v55, %v3368_v55  ;;  %v5108_v48 = vrot.slane %v3369_v40, 9  ;;  %v5109_v8 = vrot.slane %v3368_v55, 9 }
 0x1d4   : > { %v4189_v47 = vmax.f32 %v3361_v41, %v5107_v33  ;;  %v4699_v26 = vsel %vm4637_vm4, %v4698_v43, %v4697_v18  ;;  %v4200_v2 = vmax.f32 %v3404_v13, %v5118_v7 }
 0x1d5   : > { %v5110_v31 = vrot.slane %v3370_v22, 9  ;;  %v4190_v17 = vmax.f32 %v3369_v40, %v5108_v48  ;;  %v4191_v20 = vmax.f32 %v3368_v55, %v5109_v8  ;;  %v4701_v56 = vsel %vm4640_vm6, %v4700_v63, %v4699_v26 }
 0x1d6   : > { %v4285_v23 = vmax.f32 %v4189_v47, %v4197_v6 }
 0x1d7   : > { %v4192_v58 = vmax.f32 %v3370_v22, %v5110_v31  ;;  %v4286_v53 = vmax.f32 %v4190_v17, %v4198_v52  ;;  %v4287_v19 = vmax.f32 %v4191_v20, %v4199_v46 }
 0x1d8   : > { %v5303_v5 = vpack.c.bf16 %v4285_v23, %v4285_v23 }
 0x1d9   : > { %v4288_v14 = vmax.f32 %v4192_v58, %v4200_v2  ;;  %v5304_v0 = vpack.c.bf16 %v4286_v53, %v4286_v53  ;;  %v5305_v25 = vpack.c.bf16 %v4287_v19, %v4287_v19 }
 0x1da   : > { %v4605_v39 = vunpack.c.l.b16 %v5303_v5 }
 0x1db   : > { %v5306_v49 = vpack.c.bf16 %v4288_v14, %v4288_v14  ;;  %v4606_v57 = vunpack.c.l.b16 %v5304_v0  ;;  %v4607_v27 = vunpack.c.l.b16 %v5305_v25 }
 0x1dc   : > { %v4702_v59 = vrot.slane %v4605_v39, 4 }
 0x1dd   : > { %v4608_v38 = vunpack.c.l.b16 %v5306_v49  ;;  %v4704_v35 = vrot.slane %v4606_v57, 3  ;;  %v4706_v29 = vrot.slane %v4607_v27, 2 }
 0x1de   : > { %v4703_v30 = vsel %vm4643_vm7, %v4702_v59, %v4701_v56 }
 0x1df   : > { %v4705_v60 = vsel %vm4646_vm8, %v4704_v35, %v4703_v30  ;;  %v4708_v1 = vrot.slane %v4608_v38, 1 }
 0x1e0   : > { %v4707_v15 = vsel %vm4649_vm9, %v4706_v29, %v4705_v60 }
 0x1e1   : > { %v4709_v42 = vsel %vm4652_vm10, %v4708_v1, %v4707_v15 }
 0x1e2   : > { %v4756_v32 = vpack.c.b16 %v4709_v42, %v4709_v42 }
 0x1e4   : > { %v5368_v51 = vpop.f32.mrf.mxu0  ;;  %4773 = vst.msk [vmem:[%s7068_s16 + $0x10] sm:$0xf] %vm4768_vm11, %v4756_v32 }
 0x1e5   : > { %v2899_v62 = vadd.f32 %v5368_v51, %v7025_v11 }
 0x1e6   : > { %v2890_v45 = vpop.f32.mrf.mxu0 }
 0x1e7   : > { %v3007_v36 = vmax.f32 %v2899_v62, 0.0  ;;  %v2891_v3 = vadd.f32 %v7025_v11, %v2890_v45 }
 0x1e8   : > { %v5369_v12 = vpop.f32.mrf.mxu0 }
 0x1e9   : > { %v3167_v28 = vcombine.high %v3007_v36, %v3007_v36  ;;  %v3174_v44 = vrot.slane %v3007_v36, %v7033_v61  ;;  %v3005_v16 = vmax.f32 %v2891_v3, 0.0  ;;  %v2902_v37 = vadd.f32 %v5369_v12, %v7025_v11 }
 0x1ea   : > { %v2893_v24 = vpop.f32.mrf.mxu0 }
 0x1eb   : > { %v3181_v9 = vrot.slane %v3167_v28, %v7033_v61  ;;  %v3182_v34 = vcombine.high %v3174_v44, %v3174_v44  ;;  %v5063_v13 = vrot.slane %v3174_v44, 9  ;;  %v3133_v50 = vcombine.high %v3005_v16, %v3005_v16 }
 0x1ec   : > { %v3140_v41 = vrot.slane %v3005_v16, %v7033_v61  ;;  %v3008_v54 = vmax.f32 %v2902_v37, 0.0  ;;  %v2894_v55 = vadd.f32 %v7025_v11, %v2893_v24 }
 0x1ed   : > { %v3183_v10 = vcombine.high %v3181_v9, %v3181_v9  ;;  %v5064_v4 = vrot.slane %v3182_v34, 9  ;;  %v5065_v6 = vrot.slane %v3181_v9, 9  ;;  %v3147_v40 = vrot.slane %v3133_v50, %v7033_v61 }
 0x1ee   : > { %v3148_v33 = vcombine.high %v3140_v41, %v3140_v41  ;;  %v5055_v21 = vrot.slane %v3140_v41, 9  ;;  %v3184_v18 = vcombine.high %v3008_v54, %v3008_v54  ;;  %v4145_v7 = vmax.f32 %v3174_v44, %v5063_v13  ;;  %v5384_v0 = vpop.f32.mrf.mxu1 }
 0x1ef   : > { %v5066_v43 = vrot.slane %v3183_v10, 9  ;;  %v4146_v22 = vmax.f32 %v3182_v34, %v5064_v4  ;;  %v3191_v48 = vrot.slane %v3008_v54, %v7033_v61  ;;  %v3149_v8 = vcombine.high %v3147_v40, %v3147_v40 }
 0x1f0   : > { %v5056_v47 = vrot.slane %v3148_v33, 9  ;;  %v5057_v52 = vrot.slane %v3147_v40, 9  ;;  %v4137_v46 = vmax.f32 %v3140_v41, %v5055_v21  ;;  %v4147_v31 = vmax.f32 %v3181_v9, %v5065_v6  ;;  %v2954_v42 = vpop.f32.mrf.mxu1 }
 0x1f1   : > { %v3198_v17 = vrot.slane %v3184_v18, %v7033_v61  ;;  %v3199_v20 = vcombine.high %v3191_v48, %v3191_v48  ;;  %v5067_v23 = vrot.slane %v3191_v48, 9  ;;  %v5058_v26 = vrot.slane %v3149_v8, 9 }
 0x1f2   : > { %v4138_v63 = vmax.f32 %v3148_v33, %v5056_v47  ;;  %v4139_v2 = vmax.f32 %v3147_v40, %v5057_v52  ;;  %v4257_v58 = vmax.f32 %v4137_v46, %v4145_v7  ;;  %v4148_v53 = vmax.f32 %v3183_v10, %v5066_v43 }
 0x1f3   : > { %v3200_v19 = vcombine.high %v3198_v17, %v3198_v17  ;;  %v5068_v5 = vrot.slane %v3199_v20, 9  ;;  %v5069_v14 = vrot.slane %v3198_v17, 9  ;;  %v4140_v25 = vmax.f32 %v3149_v8, %v5058_v26 }
 0x1f4   : > { %v4258_v39 = vmax.f32 %v4138_v63, %v4146_v22  ;;  %v4259_v56 = vmax.f32 %v4139_v2, %v4147_v31  ;;  %v5275_v49 = vpack.c.bf16 %v4257_v58, %v4257_v58  ;;  %v4149_v27 = vmax.f32 %v3191_v48, %v5067_v23  ;;  %v5385_v63 = vpop.f32.mrf.mxu1 }
 0x1f5   : > { %v5070_v57 = vrot.slane %v3200_v19, 9  ;;  %v3006_v59 = vmax.f32 %v2894_v55, 0.0  ;;  %v4260_v38 = vmax.f32 %v4140_v25, %v4148_v53  ;;  %v4150_v29 = vmax.f32 %v3199_v20, %v5068_v5 }
 0x1f6   : > { %v5276_v30 = vpack.c.bf16 %v4258_v39, %v4258_v39  ;;  %v5277_v35 = vpack.c.bf16 %v4259_v56, %v4259_v56  ;;  %v4151_v60 = vmax.f32 %v3198_v17, %v5069_v14  ;;  %v2963_v51 = vadd.f32 %v5384_v0, %v7025_v11 }
 0x1f7   : > { %v3150_v1 = vcombine.high %v3006_v59, %v3006_v59  ;;  %v3157_v15 = vrot.slane %v3006_v59, %v7033_v61  ;;  %v5278_v62 = vpack.c.bf16 %v4260_v38, %v4260_v38  ;;  %v4577_v32 = vunpack.c.l.b16 %v5275_v49 }
 0x1f8   : > { %v4578_v45 = vunpack.c.l.b16 %v5276_v30  ;;  %v4579_v36 = vunpack.c.l.b16 %v5277_v35  ;;  %v3023_v44 = vmax.f32 %v2963_v51, 0.0  ;;  %v2955_v9 = vadd.f32 %v7025_v11, %v2954_v42 }
 0x1f9   : > { %v3164_v3 = vrot.slane %v3150_v1, %v7033_v61  ;;  %v3165_v12 = vcombine.high %v3157_v15, %v3157_v15  ;;  %v5059_v28 = vrot.slane %v3157_v15, 9  ;;  %v4580_v16 = vunpack.c.l.b16 %v5278_v62 }
 0x1fa   : > { %v4654_v37 = vrot.slane %v4578_v45, 7  ;;  %v4656_v24 = vrot.slane %v4579_v36, 6  ;;  %v4152_v10 = vmax.f32 %v3200_v19, %v5070_v57  ;;  %v3439_v4 = vcombine.high %v3023_v44, %v3023_v44 }
 0x1fb   : > { %v3166_v34 = vcombine.high %v3164_v3, %v3164_v3  ;;  %v5060_v13 = vrot.slane %v3165_v12, 9  ;;  %v5061_v50 = vrot.slane %v3164_v3, 9  ;;  %v4141_v41 = vmax.f32 %v3157_v15, %v5059_v28 }
 0x1fc   : > { %v4655_v54 = vsel %vm4634_vm0, %v4654_v37, %v4577_v32  ;;  %v3446_v6 = vrot.slane %v3023_v44, %v7033_v61  ;;  %v4658_v55 = vrot.slane %v4580_v16, 5  ;;  %v3453_v7 = vrot.slane %v3439_v4, %v7033_v61 }
 0x1fd   : > { %v5062_v40 = vrot.slane %v3166_v34, 9  ;;  %v4142_v33 = vmax.f32 %v3165_v12, %v5060_v13  ;;  %v4143_v21 = vmax.f32 %v3164_v3, %v5061_v50  ;;  %v4657_v18 = vsel %vm4637_vm4, %v4656_v24, %v4655_v54 }
 0x1fe   : > { %v4261_v43 = vmax.f32 %v4141_v41, %v4149_v27  ;;  %v3454_v22 = vcombine.high %v3446_v6, %v3446_v6  ;;  %v3021_v52 = vmax.f32 %v2955_v9, 0.0  ;;  %v5127_v31 = vrot.slane %v3446_v6, 9 }
 0x1ff   : > { %v4144_v48 = vmax.f32 %v3166_v34, %v5062_v40  ;;  %v4262_v8 = vmax.f32 %v4142_v33, %v4150_v29  ;;  %v4263_v47 = vmax.f32 %v4143_v21, %v4151_v60  ;;  %v4659_v26 = vsel %vm4640_vm6, %v4658_v55, %v4657_v18 }
 0x200   : > { %v5279_v46 = vpack.c.bf16 %v4261_v43, %v4261_v43  ;;  %v3455_v58 = vcombine.high %v3453_v7, %v3453_v7  ;;  %v5128_v53 = vrot.slane %v3454_v22, 9  ;;  %v5129_v19 = vrot.slane %v3453_v7, 9 }
 0x201   : > { %v4264_v17 = vmax.f32 %v4144_v48, %v4152_v10  ;;  %v5280_v20 = vpack.c.bf16 %v4262_v8, %v4262_v8  ;;  %v5281_v23 = vpack.c.bf16 %v4263_v47, %v4263_v47  ;;  %v3405_v25 = vcombine.high %v3021_v52, %v3021_v52 }
 0x202   : > { %v4581_v2 = vunpack.c.l.b16 %v5279_v46  ;;  %v4209_v56 = vmax.f32 %v3446_v6, %v5127_v31  ;;  %v3412_v49 = vrot.slane %v3021_v52, %v7033_v61  ;;  %v2966_v57 = vadd.f32 %v5385_v63, %v7025_v11  ;;  %v2957_v6 = vpop.f32.mrf.mxu1 }
 0x203   : > { %v5282_v5 = vpack.c.bf16 %v4264_v17, %v4264_v17  ;;  %v4582_v14 = vunpack.c.l.b16 %v5280_v20  ;;  %v4583_v0 = vunpack.c.l.b16 %v5281_v23  ;;  %v3419_v30 = vrot.slane %v3405_v25, %v7033_v61 }
 0x204   : > { %v4660_v39 = vrot.slane %v4581_v2, 4  ;;  %v3420_v29 = vcombine.high %v3412_v49, %v3412_v49  ;;  %v5119_v60 = vrot.slane %v3412_v49, 9  ;;  %v3024_v1 = vmax.f32 %v2966_v57, 0.0 }
 0x205   : > { %v4584_v27 = vunpack.c.l.b16 %v5282_v5  ;;  %v4662_v59 = vrot.slane %v4582_v14, 3  ;;  %v4664_v38 = vrot.slane %v4583_v0, 2  ;;  %v3421_v42 = vcombine.high %v3419_v30, %v3419_v30 }
 0x206   : > { %v4661_v35 = vsel %vm4643_vm7, %v4660_v39, %v4659_v26  ;;  %v5121_v62 = vrot.slane %v3419_v30, 9  ;;  %v5130_v45 = vrot.slane %v3455_v58, 9  ;;  %v5120_v36 = vrot.slane %v3420_v29, 9 }
 0x207   : > { %v4663_v15 = vsel %vm4646_vm8, %v4662_v59, %v4661_v35  ;;  %v4666_v51 = vrot.slane %v4584_v27, 1  ;;  %v4201_v3 = vmax.f32 %v3412_v49, %v5119_v60  ;;  %v4211_v28 = vmax.f32 %v3453_v7, %v5129_v19 }
 0x208   : > { %v4665_v32 = vsel %vm4649_vm9, %v4664_v38, %v4663_v15  ;;  %v5122_v44 = vrot.slane %v3421_v42, 9  ;;  %v4203_v16 = vmax.f32 %v3419_v30, %v5121_v62  ;;  %v4210_v24 = vmax.f32 %v3454_v22, %v5128_v53 }
 0x209   : > { %v4667_v12 = vsel %vm4652_vm10, %v4666_v51, %v4665_v32  ;;  %v4202_v9 = vmax.f32 %v3420_v29, %v5120_v36  ;;  %v3456_v34 = vcombine.high %v3024_v1, %v3024_v1  ;;  %v4212_v41 = vmax.f32 %v3455_v58, %v5130_v45 }
 0x20a   : > { %v4753_v37 = vpack.c.b16 %v4667_v12, %v4667_v12  ;;  %v4204_v13 = vmax.f32 %v3421_v42, %v5122_v44  ;;  %v4291_v50 = vmax.f32 %v4203_v16, %v4211_v28  ;;  %v4289_v54 = vmax.f32 %v4201_v3, %v4209_v56 }
 0x20b   : > { %v4290_v10 = vmax.f32 %v4202_v9, %v4210_v24  ;;  %v3463_v4 = vrot.slane %v3024_v1, %v7033_v61  ;;  %v3470_v21 = vrot.slane %v3456_v34, %v7033_v61  ;;  %v2958_v18 = vadd.f32 %v7025_v11, %v2957_v6 }
 0x20c   : > { %4770 = vst.msk [vmem:[%s7068_s16 + $0x4] sm:$0xf] %vm4768_vm11, %v4753_v37  ;;  %v4292_v55 = vmax.f32 %v4204_v13, %v4212_v41  ;;  %v5309_v33 = vpack.c.bf16 %v4291_v50, %v4291_v50  ;;  %v5307_v43 = vpack.c.bf16 %v4289_v54, %v4289_v54 }
 0x20d   : > { %v5308_v40 = vpack.c.bf16 %v4290_v10, %v4290_v10  ;;  %v3471_v22 = vcombine.high %v3463_v4, %v3463_v4  ;;  %v5131_v48 = vrot.slane %v3463_v4, 9  ;;  %v3022_v8 = vmax.f32 %v2958_v18, 0.0 }
 0x20e   : > { %v5310_v47 = vpack.c.bf16 %v4292_v55, %v4292_v55  ;;  %v4611_v52 = vunpack.c.l.b16 %v5309_v33  ;;  %v3472_v31 = vcombine.high %v3470_v21, %v3470_v21  ;;  %v4609_v23 = vunpack.c.l.b16 %v5307_v43 }
 0x20f   : > { %v4610_v7 = vunpack.c.l.b16 %v5308_v40  ;;  %v3422_v17 = vcombine.high %v3022_v8, %v3022_v8  ;;  %v3429_v20 = vrot.slane %v3022_v8, %v7033_v61  ;;  %v5132_v26 = vrot.slane %v3471_v22, 9 }
 0x210   : > { %v5133_v63 = vrot.slane %v3470_v21, 9  ;;  %v4213_v2 = vmax.f32 %v3463_v4, %v5131_v48  ;;  %v4612_v5 = vunpack.c.l.b16 %v5310_v47  ;;  %v4712_v0 = vrot.slane %v4611_v52, 6 }
 0x211   : > { %v4710_v46 = vrot.slane %v4610_v7, 7  ;;  %v3436_v58 = vrot.slane %v3422_v17, %v7033_v61  ;;  %v3437_v53 = vcombine.high %v3429_v20, %v3429_v20  ;;  %v5123_v19 = vrot.slane %v3429_v20, 9 }
 0x212   : > { %v5134_v25 = vrot.slane %v3472_v31, 9  ;;  %v4214_v27 = vmax.f32 %v3471_v22, %v5132_v26  ;;  %v4215_v59 = vmax.f32 %v3470_v21, %v5133_v63  ;;  %v4714_v1 = vrot.slane %v4612_v5, 5 }
 0x213   : > { %v4711_v14 = vsel %vm4634_vm0, %v4710_v46, %v4609_v23  ;;  %v3438_v39 = vcombine.high %v3436_v58, %v3436_v58  ;;  %v5124_v56 = vrot.slane %v3437_v53, 9  ;;  %v5125_v49 = vrot.slane %v3436_v58, 9 }
 0x214   : > { %v4205_v57 = vmax.f32 %v3429_v20, %v5123_v19  ;;  %v4713_v60 = vsel %vm4637_vm4, %v4712_v0, %v4711_v14  ;;  %v4216_v15 = vmax.f32 %v3472_v31, %v5134_v25 }
 0x215   : > { %v5126_v38 = vrot.slane %v3438_v39, 9  ;;  %v4206_v30 = vmax.f32 %v3437_v53, %v5124_v56  ;;  %v4207_v35 = vmax.f32 %v3436_v58, %v5125_v49  ;;  %v4715_v28 = vsel %vm4640_vm6, %v4714_v1, %v4713_v60 }
 0x216   : > { %v4293_v29 = vmax.f32 %v4205_v57, %v4213_v2 }
 0x217   : > { %v4208_v51 = vmax.f32 %v3438_v39, %v5126_v38  ;;  %v4294_v42 = vmax.f32 %v4206_v30, %v4214_v27  ;;  %v4295_v62 = vmax.f32 %v4207_v35, %v4215_v59 }
 0x218   : > { %v5311_v32 = vpack.c.bf16 %v4293_v29, %v4293_v29 }
 0x219   : > { %v4296_v45 = vmax.f32 %v4208_v51, %v4216_v15  ;;  %v5312_v36 = vpack.c.bf16 %v4294_v42, %v4294_v42  ;;  %v5313_v3 = vpack.c.bf16 %v4295_v62, %v4295_v62 }
 0x21a   : > { %v4613_v12 = vunpack.c.l.b16 %v5311_v32 }
 0x21b   : > { %v5314_v44 = vpack.c.bf16 %v4296_v45, %v4296_v45  ;;  %v4614_v16 = vunpack.c.l.b16 %v5312_v36  ;;  %v4615_v37 = vunpack.c.l.b16 %v5313_v3 }
 0x21c   : > { %v4716_v24 = vrot.slane %v4613_v12, 4 }
 0x21d   : > { %v4616_v9 = vunpack.c.l.b16 %v5314_v44  ;;  %v4718_v13 = vrot.slane %v4614_v16, 3  ;;  %v4720_v50 = vrot.slane %v4615_v37, 2 }
 0x21e   : > { %v4717_v34 = vsel %vm4643_vm7, %v4716_v24, %v4715_v28 }
 0x21f   : > { %v4719_v41 = vsel %vm4646_vm8, %v4718_v13, %v4717_v34  ;;  %v4722_v54 = vrot.slane %v4616_v9, 1 }
 0x220   : > { %v4721_v10 = vsel %vm4649_vm9, %v4720_v50, %v4719_v41 }
 0x221   : > { %v4723_v6 = vsel %vm4652_vm10, %v4722_v54, %v4721_v10 }
 0x222   : > { %v4757_v40 = vpack.c.b16 %v4723_v6, %v4723_v6 }
 0x224   : > { %v5372_v4 = vpop.f32.mrf.mxu0  ;;  %4774 = vst.msk [vmem:[%s7068_s16 + $0x14] sm:$0xf] %vm4768_vm11, %v4757_v40 }
 0x225   : > { %v2915_v55 = vadd.f32 %v5372_v4, %v7025_v11 }
 0x226   : > { %v2906_v33 = vpop.f32.mrf.mxu0 }
 0x227   : > { %v3011_v21 = vmax.f32 %v2915_v55, 0.0  ;;  %v2907_v18 = vadd.f32 %v7025_v11, %v2906_v33 }
 0x228   : > { %v5373_v43 = vpop.f32.mrf.mxu0 }
 0x229   : > { %v3235_v7 = vcombine.high %v3011_v21, %v3011_v21  ;;  %v3242_v22 = vrot.slane %v3011_v21, %v7033_v61  ;;  %v3009_v48 = vmax.f32 %v2907_v18, 0.0  ;;  %v2918_v8 = vadd.f32 %v5373_v43, %v7025_v11 }
 0x22a   : > { %v2909_v47 = vpop.f32.mrf.mxu0 }
 0x22b   : > { %v3249_v52 = vrot.slane %v3235_v7, %v7033_v61  ;;  %v3250_v46 = vcombine.high %v3242_v22, %v3242_v22  ;;  %v5079_v31 = vrot.slane %v3242_v22, 9  ;;  %v3201_v17 = vcombine.high %v3009_v48, %v3009_v48 }
 0x22c   : > { %v3208_v20 = vrot.slane %v3009_v48, %v7033_v61  ;;  %v3012_v23 = vmax.f32 %v2918_v8, 0.0  ;;  %v2910_v58 = vadd.f32 %v7025_v11, %v2909_v47 }
 0x22d   : > { %v3251_v26 = vcombine.high %v3249_v52, %v3249_v52  ;;  %v5080_v63 = vrot.slane %v3250_v46, 9  ;;  %v5081_v2 = vrot.slane %v3249_v52, 9  ;;  %v3215_v53 = vrot.slane %v3201_v17, %v7033_v61 }
 0x22e   : > { %v3216_v19 = vcombine.high %v3208_v20, %v3208_v20  ;;  %v5071_v5 = vrot.slane %v3208_v20, 9  ;;  %v3252_v14 = vcombine.high %v3012_v23, %v3012_v23  ;;  %v4161_v25 = vmax.f32 %v3242_v22, %v5079_v31  ;;  %v5388_v36 = vpop.f32.mrf.mxu1 }
 0x22f   : > { %v5082_v0 = vrot.slane %v3251_v26, 9  ;;  %v4162_v39 = vmax.f32 %v3250_v46, %v5080_v63  ;;  %v3259_v56 = vrot.slane %v3012_v23, %v7033_v61  ;;  %v3217_v49 = vcombine.high %v3215_v53, %v3215_v53 }
 0x230   : > { %v5072_v57 = vrot.slane %v3216_v19, 9  ;;  %v5073_v27 = vrot.slane %v3215_v53, 9  ;;  %v4153_v59 = vmax.f32 %v3208_v20, %v5071_v5  ;;  %v4163_v38 = vmax.f32 %v3249_v52, %v5081_v2  ;;  %v2970_v6 = vpop.f32.mrf.mxu1  ;;  %v7145_v52 = vld [vmem:[%s7223_s2] ss:$0 sm:$0xff] }
 0x231   : > { %v3266_v30 = vrot.slane %v3252_v14, %v7033_v61  ;;  %v3267_v35 = vcombine.high %v3259_v56, %v3259_v56  ;;  %v5083_v29 = vrot.slane %v3259_v56, 9  ;;  %v5074_v60 = vrot.slane %v3217_v49, 9 }
 0x232   : > { %v4154_v1 = vmax.f32 %v3216_v19, %v5072_v57  ;;  %v4155_v15 = vmax.f32 %v3215_v53, %v5073_v27  ;;  %v4265_v51 = vmax.f32 %v4153_v59, %v4161_v25  ;;  %v4164_v42 = vmax.f32 %v3251_v26, %v5082_v0 }
 0x233   : > { %v3268_v62 = vcombine.high %v3266_v30, %v3266_v30  ;;  %v5084_v32 = vrot.slane %v3267_v35, 9  ;;  %v5085_v45 = vrot.slane %v3266_v30, 9  ;;  %v4156_v3 = vmax.f32 %v3217_v49, %v5074_v60 }
 0x234   : > { %v4266_v12 = vmax.f32 %v4154_v1, %v4162_v39  ;;  %v4267_v28 = vmax.f32 %v4155_v15, %v4163_v38  ;;  %v5283_v44 = vpack.c.bf16 %v4265_v51, %v4265_v51  ;;  %v4165_v37 = vmax.f32 %v3259_v56, %v5083_v29  ;;  %v5389_v1 = vpop.f32.mrf.mxu1 }
 0x235   : > { %v5086_v16 = vrot.slane %v3268_v62, 9  ;;  %v3010_v24 = vmax.f32 %v2910_v58, 0.0  ;;  %v4268_v9 = vmax.f32 %v4156_v3, %v4164_v42  ;;  %v4166_v50 = vmax.f32 %v3267_v35, %v5084_v32 }
 0x236   : > { %v5284_v34 = vpack.c.bf16 %v4266_v12, %v4266_v12  ;;  %v5285_v13 = vpack.c.bf16 %v4267_v28, %v4267_v28  ;;  %v4167_v41 = vmax.f32 %v3266_v30, %v5085_v45  ;;  %v2979_v4 = vadd.f32 %v5388_v36, %v7025_v11 }
 0x237   : > { %v3218_v54 = vcombine.high %v3010_v24, %v3010_v24  ;;  %v3225_v10 = vrot.slane %v3010_v24, %v7033_v61  ;;  %v5286_v55 = vpack.c.bf16 %v4268_v9, %v4268_v9  ;;  %v4585_v40 = vunpack.c.l.b16 %v5283_v44 }
 0x238   : > { %v4586_v33 = vunpack.c.l.b16 %v5284_v34  ;;  %v4587_v21 = vunpack.c.l.b16 %v5285_v13  ;;  %v3027_v22 = vmax.f32 %v2979_v4, 0.0  ;;  %v2971_v11 = vadd.f32 %v7145_v52, %v2970_v6 }
 0x239   : > { %v3232_v18 = vrot.slane %v3218_v54, %v7033_v61  ;;  %v3233_v43 = vcombine.high %v3225_v10, %v3225_v10  ;;  %v5075_v7 = vrot.slane %v3225_v10, 9  ;;  %v4588_v48 = vunpack.c.l.b16 %v5286_v55 }
 0x23a   : > { %v4668_v8 = vrot.slane %v4586_v33, 7  ;;  %v4670_v47 = vrot.slane %v4587_v21, 6  ;;  %v4168_v26 = vmax.f32 %v3268_v62, %v5086_v16  ;;  %v3507_v63 = vcombine.high %v3027_v22, %v3027_v22 }
 0x23b   : > { %v3234_v46 = vcombine.high %v3232_v18, %v3232_v18  ;;  %v5076_v31 = vrot.slane %v3233_v43, 9  ;;  %v5077_v17 = vrot.slane %v3232_v18, 9  ;;  %v4157_v20 = vmax.f32 %v3225_v10, %v5075_v7 }
 0x23c   : > { %v4669_v23 = vsel %vm4634_vm0, %v4668_v8, %v4585_v40  ;;  %v3514_v2 = vrot.slane %v3027_v22, %v7033_v61  ;;  %v4672_v58 = vrot.slane %v4588_v48, 5  ;;  %v3521_v25 = vrot.slane %v3507_v63, %v7033_v61 }
 0x23d   : > { %v5078_v53 = vrot.slane %v3234_v46, 9  ;;  %v4158_v19 = vmax.f32 %v3233_v43, %v5076_v31  ;;  %v4159_v5 = vmax.f32 %v3232_v18, %v5077_v17  ;;  %v4671_v14 = vsel %vm4637_vm4, %v4670_v47, %v4669_v23 }
 0x23e   : > { %v4269_v0 = vmax.f32 %v4157_v20, %v4165_v37  ;;  %v3522_v39 = vcombine.high %v3514_v2, %v3514_v2  ;;  %v3025_v27 = vmax.f32 %v2971_v11, 0.0  ;;  %v5143_v38 = vrot.slane %v3514_v2, 9 }
 0x23f   : > { %v4160_v56 = vmax.f32 %v3234_v46, %v5078_v53  ;;  %v4270_v49 = vmax.f32 %v4158_v19, %v4166_v50  ;;  %v4271_v57 = vmax.f32 %v4159_v5, %v4167_v41  ;;  %v4673_v60 = vsel %vm4640_vm6, %v4672_v58, %v4671_v14 }
 0x240   : > { %v5287_v59 = vpack.c.bf16 %v4269_v0, %v4269_v0  ;;  %v3523_v51 = vcombine.high %v3521_v25, %v3521_v25  ;;  %v5144_v42 = vrot.slane %v3522_v39, 9  ;;  %v5145_v62 = vrot.slane %v3521_v25, 9 }
 0x241   : > { %v4272_v30 = vmax.f32 %v4160_v56, %v4168_v26  ;;  %v5288_v35 = vpack.c.bf16 %v4270_v49, %v4270_v49  ;;  %v5289_v29 = vpack.c.bf16 %v4271_v57, %v4271_v57  ;;  %v3473_v3 = vcombine.high %v3025_v27, %v3025_v27 }
 0x242   : > { %v4589_v15 = vunpack.c.l.b16 %v5287_v59  ;;  %v4225_v28 = vmax.f32 %v3514_v2, %v5143_v38  ;;  %v3480_v44 = vrot.slane %v3025_v27, %v7033_v61  ;;  %v2982_v16 = vadd.f32 %v7145_v52, %v5389_v1  ;;  %v2973_v2 = vpop.f32.mrf.mxu1 }
 0x243   : > { %v5290_v32 = vpack.c.bf16 %v4272_v30, %v4272_v30  ;;  %v4590_v45 = vunpack.c.l.b16 %v5288_v35  ;;  %v4591_v36 = vunpack.c.l.b16 %v5289_v29  ;;  %v3487_v34 = vrot.slane %v3473_v3, %v7033_v61 }
 0x244   : > { %v4674_v12 = vrot.slane %v4589_v15, 4  ;;  %v3488_v50 = vcombine.high %v3480_v44, %v3480_v44  ;;  %v5135_v41 = vrot.slane %v3480_v44, 9  ;;  %v3028_v54 = vmax.f32 %v2982_v16, 0.0 }
 0x245   : > { %v4592_v37 = vunpack.c.l.b16 %v5290_v32  ;;  %v4676_v24 = vrot.slane %v4590_v45, 3  ;;  %v4678_v9 = vrot.slane %v4591_v36, 2  ;;  %v3489_v6 = vcombine.high %v3487_v34, %v3487_v34 }
 0x246   : > { %v4675_v13 = vsel %vm4643_vm7, %v4674_v12, %v4673_v60  ;;  %v5137_v55 = vrot.slane %v3487_v34, 9  ;;  %v5146_v33 = vrot.slane %v3523_v51, 9  ;;  %v5136_v21 = vrot.slane %v3488_v50, 9 }
 0x247   : > { %v4677_v10 = vsel %vm4646_vm8, %v4676_v24, %v4675_v13  ;;  %v4680_v4 = vrot.slane %v4592_v37, 1  ;;  %v4217_v18 = vmax.f32 %v3480_v44, %v5135_v41  ;;  %v4227_v7 = vmax.f32 %v3521_v25, %v5145_v62 }
 0x248   : > { %v4679_v40 = vsel %vm4649_vm9, %v4678_v9, %v4677_v10  ;;  %v5138_v22 = vrot.slane %v3489_v6, 9  ;;  %v4219_v48 = vmax.f32 %v3487_v34, %v5137_v55  ;;  %v4226_v47 = vmax.f32 %v3522_v39, %v5144_v42 }
 0x249   : > { %v4681_v43 = vsel %vm4652_vm10, %v4680_v4, %v4679_v40  ;;  %v4218_v11 = vmax.f32 %v3488_v50, %v5136_v21  ;;  %v3524_v46 = vcombine.high %v3028_v54, %v3028_v54  ;;  %v4228_v20 = vmax.f32 %v3523_v51, %v5146_v33 }
 0x24a   : > { %v4754_v8 = vpack.c.b16 %v4681_v43, %v4681_v43  ;;  %v4220_v31 = vmax.f32 %v3489_v6, %v5138_v22  ;;  %v4299_v17 = vmax.f32 %v4219_v48, %v4227_v7  ;;  %v4297_v23 = vmax.f32 %v4217_v18, %v4225_v28 }
 0x24b   : > { %v4298_v26 = vmax.f32 %v4218_v11, %v4226_v47  ;;  %v3531_v63 = vrot.slane %v3028_v54, %v7033_v61  ;;  %v3538_v5 = vrot.slane %v3524_v46, %v7033_v61  ;;  %v2974_v14 = vadd.f32 %v7145_v52, %v2973_v2 }
 0x24c   : > { %4771 = vst.msk [vmem:[%s7068_s16 + $0x8] sm:$0xf] %vm4768_vm11, %v4754_v8  ;;  %v4300_v58 = vmax.f32 %v4220_v31, %v4228_v20  ;;  %v5317_v19 = vpack.c.bf16 %v4299_v17, %v4299_v17  ;;  %v5315_v0 = vpack.c.bf16 %v4297_v23, %v4297_v23 }
 0x24d   : > { %v5316_v53 = vpack.c.bf16 %v4298_v26, %v4298_v26  ;;  %v3539_v39 = vcombine.high %v3531_v63, %v3531_v63  ;;  %v5147_v56 = vrot.slane %v3531_v63, 9  ;;  %v3026_v49 = vmax.f32 %v2974_v14, 0.0 }
 0x24e   : > { %v5318_v57 = vpack.c.bf16 %v4300_v58, %v4300_v58  ;;  %v4619_v27 = vunpack.c.l.b16 %v5317_v19  ;;  %v3540_v38 = vcombine.high %v3538_v5, %v3538_v5  ;;  %v4617_v29 = vunpack.c.l.b16 %v5315_v0 }
 0x24f   : > { %v4618_v25 = vunpack.c.l.b16 %v5316_v53  ;;  %v3490_v30 = vcombine.high %v3026_v49, %v3026_v49  ;;  %v3497_v35 = vrot.slane %v3026_v49, %v7033_v61  ;;  %v5148_v60 = vrot.slane %v3539_v39, 9 }
 0x250   : > { %v5149_v1 = vrot.slane %v3538_v5, 9  ;;  %v4229_v15 = vmax.f32 %v3531_v63, %v5147_v56  ;;  %v4620_v32 = vunpack.c.l.b16 %v5318_v57  ;;  %v4726_v36 = vrot.slane %v4619_v27, 6 }
 0x251   : > { %v4724_v59 = vrot.slane %v4618_v25, 7  ;;  %v3504_v51 = vrot.slane %v3490_v30, %v7033_v61  ;;  %v3505_v42 = vcombine.high %v3497_v35, %v3497_v35  ;;  %v5139_v62 = vrot.slane %v3497_v35, 9 }
 0x252   : > { %v5150_v3 = vrot.slane %v3540_v38, 9  ;;  %v4230_v37 = vmax.f32 %v3539_v39, %v5148_v60  ;;  %v4231_v24 = vmax.f32 %v3538_v5, %v5149_v1  ;;  %v4728_v54 = vrot.slane %v4620_v32, 5 }
 0x253   : > { %v4725_v45 = vsel %vm4634_vm0, %v4724_v59, %v4617_v29  ;;  %v3506_v12 = vcombine.high %v3504_v51, %v3504_v51  ;;  %v5140_v28 = vrot.slane %v3505_v42, 9  ;;  %v5141_v44 = vrot.slane %v3504_v51, 9 }
 0x254   : > { %v4221_v16 = vmax.f32 %v3497_v35, %v5139_v62  ;;  %v4727_v41 = vsel %vm4637_vm4, %v4726_v36, %v4725_v45  ;;  %v4232_v10 = vmax.f32 %v3540_v38, %v5150_v3 }
 0x255   : > { %v5142_v9 = vrot.slane %v3506_v12, 9  ;;  %v4222_v34 = vmax.f32 %v3505_v42, %v5140_v28  ;;  %v4223_v13 = vmax.f32 %v3504_v51, %v5141_v44  ;;  %v4729_v7 = vsel %vm4640_vm6, %v4728_v54, %v4727_v41 }
 0x256   : > { %v4301_v50 = vmax.f32 %v4221_v16, %v4229_v15 }
 0x257   : > { %v4224_v4 = vmax.f32 %v3506_v12, %v5142_v9  ;;  %v4302_v6 = vmax.f32 %v4222_v34, %v4230_v37  ;;  %v4303_v55 = vmax.f32 %v4223_v13, %v4231_v24 }
 0x258   : > { %v5319_v40 = vpack.c.bf16 %v4301_v50, %v4301_v50 }
 0x259   : > { %v4304_v33 = vmax.f32 %v4224_v4, %v4232_v10  ;;  %v5320_v21 = vpack.c.bf16 %v4302_v6, %v4302_v6  ;;  %v5321_v18 = vpack.c.bf16 %v4303_v55, %v4303_v55 }
 0x25a   : > { %v4621_v43 = vunpack.c.l.b16 %v5319_v40 }
 0x25b   : > { %v5322_v22 = vpack.c.bf16 %v4304_v33, %v4304_v33  ;;  %v4622_v48 = vunpack.c.l.b16 %v5320_v21  ;;  %v4623_v8 = vunpack.c.l.b16 %v5321_v18 }
 0x25c   : > { %v4730_v47 = vrot.slane %v4621_v43, 4 }
 0x25d   : > { %v4624_v46 = vunpack.c.l.b16 %v5322_v22  ;;  %v4732_v17 = vrot.slane %v4622_v48, 3  ;;  %v4734_v20 = vrot.slane %v4623_v8, 2 }
 0x25e   : > { %v4731_v31 = vsel %vm4643_vm7, %v4730_v47, %v4729_v7 }
 0x25f   : > { %v4733_v63 = vsel %vm4646_vm8, %v4732_v17, %v4731_v31  ;;  %v4736_v2 = vrot.slane %v4624_v46, 1 }
 0x260   : > { %v5376_v11 = vpop.f32.mrf.mxu0  ;;  %v4735_v53 = vsel %vm4649_vm9, %v4734_v20, %v4733_v63 }
 0x261   : > { %v2931_v23 = vadd.f32 %v7145_v52, %v5376_v11  ;;  %v4737_v14 = vsel %vm4652_vm10, %v4736_v2, %v4735_v53 }
 0x262   : > { %v2922_v26 = vpop.f32.mrf.mxu0  ;;  %v4758_v39 = vpack.c.b16 %v4737_v14, %v4737_v14 }
 0x263   : > { %v2923_v58 = vadd.f32 %v7145_v52, %v2922_v26  ;;  %v3015_v19 = vmax.f32 %v2931_v23, 0.0 }
 0x264   : > { %v5377_v5 = vpop.f32.mrf.mxu0  ;;  %4775 = vst.msk [vmem:[%s7068_s16 + $0x18] sm:$0xf] %vm4768_vm11, %v4758_v39 }
 0x265   : > { %v3013_v0 = vmax.f32 %v2923_v58, 0.0  ;;  %v2934_v25 = vadd.f32 %v7145_v52, %v5377_v5  ;;  %v3303_v56 = vcombine.high %v3015_v19, %v3015_v19  ;;  %v3310_v49 = vrot.slane %v3015_v19, %v7033_v61 }
 0x266   : > { %v2925_v57 = vpop.f32.mrf.mxu0 }
 0x267   : > { %v3269_v27 = vcombine.high %v3013_v0, %v3013_v0  ;;  %v3276_v59 = vrot.slane %v3013_v0, %v7033_v61  ;;  %v3016_v38 = vmax.f32 %v2934_v25, 0.0  ;;  %v3317_v30 = vrot.slane %v3303_v56, %v7033_v61 }
 0x268   : > { %v3318_v35 = vcombine.high %v3310_v49, %v3310_v49  ;;  %v5095_v29 = vrot.slane %v3310_v49, 9  ;;  %v2926_v60 = vadd.f32 %v7145_v52, %v2925_v57 }
 0x269   : > { %v3283_v1 = vrot.slane %v3269_v27, %v7033_v61  ;;  %v3284_v15 = vcombine.high %v3276_v59, %v3276_v59  ;;  %v5087_v51 = vrot.slane %v3276_v59, 9  ;;  %v3320_v42 = vcombine.high %v3016_v38, %v3016_v38 }
 0x26a   : > { %v3319_v62 = vcombine.high %v3317_v30, %v3317_v30  ;;  %v5096_v32 = vrot.slane %v3318_v35, 9  ;;  %v5097_v45 = vrot.slane %v3317_v30, 9  ;;  %v4177_v36 = vmax.f32 %v3310_v49, %v5095_v29  ;;  %v5392_v18 = vpop.f32.mrf.mxu1 }
 0x26b   : > { %v3285_v3 = vcombine.high %v3283_v1, %v3283_v1  ;;  %v5088_v12 = vrot.slane %v3284_v15, 9  ;;  %v5089_v28 = vrot.slane %v3283_v1, 9  ;;  %v4169_v44 = vmax.f32 %v3276_v59, %v5087_v51 }
 0x26c   : > { %v5098_v16 = vrot.slane %v3319_v62, 9  ;;  %v4178_v37 = vmax.f32 %v3318_v35, %v5096_v32  ;;  %v4179_v24 = vmax.f32 %v3317_v30, %v5097_v45  ;;  %v3327_v9 = vrot.slane %v3016_v38, %v7033_v61  ;;  %v2986_v63 = vpop.f32.mrf.mxu1 }
 0x26d   : > { %v5090_v34 = vrot.slane %v3285_v3, 9  ;;  %v4170_v13 = vmax.f32 %v3284_v15, %v5088_v12  ;;  %v4171_v50 = vmax.f32 %v3283_v1, %v5089_v28  ;;  %v4273_v41 = vmax.f32 %v4169_v44, %v4177_v36 }
 0x26e   : > { %v4180_v54 = vmax.f32 %v3319_v62, %v5098_v16  ;;  %v3334_v10 = vrot.slane %v3320_v42, %v7033_v61  ;;  %v3335_v4 = vcombine.high %v3327_v9, %v3327_v9  ;;  %v5099_v6 = vrot.slane %v3327_v9, 9 }
 0x26f   : > { %v4172_v55 = vmax.f32 %v3285_v3, %v5090_v34  ;;  %v4274_v40 = vmax.f32 %v4170_v13, %v4178_v37  ;;  %v4275_v33 = vmax.f32 %v4171_v50, %v4179_v24  ;;  %v5291_v21 = vpack.c.bf16 %v4273_v41, %v4273_v41  ;;  %v5393_v13 = vpop.f32.mrf.mxu1 }
 0x270   : > { %v3336_v43 = vcombine.high %v3334_v10, %v3334_v10  ;;  %v5100_v7 = vrot.slane %v3335_v4, 9  ;;  %v5101_v11 = vrot.slane %v3334_v10, 9  ;;  %v4181_v46 = vmax.f32 %v3327_v9, %v5099_v6 }
 0x271   : > { %v4276_v22 = vmax.f32 %v4172_v55, %v4180_v54  ;;  %v5292_v48 = vpack.c.bf16 %v4274_v40, %v4274_v40  ;;  %v5293_v8 = vpack.c.bf16 %v4275_v33, %v4275_v33  ;;  %v4593_v47 = vunpack.c.l.b16 %v5291_v21 }
 0x272   : > { %v3014_v31 = vmax.f32 %v2926_v60, 0.0  ;;  %v2995_v26 = vadd.f32 %v7145_v52, %v5392_v18  ;;  %v5102_v2 = vrot.slane %v3336_v43, 9  ;;  %v4182_v58 = vmax.f32 %v3335_v4, %v5100_v7 }
 0x273   : > { %v5294_v17 = vpack.c.bf16 %v4276_v22, %v4276_v22  ;;  %v4594_v20 = vunpack.c.l.b16 %v5292_v48  ;;  %v4595_v23 = vunpack.c.l.b16 %v5293_v8  ;;  %v2987_v57 = vadd.f32 %v7145_v52, %v2986_v63 }
 0x274   : > { %v3286_v53 = vcombine.high %v3014_v31, %v3014_v31  ;;  %v3293_v19 = vrot.slane %v3014_v31, %v7033_v61  ;;  %v3031_v25 = vmax.f32 %v2995_v26, 0.0  ;;  %v4183_v59 = vmax.f32 %v3334_v10, %v5101_v11 }
 0x275   : > { %v4596_v5 = vunpack.c.l.b16 %v5294_v17  ;;  %v4682_v14 = vrot.slane %v4594_v20, 7  ;;  %v4684_v0 = vrot.slane %v4595_v23, 6  ;;  %v3029_v3 = vmax.f32 %v2987_v57, 0.0 }
 0x276   : > { %v3300_v39 = vrot.slane %v3286_v53, %v7033_v61  ;;  %v3301_v56 = vcombine.high %v3293_v19, %v3293_v19  ;;  %v5091_v49 = vrot.slane %v3293_v19, 9  ;;  %v3575_v38 = vcombine.high %v3031_v25, %v3031_v25 }
 0x277   : > { %v4683_v27 = vsel %vm4634_vm0, %v4682_v14, %v4593_v47  ;;  %v3582_v30 = vrot.slane %v3031_v25, %v7033_v61  ;;  %v4686_v35 = vrot.slane %v4596_v5, 5  ;;  %v4184_v12 = vmax.f32 %v3336_v43, %v5102_v2 }
 0x278   : > { %v3302_v29 = vcombine.high %v3300_v39, %v3300_v39  ;;  %v5092_v60 = vrot.slane %v3301_v56, 9  ;;  %v5093_v1 = vrot.slane %v3300_v39, 9  ;;  %v4685_v15 = vsel %vm4637_vm4, %v4684_v0, %v4683_v27 }
 0x279   : > { %v4173_v51 = vmax.f32 %v3293_v19, %v5091_v49  ;;  %v3589_v42 = vrot.slane %v3575_v38, %v7033_v61  ;;  %v3590_v62 = vcombine.high %v3582_v30, %v3582_v30  ;;  %v4687_v34 = vsel %vm4640_vm6, %v4686_v35, %v4685_v15 }
 0x27a   : > { %v5094_v32 = vrot.slane %v3302_v29, 9  ;;  %v4174_v45 = vmax.f32 %v3301_v56, %v5092_v60  ;;  %v4175_v36 = vmax.f32 %v3300_v39, %v5093_v1  ;;  %v5159_v41 = vrot.slane %v3582_v30, 9 }
 0x27b   : > { %v4277_v28 = vmax.f32 %v4173_v51, %v4181_v46  ;;  %v3591_v44 = vcombine.high %v3589_v42, %v3589_v42  ;;  %v5160_v16 = vrot.slane %v3590_v62, 9  ;;  %v5161_v54 = vrot.slane %v3589_v42, 9  ;;  %v2989_v51 = vpop.f32.mrf.mxu1 }
 0x27c   : > { %v4176_v37 = vmax.f32 %v3302_v29, %v5094_v32  ;;  %v4278_v24 = vmax.f32 %v4174_v45, %v4182_v58  ;;  %v4279_v9 = vmax.f32 %v4175_v36, %v4183_v59  ;;  %v3541_v40 = vcombine.high %v3029_v3, %v3029_v3 }
 0x27d   : > { %v5295_v50 = vpack.c.bf16 %v4277_v28, %v4277_v28  ;;  %v5162_v10 = vrot.slane %v3591_v44, 9  ;;  %v4242_v21 = vmax.f32 %v3590_v62, %v5160_v16  ;;  %v3548_v18 = vrot.slane %v3029_v3, %v7033_v61 }
 0x27e   : > { %v4280_v4 = vmax.f32 %v4176_v37, %v4184_v12  ;;  %v5296_v6 = vpack.c.bf16 %v4278_v24, %v4278_v24  ;;  %v5297_v55 = vpack.c.bf16 %v4279_v9, %v4279_v9  ;;  %v2998_v43 = vadd.f32 %v7145_v52, %v5393_v13 }
 0x27f   : > { %v4597_v33 = vunpack.c.l.b16 %v5295_v50  ;;  %v3555_v8 = vrot.slane %v3541_v40, %v7033_v61  ;;  %v3556_v11 = vcombine.high %v3548_v18, %v3548_v18  ;;  %v5151_v46 = vrot.slane %v3548_v18, 9 }
 0x280   : > { %v5298_v7 = vpack.c.bf16 %v4280_v4, %v4280_v4  ;;  %v4598_v22 = vunpack.c.l.b16 %v5296_v6  ;;  %v4599_v48 = vunpack.c.l.b16 %v5297_v55  ;;  %v3032_v31 = vmax.f32 %v2998_v43, 0.0 }
 0x281   : > { %v4688_v47 = vrot.slane %v4597_v33, 4  ;;  %v3557_v26 = vcombine.high %v3555_v8, %v3555_v8  ;;  %v4243_v2 = vmax.f32 %v3589_v42, %v5161_v54  ;;  %v5152_v58 = vrot.slane %v3556_v11, 9 }
 0x282   : > { %v4600_v17 = vunpack.c.l.b16 %v5298_v7  ;;  %v4690_v20 = vrot.slane %v4598_v22, 3  ;;  %v4692_v23 = vrot.slane %v4599_v48, 2  ;;  %v5153_v53 = vrot.slane %v3555_v8, 9 }
 0x283   : > { %v4689_v63 = vsel %vm4643_vm7, %v4688_v47, %v4687_v34  ;;  %v5154_v14 = vrot.slane %v3557_v26, 9  ;;  %v4233_v0 = vmax.f32 %v3548_v18, %v5151_v46  ;;  %v4234_v39 = vmax.f32 %v3556_v11, %v5152_v58 }
 0x284   : > { %v4691_v19 = vsel %vm4646_vm8, %v4690_v20, %v4689_v63  ;;  %v4694_v5 = vrot.slane %v4600_v17, 1  ;;  %v4235_v56 = vmax.f32 %v3555_v8, %v5153_v53  ;;  %v3592_v49 = vcombine.high %v3032_v31, %v3032_v31 }
 0x285   : > { %v4693_v25 = vsel %vm4649_vm9, %v4692_v23, %v4691_v19  ;;  %v4241_v27 = vmax.f32 %v3582_v30, %v5159_v41  ;;  %v4236_v59 = vmax.f32 %v3557_v26, %v5154_v14  ;;  %v4306_v35 = vmax.f32 %v4234_v39, %v4242_v21 }
 0x286   : > { %v4695_v57 = vsel %vm4652_vm10, %v4694_v5, %v4693_v25  ;;  %v4307_v29 = vmax.f32 %v4235_v56, %v4243_v2  ;;  %v4244_v60 = vmax.f32 %v3591_v44, %v5162_v10  ;;  %v3599_v15 = vrot.slane %v3032_v31, %v7033_v61 }
 0x287   : > { %v4755_v38 = vpack.c.b16 %v4695_v57, %v4695_v57  ;;  %v4305_v1 = vmax.f32 %v4233_v0, %v4241_v27  ;;  %v5324_v42 = vpack.c.bf16 %v4306_v35, %v4306_v35  ;;  %v3606_v62 = vrot.slane %v3592_v49, %v7033_v61 }
 0x288   : > { %v4308_v32 = vmax.f32 %v4236_v59, %v4244_v60  ;;  %v5325_v45 = vpack.c.bf16 %v4307_v29, %v4307_v29  ;;  %v2990_v3 = vadd.f32 %v7145_v52, %v2989_v51  ;;  %v3607_v12 = vcombine.high %v3599_v15, %v3599_v15 }
 0x289   : > { %4772 = vst.msk [vmem:[%s7068_s16 + $0xc] sm:$0xf] %vm4768_vm11, %v4755_v38  ;;  %v4626_v36 = vunpack.c.l.b16 %v5324_v42  ;;  %v5323_v30 = vpack.c.bf16 %v4305_v1, %v4305_v1  ;;  %v3608_v28 = vcombine.high %v3606_v62, %v3606_v62  ;;  %v5163_v9 = vrot.slane %v3599_v15, 9 }
 0x28a   : > { %v3030_v16 = vmax.f32 %v2990_v3, 0.0  ;;  %v5326_v37 = vpack.c.bf16 %v4308_v32, %v4308_v32  ;;  %v4627_v44 = vunpack.c.l.b16 %v5325_v45  ;;  %v5164_v41 = vrot.slane %v3607_v12, 9 }
 0x28b   : > { %v4738_v24 = vrot.slane %v4626_v36, 7  ;;  %v4625_v50 = vunpack.c.l.b16 %v5323_v30  ;;  %v5165_v54 = vrot.slane %v3606_v62, 9  ;;  %v5166_v10 = vrot.slane %v3608_v28, 9 }
 0x28c   : > { %v3558_v34 = vcombine.high %v3030_v16, %v3030_v16  ;;  %v3565_v13 = vrot.slane %v3030_v16, %v7033_v61  ;;  %v4628_v52 = vunpack.c.l.b16 %v5326_v37  ;;  %v4740_v33 = vrot.slane %v4627_v44, 6 }
 0x28d   : > { %v4739_v40 = vsel %vm4634_vm0, %v4738_v24, %v4625_v50  ;;  %v4245_v21 = vmax.f32 %v3599_v15, %v5163_v9  ;;  %v4246_v48 = vmax.f32 %v3607_v12, %v5164_v41  ;;  %v4247_v8 = vmax.f32 %v3606_v62, %v5165_v54 }
 0x28e   : > { %v3572_v4 = vrot.slane %v3558_v34, %v7033_v61  ;;  %v3573_v6 = vcombine.high %v3565_v13, %v3565_v13  ;;  %v5155_v55 = vrot.slane %v3565_v13, 9  ;;  %v4741_v17 = vsel %vm4637_vm4, %v4740_v33, %v4739_v40 }
 0x28f   : > { %v4742_v61 = vrot.slane %v4628_v52, 5  ;;  %v4248_v20 = vmax.f32 %v3608_v28, %v5166_v10 }
 0x290   : > { %v3574_v18 = vcombine.high %v3572_v4, %v3572_v4  ;;  %v5156_v43 = vrot.slane %v3573_v6, 9  ;;  %v5157_v7 = vrot.slane %v3572_v4, 9  ;;  %v4237_v22 = vmax.f32 %v3565_v13, %v5155_v55 }
 0x291   : > { %v4743_v14 = vsel %vm4640_vm6, %v4742_v61, %v4741_v17 }
 0x292   : > { %v5158_v47 = vrot.slane %v3574_v18, 9  ;;  %v4238_v11 = vmax.f32 %v3573_v6, %v5156_v43  ;;  %v4239_v46 = vmax.f32 %v3572_v4, %v5157_v7  ;;  %v4309_v31 = vmax.f32 %v4237_v22, %v4245_v21 }
 0x294   : > { %v4240_v23 = vmax.f32 %v3574_v18, %v5158_v47  ;;  %v4310_v26 = vmax.f32 %v4238_v11, %v4246_v48  ;;  %v4311_v63 = vmax.f32 %v4239_v46, %v4247_v8  ;;  %v5327_v2 = vpack.c.bf16 %v4309_v31, %v4309_v31 }
 0x296   : > { %v4312_v58 = vmax.f32 %v4240_v23, %v4248_v20  ;;  %v5328_v53 = vpack.c.bf16 %v4310_v26, %v4310_v26  ;;  %v5329_v19 = vpack.c.bf16 %v4311_v63, %v4311_v63  ;;  %v4629_v5 = vunpack.c.l.b16 %v5327_v2 }
 0x298   : > { %v5330_v0 = vpack.c.bf16 %v4312_v58, %v4312_v58  ;;  %v4630_v25 = vunpack.c.l.b16 %v5328_v53  ;;  %v4631_v39 = vunpack.c.l.b16 %v5329_v19  ;;  %v4744_v56 = vrot.slane %v4629_v5, 4 }
 0x29a   : > { %v4632_v49 = vunpack.c.l.b16 %v5330_v0  ;;  %v4745_v57 = vsel %vm4643_vm7, %v4744_v56, %v4743_v14  ;;  %v4746_v27 = vrot.slane %v4630_v25, 3  ;;  %v4748_v59 = vrot.slane %v4631_v39, 2 }
 0x29c   : > { %v4747_v38 = vsel %vm4646_vm8, %v4746_v27, %v4745_v57  ;;  %v4750_v35 = vrot.slane %v4632_v49, 1 }
 0x29d   : > { %v4749_v29 = vsel %vm4649_vm9, %v4748_v59, %v4747_v38 }
 0x29e   : > { %v4751_v60 = vsel %vm4652_vm10, %v4750_v35, %v4749_v29 }
 0x29f   : > { %v4759_v1 = vpack.c.b16 %v4751_v60, %v4751_v60 }
 0x2a1   : > { %4776 = vst.msk [vmem:[%s7068_s16 + $0x1c] sm:$0xf] %vm4768_vm11, %v4759_v1 }
 0x2a2 PF: > { %s13_s12 = sadd.s32 1, %s5575_s12  }
 0x2a3   : > { %p10_p4 = scmp.ge.s32.totalorder %s13_s12, 10  }
 0x2a5   :  { %12 = sbr.rel (!%p10_p4) target bundleno = 1 (0x1), region = 64 }

</bundles_post_ra>
